<compile_context>
chip_gen: v6e
topology: v6e:2x2x1
jax: 0.10.0
libtpu: 0.0.40
codegen_flags: <defaults>
</compile_context>

<pallas_src>
import jax
import jax.numpy as jnp
from jax.experimental import pallas as pl
from jax.experimental.pallas import tpu as pltpu

EPS = 1e-5


# ---------------- in-kernel helpers (traced inside the Pallas body) -----------

def _conv3x3_reflect(t_bf16, w_ref, H, W, C):
    """3x3 'same' conv with reflection padding on a (Bt, H, W, C) bf16 tile.

    Builds only the 3C-wide dx-concat buffer and runs 3 accumulated MXU
    matmuls over dy (K = 3C each, bf16 operands, f32 accumulation).
    Weight ref is the (9C, C) im2col matrix with row ordering (dy, dx, cin).
    Returns (Bt*H*W, C) f32.
    """
    Bt = t_bf16.shape[0]
    # Reflect pad along H (row axis) then W (sublane axis); pure copies.
    tp = jnp.concatenate([t_bf16[:, 1:2], t_bf16, t_bf16[:, H - 2:H - 1]], axis=1)   # (Bt,H+2,W,C)
    tp = jnp.concatenate([tp[:, :, 1:2], tp, tp[:, :, W - 2:W - 1]], axis=2)          # (Bt,H+2,W+2,C)
    # dx shifts stacked on the channel (lane) axis -> ordering (dx, cin).
    cols = jnp.concatenate(
        [tp[:, :, 0:W], tp[:, :, 1:W + 1], tp[:, :, 2:W + 2]], axis=-1)                # (Bt,H+2,W,3C)
    acc = jnp.zeros((Bt * H * W, C), jnp.float32)
    for dy in range(3):  # static, unrolled; weight slab rows are (dx, cin) ordered
        patch = cols[:, dy:dy + H].reshape(Bt * H * W, 3 * C)
        acc = acc + jnp.dot(patch, w_ref[dy * 3 * C:(dy + 1) * 3 * C, :],
                            preferred_element_type=jnp.float32)
    return acc


def _instance_norm(y, inv_hw):
    """Single-pass InstanceNorm (affine=False, biased variance) per image.

    y: (Bt, HW, C) f32.  NOTE: E[x^2]-mean^2 can lose precision if |mean|>>std;
    fine at these activation magnitudes (see review), keep f32 throughout.
    """
    mean = jnp.sum(y, axis=1, keepdims=True) * inv_hw
    var = jnp.sum(y * y, axis=1, keepdims=True) * inv_hw - mean * mean
    return (y - mean) * jax.lax.rsqrt(var + EPS)


# ---------------------------------- kernel ------------------------------------

def resnet_block_kernel(x_ref, w1_ref, w2_ref, o_ref):
    x = x_ref[...]                                       # (Bt, H, W, C) f32
    Bt, H, W, C = x.shape
    HW = H * W
    inv_hw = 1.0 / HW

    # ---- conv1 -> IN -> ReLU (conv bias dropped: inert before affine-less IN)
    y = _conv3x3_reflect(x.astype(jnp.bfloat16), w1_ref, H, W, C)    # (Bt*HW, C) f32
    y = jnp.maximum(_instance_norm(y.reshape(Bt, HW, C), inv_hw), 0.0)

    # ---- conv2 -> IN ---------------------------------------------------------
    z = _conv3x3_reflect(y.astype(jnp.bfloat16).reshape(Bt, H, W, C), w2_ref, H, W, C)
    z = _instance_norm(z.reshape(Bt, HW, C), inv_hw)

    # ---- residual add (f32 on the original x) --------------------------------
    o_ref[...] = x + z.reshape(Bt, H, W, C)


# --------------------------------- wrapper ------------------------------------

def _vmem_bytes_estimate(bt, h, w, c):
    """Rough per-grid-step VMEM working set (blocks + in-kernel temporaries)."""
    e = bt * h * w * c
    return (4 * 4 * e                    # double-buffered f32 in/out blocks
            + 12 * e                     # bf16 pad/cols/patch temporaries (~6 copies)
            + 3 * 4 * e                  # f32 conv accumulator + normalized acts
            + 2 * 2 * (9 * c * c * 2))   # two bf16 (9C,C) weights, double-buffered


def _pick_images_per_step(n, h, w, c, budget_bytes):
    """Largest Bt dividing n that keeps >= min(4, n) grid steps and fits budget."""
    min_grid = min(4, n)
    best = 1
    for bt in range(1, n + 1):
        if n % bt:
            continue
        if n // bt < min_grid:
            continue
        if _vmem_bytes_estimate(bt, h, w, c) <= budget_bytes:
            best = bt
    return best


def resnet_block(x_nhwc, w1, b1, w2, b2, *, images_per_step=None, vmem_limit_bytes=None):
    """x_nhwc: (N, H, W, C) f32.  w*: (3, 3, Cin, Cout) with Cin=Cout=C.  b*: (C,).

    b1/b2 are accepted for API parity with the PyTorch module but are NOT used:
    a per-channel bias before affine-less InstanceNorm is mathematically inert
    (shifts the mean, leaves the variance unchanged).
    """
    del b1, b2
    x = x_nhwc.astype(jnp.float32)
    N, H, W, C = x.shape
    assert H >= 2 and W >= 2, "reflection padding of 1 needs H >= 2 and W >= 2"
    # Keep W a multiple of 8 (true for every stage of this model) so the
    # in-kernel (Bt,H,W,C)<->(Bt*HW,.) reshapes stay layout-free.

    if images_per_step is None:
        images_per_step = _pick_images_per_step(N, H, W, C, budget_bytes=24 << 20)
    Bt = images_per_step
    assert N % Bt == 0, (N, Bt)

    if vmem_limit_bytes is None:
        vmem_limit_bytes = min(
            max(2 * _vmem_bytes_estimate(Bt, H, W, C) + (8 << 20), 32 << 20),
            100 << 20)

    # One-time weight prep: im2col matrix (9C, C) in bf16, row order (dy, dx, cin).
    w1_m = w1.astype(jnp.float32).reshape(9 * C, C).astype(jnp.bfloat16)
    w2_m = w2.astype(jnp.float32).reshape(9 * C, C).astype(jnp.bfloat16)

    grid_spec = pltpu.PrefetchScalarGridSpec(
        num_scalar_prefetch=0,
        grid=(N // Bt,),                   # IN needs full-image stats -> whole images per step
        in_specs=[
            pl.BlockSpec((Bt, H, W, C), lambda n: (n, 0, 0, 0)),
            pl.BlockSpec((9 * C, C), lambda n: (0, 0)),
            pl.BlockSpec((9 * C, C), lambda n: (0, 0)),
        ],
        out_specs=pl.BlockSpec((Bt, H, W, C), lambda n: (n, 0, 0, 0)),
    )

    return pl.pallas_call(
        resnet_block_kernel,
        out_shape=jax.ShapeDtypeStruct((N, H, W, C), jnp.float32),
        grid_spec=grid_spec,
        compiler_params=pltpu.CompilerParams(
            dimension_semantics=("parallel",),          # batch axis -> both TCs on v7x
            vmem_limit_bytes=int(vmem_limit_bytes)),
    )(x, w1_m, w2_m)


# --------------------------- pure-JAX references (check) -----------------------

def _ref_forward(x, w1, b1, w2, b2, matmul_dtype=jnp.float32):
    """NHWC reference for the PyTorch ResnetBlock (biases included). matmul_dtype
    controls the conv operand precision (f32 = exact module semantics, bf16 =
    same operand rounding as the kernel's MXU matmuls; both accumulate in f32)."""
    def pad(t):
        return jnp.pad(t, ((0, 0), (1, 1), (1, 1), (0, 0)), mode="reflect")

    def conv(t, w, b):
        y = jax.lax.conv_general_dilated(
            t.astype(matmul_dtype), w.astype(matmul_dtype),
            window_strides=(1, 1), padding="VALID",
            dimension_numbers=("NHWC", "HWIO", "NHWC"),
            preferred_element_type=jnp.float32)
        return y + b.reshape(1, 1, 1, -1).astype(jnp.float32)

    def inorm(t):
        m = t.mean(axis=(1, 2), keepdims=True)
        v = ((t - m) ** 2).mean(axis=(1, 2), keepdims=True)
        return (t - m) * jax.lax.rsqrt(v + EPS)

    y = jnp.maximum(inorm(conv(pad(x), w1, b1)), 0.0)
    z = inorm(conv(pad(y), w2, b2))
    return x + z


# ----------------------------------- main --------------------------------------

if __name__ == "__main__":
    # C=128 is a real ResnetBlock width in DecoderGenerator_feature_Res
    # (the model uses 512/256/128/64); it keeps the lane axis fully dense.
    N, H, W, C = 8, 16, 16, 128
    key = jax.random.PRNGKey(0)
    kx, kw1, kb1, kw2, kb2 = jax.random.split(key, 5)

    x = jax.random.normal(kx, (N, H, W, C), dtype=jnp.float32)
    w1 = 0.06 * jax.random.normal(kw1, (3, 3, C, C), dtype=jnp.float32)
    b1 = 0.10 * jax.random.normal(kb1, (C,), dtype=jnp.float32)
    w2 = 0.06 * jax.random.normal(kw2, (3, 3, C, C), dtype=jnp.float32)
    b2 = 0.10 * jax.random.normal(kb2, (C,), dtype=jnp.float32)

    out = jax.block_until_ready(resnet_block(x, w1, b1, w2, b2))
    assert out.shape == (N, H, W, C)

    # Primary correctness check: reference with the same bf16 matmul operands
    # (and the real conv biases) + f32 accumulation; also validates that
    # dropping the biases in the kernel is semantically a no-op.
    ref_bf16 = jax.block_until_ready(
        _ref_forward(x, w1, b1, w2, b2, matmul_dtype=jnp.bfloat16))
    err_bf16 = float(jnp.max(jnp.abs(out - ref_bf16)))
    assert jnp.allclose(out, ref_bf16, atol=5e-3, rtol=5e-3), err_bf16

    # Sanity check against exact f32 module semantics (loose: bf16 MXU operands).
    ref_f32 = jax.block_until_ready(_ref_forward(x, w1, b1, w2, b2))
    err_f32 = float(jnp.max(jnp.abs(out - ref_f32)))
    assert jnp.allclose(out, ref_f32, atol=0.3, rtol=0.05), err_f32

    print("KERNEL_OK")
</pallas_src>

<mosaic_0001>
module attributes {stable_mosaic.version = 11 : i64} {
  func.func @resnet_block_kernel(%arg0: i32, %arg1: memref<2x16x16x128xf32, #tpu.memory_space<vmem>>, %arg2: memref<1152x128xbf16, #tpu.memory_space<vmem>>, %arg3: memref<1152x128xbf16, #tpu.memory_space<vmem>>, %arg4: memref<2x16x16x128xf32, #tpu.memory_space<vmem>>) attributes {dimension_semantics = [#tpu.dimension_semantics<parallel>], iteration_bounds = array<i64: 4>, scalar_prefetch = 0 : i64, scratch_operands = 0 : i64, tpu.core_type = #tpu.core_type<tc>, window_params = [{transform_indices = @transform_0, window_bounds = array<i64: 2, 16, 16, 128>}, {pipeline_mode = #tpu.pipeline_mode<synchronous>, transform_indices = @transform_1, window_bounds = array<i64: 1152, 128>}, {pipeline_mode = #tpu.pipeline_mode<synchronous>, transform_indices = @transform_2, window_bounds = array<i64: 1152, 128>}, {transform_indices = @transform_3, window_bounds = array<i64: 2, 16, 16, 128>}]} {
    %c0 = arith.constant 0 : index
    %c0_0 = arith.constant 0 : index
    %c0_1 = arith.constant 0 : index
    %c0_2 = arith.constant 0 : index
    %0 = vector.load %arg1[%c0, %c0_0, %c0_1, %c0_2] : memref<2x16x16x128xf32, #tpu.memory_space<vmem>>, vector<2x16x16x128xf32>
    %1 = arith.truncf %0 : vector<2x16x16x128xf32> to vector<2x16x16x128xbf16>
    %2 = vector.extract_strided_slice %1 {offsets = [0, 1, 0, 0], sizes = [2, 1, 16, 128], strides = [1, 1, 1, 1]} : vector<2x16x16x128xbf16> to vector<2x1x16x128xbf16>
    %3 = vector.extract_strided_slice %1 {offsets = [0, 14, 0, 0], sizes = [2, 1, 16, 128], strides = [1, 1, 1, 1]} : vector<2x16x16x128xbf16> to vector<2x1x16x128xbf16>
    %4 = tpu.concatenate %2, %1, %3 in 1 : vector<2x1x16x128xbf16>, vector<2x16x16x128xbf16>, vector<2x1x16x128xbf16> -> vector<2x18x16x128xbf16>
    %5 = vector.extract_strided_slice %4 {offsets = [0, 0, 1, 0], sizes = [2, 18, 1, 128], strides = [1, 1, 1, 1]} : vector<2x18x16x128xbf16> to vector<2x18x1x128xbf16>
    %6 = vector.extract_strided_slice %4 {offsets = [0, 0, 14, 0], sizes = [2, 18, 1, 128], strides = [1, 1, 1, 1]} : vector<2x18x16x128xbf16> to vector<2x18x1x128xbf16>
    %7 = tpu.concatenate %5, %4, %6 in 2 : vector<2x18x1x128xbf16>, vector<2x18x16x128xbf16>, vector<2x18x1x128xbf16> -> vector<2x18x18x128xbf16>
    %8 = vector.extract_strided_slice %7 {offsets = [0, 0, 0, 0], sizes = [2, 18, 16, 128], strides = [1, 1, 1, 1]} : vector<2x18x18x128xbf16> to vector<2x18x16x128xbf16>
    %9 = vector.extract_strided_slice %7 {offsets = [0, 0, 1, 0], sizes = [2, 18, 16, 128], strides = [1, 1, 1, 1]} : vector<2x18x18x128xbf16> to vector<2x18x16x128xbf16>
    %10 = vector.extract_strided_slice %7 {offsets = [0, 0, 2, 0], sizes = [2, 18, 16, 128], strides = [1, 1, 1, 1]} : vector<2x18x18x128xbf16> to vector<2x18x16x128xbf16>
    %11 = tpu.concatenate %8, %9, %10 in 3 : vector<2x18x16x128xbf16>, vector<2x18x16x128xbf16>, vector<2x18x16x128xbf16> -> vector<2x18x16x384xbf16>
    %cst = arith.constant 0.000000e+00 : f32
    %12 = vector.broadcast %cst : f32 to vector<512x128xf32>
    %13 = vector.extract_strided_slice %11 {offsets = [0, 0, 0, 0], sizes = [2, 16, 16, 384], strides = [1, 1, 1, 1]} : vector<2x18x16x384xbf16> to vector<2x16x16x384xbf16>
    %14 = vector.shape_cast %13 : vector<2x16x16x384xbf16> to vector<512x384xbf16>
    %c0_3 = arith.constant 0 : index
    %c0_4 = arith.constant 0 : index
    %15 = vector.load %arg2[%c0_3, %c0_4] : memref<1152x128xbf16, #tpu.memory_space<vmem>>, vector<384x128xbf16>
    %cst_5 = arith.constant dense<0.000000e+00> : vector<512x128xf32>
    %16 = tpu.matmul %14, %15, %cst_5 {dimension_numbers = #tpu.dot_dimension_numbers<[1], [0], [0], [1], [0, 0, 1, 1], [], []>} : vector<512x384xbf16>, vector<384x128xbf16>, vector<512x128xf32> -> vector<512x128xf32>
    %17 = arith.addf %12, %16 : vector<512x128xf32>
    %18 = vector.extract_strided_slice %11 {offsets = [0, 1, 0, 0], sizes = [2, 16, 16, 384], strides = [1, 1, 1, 1]} : vector<2x18x16x384xbf16> to vector<2x16x16x384xbf16>
    %19 = vector.shape_cast %18 : vector<2x16x16x384xbf16> to vector<512x384xbf16>
    %c384 = arith.constant 384 : index
    %c0_6 = arith.constant 0 : index
    %20 = vector.load %arg2[%c384, %c0_6] : memref<1152x128xbf16, #tpu.memory_space<vmem>>, vector<384x128xbf16>
    %cst_7 = arith.constant dense<0.000000e+00> : vector<512x128xf32>
    %21 = tpu.matmul %19, %20, %cst_7 {dimension_numbers = #tpu.dot_dimension_numbers<[1], [0], [0], [1], [0, 0, 1, 1], [], []>} : vector<512x384xbf16>, vector<384x128xbf16>, vector<512x128xf32> -> vector<512x128xf32>
    %22 = arith.addf %17, %21 : vector<512x128xf32>
    %23 = vector.extract_strided_slice %11 {offsets = [0, 2, 0, 0], sizes = [2, 16, 16, 384], strides = [1, 1, 1, 1]} : vector<2x18x16x384xbf16> to vector<2x16x16x384xbf16>
    %24 = vector.shape_cast %23 : vector<2x16x16x384xbf16> to vector<512x384xbf16>
    %c768 = arith.constant 768 : index
    %c0_8 = arith.constant 0 : index
    %25 = vector.load %arg2[%c768, %c0_8] : memref<1152x128xbf16, #tpu.memory_space<vmem>>, vector<384x128xbf16>
    %cst_9 = arith.constant dense<0.000000e+00> : vector<512x128xf32>
    %26 = tpu.matmul %24, %25, %cst_9 {dimension_numbers = #tpu.dot_dimension_numbers<[1], [0], [0], [1], [0, 0, 1, 1], [], []>} : vector<512x384xbf16>, vector<384x128xbf16>, vector<512x128xf32> -> vector<512x128xf32>
    %27 = arith.addf %22, %26 : vector<512x128xf32>
    %28 = vector.shape_cast %27 : vector<512x128xf32> to vector<2x256x128xf32>
    %cst_10 = arith.constant dense<0.000000e+00> : vector<2x128xf32>
    %29 = vector.multi_reduction <add>, %28, %cst_10 [1] : vector<2x256x128xf32> to vector<2x128xf32>
    %30 = vector.shape_cast %29 : vector<2x128xf32> to vector<2x1x128xf32>
    %cst_11 = arith.constant 3.906250e-03 : f32
    %31 = vector.broadcast %cst_11 : f32 to vector<2x1x128xf32>
    %32 = arith.mulf %30, %31 : vector<2x1x128xf32>
    %33 = arith.mulf %28, %28 : vector<2x256x128xf32>
    %cst_12 = arith.constant dense<0.000000e+00> : vector<2x128xf32>
    %34 = vector.multi_reduction <add>, %33, %cst_12 [1] : vector<2x256x128xf32> to vector<2x128xf32>
    %35 = vector.shape_cast %34 : vector<2x128xf32> to vector<2x1x128xf32>
    %cst_13 = arith.constant 3.906250e-03 : f32
    %36 = vector.broadcast %cst_13 : f32 to vector<2x1x128xf32>
    %37 = arith.mulf %35, %36 : vector<2x1x128xf32>
    %38 = arith.mulf %32, %32 : vector<2x1x128xf32>
    %39 = arith.subf %37, %38 : vector<2x1x128xf32>
    %40 = vector.broadcast %32 : vector<2x1x128xf32> to vector<2x256x128xf32>
    %41 = arith.subf %28, %40 : vector<2x256x128xf32>
    %cst_14 = arith.constant 9.99999974E-6 : f32
    %42 = vector.broadcast %cst_14 : f32 to vector<2x1x128xf32>
    %43 = arith.addf %39, %42 : vector<2x1x128xf32>
    %44 = math.rsqrt %43 : vector<2x1x128xf32>
    %45 = vector.broadcast %44 : vector<2x1x128xf32> to vector<2x256x128xf32>
    %46 = arith.mulf %41, %45 : vector<2x256x128xf32>
    %cst_15 = arith.constant 0.000000e+00 : f32
    %47 = vector.broadcast %cst_15 : f32 to vector<2x256x128xf32>
    %48 = arith.maximumf %46, %47 : vector<2x256x128xf32>
    %49 = arith.truncf %48 : vector<2x256x128xf32> to vector<2x256x128xbf16>
    %50 = vector.shape_cast %49 : vector<2x256x128xbf16> to vector<2x16x16x128xbf16>
    %51 = vector.extract_strided_slice %50 {offsets = [0, 1, 0, 0], sizes = [2, 1, 16, 128], strides = [1, 1, 1, 1]} : vector<2x16x16x128xbf16> to vector<2x1x16x128xbf16>
    %52 = vector.extract_strided_slice %50 {offsets = [0, 14, 0, 0], sizes = [2, 1, 16, 128], strides = [1, 1, 1, 1]} : vector<2x16x16x128xbf16> to vector<2x1x16x128xbf16>
    %53 = tpu.concatenate %51, %50, %52 in 1 : vector<2x1x16x128xbf16>, vector<2x16x16x128xbf16>, vector<2x1x16x128xbf16> -> vector<2x18x16x128xbf16>
    %54 = vector.extract_strided_slice %53 {offsets = [0, 0, 1, 0], sizes = [2, 18, 1, 128], strides = [1, 1, 1, 1]} : vector<2x18x16x128xbf16> to vector<2x18x1x128xbf16>
    %55 = vector.extract_strided_slice %53 {offsets = [0, 0, 14, 0], sizes = [2, 18, 1, 128], strides = [1, 1, 1, 1]} : vector<2x18x16x128xbf16> to vector<2x18x1x128xbf16>
    %56 = tpu.concatenate %54, %53, %55 in 2 : vector<2x18x1x128xbf16>, vector<2x18x16x128xbf16>, vector<2x18x1x128xbf16> -> vector<2x18x18x128xbf16>
    %57 = vector.extract_strided_slice %56 {offsets = [0, 0, 0, 0], sizes = [2, 18, 16, 128], strides = [1, 1, 1, 1]} : vector<2x18x18x128xbf16> to vector<2x18x16x128xbf16>
    %58 = vector.extract_strided_slice %56 {offsets = [0, 0, 1, 0], sizes = [2, 18, 16, 128], strides = [1, 1, 1, 1]} : vector<2x18x18x128xbf16> to vector<2x18x16x128xbf16>
    %59 = vector.extract_strided_slice %56 {offsets = [0, 0, 2, 0], sizes = [2, 18, 16, 128], strides = [1, 1, 1, 1]} : vector<2x18x18x128xbf16> to vector<2x18x16x128xbf16>
    %60 = tpu.concatenate %57, %58, %59 in 3 : vector<2x18x16x128xbf16>, vector<2x18x16x128xbf16>, vector<2x18x16x128xbf16> -> vector<2x18x16x384xbf16>
    %cst_16 = arith.constant 0.000000e+00 : f32
    %61 = vector.broadcast %cst_16 : f32 to vector<512x128xf32>
    %62 = vector.extract_strided_slice %60 {offsets = [0, 0, 0, 0], sizes = [2, 16, 16, 384], strides = [1, 1, 1, 1]} : vector<2x18x16x384xbf16> to vector<2x16x16x384xbf16>
    %63 = vector.shape_cast %62 : vector<2x16x16x384xbf16> to vector<512x384xbf16>
    %c0_17 = arith.constant 0 : index
    %c0_18 = arith.constant 0 : index
    %64 = vector.load %arg3[%c0_17, %c0_18] : memref<1152x128xbf16, #tpu.memory_space<vmem>>, vector<384x128xbf16>
    %cst_19 = arith.constant dense<0.000000e+00> : vector<512x128xf32>
    %65 = tpu.matmul %63, %64, %cst_19 {dimension_numbers = #tpu.dot_dimension_numbers<[1], [0], [0], [1], [0, 0, 1, 1], [], []>} : vector<512x384xbf16>, vector<384x128xbf16>, vector<512x128xf32> -> vector<512x128xf32>
    %66 = arith.addf %61, %65 : vector<512x128xf32>
    %67 = vector.extract_strided_slice %60 {offsets = [0, 1, 0, 0], sizes = [2, 16, 16, 384], strides = [1, 1, 1, 1]} : vector<2x18x16x384xbf16> to vector<2x16x16x384xbf16>
    %68 = vector.shape_cast %67 : vector<2x16x16x384xbf16> to vector<512x384xbf16>
    %c384_20 = arith.constant 384 : index
    %c0_21 = arith.constant 0 : index
    %69 = vector.load %arg3[%c384_20, %c0_21] : memref<1152x128xbf16, #tpu.memory_space<vmem>>, vector<384x128xbf16>
    %cst_22 = arith.constant dense<0.000000e+00> : vector<512x128xf32>
    %70 = tpu.matmul %68, %69, %cst_22 {dimension_numbers = #tpu.dot_dimension_numbers<[1], [0], [0], [1], [0, 0, 1, 1], [], []>} : vector<512x384xbf16>, vector<384x128xbf16>, vector<512x128xf32> -> vector<512x128xf32>
    %71 = arith.addf %66, %70 : vector<512x128xf32>
    %72 = vector.extract_strided_slice %60 {offsets = [0, 2, 0, 0], sizes = [2, 16, 16, 384], strides = [1, 1, 1, 1]} : vector<2x18x16x384xbf16> to vector<2x16x16x384xbf16>
    %73 = vector.shape_cast %72 : vector<2x16x16x384xbf16> to vector<512x384xbf16>
    %c768_23 = arith.constant 768 : index
    %c0_24 = arith.constant 0 : index
    %74 = vector.load %arg3[%c768_23, %c0_24] : memref<1152x128xbf16, #tpu.memory_space<vmem>>, vector<384x128xbf16>
    %cst_25 = arith.constant dense<0.000000e+00> : vector<512x128xf32>
    %75 = tpu.matmul %73, %74, %cst_25 {dimension_numbers = #tpu.dot_dimension_numbers<[1], [0], [0], [1], [0, 0, 1, 1], [], []>} : vector<512x384xbf16>, vector<384x128xbf16>, vector<512x128xf32> -> vector<512x128xf32>
    %76 = arith.addf %71, %75 : vector<512x128xf32>
    %77 = vector.shape_cast %76 : vector<512x128xf32> to vector<2x256x128xf32>
    %cst_26 = arith.constant dense<0.000000e+00> : vector<2x128xf32>
    %78 = vector.multi_reduction <add>, %77, %cst_26 [1] : vector<2x256x128xf32> to vector<2x128xf32>
    %79 = vector.shape_cast %78 : vector<2x128xf32> to vector<2x1x128xf32>
    %cst_27 = arith.constant 3.906250e-03 : f32
    %80 = vector.broadcast %cst_27 : f32 to vector<2x1x128xf32>
    %81 = arith.mulf %79, %80 : vector<2x1x128xf32>
    %82 = arith.mulf %77, %77 : vector<2x256x128xf32>
    %cst_28 = arith.constant dense<0.000000e+00> : vector<2x128xf32>
    %83 = vector.multi_reduction <add>, %82, %cst_28 [1] : vector<2x256x128xf32> to vector<2x128xf32>
    %84 = vector.shape_cast %83 : vector<2x128xf32> to vector<2x1x128xf32>
    %cst_29 = arith.constant 3.906250e-03 : f32
    %85 = vector.broadcast %cst_29 : f32 to vector<2x1x128xf32>
    %86 = arith.mulf %84, %85 : vector<2x1x128xf32>
    %87 = arith.mulf %81, %81 : vector<2x1x128xf32>
    %88 = arith.subf %86, %87 : vector<2x1x128xf32>
    %89 = vector.broadcast %81 : vector<2x1x128xf32> to vector<2x256x128xf32>
    %90 = arith.subf %77, %89 : vector<2x256x128xf32>
    %cst_30 = arith.constant 9.99999974E-6 : f32
    %91 = vector.broadcast %cst_30 : f32 to vector<2x1x128xf32>
    %92 = arith.addf %88, %91 : vector<2x1x128xf32>
    %93 = math.rsqrt %92 : vector<2x1x128xf32>
    %94 = vector.broadcast %93 : vector<2x1x128xf32> to vector<2x256x128xf32>
    %95 = arith.mulf %90, %94 : vector<2x256x128xf32>
    %96 = vector.shape_cast %95 : vector<2x256x128xf32> to vector<2x16x16x128xf32>
    %97 = arith.addf %0, %96 : vector<2x16x16x128xf32>
    %c0_31 = arith.constant 0 : index
    %c0_32 = arith.constant 0 : index
    %c0_33 = arith.constant 0 : index
    %c0_34 = arith.constant 0 : index
    %98 = vector.load %arg4[%c0_31, %c0_32, %c0_33, %c0_34] : memref<2x16x16x128xf32, #tpu.memory_space<vmem>>, vector<2x16x16x128xf32>
    tpu.vector_store %arg4[%c0_31, %c0_32, %c0_33, %c0_34], %97 {strides = array<i32>} : memref<2x16x16x128xf32, #tpu.memory_space<vmem>>, vector<2x16x16x128xf32>,
    return
  }
  func.func @transform_0(%arg0: i32) -> (i32, i32, i32, i32) {
    %c0_i32 = arith.constant 0 : i32
    %c0_i32_0 = arith.constant 0 : i32
    %c0_i32_1 = arith.constant 0 : i32
    %c0_i32_2 = arith.constant 0 : i32
    return %arg0, %c0_i32, %c0_i32_0, %c0_i32_1 : i32, i32, i32, i32
  }
  func.func @transform_1(%arg0: i32) -> (i32, i32) {
    %c0_i32 = arith.constant 0 : i32
    %c0_i32_0 = arith.constant 0 : i32
    %c0_i32_1 = arith.constant 0 : i32
    return %c0_i32, %c0_i32_0 : i32, i32
  }
  func.func @transform_2(%arg0: i32) -> (i32, i32) {
    %c0_i32 = arith.constant 0 : i32
    %c0_i32_0 = arith.constant 0 : i32
    %c0_i32_1 = arith.constant 0 : i32
    return %c0_i32, %c0_i32_0 : i32, i32
  }
  func.func @transform_3(%arg0: i32) -> (i32, i32, i32, i32) {
    %c0_i32 = arith.constant 0 : i32
    %c0_i32_0 = arith.constant 0 : i32
    %c0_i32_1 = arith.constant 0 : i32
    %c0_i32_2 = arith.constant 0 : i32
    return %arg0, %c0_i32, %c0_i32_0, %c0_i32_1 : i32, i32, i32, i32
  }
}

</mosaic_0001>

<bundles_post_ra>
// kernel: tpu_custom_call.1
= control target key start
LH: loop header
LB: loop body
LE: loop exit
PB: predicated region body
PF: predicated region fallthrough
CT: control target
= control target key end

     0   :  { %8 = vsyncpa [#allocation3], 0  ;;  %s14942_s0 = inlined_call_operand.hbm [shape: f32[8,16,16,128], index: 0, kind: input, shape index: {}]   ;;  %s14943_s1 = inlined_call_operand.hbm [shape: bf16[1152,128], index: 1, kind: input, shape index: {}]   ;;  %s14944_s2 = inlined_call_operand.hbm [shape: bf16[1152,128], index: 2, kind: input, shape index: {}]   ;;  %s14945_s3 = inlined_call_operand.hbm [shape: f32[8,16,16,128], index: 3, kind: output, shape index: {}]  }
   0x1   :  { %10 = vsyncpa [#allocation3 + $0x1], 0 }
   0x2   :  { %11 = vsyncpa [#allocation6], 0 }
   0x3   :  { %12 = vsyncpa [#allocation4], 0 }
   0x4   :  { %14 = vsyncpa [#allocation4 + $0x1], 0  ;;  %s9577_s12 = smov 0   ;;  %s9579_s13 = smov 0  }
   0x5   :  { %s9581_s14 = smov 0   ;;  %s9583_s15 = smov 0  }
   0x6 LB: > { %s9598_s16 = sadd.s32 4294967295, %s9544_s15   ;;  %s8218_s17 = sadd.s32 4294967294, %s9544_s15   ;;  %s9544_s15 = sphi %s9583_s15, %s16235_s15   ;;  %s9540_s14 = sphi %s9581_s14, %s16234_s14   ;;  %s9536_s13 = sphi %s9579_s13, %s16233_s13   ;;  %s9532_s12 = sphi %s9577_s12, %s16232_s12  }
   0x7   : > { %p40_p0 = scmp.ne.s32.totalorder %s9536_s13, %s9532_s12  ;;  %p14946_p1 = scmp.eq.s32.totalorder %s9598_s16, 0 }
   0x8   : > { %p112_p3 = scmp.eq.s32.totalorder %s8218_s17, 3  ;;  %p8219_p5 = scmp.ge.s32.totalorder %s9544_s15, 1 }
   0x9   : > { %p9607_p4 = por %p14946_p1, %p40_p0  ;;  %p119_p7 = scmp.lt.s32.totalorder %s9544_s15, 5 }
   0xa   : > { %p9612_p6 = por %p112_p3, %p40_p0  ;;  %s9546_s21 = smov [#allocation5]  }
   0xb   : > { %s15270_s18 = scalar_select %p9607_p4, 1, 0 }
   0xc   : > { %s15271_s19 = scalar_select %p9612_p6, 1, 0 }
   0xd   : > { %p9617_p8 = pnand %p8219_p5, %p119_p7  ;;  %s131_s22 = sshll.u32 %s9546_s21, 4  ;;  %s132_s22 = int_to_ptr.vmem [resolvable:$true] %s131_s22 }
   0xe   : > { %s9547_s24 = smov [#allocation7]   ;;  %s9407_s26 = scalar_lea.vmem %s132_s22, 9216 }
   0xf   : > { %s15272_s20 = scalar_select %p9617_p8, 1, 0 }
  0x10   : > { %p9118_p9 = pneg %p9617_p8  ;;  %s144_s25 = sshll.u32 %s9547_s24, 4  ;;  %s145_s25 = int_to_ptr.vmem [resolvable:$true] %s144_s25 }
  0x11   : > { %p9408_p12 = scmp.ne.s32.totalorder %s132_s22, %s9407_s26  ;;  %p9415_p3 = scmp.lt.s32.totalorder %s132_s22, %s132_s22 }
  0x12   : > { %p9625_p10 = pnand %p9118_p9, %p14946_p1  ;;  %p9416_p5 = scmp.lt.s32.totalorder %s9407_s26, %s9407_s26 }
  0x14   : > { %p9398_p11 = pneg %p9625_p10  ;;  %p9417_p7 = por %p9416_p5, %p9415_p3 }
  0x16   : > { %p9410_p13 = pnand %p9408_p12, %p9398_p11 }
  0x18   : > { %p9411_p0 = pneg %p9410_p13 }
  0x1a   : > { %p9418_p9 = pnand %p9417_p7, %p9411_p0 }
  0x1c   : > { %9421 = shalt.err (!%p9418_p9)
}
  0x1d   : > { %s9548_s27 = smov 64   ;;  %s9549_s28 = smov 4  }
  0x1e   : > { %9121 = dma.hbm_to_vmem [thread:$0]  (!%p9625_p10), %s14943_s1, 9216, %s132_s22, [#allocation6], %s9548_s27, %s9548_s27, %s9549_s28  }
  0x1f   : > { %s9433_s4 = scalar_lea.vmem %s145_s25, 9216  ;;  %p9441_p2 = scmp.lt.s32.totalorder %s145_s25, %s145_s25 }
  0x20   : > { %p9434_p1 = scmp.ne.s32.totalorder %s145_s25, %s9433_s4  ;;  %p9442_p6 = scmp.lt.s32.totalorder %s9433_s4, %s9433_s4 }
  0x22   : > { %p9436_p12 = pnand %p9434_p1, %p9398_p11  ;;  %p9443_p3 = por %p9442_p6, %p9441_p2 }
  0x24   : > { %p9437_p13 = pneg %p9436_p12 }
  0x26   : > { %p9444_p0 = pnand %p9443_p3, %p9437_p13 }
  0x28   : > { %9447 = shalt.err (!%p9444_p0)
}
  0x29   : > { %9124 = dma.hbm_to_vmem [thread:$0]  (!%p9625_p10), %s14944_s2, 9216, %s145_s25, [#allocation6], %s9548_s27, %s9548_s27, %s9549_s28  }
  0x2a   : > { %s9648_s7 = sadd.s32 1, %s9544_s15   ;;  %s27_s8 = sadd.s32 1, %s9540_s14 }
  0x2b   : > { %s24_s9 = ssub.s32 %s9544_s15, %s9648_s7  ;;  %p34_p1 = scmp.ne.s32.totalorder %s9540_s14, %s9536_s13 }
  0x2c   : > { %p25_p2 = scmp.eq.s32.totalorder %s24_s9, 0  ;;  %p35_p6 = scmp.eq.s32.totalorder %s9544_s15, 0 }
  0x2d   : > { %p15274_p11 = scmp.eq.s32.totalorder %s9598_s16, 3  ;;  %p9135_p7 = scmp.lt.s32.totalorder %s9544_s15, 4 }
  0x2e   : > { %s9664_s11 = scalar_select %p25_p2, %s9540_s14, %s27_s8  }
  0x2f   : > { %p9658_p5 = por %p15274_p11, %p34_p1  ;;  %p36_p9 = por %p35_p6, %p34_p1 }
  0x30   : > { %s158_s17 = sand.u32 1, %s9540_s14   ;;  %s8383_s22 = sshll.u32 %s9544_s15, 13 }
  0x31   : > { %s15275_s10 = scalar_select %p9658_p5, 1, 0 }
  0x32   : > { %s8223_s21 = sshll.u32 %s158_s17, 9  ;;  %s9671_s25 = scalar_lea.hbm %s14942_s0, %s8383_s22 }
  0x33   : > { %s162_s26 = scalar_lea.vmem [#allocation2], %s8223_s21  ;;  %p9675_p10 = pnand %p9135_p7, %p36_p9 }
  0x34   : > { %s170_s27 = sshll.u32 %s162_s26, 4  ;;  %s9679_s29 = scalar_lea.sflag [#allocation3], %s158_s17  ;;  %s9673_s27 = int_to_ptr.vmem [resolvable:$true] %s170_s27 }
  0x35   : > { %s9448_s30 = scalar_lea.hbm %s9671_s25, 8192  ;;  %p9450_p13 = pneg %p9675_p10 }
  0x36   : > { %p9449_p12 = scmp.ne.s32.totalorder %s9671_s25, %s9448_s30  ;;  %s9453_s6 = scalar_lea.hbm %s14942_s0, 32768 }
  0x37   : > { %p9454_p1 = scmp.lt.s32.totalorder %s9671_s25, %s14942_s0  ;;  %p9455_p2 = scmp.lt.s32.totalorder %s9453_s6, %s9448_s30 }
  0x38   : > { %p9451_p3 = pnand %p9450_p13, %p9449_p12 }
  0x39   : > { %p9456_p6 = por %p9455_p2, %p9454_p1 }
  0x3a   : > { %p9452_p0 = pneg %p9451_p3 }
  0x3c   : > { %p9457_p11 = pnand %p9456_p6, %p9452_p0 }
  0x3e   : > { %9460 = shalt.err (!%p9457_p11)
}
  0x3f   : > { %s9461_s17 = scalar_lea.vmem %s9673_s27, 8192  ;;  %s9550_s21 = smov [#allocation2]  }
  0x40   : > { %p9462_p7 = scmp.ne.s32.totalorder %s9673_s27, %s9461_s17  ;;  %s9466_s22 = sshll.u32 %s9550_s21, 4  ;;  %s9467_s22 = int_to_ptr.vmem [resolvable:$false] %s9466_s22 }
  0x41   : > { %s9468_s23 = scalar_lea.vmem %s9467_s22, 16384  ;;  %p9469_p3 = scmp.lt.s32.totalorder %s9673_s27, %s9467_s22 }
  0x42   : > { %p9464_p9 = pnand %p9462_p7, %p9450_p13  ;;  %p9470_p5 = scmp.lt.s32.totalorder %s9468_s23, %s9461_s17 }
  0x44   : > { %p9465_p12 = pneg %p9464_p9  ;;  %p9471_p4 = por %p9470_p5, %p9469_p3 }
  0x46   : > { %p9472_p8 = pnand %p9471_p4, %p9465_p12 }
  0x48   : > { %9475 = shalt.err (!%p9472_p8)
}
  0x49   : > { %s9551_s24 = smov 128   ;;  %s9552_s26 = smov 8  }
  0x4a   : > { %9128 = dma.hbm_to_vmem [thread:$0]  (!%p9675_p10), %s9671_s25, 8192, %s9673_s27, %s9679_s29, %s9551_s24, %s9551_s24, %s9552_s26  }
  0x4b   : > { %p15277_p13 = scmp.ne.s32.totalorder %s15272_s20, 0 }
  0x4d   : > { %182 = sbr.rel (%p15277_p13) target bundleno = 1837 (0x72d), region = 32 }
  0x52   : > { %s9703_s30 = sand.u32 1, %s9536_s13   ;;  %p15278_p4 = scmp.ne.s32.totalorder %s15270_s18, 0 }
  0x53   : > { %s8228_s4 = sshll.u32 %s9703_s30, 9  ;;  %s185_s5 = scalar_lea.sflag [#allocation3], %s9703_s30 }
  0x54   : > { %s9709_s6 = scalar_lea.vmem [#allocation2], %s8228_s4 }
  0x55   : > { %9519 = dma.done.wait (%p15278_p4), %s185_s5, 8192  }
  0x56   : > { %9521 = vsyncadd (%p15278_p4), %s185_s5, 4294959104  ;;  %p15279_p8 = scmp.eq.s32.totalorder %s9598_s16, 0 }
  0x58   : > { %9523 = dma.done.wait (%p15279_p8), [#allocation6], 18432   ;;  %p15280_p5 = pmov %p15279_p8 }
  0x59   : > { %v14951_v0 = vmov 0   ;;  %v9180_v1 = vld [vmem:[#allocation5 + $0xf8] sm:$0xff]   ;;  %v9182_v3 = vld [vmem:[#allocation5 + $0xf0] sm:$0xff]   ;;  %v9185_v5 = vld [vmem:[#allocation5 + $0x168] sm:$0xff]   ;;  %vm702_vm0 = vcmask 1040384   ;;  %v15281_v21 = vmov 0 }
  0x5a   : > { %9525 = vsyncadd (%p15280_p5), [#allocation6], 4294948864  ;;  %1619 = vmatprep.subr.bf16.mxu0 %v14951_v0  ;;  %v9181_v2 = vld [vmem:[#allocation5 + $0x178] sm:$0xff]   ;;  %v9183_v4 = vld [vmem:[#allocation5 + $0x170] sm:$0xff]   ;;  %vm703_vm1 = vsmask.f32 256 }
  0x5b   : > { %1620 = vmatpush1.bf16.msra.mxu0 %v9180_v1  ;;  %8626 = vmatprep.subr.bf16.mxu1 %v9181_v2  ;;  %v9184_v6 = vld [vmem:[#allocation5 + $0xe8] sm:$0xff]   ;;  %v9187_v7 = vld [vmem:[#allocation5 + $0x160] sm:$0xff]   ;;  %v9189_v9 = vld [vmem:[#allocation5 + $0x158] sm:$0xff]   ;;  %vm1250_vm3 = vcmask 1046528   ;;  %vm769_vm4 = vsmask.f32 7424 }
  0x5c   : > { %1621 = vmatprep.subr.bf16.mxu0 %v14951_v0  ;;  %8627 = vmatpush3.bf16.msra.mxu1 %v9181_v2  ;;  %v9186_v8 = vld [vmem:[#allocation5 + $0xe0] sm:$0xff]   ;;  %v9188_v10 = vld [vmem:[#allocation5 + $0xd8] sm:$0xff]   ;;  %v9190_v11 = vld [vmem:[#allocation5 + $0xd0] sm:$0xff]   ;;  %s14385_s18 = scalar_lea.vmem [#allocation8], %s8228_s4  ;;  %s8385_s20 = sshll.u32 %s9598_s16, 13 }
  0x5d   : > { %8628 = vmatprep.subr.bf16.mxu1 %v9183_v4  ;;  %v222_v12 = vld [vmem:[%s9709_s6] sm:$0xff]  ;;  %v223_v13 = vld [vmem:[%s9709_s6 + $0x8] sm:$0xff]  ;;  %v9191_v14 = vld [vmem:[#allocation5 + $0x150] sm:$0xff]   ;;  %s8126_s25 = sshll.u32 %s14385_s18, 4  ;;  %s14876_s29 = scalar_lea.hbm %s14945_s3, %s8385_s20  ;;  %s14880_s25 = int_to_ptr.vmem [resolvable:$true] %s8126_s25 }
  0x5e   : > { %v286_v15 = vpack.c.bf16 %v223_v13, %v222_v12  ;;  %v224_v16 = vld [vmem:[%s9709_s6 + $0x10] sm:$0xff]  ;;  %v225_v17 = vld [vmem:[%s9709_s6 + $0x18] sm:$0xff]  ;;  %v9193_v18 = vld [vmem:[#allocation5 + $0x148] sm:$0xff]   ;;  %s8112_s16 = scalar_lea.sflag [#allocation4], %s9703_s30  ;;  %s9476_s8 = scalar_lea.vmem %s14880_s25, 8192 }
  0x5f   : > { %1622 = vmatpush1.bf16.msra.mxu0 %v9182_v3  ;;  %vm9730_vm2 = vmand %vm702_vm0, %vm703_vm1  ;;  %v287_v22 = vpack.c.bf16 %v225_v17, %v224_v16  ;;  %v226_v23 = vld [vmem:[%s9709_s6 + $0x20] sm:$0xff]  ;;  %v227_v24 = vld [vmem:[%s9709_s6 + $0x28] sm:$0xff]  ;;  %p9477_p10 = scmp.ne.s32.totalorder %s14880_s25, %s9476_s8  ;;  %p16230_p0 = scmp.ne.s32.totalorder %s15275_s10, 0 }
  0x60   : > { %1623 = vmatprep.subr.bf16.mxu0 %v14951_v0  ;;  %8629 = vmatpush3.bf16.msra.mxu1 %v9183_v4  ;;  %v322_v19 = vshrl.u32 %v286_v15, 16  ;;  %v451_v20 = vshll.u32 %v286_v15, 16  ;;  %v15282_v21 = vsel %vm9730_vm2, 4294967295, %v15281_v21  ;;  %v9192_v29 = vld [vmem:[#allocation5 + $0xc8] sm:$0xff]   ;;  %v288_v30 = vpack.c.bf16 %v227_v24, %v226_v23  ;;  %v228_v31 = vld [vmem:[%s9709_s6 + $0x30] sm:$0xff]  ;;  %v229_v36 = vld [vmem:[%s9709_s6 + $0x38] sm:$0xff] }
  0x61   : > { %8630 = vmatprep.subr.bf16.mxu1 %v9185_v5  ;;  %15283 = vst [vmem:[#allocation12_spill] sm:$0xff] %v15282_v21  ;;  %v319_v27 = vshrl.u32 %v287_v22, 16  ;;  %v447_v28 = vshll.u32 %v287_v22, 16  ;;  %v9195_v37 = vld [vmem:[#allocation5 + $0x140] sm:$0xff]   ;;  %v289_v41 = vpack.c.bf16 %v229_v36, %v228_v31  ;;  %v231_v52 = vld [vmem:[%s9709_s6 + $0x48] sm:$0xff]  ;;  %v232_v61 = vld [vmem:[%s9709_s6 + $0x50] sm:$0xff]  ;;  %p9478_p1 = pnand %p9477_p10, %p16230_p0 }
  0x62   : > { %v450_v25 = vrot.slane %v322_v19, 7  ;;  %v639_v26 = vrot.slane %v451_v20, 7  ;;  %v325_v39 = vshrl.u32 %v288_v30, 16  ;;  %v455_v40 = vshll.u32 %v288_v30, 16  ;;  %v230_v45 = vld [vmem:[%s9709_s6 + $0x40] sm:$0xff]  ;;  %v233_v62 = vld [vmem:[%s9709_s6 + $0x58] sm:$0xff] }
  0x63   : > { %1624 = vmatpush1.bf16.msra.mxu0 %v9184_v6  ;;  %v446_v34 = vrot.slane %v319_v27, 7  ;;  %v638_v35 = vrot.slane %v447_v28, 7  ;;  %v9194_v47 = vld [vmem:[#allocation5 + $0xc0] sm:$0xff]   ;;  %v328_v54 = vshrl.u32 %v289_v41, 16  ;;  %v459_v55 = vshll.u32 %v289_v41, 16  ;;  %v9196_v4 = vld [vmem:[#allocation5 + $0x138] sm:$0xff]   ;;  %p9479_p2 = pneg %p9478_p1 }
  0x64   : > { %1625 = vmatprep.subr.bf16.mxu0 %v14951_v0  ;;  %8631 = vmatpush3.bf16.msra.mxu1 %v9185_v5  ;;  %v453_v32 = vor.u32 %v451_v20, %v450_v25  ;;  %v9740_v33 = vsel %vm9730_vm2, %v450_v25, %v639_v26  ;;  %v454_v50 = vrot.slane %v325_v39, 7  ;;  %v640_v51 = vrot.slane %v455_v40, 7  ;;  %v235_v15 = vld [vmem:[%s9709_s6 + $0x68] sm:$0xff]  ;;  %v9198_v20 = vld [vmem:[#allocation5 + $0x130] sm:$0xff]   ;;  %v237_v30 = vld [vmem:[%s9709_s6 + $0x78] sm:$0xff]  ;;  %s9554_s9 = smov [#allocation8]  }
  0x65   : > { %8632 = vmatprep.subr.bf16.mxu1 %v9187_v7  ;;  %v1255_v38 = vrot.slane %v9740_v33, 1  ;;  %v449_v43 = vor.u32 %v447_v28, %v446_v34  ;;  %v9750_v44 = vsel %vm9730_vm2, %v446_v34, %v638_v35  ;;  %v790_v46 = vshll.u32 %v9740_v33, 16  ;;  %v9200_v31 = vld [vmem:[#allocation5 + $0x30] sm:$0xff]   ;;  %v9206_v33 = vld [vmem:[#allocation5 + $0x20] sm:$0xff]   ;;  %v9235_v21 = vld [vmem:[#allocation5 + $0x1f8] sm:$0xff]   ;;  %s9480_s17 = sshll.u32 %s9554_s9, 4  ;;  %s9481_s17 = int_to_ptr.vmem [resolvable:$false] %s9480_s17 }
  0x66   : > { %v9746_v42 = vsel %vm9730_vm2, %v322_v19, %v453_v32  ;;  %v1252_v49 = vrot.slane %v9750_v44, 1  ;;  %v290_v56 = vpack.c.bf16 %v231_v52, %v230_v45  ;;  %v457_v59 = vor.u32 %v455_v40, %v454_v50  ;;  %v9199_v40 = vld [vmem:[#allocation5 + $0x128] sm:$0xff]   ;;  %s9482_s21 = scalar_lea.vmem %s9481_s17, 16384  ;;  %p9483_p6 = scmp.lt.s32.totalorder %s14880_s25, %s9481_s17 }
  0x67   : > { %1626 = vmatpush1.bf16.msra.mxu0 %v9186_v8  ;;  %v1254_v48 = vrot.slane %v9746_v42, 1  ;;  %v9760_v53 = vsel %vm9730_vm2, %v319_v27, %v449_v43  ;;  %v9768_v60 = vsel %vm9730_vm2, %v454_v50, %v640_v51  ;;  %v458_v1 = vrot.slane %v328_v54, 7  ;;  %v239_v50 = vld [vmem:[%s9709_s6 + $0x88] sm:$0xff]  ;;  %p9484_p11 = scmp.lt.s32.totalorder %s9482_s21, %s9476_s8 }
  0x68   : > { %1627 = vmatprep.subr.bf16.mxu0 %v14951_v0  ;;  %8633 = vmatpush3.bf16.msra.mxu1 %v9187_v7  ;;  %15284 = vst [vmem:[#allocation13_spill] sm:$0xff] %v9760_v53  ;;  %v1251_v58 = vrot.slane %v9760_v53, 1  ;;  %v1258_v63 = vrot.slane %v9768_v60, 1  ;;  %v641_v2 = vrot.slane %v459_v55, 7  ;;  %v331_v3 = vshrl.u32 %v290_v56, 16 }
  0x69   : > { %8634 = vmatprep.subr.bf16.mxu1 %v9189_v9  ;;  %v9763_v57 = vsel %vm1250_vm3, %v1254_v48, %v1255_v38  ;;  %v9779_v6 = vsel %vm9730_vm2, %v325_v39, %v457_v59  ;;  %v463_v7 = vshll.u32 %v290_v56, 16  ;;  %v291_v8 = vpack.c.bf16 %v233_v62, %v232_v61  ;;  %v240_v56 = vld [vmem:[%s9709_s6 + $0x90] sm:$0xff]  ;;  %v9203_v62 = vld [vmem:[#allocation5 + $0x28] sm:$0xff]   ;;  %p9485_p7 = por %p9484_p11, %p9483_p6 }
  0x6a   : > { %15285 = vst [vmem:[#allocation14_spill] sm:$0xff] %v9763_v57  ;;  %8642 = vmatprep.mubr.bf16.mxu1 %v9763_v57  ;;  %v9775_v5 = vsel %vm1250_vm3, %v1251_v58, %v1252_v49  ;;  %15287 = vst [vmem:[#allocation16_spill] sm:$0xff] %v9779_v6  ;;  %v9785_v12 = vsel %vm9730_vm2, %v458_v1, %v641_v2  ;;  %v462_v13 = vrot.slane %v331_v3, 7  ;;  %v785_v48 = vshll.u32 %v9746_v42, 16  ;;  %v238_v49 = vld [vmem:[%s9709_s6 + $0x80] sm:$0xff]  ;;  %v241_v58 = vld [vmem:[%s9709_s6 + $0x98] sm:$0xff] }
  0x6b   : > { %1628 = vmatpush1.bf16.msra.mxu0 %v9188_v10  ;;  %15286 = vst [vmem:[#allocation15_spill] sm:$0xff] %v9775_v5  ;;  %v1257_v10 = vrot.slane %v9779_v6, 1  ;;  %v1261_v16 = vrot.slane %v9785_v12, 1  ;;  %v642_v17 = vrot.slane %v463_v7, 7  ;;  %v467_v19 = vshll.u32 %v291_v8, 16  ;;  %p9486_p9 = pnand %p9485_p7, %p9479_p2 }
  0x6c   : > { %1629 = vmatprep.subr.bf16.mxu0 %v14951_v0  ;;  %8635 = vmatpush3.bf16.msra.mxu1 %v9189_v9  ;;  %v9197_v9 = vld [vmem:[#allocation5 + $0x38] sm:$0xff]   ;;  %v465_v24 = vor.u32 %v463_v7, %v462_v13  ;;  %v294_v7 = vpack.c.bf16 %v239_v50, %v238_v49 }
  0x6d   : > { %8636 = vmatprep.subr.bf16.mxu1 %v9191_v14  ;;  %v9792_v22 = vsel %vm1250_vm3, %v1257_v10, %v1258_v63  ;;  %v9801_v27 = vsel %vm9730_vm2, %v462_v13, %v642_v17  ;;  %v643_v34 = vrot.slane %v467_v19, 7  ;;  %v787_v63 = vrot.slane %v785_v48, 1  ;;  %v9204_v48 = vld [vmem:[#allocation5 + $0x110] sm:$0xff]  }
  0x6e   : > { %15288 = vst [vmem:[#allocation17_spill] sm:$0xff] %v9792_v22  ;;  %v9809_v32 = vsel %vm9730_vm2, %v331_v3, %v465_v24  ;;  %v1264_v38 = vrot.slane %v9801_v27, 1  ;;  %v9851_v10 = vpack.c.bf16 %v241_v58, %v240_v56  ;;  %v773_v58 = vshll.u32 %v9760_v53, 16 }
  0x6f   : > { %1630 = vmatpush1.bf16.msra.mxu0 %v9190_v11  ;;  %v461_v11 = vor.u32 %v459_v55, %v458_v1  ;;  %15290 = vst [vmem:[#allocation19_spill] sm:$0xff] %v9809_v32  ;;  %v792_v1 = vrot.slane %v790_v46, 1 }
  0x70   : > { %1631 = vmatprep.subr.bf16.mxu0 %v14951_v0  ;;  %8637 = vmatpush3.bf16.msra.mxu1 %v9191_v14  ;;  %v234_v14 = vld [vmem:[%s9709_s6 + $0x60] sm:$0xff] }
  0x71   : > { %8638 = vmatprep.subr.bf16.mxu1 %v9193_v18  ;;  %v9796_v23 = vsel %vm9730_vm2, %v328_v54, %v461_v11  ;;  %v292_v25 = vpack.c.bf16 %v235_v15, %v234_v14  ;;  %v343_v14 = vshrl.u32 %v294_v7, 16  ;;  %v479_v15 = vshll.u32 %v294_v7, 16 }
  0x72   : > { %15289 = vst [vmem:[#allocation18_spill] sm:$0xff] %v9796_v23  ;;  %v1260_v26 = vrot.slane %v9796_v23, 1  ;;  %v778_v7 = vshll.u32 %v9750_v44, 16 }
  0x73   : > { %1632 = vmatpush1.bf16.msra.mxu0 %v9192_v29  ;;  %v236_v29 = vld [vmem:[%s9709_s6 + $0x70] sm:$0xff]  ;;  %v337_v35 = vshrl.u32 %v292_v25, 16  ;;  %v471_v36 = vshll.u32 %v292_v25, 16 }
  0x74   : > { %1633 = vmatprep.subr.bf16.mxu0 %v14951_v0  ;;  %8639 = vmatpush3.bf16.msra.mxu1 %v9193_v18  ;;  %v334_v18 = vshrl.u32 %v291_v8, 16  ;;  %v9815_v45 = vpack.c.bf16 %v237_v30, %v236_v29  ;;  %v9823_v51 = vsel %vm1250_vm3, %v1260_v26, %v1261_v16  ;;  %v9201_v8 = vld [vmem:[#allocation5 + $0x120] sm:$0xff]   ;;  %v9202_v29 = vld [vmem:[#allocation5 + $0x118] sm:$0xff]   ;;  %v646_v30 = vrot.slane %v479_v15, 7 }
  0x75   : > { %8640 = vmatprep.subr.bf16.mxu1 %v9195_v37  ;;  %v470_v41 = vrot.slane %v337_v35, 7  ;;  %v644_v43 = vrot.slane %v471_v36, 7  ;;  %15291 = vst [vmem:[#allocation20_spill] sm:$0xff] %v9823_v51 }
  0x76   : > { %v466_v28 = vrot.slane %v334_v18, 7  ;;  %v340_v55 = vshrl.u32 %v9815_v45, 16 }
  0x77   : > { %1634 = vmatpush1.bf16.msra.mxu0 %v9194_v47  ;;  %v783_v47 = vshrl.u32 %v9746_v42, 16  ;;  %v473_v54 = vor.u32 %v471_v36, %v470_v41  ;;  %v9844_v2 = vsel %vm9730_vm2, %v470_v41, %v644_v43 }
  0x78   : > { %1635 = vmatprep.subr.bf16.mxu0 %v14951_v0  ;;  %8641 = vmatpush3.bf16.msra.mxu1 %v9195_v37  ;;  %v1263_v37 = vrot.slane %v9809_v32, 1  ;;  %v469_v39 = vor.u32 %v467_v19, %v466_v28  ;;  %v9827_v52 = vsel %vm9730_vm2, %v466_v28, %v643_v34  ;;  %v474_v3 = vrot.slane %v340_v55, 7  ;;  %v242_v19 = vld [vmem:[%s9709_s6 + $0xa0] sm:$0xff] }
  0x79   : > { %2341 = vmatprep.subr.bf16.mxu1 %v14951_v0  ;;  %v788_v46 = vor.u32 %v787_v63, %v783_v47  ;;  %v1267_v13 = vrot.slane %v9827_v52, 1  ;;  %v1270_v16 = vrot.slane %v9844_v2, 1  ;;  %v478_v28 = vrot.slane %v343_v14, 7  ;;  %v245_v47 = vld [vmem:[%s9709_s6 + $0xb8] sm:$0xff]  ;;  %v9209_v63 = vld [vmem:[#allocation5 + $0x10] sm:$0xff]  }
  0x7a   : > { %v9833_v59 = vsel %vm1250_vm3, %v1263_v37, %v1264_v38  ;;  %v9837_v61 = vsel %vm9730_vm2, %v334_v18, %v469_v39  ;;  %v346_v18 = vshrl.u32 %v9851_v10, 16  ;;  %v483_v34 = vshll.u32 %v9851_v10, 16  ;;  %v9208_v38 = vld [vmem:[#allocation5 + $0x18] sm:$0xff]  }
  0x7b   : > { %1636 = vmatpush2.bf16.msra.mxu0 %v9196_v4  ;;  %8643 = vmatmul.mubr.bf16.vlgmr.msra.gmra.mxu1 %v9775_v5  ;;  %15292 = vst [vmem:[#allocation21_spill] sm:$0xff] %v9833_v59  ;;  %15293 = vst [vmem:[#allocation22_spill] sm:$0xff] %v9837_v61  ;;  %v475_v4 = vshll.u32 %v9815_v45, 16  ;;  %v1266_v11 = vrot.slane %v9837_v61, 1  ;;  %v9860_v17 = vsel %vm769_vm4, %v788_v46, %v792_v1  ;;  %v244_v45 = vld [vmem:[%s9709_s6 + $0xb0] sm:$0xff]  ;;  %v246_v1 = vld [vmem:[%s9709_s6 + $0xc0] sm:$0xff] }
  0x7c   : > { %1637 = vmatprep.subr.bf16.mxu0 %v14951_v0  ;;  %2342 = vmatpush1.bf16.msra.mxu1 %v9197_v9  ;;  %v9849_v9 = vsel %vm9730_vm2, %v337_v35, %v473_v54  ;;  %v481_v35 = vor.u32 %v479_v15, %v478_v28  ;;  %v9896_v50 = vsel %vm9730_vm2, %v478_v28, %v646_v30  ;;  %v647_v56 = vrot.slane %v483_v34, 7 }
  0x7d   : > { %8646 = vmatprep.mubr.bf16.mxu1 %v9792_v22  ;;  %2343 = vmatprep.subr.bf16.mxu1 %v14951_v0  ;;  %15294 = vst [vmem:[#allocation23_spill] sm:$0xff] %v9849_v9  ;;  %v1269_v24 = vrot.slane %v9849_v9, 1  ;;  %v477_v25 = vor.u32 %v475_v4, %v474_v3  ;;  %v645_v26 = vrot.slane %v475_v4, 7  ;;  %v9873_v37 = vsel %vm1250_vm3, %v1266_v11, %v1267_v13  ;;  %v9205_v13 = vld [vmem:[#allocation5 + $0x108] sm:$0xff]  }
  0x7e   : > { %1651 = vmatprep.mubr.bf16.mxu0 %v9860_v17  ;;  %15295 = vst [vmem:[#allocation24_spill] sm:$0xff] %v9873_v37  ;;  %v9892_v49 = vsel %vm9730_vm2, %v343_v14, %v481_v35  ;;  %v1276_v10 = vrot.slane %v9896_v50, 1  ;;  %v771_v11 = vshrl.u32 %v9760_v53, 16  ;;  %v9210_v35 = vld [vmem:[#allocation5 + $0x8] sm:$0xff]  }
  0x7f   : > { %1638 = vmatpush2.bf16.msra.mxu0 %v9198_v20  ;;  %v243_v20 = vld [vmem:[%s9709_s6 + $0xa8] sm:$0xff]  ;;  %v9876_v39 = vsel %vm1250_vm3, %v1269_v24, %v1270_v16  ;;  %v9884_v41 = vsel %vm9730_vm2, %v474_v3, %v645_v26  ;;  %15298 = vst [vmem:[#allocation27_spill] sm:$0xff] %v9892_v49  ;;  %v1275_v46 = vrot.slane %v9892_v49, 1 }
  0x80   : > { %1639 = vmatprep.subr.bf16.mxu0 %v14951_v0  ;;  %2344 = vmatpush1.bf16.msra.mxu1 %v9200_v31  ;;  %v482_v31 = vrot.slane %v346_v18, 7  ;;  %v9870_v36 = vpack.c.bf16 %v243_v20, %v242_v19  ;;  %15296 = vst [vmem:[#allocation25_spill] sm:$0xff] %v9876_v39  ;;  %v1273_v4 = vrot.slane %v9884_v41, 1  ;;  %v248_v19 = vld [vmem:[%s9709_s6 + $0xd0] sm:$0xff]  ;;  %v249_v20 = vld [vmem:[%s9709_s6 + $0xd8] sm:$0xff] }
  0x81   : > { %2345 = vmatprep.subr.bf16.mxu1 %v14951_v0 }
  0x82   : > { %v349_v43 = vshrl.u32 %v9870_v36, 16  ;;  %v485_v54 = vor.u32 %v483_v34, %v482_v31  ;;  %v9924_v24 = vsel %vm9730_vm2, %v482_v31, %v647_v56  ;;  %v797_v34 = vshll.u32 %v9779_v6, 16 }
  0x83   : > { %1640 = vmatpush2.bf16.msra.mxu0 %v9199_v40  ;;  %8647 = vmatmul.mubr.bf16.gmra.mxu1 %v9823_v51  ;;  %v9880_v40 = vsel %vm9730_vm2, %v340_v55, %v477_v25  ;;  %v487_v55 = vshll.u32 %v9870_v36, 16  ;;  %v775_v25 = vrot.slane %v773_v58, 1  ;;  %v9207_v36 = vld [vmem:[#allocation5 + $0x100] sm:$0xff]   ;;  %v9934_v31 = vsel %vm1250_vm3, %v1275_v46, %v1276_v10 }
  0x84   : > { %1641 = vmatprep.subr.bf16.mxu0 %v14951_v0  ;;  %8650 = vmatprep.mubr.bf16.mxu1 %v9833_v59  ;;  %15297 = vst [vmem:[#allocation26_spill] sm:$0xff] %v9880_v40  ;;  %v1272_v3 = vrot.slane %v9880_v40, 1  ;;  %v9916_v14 = vsel %vm9730_vm2, %v346_v18, %v485_v54  ;;  %15301 = vst [vmem:[#allocation30_spill] sm:$0xff] %v9934_v31  ;;  %v250_v58 = vld [vmem:[%s9709_s6 + $0xe0] sm:$0xff]  ;;  %v261_v59 = vld [vmem:[%s9709_s6 + $0x138] sm:$0xff]  ;;  %v826_v51 = vshll.u32 %v9801_v27, 16 }
  0x85   : > { %2346 = vmatpush1.bf16.msra.mxu1 %v9203_v62  ;;  %v486_v62 = vrot.slane %v349_v43, 7  ;;  %15299 = vst [vmem:[#allocation28_spill] sm:$0xff] %v9916_v14  ;;  %v648_v16 = vrot.slane %v487_v55, 7  ;;  %v9211_v10 = vld [vmem:[#allocation5] sm:$0xff]  }
  0x86   : > { %2347 = vmatprep.subr.bf16.mxu1 %v14951_v0  ;;  %v9930_v18 = vsel %vm1250_vm3, %v1272_v3, %v1273_v4  ;;  %v795_v4 = vshrl.u32 %v9779_v6, 16 }
  0x87   : > { %1642 = vmatpush2.bf16.msra.mxu0 %v9201_v8  ;;  %v9907_v8 = vpack.c.bf16 %v245_v47, %v244_v45  ;;  %v489_v15 = vor.u32 %v487_v55, %v486_v62  ;;  %15300 = vst [vmem:[#allocation29_spill] sm:$0xff] %v9930_v18  ;;  %v9938_v47 = vpack.c.bf16 %v249_v20, %v248_v19  ;;  %v252_v20 = vld [vmem:[%s9709_s6 + $0xf0] sm:$0xff] }
  0x88   : > { %1643 = vmatprep.subr.bf16.mxu0 %v14951_v0  ;;  %v9948_v55 = vsel %vm9730_vm2, %v486_v62, %v648_v16 }
  0x89   : > { %2348 = vmatpush1.bf16.msra.mxu1 %v9206_v33  ;;  %v247_v33 = vld [vmem:[%s9709_s6 + $0xc8] sm:$0xff]  ;;  %v352_v44 = vshrl.u32 %v9907_v8, 16  ;;  %v491_v26 = vshll.u32 %v9907_v8, 16  ;;  %v9944_v54 = vsel %vm9730_vm2, %v349_v43, %v489_v15  ;;  %v9212_v43 = vld [vmem:[#allocation5 + $0xb8] sm:$0xff]   ;;  %v799_v8 = vrot.slane %v797_v34, 1 }
  0x8a   : > { %2349 = vmatprep.subr.bf16.mxu1 %v14951_v0  ;;  %v9927_v28 = vpack.c.bf16 %v247_v33, %v246_v1  ;;  %15302 = vst [vmem:[#allocation31_spill] sm:$0xff] %v9944_v54  ;;  %v776_v1 = vor.u32 %v775_v25, %v771_v11  ;;  %v802_v33 = vshll.u32 %v9768_v60, 16  ;;  %v14950_v46 = vshrl.u32 %v9938_v47, 16  ;;  %v253_v25 = vld [vmem:[%s9709_s6 + $0xf8] sm:$0xff] }
  0x8b   : > { %1644 = vmatpush2.bf16.msra.mxu0 %v9202_v29  ;;  %8651 = vmatmul.mubr.bf16.gmra.mxu1 %v9873_v37  ;;  %v780_v29 = vrot.slane %v778_v7, 1  ;;  %v490_v30 = vrot.slane %v352_v44, 7  ;;  %v649_v3 = vrot.slane %v491_v26, 7  ;;  %v1282_v11 = vrot.slane %v9948_v55, 1  ;;  %v260_v37 = vld [vmem:[%s9709_s6 + $0x130] sm:$0xff] }
  0x8c   : > { %1645 = vmatprep.subr.bf16.mxu0 %v14951_v0  ;;  %8654 = vmatprep.mubr.bf16.mxu1 %v9876_v39  ;;  %v355_v45 = vshrl.u32 %v9927_v28, 16  ;;  %v495_v56 = vshll.u32 %v9927_v28, 16  ;;  %v499_v28 = vshll.u32 %v9938_v47, 16  ;;  %v10093_v5 = vpack.c.bf16 %v261_v59, %v260_v37  ;;  %v262_v59 = vld [vmem:[%s9709_s6 + $0x140] sm:$0xff]  ;;  %v263_v37 = vld [vmem:[%s9709_s6 + $0x148] sm:$0xff] }
  0x8d   : > { %2350 = vmatpush1.bf16.msra.mxu1 %v9208_v38  ;;  %v1278_v38 = vrot.slane %v9916_v14, 1  ;;  %v493_v62 = vor.u32 %v491_v26, %v490_v30  ;;  %v9968_v60 = vsel %vm769_vm4, %v776_v1, %v780_v29  ;;  %v9972_v26 = vsel %vm9730_vm2, %v490_v30, %v649_v3  ;;  %v9213_v30 = vld [vmem:[#allocation5 + $0x78] sm:$0xff]   ;;  %v255_v3 = vld [vmem:[%s9709_s6 + $0x108] sm:$0xff] }
  0x8e   : > { %2351 = vmatprep.subr.bf16.mxu1 %v14951_v0  ;;  %v494_v7 = vrot.slane %v355_v45, 7  ;;  %v650_v19 = vrot.slane %v495_v56, 7  ;;  %15304 = vst [vmem:[#allocation33_spill] sm:$0xff] %v9968_v60  ;;  %v498_v29 = vrot.slane %v14950_v46, 7  ;;  %v9989_v1 = vpack.c.bf16 %v253_v25, %v252_v20  ;;  %v256_v25 = vld [vmem:[%s9709_s6 + $0x110] sm:$0xff] }
  0x8f   : > { %1646 = vmatpush2.bf16.msra.mxu0 %v9204_v48  ;;  %v1279_v48 = vrot.slane %v9924_v24, 1  ;;  %v15308_v20 = vmov 0  }
  0x90   : > { %1647 = vmatprep.subr.bf16.mxu0 %v14951_v0  ;;  %v497_v16 = vor.u32 %v495_v56, %v494_v7 }
  0x91   : > { %2352 = vmatpush1.bf16.msra.mxu1 %v9209_v63  ;;  %v251_v63 = vld [vmem:[%s9709_s6 + $0xe8] sm:$0xff]  ;;  %v9963_v15 = vsel %vm1250_vm3, %v1278_v38, %v1279_v48  ;;  %v800_v38 = vor.u32 %v799_v8, %v795_v4  ;;  %v804_v48 = vrot.slane %v802_v33, 1  ;;  %v1285_v4 = vrot.slane %v9972_v26, 1 }
  0x92   : > { %2353 = vmatprep.subr.bf16.mxu1 %v14951_v0  ;;  %15303 = vst [vmem:[#allocation32_spill] sm:$0xff] %v9963_v15  ;;  %v9975_v34 = vpack.c.bf16 %v251_v63, %v250_v58  ;;  %v10002_v8 = vsel %vm9730_vm2, %v494_v7, %v650_v19  ;;  %v809_v33 = vshll.u32 %v9796_v23, 16  ;;  %v257_v19 = vld [vmem:[%s9709_s6 + $0x118] sm:$0xff] }
  0x93   : > { %1648 = vmatpush2.bf16.msra.mxu0 %v9205_v13  ;;  %8655 = vmatmul.mubr.bf16.gmra.mxu1 %v9930_v18  ;;  %v1281_v13 = vrot.slane %v9944_v54, 1  ;;  %v1288_v46 = vrot.slane %v10002_v8, 1  ;;  %v15311_v18 = vshrl.u32 %v9989_v1, 16 }
  0x94   : > { %1649 = vmatprep.subr.bf16.mxu0 %v14951_v0  ;;  %8658 = vmatprep.mubr.bf16.mxu1 %v9934_v31  ;;  %v361_v58 = vshrl.u32 %v9975_v34, 16  ;;  %v503_v63 = vshll.u32 %v9975_v34, 16 }
  0x95   : > { %2354 = vmatpush1.bf16.msra.mxu1 %v9210_v35  ;;  %v9217_v35 = vld [vmem:[#allocation5 + $0xb0] sm:$0xff]   ;;  %v9985_v56 = vsel %vm1250_vm3, %v1281_v13, %v1282_v11  ;;  %v651_v13 = vrot.slane %v499_v28, 7  ;;  %v506_v39 = vrot.slane %v15311_v18, 7 }
  0x96   : > { %2355 = vmatprep.subr.bf16.mxu1 %v14951_v0  ;;  %15306 = vst [vmem:[#allocation35_spill] sm:$0xff] %v9985_v56  ;;  %v502_v11 = vrot.slane %v361_v58, 7 }
  0x97   : > { %1650 = vmatpush2.bf16.msra.mxu0 %v9207_v36  ;;  %v9979_v36 = vsel %vm9730_vm2, %v352_v44, %v493_v62  ;;  %v254_v44 = vld [vmem:[%s9709_s6 + $0x100] sm:$0xff]  ;;  %v9998_v62 = vsel %vm9730_vm2, %v355_v45, %v497_v16  ;;  %v501_v45 = vor.u32 %v499_v28, %v498_v29  ;;  %v814_v16 = vshll.u32 %v9785_v12, 16 }
  0x98   : > { %8706 = vmatprep.subr.bf16.mxu0 %v9212_v43  ;;  %15305 = vst [vmem:[#allocation34_spill] sm:$0xff] %v9979_v36  ;;  %15307 = vst [vmem:[#allocation36_spill] sm:$0xff] %v9998_v62  ;;  %v10011_v7 = vpack.c.bf16 %v255_v3, %v254_v44  ;;  %v1287_v34 = vrot.slane %v9998_v62, 1  ;;  %v811_v28 = vrot.slane %v809_v33, 1  ;;  %v505_v12 = vor.u32 %v503_v63, %v502_v11  ;;  %v9215_v3 = vld [vmem:[#allocation5 + $0x68] sm:$0xff]  }
  0x99   : > { %2356 = vmatpush1.bf16.msra.mxu1 %v9211_v10  ;;  %v1284_v10 = vrot.slane %v9979_v36, 1  ;;  %v507_v44 = vshll.u32 %v9989_v1, 16  ;;  %v10027_v31 = vsel %vm9730_vm2, %v498_v29, %v651_v13  ;;  %v821_v33 = vshll.u32 %v9809_v32, 16 }
  0x9a   : > { %1652 = vmatmul.mubr.bf16.vlgmr.msra.gmra.mxu0 %v9746_v42  ;;  %2357 = vmatprep.subr.bf16.mxu1 %v14951_v0  ;;  %v807_v0 = vshrl.u32 %v9796_v23, 16  ;;  %v10044_v29 = vsel %vm1250_vm3, %v1287_v34, %v1288_v46  ;;  %v515_v13 = vshll.u32 %v10011_v7, 16  ;;  %v10057_v46 = vsel %vm9730_vm2, %v361_v58, %v505_v12 }
  0x9b   : > { %1659 = vmatprep.mubr.bf16.mxu0 %v9968_v60  ;;  %8707 = vmatpush3.bf16.msra.mxu0 %v9212_v43  ;;  %v9214_v43 = vld [vmem:[#allocation5 + $0x70] sm:$0xff]   ;;  %15314 = vst [vmem:[#allocation40_spill] sm:$0xff] %v10044_v29  ;;  %15315 = vst [vmem:[#allocation41_spill] sm:$0xff] %v10057_v46  ;;  %v509_v34 = vor.u32 %v507_v44, %v506_v39  ;;  %v823_v12 = vrot.slane %v821_v33, 1 }
  0x9c   : > { %8659 = vmatmul.mubr.bf16.gmra.mxu1 %v9963_v15  ;;  %8708 = vmatprep.subr.bf16.mxu0 %v9217_v35  ;;  %v652_v15 = vrot.slane %v503_v63, 7  ;;  %v655_v57 = vrot.slane %v515_v13, 7 }
  0x9d   : > { %8662 = vmatprep.mubr.bf16.mxu1 %v9985_v56  ;;  %2358 = vmatpush2.bf16.msra.mxu1 %v9213_v30  ;;  %v10019_v56 = vsel %vm769_vm4, %v800_v38, %v804_v48  ;;  %v10023_v30 = vsel %vm1250_vm3, %v1284_v10, %v1285_v4  ;;  %v370_v38 = vshrl.u32 %v10011_v7, 16  ;;  %v15312_v48 = vshrl.u32 %v9938_v47, 16  ;;  %v258_v10 = vld [vmem:[%s9709_s6 + $0x120] sm:$0xff] }
  0x9e   : > { %2359 = vmatprep.subr.bf16.mxu1 %v15308_v20  ;;  %15309 = vst [vmem:[#allocation37_spill] sm:$0xff] %v10019_v56  ;;  %15310 = vst [vmem:[#allocation38_spill] sm:$0xff] %v10023_v30  ;;  %v10039_v4 = vpack.c.bf16 %v257_v19, %v256_v25  ;;  %v10048_v18 = vsel %vm9730_vm2, %v502_v11, %v652_v15  ;;  %v9222_v25 = vld [vmem:[#allocation5 + $0xa8] sm:$0xff]   ;;  %v653_v19 = vrot.slane %v507_v44, 7  ;;  %v9216_v11 = vld [vmem:[#allocation5 + $0x60] sm:$0xff]  }
  0x9f   : > { %8709 = vmatpush3.bf16.msra.mxu0 %v9217_v35  ;;  %v10036_v63 = vsel %vm9730_vm2, %v15312_v48, %v501_v45  ;;  %v816_v35 = vrot.slane %v814_v16, 1  ;;  %v514_v47 = vrot.slane %v370_v38, 7  ;;  %v259_v45 = vld [vmem:[%s9709_s6 + $0x128] sm:$0xff]  ;;  %v1291_v16 = vrot.slane %v10027_v31, 1  ;;  %v9225_v15 = vld [vmem:[#allocation5 + $0xa0] sm:$0xff]  }
  0xa0   : > { %15313 = vst [vmem:[#allocation39_spill] sm:$0xff] %v10036_v63  ;;  %v1290_v7 = vrot.slane %v10036_v63, 1  ;;  %v819_v48 = vshrl.u32 %v9809_v32, 16  ;;  %8710 = vmatprep.subr.bf16.mxu0 %v9222_v25  ;;  %v1294_v58 = vrot.slane %v10048_v18, 1  ;;  %v15316_v44 = vshrl.u32 %v10039_v4, 16 }
  0xa1   : > { %2360 = vmatpush2.bf16.msra.mxu1 %v9214_v43  ;;  %v812_v43 = vor.u32 %v811_v28, %v807_v0  ;;  %v517_v22 = vor.u32 %v515_v13, %v514_v47  ;;  %v10069_v0 = vpack.c.bf16 %v259_v45, %v258_v10  ;;  %v10074_v28 = vsel %vm9730_vm2, %v506_v39, %v653_v19 }
  0xa2   : > { %1660 = vmatmul.mubr.bf16.gmra.mxu0 %v9760_v53  ;;  %2361 = vmatprep.subr.bf16.mxu1 %v15308_v20  ;;  %v510_v33 = vrot.slane %v15316_v44, 7  ;;  %v511_v27 = vshll.u32 %v10039_v4, 16  ;;  %v15319_v13 = vshrl.u32 %v9989_v1, 16  ;;  %v824_v19 = vor.u32 %v823_v12, %v819_v48 }
  0xa3   : > { %1667 = vmatprep.mubr.bf16.mxu0 %v10019_v56  ;;  %8711 = vmatpush3.bf16.msra.mxu0 %v9222_v25  ;;  %v10083_v10 = vsel %vm769_vm4, %v812_v43, %v816_v35  ;;  %v373_v45 = vshrl.u32 %v10069_v0, 16  ;;  %v9218_v25 = vld [vmem:[#allocation5 + $0x58] sm:$0xff]   ;;  %v828_v44 = vrot.slane %v826_v51, 1  ;;  %v1297_v1 = vrot.slane %v10074_v28, 1 }
  0xa4   : > { %8663 = vmatmul.mubr.bf16.gmra.mxu1 %v10023_v30  ;;  %v1293_v30 = vrot.slane %v10057_v46, 1  ;;  %8712 = vmatprep.subr.bf16.mxu0 %v9225_v15  ;;  %15318 = vst [vmem:[#allocation43_spill] sm:$0xff] %v10083_v10  ;;  %v10089_v39 = vsel %vm9730_vm2, %v15319_v13, %v509_v34  ;;  %v10106_v51 = vsel %vm9730_vm2, %v514_v47, %v655_v57  ;;  %v9219_v34 = vld [vmem:[#allocation5 + $0x50] sm:$0xff]   ;;  %v838_v57 = vshll.u32 %v9827_v52, 16  ;;  %v265_v47 = vld [vmem:[%s9709_s6 + $0x158] sm:$0xff] }
  0xa5   : > { %8666 = vmatprep.mubr.bf16.mxu1 %v10044_v29  ;;  %2362 = vmatpush2.bf16.msra.mxu1 %v9215_v3  ;;  %v10080_v3 = vsel %vm1250_vm3, %v1290_v7, %v1291_v16  ;;  %15320 = vst [vmem:[#allocation44_spill] sm:$0xff] %v10089_v39  ;;  %v519_v29 = vshll.u32 %v10069_v0, 16  ;;  %v10102_v16 = vsel %vm9730_vm2, %v370_v38, %v517_v22  ;;  %v654_v7 = vrot.slane %v511_v27, 7  ;;  %v264_v38 = vld [vmem:[%s9709_s6 + $0x150] sm:$0xff] }
  0xa6   : > { %2363 = vmatprep.subr.bf16.mxu1 %v15308_v20  ;;  %15317 = vst [vmem:[#allocation42_spill] sm:$0xff] %v10080_v3  ;;  %v10097_v35 = vsel %vm1250_vm3, %v1293_v30, %v1294_v58  ;;  %v1296_v30 = vrot.slane %v10089_v39, 1  ;;  %v518_v43 = vrot.slane %v373_v45, 7  ;;  %v833_v22 = vshll.u32 %v9837_v61, 16 }
  0xa7   : > { %15321 = vst [vmem:[#allocation45_spill] sm:$0xff] %v10097_v35  ;;  %8713 = vmatpush3.bf16.msra.mxu0 %v9225_v15  ;;  %v1302_v48 = vrot.slane %v10102_v16, 1  ;;  %v1303_v58 = vrot.slane %v10106_v51, 1  ;;  %v656_v12 = vrot.slane %v519_v29, 7  ;;  %v376_v0 = vshrl.u32 %v10093_v5, 16 }
  0xa8   : > { %v10123_v15 = vsel %vm769_vm4, %v824_v19, %v828_v44  ;;  %v15323_v52 = vshrl.u32 %v10039_v4, 16  ;;  %v267_v19 = vld [vmem:[%s9709_s6 + $0x168] sm:$0xff]  ;;  %v10144_v56 = vsel %vm1250_vm3, %v1296_v30, %v1297_v1 }
  0xa9   : > { %2364 = vmatpush2.bf16.msra.mxu1 %v9216_v11  ;;  %v513_v11 = vor.u32 %v511_v27, %v510_v33  ;;  %15322 = vst [vmem:[#allocation46_spill] sm:$0xff] %v10123_v15  ;;  %v10125_v27 = vpack.c.bf16 %v263_v37, %v262_v59  ;;  %v9220_v44 = vld [vmem:[#allocation5 + $0x48] sm:$0xff]   ;;  %v831_v59 = vshrl.u32 %v9837_v61, 16  ;;  %v835_v37 = vrot.slane %v833_v22, 1  ;;  %15325 = vst [vmem:[#allocation48_spill] sm:$0xff] %v10144_v56 }
  0xaa   : > { %1668 = vmatmul.mubr.bf16.gmra.mxu0 %v9779_v6  ;;  %2365 = vmatprep.subr.bf16.mxu1 %v15308_v20  ;;  %v840_v6 = vrot.slane %v838_v57, 1  ;;  %v10157_v22 = vsel %vm9730_vm2, %v518_v43, %v656_v12 }
  0xab   : > { %1675 = vmatprep.mubr.bf16.mxu0 %v10083_v10  ;;  %v10132_v13 = vsel %vm9730_vm2, %v15323_v52, %v513_v11  ;;  %v266_v10 = vld [vmem:[%s9709_s6 + $0x160] sm:$0xff]  ;;  %v379_v4 = vshrl.u32 %v10125_v27, 16  ;;  %v522_v11 = vrot.slane %v376_v0, 7  ;;  %v845_v52 = vshll.u32 %v9849_v9, 16  ;;  %15327 = vst [vmem:[#allocation50_spill] sm:$0xff] %v10157_v22 }
  0xac   : > { %8667 = vmatmul.mubr.bf16.gmra.mxu1 %v10080_v3  ;;  %15324 = vst [vmem:[#allocation47_spill] sm:$0xff] %v10132_v13  ;;  %v521_v3 = vor.u32 %v519_v29, %v518_v43  ;;  %v1299_v29 = vrot.slane %v10132_v13, 1  ;;  %v527_v57 = vshll.u32 %v10125_v27, 16  ;;  %v843_v43 = vshrl.u32 %v9849_v9, 16  ;;  %v269_v27 = vld [vmem:[%s9709_s6 + $0x178] sm:$0xff] }
  0xad   : > { %8670 = vmatprep.mubr.bf16.mxu1 %v10097_v35  ;;  %2366 = vmatpush2.bf16.msra.mxu1 %v9218_v25  ;;  %v10136_v35 = vsel %vm9730_vm2, %v510_v33, %v654_v7  ;;  %v523_v25 = vshll.u32 %v10093_v5, 16  ;;  %v10147_v33 = vpack.c.bf16 %v265_v47, %v264_v38  ;;  %v10151_v5 = vsel %vm1250_vm3, %v1302_v48, %v1303_v58  ;;  %v9228_v48 = vld [vmem:[#allocation5 + $0x98] sm:$0xff]  }
  0xae   : > { %2367 = vmatprep.subr.bf16.mxu1 %v15308_v20  ;;  %15326 = vst [vmem:[#allocation49_spill] sm:$0xff] %v10151_v5  ;;  %v1300_v7 = vrot.slane %v10136_v35, 1  ;;  %v10163_v1 = vsel %vm9730_vm2, %v373_v45, %v521_v3  ;;  %v836_v38 = vor.u32 %v835_v37, %v831_v59  ;;  %v10168_v47 = vpack.c.bf16 %v267_v19, %v266_v10  ;;  %v268_v45 = vld [vmem:[%s9709_s6 + $0x170] sm:$0xff] }
  0xaf   : > { %15328 = vst [vmem:[#allocation51_spill] sm:$0xff] %v10163_v1  ;;  %v657_v30 = vrot.slane %v523_v25, 7  ;;  %v1306_v58 = vrot.slane %v10157_v22, 1  ;;  %v525_v12 = vor.u32 %v523_v25, %v522_v11  ;;  %v382_v3 = vshrl.u32 %v10147_v33, 16  ;;  %8714 = vmatprep.subr.bf16.mxu0 %v9228_v48 }
  0xb0   : > { %v1305_v59 = vrot.slane %v10163_v1, 1  ;;  %v850_v10 = vshll.u32 %v9844_v2, 16  ;;  %v658_v37 = vrot.slane %v527_v57, 7  ;;  %8715 = vmatpush3.bf16.msra.mxu0 %v9228_v48  ;;  %v271_v2 = vld [vmem:[%s9709_s6 + $0x188] sm:$0xff] }
  0xb1   : > { %2368 = vmatpush2.bf16.msra.mxu1 %v9219_v34  ;;  %v526_v34 = vrot.slane %v379_v4, 7  ;;  %v10180_v19 = vsel %vm9730_vm2, %v522_v11, %v657_v30  ;;  %v10193_v22 = vsel %vm9730_vm2, %v376_v0, %v525_v12  ;;  %v530_v11 = vrot.slane %v382_v3, 7  ;;  %v272_v12 = vld [vmem:[%s9709_s6 + $0x190] sm:$0xff] }
  0xb2   : > { %1676 = vmatmul.mubr.bf16.gmra.mxu0 %v9796_v23  ;;  %2369 = vmatprep.subr.bf16.mxu1 %v15308_v20  ;;  %v270_v23 = vld [vmem:[%s9709_s6 + $0x180] sm:$0xff]  ;;  %15331 = vst [vmem:[#allocation54_spill] sm:$0xff] %v10193_v22  ;;  %v531_v30 = vshll.u32 %v10147_v33, 16  ;;  %v535_v33 = vshll.u32 %v10168_v47, 16 }
  0xb3   : > { %1683 = vmatprep.mubr.bf16.mxu0 %v10123_v15  ;;  %v847_v15 = vrot.slane %v845_v52, 1  ;;  %v529_v25 = vor.u32 %v527_v57, %v526_v34  ;;  %v385_v52 = vshrl.u32 %v10168_v47, 16  ;;  %v10198_v57 = vsel %vm1250_vm3, %v1305_v59, %v1306_v58 }
  0xb4   : > { %8671 = vmatmul.mubr.bf16.gmra.mxu1 %v10144_v56  ;;  %v9221_v56 = vld [vmem:[#allocation5 + $0x40] sm:$0xff]   ;;  %15332 = vst [vmem:[#allocation55_spill] sm:$0xff] %v10198_v57  ;;  %v10217_v48 = vpack.c.bf16 %v271_v2, %v270_v23  ;;  %v533_v58 = vor.u32 %v531_v30, %v530_v11  ;;  %v660_v23 = vrot.slane %v535_v33, 7  ;;  %v855_v2 = vshrl.u32 %v9880_v40, 16 }
  0xb5   : > { %8674 = vmatprep.mubr.bf16.mxu1 %v10151_v5  ;;  %2370 = vmatpush2.bf16.msra.mxu1 %v9220_v44  ;;  %v10184_v5 = vsel %vm1250_vm3, %v1299_v29, %v1300_v7  ;;  %v10187_v44 = vsel %vm769_vm4, %v836_v38, %v840_v6  ;;  %v848_v1 = vor.u32 %v847_v15, %v843_v43  ;;  %v1309_v29 = vrot.slane %v10180_v19, 1 }
  0xb6   : > { %2371 = vmatprep.subr.bf16.mxu1 %v15308_v20  ;;  %15329 = vst [vmem:[#allocation52_spill] sm:$0xff] %v10184_v5  ;;  %15330 = vst [vmem:[#allocation53_spill] sm:$0xff] %v10187_v44  ;;  %v852_v6 = vrot.slane %v850_v10, 1  ;;  %v10201_v7 = vpack.c.bf16 %v269_v27, %v268_v45  ;;  %v10207_v0 = vsel %vm9730_vm2, %v379_v4, %v529_v25  ;;  %v534_v15 = vrot.slane %v385_v52, 7  ;;  %v273_v27 = vld [vmem:[%s9709_s6 + $0x198] sm:$0xff] }
  0xb7   : > { %15333 = vst [vmem:[#allocation56_spill] sm:$0xff] %v10207_v0  ;;  %v1308_v38 = vrot.slane %v10193_v22, 1  ;;  %v857_v43 = vshll.u32 %v9880_v40, 16  ;;  %v659_v4 = vrot.slane %v531_v30, 7  ;;  %v1311_v45 = vrot.slane %v10207_v0, 1 }
  0xb8   : > { %v388_v47 = vshrl.u32 %v10201_v7, 16  ;;  %v10226_v59 = vsel %vm769_vm4, %v848_v1, %v852_v6  ;;  %v537_v10 = vor.u32 %v535_v33, %v534_v15  ;;  %v391_v25 = vshrl.u32 %v10217_v48, 16 }
  0xb9   : > { %2372 = vmatpush2.bf16.msra.mxu1 %v9221_v56  ;;  %v10211_v56 = vsel %vm9730_vm2, %v526_v34, %v658_v37  ;;  %15335 = vst [vmem:[#allocation58_spill] sm:$0xff] %v10226_v59  ;;  %v10230_v37 = vsel %vm1250_vm3, %v1308_v38, %v1309_v29  ;;  %v859_v30 = vrot.slane %v857_v43, 1  ;;  %v10240_v1 = vsel %vm9730_vm2, %v530_v11, %v659_v4  ;;  %v275_v29 = vld [vmem:[%s9709_s6 + $0x1a8] sm:$0xff] }
  0xba   : > { %1684 = vmatmul.mubr.bf16.gmra.mxu0 %v9809_v32  ;;  %3111 = vmatprep.subr.bf16.mxu1 %v15308_v20  ;;  %15334 = vst [vmem:[#allocation57_spill] sm:$0xff] %v10211_v56  ;;  %v1312_v34 = vrot.slane %v10211_v56, 1  ;;  %15336 = vst [vmem:[#allocation59_spill] sm:$0xff] %v10230_v37  ;;  %v539_v6 = vshll.u32 %v10201_v7, 16  ;;  %v10243_v33 = vpack.c.bf16 %v273_v27, %v272_v12  ;;  %v274_v56 = vld [vmem:[%s9709_s6 + $0x1a0] sm:$0xff]  ;;  %v538_v38 = vrot.slane %v388_v47, 7 }
  0xbb   : > { %1691 = vmatprep.mubr.bf16.mxu0 %v10187_v44  ;;  %15338 = vst [vmem:[#allocation61_spill] sm:$0xff] %v10240_v1  ;;  %v10255_v11 = vsel %vm9730_vm2, %v385_v52, %v537_v10  ;;  %v10259_v7 = vsel %vm9730_vm2, %v534_v15, %v660_v23  ;;  %v869_v43 = vshll.u32 %v9892_v49, 16  ;;  %v860_v12 = vor.u32 %v859_v30, %v855_v2  ;;  %v277_v52 = vld [vmem:[%s9709_s6 + $0x1b8] sm:$0xff]  ;;  %v279_v44 = vld [vmem:[%s9709_s6 + $0x1c8] sm:$0xff] }
  0xbc   : > { %8675 = vmatmul.mubr.bf16.gmra.mxu1 %v10184_v5  ;;  %v10236_v5 = vsel %vm9730_vm2, %v382_v3, %v533_v58  ;;  %v543_v3 = vshll.u32 %v10217_v48, 16  ;;  %15340 = vst [vmem:[#allocation63_spill] sm:$0xff] %v10255_v11  ;;  %15341 = vst [vmem:[#allocation64_spill] sm:$0xff] %v10259_v7  ;;  %v542_v58 = vrot.slane %v391_v25, 7  ;;  %v1315_v48 = vrot.slane %v10240_v1, 1 }
  0xbd   : > { %8678 = vmatprep.mubr.bf16.mxu1 %v10198_v57  ;;  %v862_v57 = vshll.u32 %v9884_v41, 16  ;;  %15337 = vst [vmem:[#allocation60_spill] sm:$0xff] %v10236_v5  ;;  %v10249_v41 = vsel %vm1250_vm3, %v1311_v45, %v1312_v34  ;;  %v1314_v4 = vrot.slane %v10236_v5, 1  ;;  %v276_v34 = vld [vmem:[%s9709_s6 + $0x1b0] sm:$0xff]  ;;  %v661_v27 = vrot.slane %v539_v6, 7 }
  0xbe   : > { %15339 = vst [vmem:[#allocation62_spill] sm:$0xff] %v10249_v41  ;;  %v394_v15 = vshrl.u32 %v10243_v33, 16  ;;  %v10269_v10 = vpack.c.bf16 %v275_v29, %v274_v56  ;;  %v1317_v23 = vrot.slane %v10255_v11, 1  ;;  %v662_v5 = vrot.slane %v543_v3, 7 }
  0xbf   : > { %v864_v45 = vrot.slane %v862_v57, 1  ;;  %v867_v2 = vshrl.u32 %v9892_v49, 16  ;;  %v871_v57 = vrot.slane %v869_v43, 1  ;;  %v545_v30 = vor.u32 %v543_v3, %v542_v58 }
  0xc0   : > { %v397_v1 = vshrl.u32 %v10269_v10, 16  ;;  %v874_v56 = vshll.u32 %v9896_v50, 16  ;;  %v547_v29 = vshll.u32 %v10243_v33, 16  ;;  %v10283_v11 = vsel %vm1250_vm3, %v1314_v4, %v1315_v48 }
  0xc1   : > { %15343 = vst [vmem:[#allocation66_spill] sm:$0xff] %v10283_v11  ;;  %v10289_v43 = vpack.c.bf16 %v277_v52, %v276_v34  ;;  %v10301_v33 = vsel %vm9730_vm2, %v542_v58, %v662_v5  ;;  %v10307_v4 = vsel %vm9730_vm2, %v391_v25, %v545_v30  ;;  %v280_v52 = vld [vmem:[%s9709_s6 + $0x1d0] sm:$0xff]  ;;  %v886_v30 = vshll.u32 %v9924_v24, 16 }
  0xc2   : > { %1692 = vmatmul.mubr.bf16.gmra.mxu0 %v9837_v61  ;;  %v278_v61 = vld [vmem:[%s9709_s6 + $0x1c0] sm:$0xff]  ;;  %15347 = vst [vmem:[#allocation70_spill] sm:$0xff] %v10301_v33  ;;  %15348 = vst [vmem:[#allocation71_spill] sm:$0xff] %v10307_v4  ;;  %v550_v48 = vrot.slane %v397_v1, 7  ;;  %v663_v58 = vrot.slane %v547_v29, 7 }
  0xc3   : > { %1699 = vmatprep.mubr.bf16.mxu0 %v10226_v59  ;;  %v541_v59 = vor.u32 %v539_v6, %v538_v38  ;;  %v10287_v6 = vsel %vm9730_vm2, %v538_v38, %v661_v27  ;;  %v551_v38 = vshll.u32 %v10269_v10, 16  ;;  %v400_v34 = vshrl.u32 %v10289_v43, 16  ;;  %v281_v27 = vld [vmem:[%s9709_s6 + $0x1d8] sm:$0xff] }
  0xc4   : > { %8679 = vmatmul.mubr.bf16.gmra.mxu1 %v10230_v37  ;;  %v1318_v37 = vrot.slane %v10259_v7, 1  ;;  %15344 = vst [vmem:[#allocation67_spill] sm:$0xff] %v10287_v6  ;;  %v546_v7 = vrot.slane %v394_v15, 7  ;;  %v1321_v5 = vrot.slane %v10287_v6, 1  ;;  %v879_v10 = vshrl.u32 %v9916_v14, 16 }
  0xc5   : > { %8682 = vmatprep.mubr.bf16.mxu1 %v10249_v41  ;;  %v10278_v41 = vsel %vm769_vm4, %v860_v12, %v864_v45  ;;  %v10297_v50 = vsel %vm9730_vm2, %v388_v47, %v541_v59  ;;  %v10310_v12 = vpack.c.bf16 %v279_v44, %v278_v61  ;;  %v872_v47 = vor.u32 %v871_v57, %v867_v2  ;;  %v282_v2 = vld [vmem:[%s9709_s6 + $0x1e0] sm:$0xff] }
  0xc6   : > { %15342 = vst [vmem:[#allocation65_spill] sm:$0xff] %v10278_v41  ;;  %v10293_v3 = vsel %vm1250_vm3, %v1317_v23, %v1318_v37  ;;  %15346 = vst [vmem:[#allocation69_spill] sm:$0xff] %v10297_v50  ;;  %v881_v37 = vshll.u32 %v9916_v14, 16  ;;  %v876_v59 = vrot.slane %v874_v56, 1  ;;  %v1320_v45 = vrot.slane %v10297_v50, 1 }
  0xc7   : > { %15345 = vst [vmem:[#allocation68_spill] sm:$0xff] %v10293_v3  ;;  %v549_v25 = vor.u32 %v547_v29, %v546_v7  ;;  %v1323_v61 = vrot.slane %v10307_v4, 1  ;;  %v1324_v44 = vrot.slane %v10301_v33, 1  ;;  %v664_v23 = vrot.slane %v551_v38, 7 }
  0xc8   : > { %v883_v57 = vrot.slane %v881_v37, 1  ;;  %v553_v56 = vor.u32 %v551_v38, %v550_v48  ;;  %v10327_v29 = vsel %vm769_vm4, %v872_v47, %v876_v59  ;;  %v10331_v6 = vsel %vm9730_vm2, %v546_v7, %v663_v58 }
  0xc9   : > { %15349 = vst [vmem:[#allocation72_spill] sm:$0xff] %v10327_v29  ;;  %15350 = vst [vmem:[#allocation73_spill] sm:$0xff] %v10331_v6  ;;  %v10334_v33 = vsel %vm1250_vm3, %v1320_v45, %v1321_v5  ;;  %v10338_v4 = vsel %vm9730_vm2, %v394_v15, %v549_v25  ;;  %v554_v37 = vrot.slane %v400_v34, 7  ;;  %v555_v24 = vshll.u32 %v10289_v43, 16 }
  0xca   : > { %1700 = vmatmul.mubr.bf16.gmra.mxu0 %v9849_v9  ;;  %15351 = vst [vmem:[#allocation74_spill] sm:$0xff] %v10334_v33  ;;  %15352 = vst [vmem:[#allocation75_spill] sm:$0xff] %v10338_v4  ;;  %v10343_v38 = vsel %vm1250_vm3, %v1323_v61, %v1324_v44  ;;  %v10347_v47 = vsel %vm9730_vm2, %v550_v48, %v664_v23  ;;  %v559_v7 = vshll.u32 %v10310_v12, 16  ;;  %v1327_v15 = vrot.slane %v10331_v6, 1  ;;  %v9231_v23 = vld [vmem:[#allocation5 + $0x90] sm:$0xff]  }
  0xcb   : > { %1707 = vmatprep.mubr.bf16.mxu0 %v10278_v41  ;;  %15353 = vst [vmem:[#allocation76_spill] sm:$0xff] %v10343_v38  ;;  %15354 = vst [vmem:[#allocation77_spill] sm:$0xff] %v10347_v47  ;;  %v10350_v5 = vpack.c.bf16 %v281_v27, %v280_v52  ;;  %v10356_v43 = vsel %vm9730_vm2, %v397_v1, %v553_v56  ;;  %v1326_v48 = vrot.slane %v10338_v4, 1  ;;  %v888_v45 = vrot.slane %v886_v30, 1  ;;  %v285_v30 = vld [vmem:[%s9709_s6 + $0x1f8] sm:$0xff] }
  0xcc   : > { %8683 = vmatmul.mubr.bf16.gmra.mxu1 %v10283_v11  ;;  %v283_v11 = vld [vmem:[%s9709_s6 + $0x1e8] sm:$0xff]  ;;  %15355 = vst [vmem:[#allocation78_spill] sm:$0xff] %v10356_v43  ;;  %v893_v25 = vshll.u32 %v9944_v54, 16  ;;  %v1330_v52 = vrot.slane %v10347_v47, 1  ;;  %v557_v27 = vor.u32 %v555_v24, %v554_v37  ;;  %v665_v1 = vrot.slane %v555_v24, 7  ;;  %8716 = vmatprep.subr.bf16.mxu0 %v9231_v23 }
  0xcd   : > { %8686 = vmatprep.mubr.bf16.mxu1 %v10293_v3  ;;  %v403_v3 = vshrl.u32 %v10310_v12, 16  ;;  %v10358_v58 = vpack.c.bf16 %v283_v11, %v282_v2  ;;  %v884_v12 = vor.u32 %v883_v57, %v879_v10  ;;  %v1329_v61 = vrot.slane %v10356_v43, 1  ;;  %v284_v57 = vld [vmem:[%s9709_s6 + $0x1f0] sm:$0xff]  ;;  %8717 = vmatpush3.bf16.msra.mxu0 %v9231_v23 }
  0xce   : > { %v666_v11 = vrot.slane %v559_v7, 7  ;;  %v406_v44 = vshrl.u32 %v10350_v5, 16  ;;  %v891_v2 = vshrl.u32 %v9944_v54, 16  ;;  %v898_v47 = vshll.u32 %v9948_v55, 16 }
  0xcf   : > { %v558_v59 = vrot.slane %v403_v3, 7  ;;  %v409_v10 = vshrl.u32 %v10358_v58, 16  ;;  %v10376_v24 = vsel %vm1250_vm3, %v1326_v48, %v1327_v15  ;;  %v10380_v43 = vsel %vm9730_vm2, %v400_v34, %v557_v27 }
  0xd0   : > { %15357 = vst [vmem:[#allocation80_spill] sm:$0xff] %v10376_v24  ;;  %15358 = vst [vmem:[#allocation81_spill] sm:$0xff] %v10380_v43  ;;  %v563_v6 = vshll.u32 %v10350_v5, 16  ;;  %v562_v15 = vrot.slane %v406_v44, 7  ;;  %v317_v48 = vpack.c.bf16 %v285_v30, %v284_v57  ;;  %v567_v5 = vshll.u32 %v10358_v58, 16 }
  0xd1   : > { %v561_v56 = vor.u32 %v559_v7, %v558_v59  ;;  %v10384_v7 = vsel %vm9730_vm2, %v554_v37, %v665_v1  ;;  %v10393_v55 = vsel %vm9730_vm2, %v558_v59, %v666_v11  ;;  %v566_v37 = vrot.slane %v409_v10, 7 }
  0xd2   : > { %1708 = vmatmul.mubr.bf16.gmra.mxu0 %v9880_v40  ;;  %v905_v59 = vshll.u32 %v9979_v36, 16  ;;  %v1332_v27 = vrot.slane %v10380_v43, 1  ;;  %v1336_v1 = vrot.slane %v10393_v55, 1  ;;  %v667_v11 = vrot.slane %v563_v6, 7 }
  0xd3   : > { %1715 = vmatprep.mubr.bf16.mxu0 %v10327_v29  ;;  %v10398_v34 = vsel %vm9730_vm2, %v403_v3, %v561_v56  ;;  %v412_v23 = vshrl.u32 %v317_v48, 16  ;;  %v569_v58 = vor.u32 %v567_v5, %v566_v37  ;;  %v668_v56 = vrot.slane %v567_v5, 7 }
  0xd4   : > { %8687 = vmatmul.mubr.bf16.gmra.mxu1 %v10334_v33  ;;  %v10372_v33 = vsel %vm769_vm4, %v884_v12, %v888_v45  ;;  %v10389_v12 = vsel %vm1250_vm3, %v1329_v61, %v1330_v52  ;;  %15360 = vst [vmem:[#allocation83_spill] sm:$0xff] %v10398_v34  ;;  %v1333_v45 = vrot.slane %v10384_v7, 1  ;;  %v900_v52 = vrot.slane %v898_v47, 1 }
  0xd5   : > { %8690 = vmatprep.mubr.bf16.mxu1 %v10343_v38  ;;  %15356 = vst [vmem:[#allocation79_spill] sm:$0xff] %v10372_v33  ;;  %v895_v38 = vrot.slane %v893_v25, 1  ;;  %15359 = vst [vmem:[#allocation82_spill] sm:$0xff] %v10389_v12  ;;  %v1335_v3 = vrot.slane %v10398_v34, 1  ;;  %v565_v61 = vor.u32 %v563_v6, %v562_v15  ;;  %v907_v47 = vrot.slane %v905_v59, 1 }
  0xd6   : > { %v10414_v30 = vsel %vm1250_vm3, %v1332_v27, %v1333_v45  ;;  %v10426_v5 = vsel %vm9730_vm2, %v562_v15, %v667_v11 }
  0xd7   : > { %v896_v25 = vor.u32 %v895_v38, %v891_v2  ;;  %v903_v38 = vshrl.u32 %v9979_v36, 16  ;;  %v910_v2 = vshll.u32 %v9972_v26, 16  ;;  %15362 = vst [vmem:[#allocation85_spill] sm:$0xff] %v10414_v30  ;;  %v10422_v6 = vsel %vm9730_vm2, %v406_v44, %v565_v61 }
  0xd8   : > { %15364 = vst [vmem:[#allocation87_spill] sm:$0xff] %v10422_v6  ;;  %v10431_v26 = vsel %vm9730_vm2, %v409_v10, %v569_v58  ;;  %v1338_v15 = vrot.slane %v10422_v6, 1  ;;  %v1339_v59 = vrot.slane %v10426_v5, 1  ;;  %v915_v61 = vshrl.u32 %v9998_v62, 16 }
  0xd9   : > { %v10409_v57 = vsel %vm769_vm4, %v896_v25, %v900_v52  ;;  %v570_v25 = vrot.slane %v412_v23, 7  ;;  %15365 = vst [vmem:[#allocation88_spill] sm:$0xff] %v10431_v26  ;;  %v908_v45 = vor.u32 %v907_v47, %v903_v38  ;;  %v912_v44 = vrot.slane %v910_v2, 1 }
  0xda   : > { %1716 = vmatmul.mubr.bf16.gmra.mxu0 %v9892_v49  ;;  %15361 = vst [vmem:[#allocation84_spill] sm:$0xff] %v10409_v57  ;;  %v917_v52 = vshll.u32 %v9998_v62, 16  ;;  %v1341_v10 = vrot.slane %v10431_v26, 1  ;;  %v922_v58 = vshll.u32 %v10002_v8, 16 }
  0xdb   : > { %1723 = vmatprep.mubr.bf16.mxu0 %v10372_v33 }
  0xdc   : > { %8691 = vmatmul.mubr.bf16.gmra.mxu1 %v10376_v24  ;;  %v10418_v24 = vsel %vm1250_vm3, %v1335_v3, %v1336_v1  ;;  %v919_v11 = vrot.slane %v917_v52, 1  ;;  %v924_v2 = vrot.slane %v922_v58, 1  ;;  %v939_v58 = vshrl.u32 %v10057_v46, 16 }
  0xdd   : > { %8694 = vmatprep.mubr.bf16.mxu1 %v10389_v12  ;;  %v571_v12 = vshll.u32 %v317_v48, 16  ;;  %15363 = vst [vmem:[#allocation86_spill] sm:$0xff] %v10418_v24  ;;  %v10435_v48 = vsel %vm9730_vm2, %v566_v37, %v668_v56  ;;  %v10445_v37 = vsel %vm769_vm4, %v908_v45, %v912_v44  ;;  %v10450_v56 = vsel %vm1250_vm3, %v1338_v15, %v1339_v59 }
  0xde   : > { %v1342_v1 = vrot.slane %v10435_v48, 1  ;;  %15366 = vst [vmem:[#allocation89_spill] sm:$0xff] %v10445_v37  ;;  %15367 = vst [vmem:[#allocation90_spill] sm:$0xff] %v10450_v56  ;;  %v920_v8 = vor.u32 %v919_v11, %v915_v61  ;;  %v929_v45 = vshll.u32 %v10036_v63, 16  ;;  %v934_v59 = vshll.u32 %v10027_v31, 16  ;;  %v9234_v61 = vld [vmem:[#allocation5 + $0x88] sm:$0xff]  }
  0xdf   : > { %v669_v27 = vrot.slane %v571_v12, 7  ;;  %v573_v3 = vor.u32 %v571_v12, %v570_v25  ;;  %v9223_v11 = vld [vmem:[#allocation5 + $0x1b8] sm:$0xff]   ;;  %8718 = vmatprep.subr.bf16.mxu0 %v9234_v61 }
  0xe0   : > { %v10454_v38 = vsel %vm1250_vm3, %v1341_v10, %v1342_v1  ;;  %v10472_v15 = vsel %vm769_vm4, %v920_v8, %v924_v2  ;;  %v936_v1 = vrot.slane %v934_v59, 1  ;;  %v946_v2 = vshll.u32 %v10048_v18, 16  ;;  %8719 = vmatpush3.bf16.msra.mxu0 %v9234_v61 }
  0xe1   : > { %15368 = vst [vmem:[#allocation91_spill] sm:$0xff] %v10454_v38  ;;  %v10458_v47 = vsel %vm9730_vm2, %v412_v23, %v573_v3  ;;  %v10462_v12 = vsel %vm9730_vm2, %v570_v25, %v669_v27  ;;  %v927_v23 = vshrl.u32 %v10036_v63, 16  ;;  %15370 = vst [vmem:[#allocation93_spill] sm:$0xff] %v10472_v15  ;;  %v931_v25 = vrot.slane %v929_v45, 1 }
  0xe2   : > { %1724 = vmatmul.mubr.bf16.gmra.mxu0 %v9916_v14  ;;  %15369 = vst [vmem:[#allocation92_spill] sm:$0xff] %v10458_v47  ;;  %v1344_v44 = vrot.slane %v10458_v47, 1  ;;  %v1345_v52 = vrot.slane %v10462_v12, 1  ;;  %v941_v3 = vshll.u32 %v10057_v46, 16  ;;  %v953_v45 = vshll.u32 %v10089_v39, 16 }
  0xe3   : > { %1731 = vmatprep.mubr.bf16.mxu0 %v10409_v57  ;;  %v932_v10 = vor.u32 %v931_v25, %v927_v23  ;;  %v9224_v23 = vld [vmem:[#allocation5 + $0x1b0] sm:$0xff]   ;;  %v951_v25 = vshrl.u32 %v10089_v39, 16  ;;  %v958_v59 = vshll.u32 %v10074_v28, 16  ;;  %v975_v28 = vshrl.u32 %v10102_v16, 16 }
  0xe4   : > { %8695 = vmatmul.mubr.bf16.gmra.mxu1 %v10414_v30  ;;  %v10476_v27 = vsel %vm1250_vm3, %v1344_v44, %v1345_v52  ;;  %v943_v8 = vrot.slane %v941_v3, 1  ;;  %v948_v52 = vrot.slane %v946_v2, 1  ;;  %v955_v18 = vrot.slane %v953_v45, 1  ;;  %v9229_v2 = vld [vmem:[#allocation5 + $0x198] sm:$0xff]  }
  0xe5   : > { %8698 = vmatprep.mubr.bf16.mxu1 %v10418_v24  ;;  %15371 = vst [vmem:[#allocation94_spill] sm:$0xff] %v10476_v27  ;;  %v10485_v31 = vsel %vm769_vm4, %v932_v10, %v936_v1  ;;  %v9226_v10 = vld [vmem:[#allocation5 + $0x1a8] sm:$0xff]   ;;  %v977_v3 = vshll.u32 %v10102_v16, 16 }
  0xe6   : > { %15372 = vst [vmem:[#allocation95_spill] sm:$0xff] %v10485_v31  ;;  %v944_v44 = vor.u32 %v943_v8, %v939_v58  ;;  %v956_v61 = vor.u32 %v955_v18, %v951_v25  ;;  %v982_v8 = vshll.u32 %v10106_v51, 16  ;;  %v15375_v51 = vld [vmem:[#allocation37_spill] sm:$0xff]  ;;  %v963_v25 = vshrl.u32 %v10132_v13, 16  ;;  %v15376_v18 = vld [vmem:[#allocation51_spill] sm:$0xff] }
  0xe7   : > { %v979_v58 = vrot.slane %v977_v3, 1 }
  0xe8   : > { %v10497_v1 = vsel %vm769_vm4, %v944_v44, %v948_v52  ;;  %v970_v44 = vshll.u32 %v10136_v35, 16  ;;  %v9233_v35 = vld [vmem:[#allocation5 + $0x180] sm:$0xff]  }
  0xe9   : > { %15373 = vst [vmem:[#allocation96_spill] sm:$0xff] %v10497_v1  ;;  %v980_v52 = vor.u32 %v979_v58, %v975_v28  ;;  %v15377_v28 = vld [vmem:[#allocation16_spill] sm:$0xff] }
  0xea   : > { %1732 = vmatmul.mubr.bf16.gmra.mxu0 %v9944_v54  ;;  %v972_v3 = vrot.slane %v970_v44, 1  ;;  %v987_v44 = vshrl.u32 %v15376_v18, 16 }
  0xeb   : > { %1739 = vmatprep.mubr.bf16.mxu0 %v10445_v37 }
  0xec   : > { %8699 = vmatmul.mubr.bf16.gmra.mxu1 %v10450_v56 }
  0xed   : > { %8702 = vmatprep.mubr.bf16.mxu1 %v10454_v38 }
  0xf2   : > { %1740 = vmatmul.mubr.bf16.gmra.mxu0 %v9979_v36 }
  0xf3   : > { %1747 = vmatprep.mubr.bf16.mxu0 %v10472_v15 }
  0xf4   : > { %8703 = vmatmul.mubr.bf16.gmra.mxu1 %v10476_v27  ;;  %v1006_v27 = vshll.u32 %v10180_v19, 16 }
  0xf5   : > { %2373 = vmatprep.mubr.bf16.mxu1 %v9968_v60 }
  0xfa   : > { %1748 = vmatmul.mubr.bf16.gmra.mxu0 %v9998_v62 }
  0xfb   : > { %1755 = vmatprep.mubr.bf16.mxu0 %v10485_v31 }
  0xfc   : > { %2374 = vmatmul.mubr.bf16.vlgmr.msra.gmra.mxu1 %v9760_v53 }
  0xfd   : > { %3112 = vmatpush1.bf16.msra.mxu1 %v9223_v11  ;;  %2381 = vmatprep.mubr.bf16.mxu1 %v9860_v17  ;;  %v960_v17 = vrot.slane %v958_v59, 1  ;;  %v9227_v11 = vld [vmem:[#allocation5 + $0x1a0] sm:$0xff]   ;;  %v989_v59 = vshll.u32 %v15376_v18, 16 }
  0xfe   : > { %3113 = vmatprep.subr.bf16.mxu1 %v15308_v20 }
  0xff   : > { %v10509_v45 = vsel %vm769_vm4, %v956_v61, %v960_v17  ;;  %v9232_v61 = vld [vmem:[#allocation5 + $0x188] sm:$0xff]  }
 0x100   : > { %15374 = vst [vmem:[#allocation97_spill] sm:$0xff] %v10509_v45 }
 0x101   : > { %3114 = vmatpush1.bf16.msra.mxu1 %v9224_v23  ;;  %v984_v23 = vrot.slane %v982_v8, 1  ;;  %v15378_v8 = vld [vmem:[#allocation43_spill] sm:$0xff] }
 0x102   : > { %1756 = vmatmul.mubr.bf16.gmra.mxu0 %v10036_v63  ;;  %3115 = vmatprep.subr.bf16.mxu1 %v15308_v20 }
 0x103   : > { %1763 = vmatprep.mubr.bf16.mxu0 %v10497_v1 }
 0x104   : > { %2382 = vmatmul.mubr.bf16.gmra.mxu1 %v9746_v42  ;;  %v965_v42 = vshll.u32 %v10132_v13, 16 }
 0x105   : > { %2389 = vmatprep.mubr.bf16.mxu1 %v9968_v60  ;;  %3116 = vmatpush1.bf16.msra.mxu1 %v9226_v10  ;;  %v9230_v10 = vld [vmem:[#allocation5 + $0x190] sm:$0xff]  }
 0x106   : > { %3117 = vmatprep.subr.bf16.mxu1 %v15308_v20  ;;  %v967_v17 = vrot.slane %v965_v42, 1 }
 0x108   : > { %v968_v58 = vor.u32 %v967_v17, %v963_v25  ;;  %v15381_v25 = vld [vmem:[#allocation18_spill] sm:$0xff] }
 0x109   : > { %3118 = vmatpush1.bf16.msra.mxu1 %v9227_v11  ;;  %v10522_v11 = vsel %vm769_vm4, %v980_v52, %v984_v23  ;;  %v991_v52 = vrot.slane %v989_v59, 1  ;;  %v15380_v23 = vld [vmem:[#allocation50_spill] sm:$0xff] }
 0x10a   : > { %1764 = vmatmul.mubr.bf16.gmra.mxu0 %v10057_v46  ;;  %3119 = vmatprep.subr.bf16.mxu1 %v15308_v20  ;;  %v10531_v42 = vsel %vm769_vm4, %v968_v58, %v972_v3  ;;  %v1001_v3 = vshll.u32 %v10193_v22, 16  ;;  %v15382_v58 = vld [vmem:[#allocation46_spill] sm:$0xff] }
 0x10b   : > { %1771 = vmatprep.mubr.bf16.mxu0 %v10509_v45  ;;  %15379 = vst [vmem:[#allocation98_spill] sm:$0xff] %v10531_v42  ;;  %v992_v17 = vor.u32 %v991_v52, %v987_v44  ;;  %v9236_v59 = vld [vmem:[#allocation5 + $0x1f0] sm:$0xff]   ;;  %v1008_v44 = vrot.slane %v1006_v27, 1  ;;  %v1013_v52 = vshll.u32 %v10207_v0, 16  ;;  %v15388_v45 = vld [vmem:[#allocation60_spill] sm:$0xff] }
 0x10c   : > { %2390 = vmatmul.mubr.bf16.gmra.mxu1 %v9760_v53  ;;  %v15387_v27 = vld [vmem:[#allocation22_spill] sm:$0xff]  ;;  %v15401_v53 = vld [vmem:[#allocation73_spill] sm:$0xff] }
 0x10d   : > { %2397 = vmatprep.mubr.bf16.mxu1 %v15375_v51  ;;  %3120 = vmatpush1.bf16.msra.mxu1 %v9229_v2  ;;  %v9237_v2 = vld [vmem:[#allocation5 + $0x80] sm:$0xff]  }
 0x10e   : > { %3121 = vmatprep.subr.bf16.mxu1 %v15308_v20  ;;  %8720 = vmatprep.subr.bf16.mxu0 %v9237_v2 }
 0x10f   : > { %8721 = vmatpush3.bf16.msra.mxu0 %v9237_v2  ;;  %v999_v2 = vshrl.u32 %v10193_v22, 16 }
 0x111   : > { %3122 = vmatpush1.bf16.msra.mxu1 %v9230_v10  ;;  %v994_v10 = vshll.u32 %v15380_v23, 16  ;;  %v1003_v23 = vrot.slane %v1001_v3, 1  ;;  %v15386_v3 = vld [vmem:[#allocation57_spill] sm:$0xff] }
 0x112   : > { %1772 = vmatmul.mubr.bf16.gmra.mxu0 %v10089_v39  ;;  %3123 = vmatprep.subr.bf16.mxu1 %v15308_v20  ;;  %v9238_v39 = vld [vmem:[#allocation5 + $0x1e8] sm:$0xff]  }
 0x113   : > { %1779 = vmatprep.mubr.bf16.mxu0 %v10522_v11 }
 0x114   : > { %2398 = vmatmul.mubr.bf16.gmra.mxu1 %v15377_v28 }
 0x115   : > { %2405 = vmatprep.mubr.bf16.mxu1 %v15378_v8  ;;  %3124 = vmatpush1.bf16.msra.mxu1 %v9232_v61  ;;  %v996_v61 = vrot.slane %v994_v10, 1  ;;  %v15384_v10 = vld [vmem:[#allocation53_spill] sm:$0xff]  ;;  %v15399_v8 = vld [vmem:[#allocation70_spill] sm:$0xff] }
 0x116   : > { %3125 = vmatprep.subr.bf16.mxu1 %v15308_v20  ;;  %v1066_v28 = vshll.u32 %v15399_v8, 16 }
 0x119   : > { %3126 = vmatpush1.bf16.msra.mxu1 %v9233_v35  ;;  %v10543_v35 = vsel %vm769_vm4, %v992_v17, %v996_v61  ;;  %v1011_v17 = vshrl.u32 %v10207_v0, 16  ;;  %v1015_v61 = vrot.slane %v1013_v52, 1 }
 0x11a   : > { %1780 = vmatmul.mubr.bf16.gmra.mxu0 %v10102_v16  ;;  %3127 = vmatprep.subr.bf16.mxu1 %v15308_v20  ;;  %15383 = vst [vmem:[#allocation50_spill] sm:$0xff] %v10543_v35 }
 0x11b   : > { %1787 = vmatprep.mubr.bf16.mxu0 %v10531_v42 }
 0x11c   : > { %2406 = vmatmul.mubr.bf16.gmra.mxu1 %v15381_v25  ;;  %v15396_v25 = vld [vmem:[#allocation67_spill] sm:$0xff] }
 0x11d   : > { %2413 = vmatprep.mubr.bf16.mxu1 %v15382_v58  ;;  %3128 = vmatpush2.bf16.msra.mxu1 %v9235_v21  ;;  %v1004_v21 = vor.u32 %v1003_v23, %v999_v2  ;;  %v1016_v2 = vor.u32 %v1015_v61, %v1011_v17  ;;  %v1054_v56 = vshll.u32 %v15396_v25, 16 }
 0x11e   : > { %3129 = vmatprep.subr.bf16.mxu1 %v15308_v20 }
 0x11f   : > { %v10555_v19 = vsel %vm769_vm4, %v1004_v21, %v1008_v44  ;;  %v1023_v44 = vshrl.u32 %v15388_v45, 16 }
 0x120   : > { %15385 = vst [vmem:[#allocation99_spill] sm:$0xff] %v10555_v19 }
 0x121   : > { %3130 = vmatpush2.bf16.msra.mxu1 %v9236_v59  ;;  %v1018_v59 = vshll.u32 %v15386_v3, 16  ;;  %v15391_v3 = vld [vmem:[#allocation61_spill] sm:$0xff] }
 0x122   : > { %1788 = vmatmul.mubr.bf16.gmra.mxu0 %v10132_v13  ;;  %3131 = vmatprep.subr.bf16.mxu1 %v15308_v20  ;;  %v1030_v38 = vshll.u32 %v15391_v3, 16  ;;  %v15394_v3 = vld [vmem:[#allocation64_spill] sm:$0xff] }
 0x123   : > { %1795 = vmatprep.mubr.bf16.mxu0 %v10543_v35  ;;  %v1020_v23 = vrot.slane %v1018_v59, 1  ;;  %v15392_v59 = vld [vmem:[#allocation63_spill] sm:$0xff] }
 0x124   : > { %2414 = vmatmul.mubr.bf16.gmra.mxu1 %v9809_v32  ;;  %v15389_v32 = vld [vmem:[#allocation58_spill] sm:$0xff]  ;;  %v1032_v61 = vrot.slane %v1030_v38, 1 }
 0x125   : > { %2421 = vmatprep.mubr.bf16.mxu1 %v15384_v10  ;;  %3132 = vmatpush2.bf16.msra.mxu1 %v9238_v39  ;;  %v1025_v39 = vshll.u32 %v15388_v45, 16  ;;  %v9239_v10 = vld [vmem:[#allocation5 + $0x1e0] sm:$0xff]   ;;  %v10566_v21 = vsel %vm769_vm4, %v1016_v2, %v1020_v23  ;;  %v1035_v23 = vshrl.u32 %v15392_v59, 16 }
 0x126   : > { %3133 = vmatprep.subr.bf16.mxu1 %v15308_v20  ;;  %15390 = vst [vmem:[#allocation57_spill] sm:$0xff] %v10566_v21 }
 0x127   : > { %v1027_v52 = vrot.slane %v1025_v39, 1 }
 0x129   : > { %3134 = vmatpush2.bf16.msra.mxu1 %v9239_v10  ;;  %v1028_v17 = vor.u32 %v1027_v52, %v1023_v44  ;;  %v1037_v10 = vshll.u32 %v15392_v59, 16 }
 0x12a   : > { %1796 = vmatmul.mubr.bf16.gmra.mxu0 %v15376_v18  ;;  %3135 = vmatprep.subr.bf16.mxu1 %v15308_v20 }
 0x12b   : > { %1803 = vmatprep.mubr.bf16.mxu0 %v10555_v19  ;;  %v10578_v2 = vsel %vm769_vm4, %v1028_v17, %v1032_v61  ;;  %v1039_v39 = vrot.slane %v1037_v10, 1  ;;  %v1049_v17 = vshll.u32 %v10297_v50, 16  ;;  %v9241_v61 = vld [vmem:[#allocation5 + $0x1d8] sm:$0xff]  }
 0x12c   : > { %2422 = vmatmul.mubr.bf16.gmra.mxu1 %v15387_v27  ;;  %15393 = vst [vmem:[#allocation61_spill] sm:$0xff] %v10578_v2  ;;  %v1042_v27 = vshll.u32 %v15394_v3, 16 }
 0x12d   : > { %2429 = vmatprep.mubr.bf16.mxu1 %v15389_v32  ;;  %v10575_v32 = vld [vmem:[#allocation5 + $0x238] sm:$0xff]   ;;  %v1040_v44 = vor.u32 %v1039_v39, %v1035_v23  ;;  %3136 = vmatpush2.bf16.msra.mxu1 %v9241_v61  ;;  %v1051_v58 = vrot.slane %v1049_v17, 1 }
 0x12e   : > { %8786 = vmatprep.subr.bf16.mxu0 %v10575_v32  ;;  %v1044_v52 = vrot.slane %v1042_v27, 1  ;;  %3137 = vmatprep.subr.bf16.mxu1 %v15308_v20 }
 0x132   : > { %1804 = vmatmul.mubr.bf16.gmra.mxu0 %v10193_v22 }
 0x133   : > { %1811 = vmatprep.mubr.bf16.mxu0 %v10566_v21 }
 0x134   : > { %2430 = vmatmul.mubr.bf16.gmra.mxu1 %v9849_v9  ;;  %v1047_v9 = vshrl.u32 %v10297_v50, 16 }
 0x135   : > { %2437 = vmatprep.mubr.bf16.mxu1 %v10278_v41  ;;  %v10593_v41 = vsel %vm769_vm4, %v1040_v44, %v1044_v52  ;;  %v1056_v44 = vrot.slane %v1054_v56, 1  ;;  %v15397_v52 = vld [vmem:[#allocation71_spill] sm:$0xff] }
 0x136   : > { %15395 = vst [vmem:[#allocation64_spill] sm:$0xff] %v10593_v41  ;;  %v1052_v39 = vor.u32 %v1051_v58, %v1047_v9  ;;  %v1061_v61 = vshll.u32 %v15397_v52, 16  ;;  %v1068_v58 = vrot.slane %v1066_v28, 1 }
 0x138   : > { %v1063_v24 = vrot.slane %v1061_v61, 1 }
 0x13a   : > { %1812 = vmatmul.mubr.bf16.gmra.mxu0 %v10207_v0 }
 0x13b   : > { %1819 = vmatprep.mubr.bf16.mxu0 %v10578_v2  ;;  %v10585_v38 = vpop.f32.mrf.mxu1 }
 0x13c   : > { %2438 = vmatmul.mubr.bf16.gmra.mxu1 %v9880_v40  ;;  %v1059_v40 = vshrl.u32 %v15397_v52, 16 }
 0x13d   : > { %2445 = vmatprep.mubr.bf16.mxu1 %v10327_v29  ;;  %v1942_v10 = vpop.f32.mrf.mxu1  ;;  %v10612_v29 = vsel %vm769_vm4, %v1052_v39, %v1056_v44  ;;  %v1073_v39 = vshll.u32 %v10338_v4, 16  ;;  %v9243_v44 = vld [vmem:[#allocation5 + $0x1d0] sm:$0xff]  }
 0x13e   : > { %15398 = vst [vmem:[#allocation67_spill] sm:$0xff] %v10612_v29  ;;  %v1064_v56 = vor.u32 %v1063_v24, %v1059_v40  ;;  %3138 = vmatpush2.bf16.msra.mxu1 %v9243_v44 }
 0x13f   : > { %v10590_v3 = vpop.f32.mrf.mxu1  ;;  %v1075_v51 = vrot.slane %v1073_v39, 1  ;;  %3139 = vmatprep.subr.bf16.mxu1 %v15308_v20 }
 0x141   : > { %v10598_v27 = vpop.f32.mrf.mxu1 }
 0x142   : > { %1820 = vmatmul.mubr.bf16.gmra.mxu0 %v15388_v45 }
 0x143   : > { %1827 = vmatprep.mubr.bf16.mxu0 %v10593_v41  ;;  %v10602_v23 = vpop.f32.mrf.mxu1 }
 0x144   : > { %2446 = vmatmul.mubr.bf16.gmra.mxu1 %v9892_v49  ;;  %v1071_v49 = vshrl.u32 %v10338_v4, 16 }
 0x145   : > { %2453 = vmatprep.mubr.bf16.mxu1 %v10372_v33  ;;  %v10607_v17 = vpop.f32.mrf.mxu1  ;;  %v10630_v33 = vsel %vm769_vm4, %v1064_v56, %v1068_v58  ;;  %v15402_v58 = vld [vmem:[#allocation78_spill] sm:$0xff] }
 0x146   : > { %15400 = vst [vmem:[#allocation70_spill] sm:$0xff] %v10630_v33  ;;  %v1076_v28 = vor.u32 %v1075_v51, %v1071_v49  ;;  %v1085_v44 = vshll.u32 %v15402_v58, 16  ;;  %v1083_v60 = vshrl.u32 %v15402_v58, 16 }
 0x147   : > { %v10609_v25 = vpop.f32.mrf.mxu1 }
 0x149   : > { %v10616_v30 = vpop.f32.mrf.mxu1 }
 0x14a   : > { %1828 = vmatmul.mubr.bf16.gmra.mxu0 %v15392_v59 }
 0x14b   : > { %1835 = vmatprep.mubr.bf16.mxu0 %v10612_v29  ;;  %v10620_v9 = vpop.f32.mrf.mxu1 }
 0x14c   : > { %2454 = vmatmul.mubr.bf16.gmra.mxu1 %v9916_v14  ;;  %v1078_v14 = vshll.u32 %v15401_v53, 16 }
 0x14d   : > { %2461 = vmatprep.mubr.bf16.mxu1 %v10409_v57  ;;  %v10625_v61 = vpop.f32.mrf.mxu1 }
 0x14e   : > { %v1080_v56 = vrot.slane %v1078_v14, 1 }
 0x14f   : > { %v10627_v8 = vpop.f32.mrf.mxu1 }
 0x150   : > { %v10649_v57 = vsel %vm769_vm4, %v1076_v28, %v1080_v56 }
 0x151   : > { %v10635_v40 = vpop.f32.mrf.mxu1  ;;  %15403 = vst [vmem:[#allocation73_spill] sm:$0xff] %v10649_v57 }
 0x152   : > { %1836 = vmatmul.mubr.bf16.gmra.mxu0 %v10297_v50  ;;  %v15404_v50 = vld [vmem:[#allocation77_spill] sm:$0xff] }
 0x153   : > { %1843 = vmatprep.mubr.bf16.mxu0 %v10630_v33  ;;  %v10639_v24 = vpop.f32.mrf.mxu1  ;;  %v1087_v33 = vrot.slane %v1085_v44, 1  ;;  %v1090_v29 = vshll.u32 %v15404_v50, 16  ;;  %v1097_v44 = vshll.u32 %v10380_v43, 16  ;;  %v9245_v50 = vld [vmem:[#allocation5 + $0x1c8] sm:$0xff]  }
 0x154   : > { %2462 = vmatmul.mubr.bf16.gmra.mxu1 %v9944_v54 }
 0x155   : > { %2469 = vmatprep.mubr.bf16.mxu1 %v10445_v37  ;;  %v10644_v39 = vpop.f32.mrf.mxu1  ;;  %v1088_v56 = vor.u32 %v1087_v33, %v1083_v60  ;;  %v1092_v37 = vrot.slane %v1090_v29, 1  ;;  %3140 = vmatpush2.bf16.msra.mxu1 %v9245_v50  ;;  %v1095_v60 = vshrl.u32 %v10380_v43, 16  ;;  %v1099_v33 = vrot.slane %v1097_v44, 1 }
 0x156   : > { %v1102_v29 = vshll.u32 %v10384_v7, 16  ;;  %3141 = vmatprep.subr.bf16.mxu1 %v15308_v20  ;;  %v1109_v7 = vshll.u32 %v10398_v34, 16 }
 0x157   : > { %v10646_v53 = vpop.f32.mrf.mxu1 }
 0x159   : > { %v10653_v59 = vpop.f32.mrf.mxu1 }
 0x15a   : > { %v1653_v49 = vpop.f32.mrf.mxu0  ;;  %1844 = vmatmul.mubr.bf16.gmra.mxu0 %v15397_v52 }
 0x15b   : > { %v10656_v14 = vadd.f32 %v1942_v10, %v1653_v49  ;;  %1851 = vmatprep.mubr.bf16.mxu0 %v10649_v57 }
 0x15c   : > { %v10659_v51 = vpop.f32.mrf.mxu1  ;;  %2470 = vmatmul.mubr.bf16.gmra.mxu1 %v9979_v36  ;;  %v1655_v28 = vpop.f32.mrf.mxu0  ;;  %v10672_v36 = vsel %vm769_vm4, %v1088_v56, %v1092_v37  ;;  %v1104_v56 = vrot.slane %v1102_v29, 1 }
 0x15d   : > { %15405 = vst [vmem:[#allocation77_spill] sm:$0xff] %v10659_v51  ;;  %2477 = vmatprep.mubr.bf16.mxu1 %v10472_v15  ;;  %15407 = vst [vmem:[#allocation101_spill] sm:$0xff] %v10672_v36 }
 0x15e   : > { %v10664_v54 = vpop.f32.mrf.mxu1  ;;  %v1656_v41 = vpop.f32.mrf.mxu0 }
 0x15f   : > { %v10667_v10 = vadd.f32 %v10598_v27, %v1656_v41 }
 0x160   : > { %v10669_v49 = vpop.f32.mrf.mxu1  ;;  %v1658_v51 = vpop.f32.mrf.mxu0 }
 0x161   : > { %15406 = vst [vmem:[#allocation100_spill] sm:$0xff] %v10669_v49  ;;  %v1100_v51 = vor.u32 %v1099_v33, %v1095_v60  ;;  %v1111_v60 = vrot.slane %v1109_v7, 1  ;;  %v1114_v33 = vshll.u32 %v10393_v55, 16  ;;  %v1121_v7 = vshll.u32 %v10422_v6, 16  ;;  %v9247_v55 = vld [vmem:[#allocation5 + $0x1c0] sm:$0xff]  }
 0x162   : > { %v10677_v28 = vpop.f32.mrf.mxu1  ;;  %v1661_v15 = vpop.f32.mrf.mxu0  ;;  %1852 = vmatmul.mubr.bf16.gmra.mxu0 %v10338_v4  ;;  %3142 = vmatpush2.bf16.msra.mxu1 %v9247_v55 }
 0x163   : > { %v10681_v41 = vadd.f32 %v10585_v38, %v1661_v15  ;;  %1859 = vmatprep.mubr.bf16.mxu0 %v10672_v36 }
 0x164   : > { %v10684_v27 = vpop.f32.mrf.mxu1  ;;  %2478 = vmatmul.mubr.bf16.gmra.mxu1 %v9998_v62  ;;  %v1663_v37 = vpop.f32.mrf.mxu0 }
 0x165   : > { %15408 = vst [vmem:[#allocation102_spill] sm:$0xff] %v10684_v27  ;;  %2485 = vmatprep.mubr.bf16.mxu1 %v10485_v31  ;;  %v10697_v27 = vsel %vm769_vm4, %v1100_v51, %v1104_v56  ;;  %v1107_v37 = vshrl.u32 %v10398_v34, 16 }
 0x166   : > { %v10689_v44 = vpop.f32.mrf.mxu1  ;;  %v1664_v50 = vpop.f32.mrf.mxu0  ;;  %15410 = vst [vmem:[#allocation104_spill] sm:$0xff] %v10697_v27 }
 0x167   : > { %v10692_v49 = vadd.f32 %v10590_v3, %v1664_v50  ;;  %v1112_v56 = vor.u32 %v1111_v60, %v1107_v37  ;;  %v1116_v50 = vrot.slane %v1114_v33, 1  ;;  %v1119_v37 = vshrl.u32 %v10422_v6, 16 }
 0x168   : > { %v10694_v15 = vpop.f32.mrf.mxu1  ;;  %v1666_v38 = vpop.f32.mrf.mxu0  ;;  %v1123_v60 = vrot.slane %v1121_v7, 1  ;;  %v1126_v33 = vshll.u32 %v10426_v5, 16  ;;  %v1133_v7 = vshll.u32 %v10431_v26, 16 }
 0x169   : > { %15409 = vst [vmem:[#allocation103_spill] sm:$0xff] %v10694_v15 }
 0x16a   : > { %v10701_v29 = vpop.f32.mrf.mxu1  ;;  %v1669_v31 = vpop.f32.mrf.mxu0  ;;  %1860 = vmatmul.mubr.bf16.gmra.mxu0 %v15402_v58 }
 0x16b   : > { %v10705_v62 = vadd.f32 %v10607_v17, %v1669_v31  ;;  %1867 = vmatprep.mubr.bf16.mxu0 %v10697_v27 }
 0x16c   : > { %v10708_v3 = vpop.f32.mrf.mxu1  ;;  %2486 = vmatmul.mubr.bf16.gmra.mxu1 %v10036_v63  ;;  %v1671_v51 = vpop.f32.mrf.mxu0  ;;  %v10721_v63 = vsel %vm769_vm4, %v1112_v56, %v1116_v50  ;;  %v1124_v56 = vor.u32 %v1123_v60, %v1119_v37  ;;  %v1128_v50 = vrot.slane %v1126_v33, 1  ;;  %v1135_v37 = vrot.slane %v1133_v7, 1 }
 0x16d   : > { %15411 = vst [vmem:[#allocation105_spill] sm:$0xff] %v10708_v3  ;;  %2493 = vmatprep.mubr.bf16.mxu1 %v10497_v1  ;;  %15413 = vst [vmem:[#allocation107_spill] sm:$0xff] %v10721_v63  ;;  %v1138_v60 = vshll.u32 %v10435_v48, 16  ;;  %v1145_v7 = vshll.u32 %v10458_v47, 16 }
 0x16e   : > { %v10713_v38 = vpop.f32.mrf.mxu1  ;;  %v1672_v15 = vpop.f32.mrf.mxu0 }
 0x16f   : > { %v10716_v31 = vadd.f32 %v10616_v30, %v1672_v15 }
 0x170   : > { %v10718_v17 = vpop.f32.mrf.mxu1  ;;  %v1674_v3 = vpop.f32.mrf.mxu0 }
 0x171   : > { %15412 = vst [vmem:[#allocation106_spill] sm:$0xff] %v10718_v17 }
 0x172   : > { %v10725_v51 = vpop.f32.mrf.mxu1  ;;  %v1677_v1 = vpop.f32.mrf.mxu0  ;;  %1868 = vmatmul.mubr.bf16.gmra.mxu0 %v10380_v43 }
 0x173   : > { %v10729_v30 = vadd.f32 %v10602_v23, %v1677_v1  ;;  %1875 = vmatprep.mubr.bf16.mxu0 %v10721_v63 }
 0x174   : > { %v10732_v15 = vpop.f32.mrf.mxu1  ;;  %2494 = vmatmul.mubr.bf16.gmra.mxu1 %v10057_v46  ;;  %v1679_v3 = vpop.f32.mrf.mxu0 }
 0x175   : > { %15414 = vst [vmem:[#allocation108_spill] sm:$0xff] %v10732_v15  ;;  %2501 = vmatprep.mubr.bf16.mxu1 %v10531_v42  ;;  %v10745_v15 = vsel %vm769_vm4, %v1124_v56, %v1128_v50  ;;  %v1131_v3 = vshrl.u32 %v10431_v26, 16 }
 0x176   : > { %v10737_v5 = vpop.f32.mrf.mxu1  ;;  %v1680_v55 = vpop.f32.mrf.mxu0  ;;  %15417 = vst [vmem:[#allocation111_spill] sm:$0xff] %v10745_v15 }
 0x177   : > { %15415 = vst [vmem:[#allocation109_spill] sm:$0xff] %v10737_v5  ;;  %v10740_v17 = vadd.f32 %v10609_v25, %v1680_v55  ;;  %v1136_v50 = vor.u32 %v1135_v37, %v1131_v3  ;;  %v1140_v55 = vrot.slane %v1138_v60, 1  ;;  %v1147_v3 = vrot.slane %v1145_v7, 1 }
 0x178   : > { %v10742_v1 = vpop.f32.mrf.mxu1  ;;  %v1682_v23 = vpop.f32.mrf.mxu0  ;;  %v1150_v37 = vshll.u32 %v10462_v12, 16 }
 0x179   : > { %15416 = vst [vmem:[#allocation110_spill] sm:$0xff] %v10742_v1 }
 0x17a   : > { %v10749_v33 = vpop.f32.mrf.mxu1  ;;  %v1685_v46 = vpop.f32.mrf.mxu0  ;;  %1876 = vmatmul.mubr.bf16.gmra.mxu0 %v10398_v34 }
 0x17b   : > { %v10753_v5 = vadd.f32 %v10625_v61, %v1685_v46  ;;  %1883 = vmatprep.mubr.bf16.mxu0 %v10745_v15 }
 0x17c   : > { %v10756_v25 = vpop.f32.mrf.mxu1  ;;  %2502 = vmatmul.mubr.bf16.gmra.mxu1 %v10132_v13  ;;  %v1687_v56 = vpop.f32.mrf.mxu0 }
 0x17d   : > { %15418 = vst [vmem:[#allocation112_spill] sm:$0xff] %v10756_v25  ;;  %2509 = vmatprep.mubr.bf16.mxu1 %v10522_v11  ;;  %v10769_v25 = vsel %vm769_vm4, %v1136_v50, %v1140_v55  ;;  %v1143_v56 = vshrl.u32 %v10458_v47, 16 }
 0x17e   : > { %v10761_v48 = vpop.f32.mrf.mxu1  ;;  %v1688_v23 = vpop.f32.mrf.mxu0  ;;  %15421 = vst [vmem:[#allocation115_spill] sm:$0xff] %v10769_v25 }
 0x17f   : > { %15419 = vst [vmem:[#allocation113_spill] sm:$0xff] %v10761_v48  ;;  %v10764_v1 = vadd.f32 %v10635_v40, %v1688_v23  ;;  %v1148_v55 = vor.u32 %v1147_v3, %v1143_v56  ;;  %v1152_v23 = vrot.slane %v1150_v37, 1 }
 0x180   : > { %v10766_v46 = vpop.f32.mrf.mxu1  ;;  %v1690_v61 = vpop.f32.mrf.mxu0 }
 0x181   : > { %15420 = vst [vmem:[#allocation114_spill] sm:$0xff] %v10766_v46 }
 0x182   : > { %v10773_v60 = vpop.f32.mrf.mxu1  ;;  %v1693_v11 = vpop.f32.mrf.mxu0  ;;  %1884 = vmatmul.mubr.bf16.gmra.mxu0 %v10422_v6 }
 0x183   : > { %15422 = vst [vmem:[#allocation116_spill] sm:$0xff] %v10773_v60  ;;  %v10777_v48 = vadd.f32 %v10620_v9, %v1693_v11  ;;  %1891 = vmatprep.mubr.bf16.mxu0 %v10769_v25  ;;  %v10792_v11 = vsel %vm769_vm4, %v1148_v55, %v1152_v23 }
 0x184   : > { %v10780_v40 = vpop.f32.mrf.mxu1  ;;  %2510 = vmatmul.mubr.bf16.gmra.mxu1 %v10102_v16  ;;  %v1695_v50 = vpop.f32.mrf.mxu0  ;;  %15426 = vst [vmem:[#allocation120_spill] sm:$0xff] %v10792_v11 }
 0x185   : > { %15423 = vst [vmem:[#allocation117_spill] sm:$0xff] %v10780_v40  ;;  %2517 = vmatprep.mubr.bf16.mxu1 %v10531_v42 }
 0x186   : > { %v10784_v12 = vpop.f32.mrf.mxu1  ;;  %v1696_v7 = vpop.f32.mrf.mxu0 }
 0x187   : > { %15424 = vst [vmem:[#allocation118_spill] sm:$0xff] %v10784_v12  ;;  %v10787_v61 = vadd.f32 %v10627_v8, %v1696_v7 }
 0x188   : > { %v10789_v46 = vpop.f32.mrf.mxu1  ;;  %v1698_v9 = vpop.f32.mrf.mxu0 }
 0x189   : > { %15425 = vst [vmem:[#allocation119_spill] sm:$0xff] %v10789_v46 }
 0x18a   : > { %v10794_v40 = vpop.f32.mrf.mxu1  ;;  %v1701_v16 = vpop.f32.mrf.mxu0  ;;  %1892 = vmatmul.mubr.bf16.gmra.mxu0 %v10431_v26 }
 0x18b   : > { %15427 = vst [vmem:[#allocation121_spill] sm:$0xff] %v10794_v40  ;;  %v10798_v56 = vadd.f32 %v10644_v39, %v1701_v16  ;;  %1899 = vmatprep.mubr.bf16.mxu0 %v10792_v11 }
 0x18c   : > { %v10801_v3 = vpop.f32.mrf.mxu1  ;;  %2518 = vmatmul.mubr.bf16.gmra.mxu1 %v10132_v13  ;;  %v1703_v8 = vpop.f32.mrf.mxu0 }
 0x18d   : > { %15428 = vst [vmem:[#allocation122_spill] sm:$0xff] %v10801_v3  ;;  %2525 = vmatprep.mubr.bf16.mxu1 %v10543_v35  ;;  %v15432_v8 = vld [vmem:[#allocation15_spill] sm:$0xff] }
 0x18e   : > { %v10805_v37 = vpop.f32.mrf.mxu1  ;;  %v1704_v50 = vpop.f32.mrf.mxu0 }
 0x18f   : > { %15429 = vst [vmem:[#allocation123_spill] sm:$0xff] %v10805_v37  ;;  %v10808_v55 = vadd.f32 %v10653_v59, %v1704_v50 }
 0x190   : > { %v10810_v23 = vpop.f32.mrf.mxu1  ;;  %v1706_v7 = vpop.f32.mrf.mxu0 }
 0x191   : > { %15430 = vst [vmem:[#allocation124_spill] sm:$0xff] %v10810_v23  ;;  %v15437_v23 = vld [vmem:[#allocation14_spill] sm:$0xff] }
 0x192   : > { %v10812_v39 = vpop.f32.mrf.mxu1  ;;  %v1709_v9 = vpop.f32.mrf.mxu0  ;;  %1900 = vmatmul.mubr.bf16.gmra.mxu0 %v10458_v47 }
 0x193   : > { %15431 = vst [vmem:[#allocation125_spill] sm:$0xff] %v10812_v39  ;;  %v10816_v16 = vadd.f32 %v10639_v24, %v1709_v9  ;;  %8722 = vmatprep.mubr.bf16.mxu0 %v15432_v8  ;;  %v9242_v24 = vld [vmem:[#allocation5 + $0x230] sm:$0xff]  }
 0x194   : > { %v10819_v11 = vpop.f32.mrf.mxu1  ;;  %2526 = vmatmul.mubr.bf16.gmra.mxu1 %v15376_v18  ;;  %v1711_v35 = vpop.f32.mrf.mxu0 }
 0x195   : > { %15433 = vst [vmem:[#allocation15_spill] sm:$0xff] %v10819_v11  ;;  %2533 = vmatprep.mubr.bf16.mxu1 %v10555_v19 }
 0x196   : > { %v10823_v59 = vpop.f32.mrf.mxu1  ;;  %v1712_v50 = vpop.f32.mrf.mxu0 }
 0x197   : > { %15434 = vst [vmem:[#allocation126_spill] sm:$0xff] %v10823_v59  ;;  %v10826_v7 = vadd.f32 %v10646_v53, %v1712_v50  ;;  %v9251_v59 = vld [vmem:[#allocation5 + $0x200] sm:$0xff]  }
 0x198   : > { %v10828_v13 = vpop.f32.mrf.mxu1  ;;  %v1714_v47 = vpop.f32.mrf.mxu0 }
 0x199   : > { %15435 = vst [vmem:[#allocation127_spill] sm:$0xff] %v10828_v13  ;;  %v9244_v47 = vld [vmem:[#allocation5 + $0x228] sm:$0xff]   ;;  %v15443_v13 = vld [vmem:[#allocation20_spill] sm:$0xff] }
 0x19a   : > { %v10830_v9 = vpop.f32.mrf.mxu1  ;;  %v1717_v42 = vpop.f32.mrf.mxu0  ;;  %8723 = vmatmul.mubr.bf16.vlgmr.msra.gmra.mxu0 %v15437_v23 }
 0x19b   : > { %15436 = vst [vmem:[#allocation128_spill] sm:$0xff] %v10830_v9  ;;  %v10834_v18 = vadd.f32 %v10664_v54, %v1717_v42  ;;  %8726 = vmatprep.mubr.bf16.mxu0 %v15432_v8  ;;  %8787 = vmatpush3.bf16.msra.mxu0 %v10575_v32  ;;  %v9246_v32 = vld [vmem:[#allocation5 + $0x220] sm:$0xff]  }
 0x19c   : > { %v10838_v35 = vpop.f32.mrf.mxu1  ;;  %2534 = vmatmul.mubr.bf16.gmra.mxu1 %v10193_v22  ;;  %v1719_v53 = vpop.f32.mrf.mxu0  ;;  %8788 = vmatprep.subr.bf16.mxu0 %v9242_v24 }
 0x19d   : > { %15438 = vst [vmem:[#allocation14_spill] sm:$0xff] %v10838_v35  ;;  %2541 = vmatprep.mubr.bf16.mxu1 %v10566_v21  ;;  %v15442_v53 = vld [vmem:[#allocation17_spill] sm:$0xff] }
 0x19e   : > { %v10842_v50 = vpop.f32.mrf.mxu1  ;;  %v1720_v19 = vpop.f32.mrf.mxu0 }
 0x19f   : > { %15439 = vst [vmem:[#allocation129_spill] sm:$0xff] %v10842_v50  ;;  %v10845_v23 = vadd.f32 %v10677_v28, %v1720_v19  ;;  %8789 = vmatpush3.bf16.msra.mxu0 %v9242_v24  ;;  %v9248_v28 = vld [vmem:[#allocation5 + $0x218] sm:$0xff]   ;;  %v9249_v50 = vld [vmem:[#allocation5 + $0x210] sm:$0xff]  }
 0x1a0   : > { %v10847_v54 = vpop.f32.mrf.mxu1  ;;  %v1722_v42 = vpop.f32.mrf.mxu0  ;;  %8790 = vmatprep.subr.bf16.mxu0 %v9244_v47 }
 0x1a1   : > { %15440 = vst [vmem:[#allocation130_spill] sm:$0xff] %v10847_v54 }
 0x1a2   : > { %v10849_v35 = vpop.f32.mrf.mxu1  ;;  %v10851_v22 = vpop.f32.mrf.mxu0  ;;  %8727 = vmatmul.mubr.bf16.gmra.mxu0 %v15442_v53 }
 0x1a3   : > { %15441 = vst [vmem:[#allocation131_spill] sm:$0xff] %v10849_v35  ;;  %8730 = vmatprep.mubr.bf16.mxu0 %v15443_v13  ;;  %8791 = vmatpush3.bf16.msra.mxu0 %v9244_v47 }
 0x1a4   : > { %v10855_v21 = vpop.f32.mrf.mxu1  ;;  %2542 = vmatmul.mubr.bf16.gmra.mxu1 %v10207_v0  ;;  %v1727_v19 = vpop.f32.mrf.mxu0  ;;  %8792 = vmatprep.subr.bf16.mxu0 %v9246_v32  ;;  %v15448_v0 = vld [vmem:[#allocation21_spill] sm:$0xff] }
 0x1a5   : > { %15444 = vst [vmem:[#allocation17_spill] sm:$0xff] %v10855_v21  ;;  %2549 = vmatprep.mubr.bf16.mxu1 %v10578_v2  ;;  %v15449_v19 = vld [vmem:[#allocation24_spill] sm:$0xff] }
 0x1a6   : > { %v10859_v24 = vpop.f32.mrf.mxu1  ;;  %v10861_v42 = vpop.f32.mrf.mxu0 }
 0x1a7   : > { %15445 = vst [vmem:[#allocation20_spill] sm:$0xff] %v10859_v24  ;;  %8793 = vmatpush3.bf16.msra.mxu0 %v9246_v32  ;;  %v9250_v32 = vld [vmem:[#allocation5 + $0x208] sm:$0xff]  }
 0x1a8   : > { %v10863_v54 = vpop.f32.mrf.mxu1  ;;  %v1730_v35 = vpop.f32.mrf.mxu0  ;;  %8794 = vmatprep.subr.bf16.mxu0 %v9248_v28 }
 0x1a9   : > { %15446 = vst [vmem:[#allocation132_spill] sm:$0xff] %v10863_v54  ;;  %v15451_v54 = vld [vmem:[#allocation64_spill] sm:$0xff] }
 0x1aa   : > { %v10865_v47 = vpop.f32.mrf.mxu1  ;;  %v10867_v21 = vpop.f32.mrf.mxu0  ;;  %8731 = vmatmul.mubr.bf16.gmra.mxu0 %v15448_v0 }
 0x1ab   : > { %15447 = vst [vmem:[#allocation133_spill] sm:$0xff] %v10865_v47  ;;  %8734 = vmatprep.mubr.bf16.mxu0 %v15449_v19  ;;  %8795 = vmatpush3.bf16.msra.mxu0 %v9248_v28 }
 0x1ac   : > { %v10871_v2 = vpop.f32.mrf.mxu1  ;;  %2550 = vmatmul.mubr.bf16.gmra.mxu1 %v15388_v45  ;;  %v1735_v24 = vpop.f32.mrf.mxu0  ;;  %8796 = vmatprep.subr.bf16.mxu0 %v9249_v50  ;;  %v15455_v45 = vld [vmem:[#allocation25_spill] sm:$0xff] }
 0x1ad   : > { %15450 = vst [vmem:[#allocation21_spill] sm:$0xff] %v10871_v2  ;;  %2557 = vmatprep.mubr.bf16.mxu1 %v15451_v54  ;;  %v15456_v24 = vld [vmem:[#allocation29_spill] sm:$0xff] }
 0x1ae   : > { %v10875_v35 = vpop.f32.mrf.mxu1  ;;  %v10877_v11 = vpop.f32.mrf.mxu0 }
 0x1af   : > { %15452 = vst [vmem:[#allocation24_spill] sm:$0xff] %v10875_v35  ;;  %8797 = vmatpush3.bf16.msra.mxu0 %v9249_v50  ;;  %v15458_v35 = vld [vmem:[#allocation63_spill] sm:$0xff] }
 0x1b0   : > { %v10879_v47 = vpop.f32.mrf.mxu1  ;;  %v1738_v9 = vpop.f32.mrf.mxu0  ;;  %8798 = vmatprep.subr.bf16.mxu0 %v9250_v32  ;;  %v15459_v50 = vld [vmem:[#allocation67_spill] sm:$0xff] }
 0x1b1   : > { %15453 = vst [vmem:[#allocation134_spill] sm:$0xff] %v10879_v47 }
 0x1b2   : > { %v10881_v28 = vpop.f32.mrf.mxu1  ;;  %v10883_v2 = vpop.f32.mrf.mxu0  ;;  %8735 = vmatmul.mubr.bf16.gmra.mxu0 %v15455_v45 }
 0x1b3   : > { %15454 = vst [vmem:[#allocation135_spill] sm:$0xff] %v10881_v28  ;;  %8738 = vmatprep.mubr.bf16.mxu0 %v15456_v24  ;;  %8799 = vmatpush3.bf16.msra.mxu0 %v9250_v32 }
 0x1b4   : > { %v10887_v54 = vpop.f32.mrf.mxu1  ;;  %2558 = vmatmul.mubr.bf16.gmra.mxu1 %v15458_v35  ;;  %v1743_v3 = vpop.f32.mrf.mxu0  ;;  %8800 = vmatprep.subr.bf16.mxu0 %v9251_v59 }
 0x1b5   : > { %15457 = vst [vmem:[#allocation25_spill] sm:$0xff] %v10887_v54  ;;  %2565 = vmatprep.mubr.bf16.mxu1 %v15459_v50  ;;  %v15463_v54 = vld [vmem:[#allocation30_spill] sm:$0xff]  ;;  %v15464_v3 = vld [vmem:[#allocation32_spill] sm:$0xff]  ;;  %v15465_v50 = vld [vmem:[#allocation69_spill] sm:$0xff] }
 0x1b6   : > { %v10891_v9 = vpop.f32.mrf.mxu1  ;;  %v10893_v47 = vpop.f32.mrf.mxu0 }
 0x1b7   : > { %15460 = vst [vmem:[#allocation29_spill] sm:$0xff] %v10891_v9  ;;  %8801 = vmatpush3.bf16.msra.mxu0 %v9251_v59  ;;  %v15467_v59 = vld [vmem:[#allocation70_spill] sm:$0xff] }
 0x1b8   : > { %v10895_v28 = vpop.f32.mrf.mxu1  ;;  %v1746_v39 = vpop.f32.mrf.mxu0  ;;  %5497 = vmatprep.subr.bf16.mxu0 %v15308_v20 }
 0x1b9   : > { %15461 = vst [vmem:[#allocation136_spill] sm:$0xff] %v10895_v28 }
 0x1ba   : > { %v10898_v37 = vpop.f32.mrf.mxu1  ;;  %v10900_v32 = vpop.f32.mrf.mxu0  ;;  %8739 = vmatmul.mubr.bf16.gmra.mxu0 %v15463_v54 }
 0x1bb   : > { %15462 = vst [vmem:[#allocation137_spill] sm:$0xff] %v10898_v37  ;;  %8742 = vmatprep.mubr.bf16.mxu0 %v15464_v3  ;;  %v15469_v3 = vld [vmem:[#allocation35_spill] sm:$0xff] }
 0x1bc   : > { %v2375_v35 = vpop.f32.mrf.mxu1  ;;  %2566 = vmatmul.mubr.bf16.gmra.mxu1 %v15465_v50  ;;  %v1751_v9 = vpop.f32.mrf.mxu0  ;;  %v15470_v50 = vld [vmem:[#allocation38_spill] sm:$0xff] }
 0x1bd   : > { %v10906_v46 = vadd.f32 %v2375_v35, %v10656_v14  ;;  %2573 = vmatprep.mubr.bf16.mxu1 %v15467_v59 }
 0x1be   : > { %v2377_v39 = vpop.f32.mrf.mxu1  ;;  %v10909_v28 = vpop.f32.mrf.mxu0 }
 0x1bf   : > { %15466 = vst [vmem:[#allocation30_spill] sm:$0xff] %v10906_v46  ;;  %v15473_v46 = vld [vmem:[#allocation40_spill] sm:$0xff] }
 0x1c0   : > { %v2378_v20 = vpop.f32.mrf.mxu1  ;;  %v1754_v37 = vpop.f32.mrf.mxu0 }
 0x1c1   : > { %v10912_v40 = vadd.f32 %v2378_v20, %v10667_v10 }
 0x1c2   : > { %v2380_v12 = vpop.f32.mrf.mxu1  ;;  %v10914_v60 = vpop.f32.mrf.mxu0  ;;  %8743 = vmatmul.mubr.bf16.gmra.mxu0 %v15469_v3 }
 0x1c3   : > { %15468 = vst [vmem:[#allocation138_spill] sm:$0xff] %v10912_v40  ;;  %8746 = vmatprep.mubr.bf16.mxu0 %v15470_v50 }
 0x1c4   : > { %v2383_v9 = vpop.f32.mrf.mxu1  ;;  %2574 = vmatmul.mubr.bf16.gmra.mxu1 %v15397_v52  ;;  %v1759_v14 = vpop.f32.mrf.mxu0  ;;  %v15474_v52 = vld [vmem:[#allocation42_spill] sm:$0xff] }
 0x1c5   : > { %v10920_v35 = vadd.f32 %v2383_v9, %v10681_v41  ;;  %2581 = vmatprep.mubr.bf16.mxu1 %v10649_v57 }
 0x1c6   : > { %v2385_v37 = vpop.f32.mrf.mxu1  ;;  %v10923_v39 = vpop.f32.mrf.mxu0 }
 0x1c7   : > { %15471 = vst [vmem:[#allocation35_spill] sm:$0xff] %v10920_v35  ;;  %v15477_v35 = vld [vmem:[#allocation45_spill] sm:$0xff] }
 0x1c8   : > { %v2386_v20 = vpop.f32.mrf.mxu1  ;;  %v1762_v10 = vpop.f32.mrf.mxu0 }
 0x1c9   : > { %v10926_v12 = vadd.f32 %v2386_v20, %v10692_v49 }
 0x1ca   : > { %v2388_v59 = vpop.f32.mrf.mxu1  ;;  %v10928_v40 = vpop.f32.mrf.mxu0  ;;  %8747 = vmatmul.mubr.bf16.gmra.mxu0 %v15473_v46 }
 0x1cb   : > { %15472 = vst [vmem:[#allocation38_spill] sm:$0xff] %v10926_v12  ;;  %8750 = vmatprep.mubr.bf16.mxu0 %v15474_v52 }
 0x1cc   : > { %v2391_v14 = vpop.f32.mrf.mxu1  ;;  %2582 = vmatmul.mubr.bf16.gmra.mxu1 %v10338_v4  ;;  %v1767_v41 = vpop.f32.mrf.mxu0  ;;  %v15478_v4 = vld [vmem:[#allocation52_spill] sm:$0xff] }
 0x1cd   : > { %v10934_v9 = vadd.f32 %v2391_v14, %v10705_v62  ;;  %2589 = vmatprep.mubr.bf16.mxu1 %v10672_v36 }
 0x1ce   : > { %v2393_v37 = vpop.f32.mrf.mxu1  ;;  %v10937_v10 = vpop.f32.mrf.mxu0 }
 0x1cf   : > { %15475 = vst [vmem:[#allocation40_spill] sm:$0xff] %v10934_v9  ;;  %v15480_v9 = vld [vmem:[#allocation49_spill] sm:$0xff] }
 0x1d0   : > { %v2394_v49 = vpop.f32.mrf.mxu1  ;;  %v1770_v59 = vpop.f32.mrf.mxu0 }
 0x1d1   : > { %v10940_v20 = vadd.f32 %v2394_v49, %v10716_v31 }
 0x1d2   : > { %v2396_v57 = vpop.f32.mrf.mxu1  ;;  %v10942_v12 = vpop.f32.mrf.mxu0  ;;  %8751 = vmatmul.mubr.bf16.gmra.mxu0 %v15477_v35 }
 0x1d3   : > { %15476 = vst [vmem:[#allocation42_spill] sm:$0xff] %v10940_v20  ;;  %8754 = vmatprep.mubr.bf16.mxu0 %v15478_v4 }
 0x1d4   : > { %v2399_v41 = vpop.f32.mrf.mxu1  ;;  %2590 = vmatmul.mubr.bf16.gmra.mxu1 %v15402_v58  ;;  %v1775_v62 = vpop.f32.mrf.mxu0  ;;  %v15483_v58 = vld [vmem:[#allocation55_spill] sm:$0xff] }
 0x1d5   : > { %v10948_v14 = vadd.f32 %v2399_v41, %v10729_v30  ;;  %2597 = vmatprep.mubr.bf16.mxu1 %v10697_v27 }
 0x1d6   : > { %v2401_v37 = vpop.f32.mrf.mxu1  ;;  %v10951_v59 = vpop.f32.mrf.mxu0 }
 0x1d8   : > { %v2402_v31 = vpop.f32.mrf.mxu1  ;;  %v1778_v57 = vpop.f32.mrf.mxu0 }
 0x1d9   : > { %v10954_v49 = vadd.f32 %v2402_v31, %v10740_v17 }
 0x1da   : > { %v2404_v36 = vpop.f32.mrf.mxu1  ;;  %v10956_v20 = vpop.f32.mrf.mxu0  ;;  %8755 = vmatmul.mubr.bf16.gmra.mxu0 %v15480_v9 }
 0x1db   : > { %15479 = vst [vmem:[#allocation45_spill] sm:$0xff] %v10954_v49  ;;  %8758 = vmatprep.mubr.bf16.mxu0 %v15478_v4 }
 0x1dc   : > { %v2407_v62 = vpop.f32.mrf.mxu1  ;;  %2598 = vmatmul.mubr.bf16.gmra.mxu1 %v10380_v43  ;;  %v1783_v30 = vpop.f32.mrf.mxu0  ;;  %v15484_v43 = vld [vmem:[#allocation59_spill] sm:$0xff] }
 0x1dd   : > { %v10962_v41 = vadd.f32 %v2407_v62, %v10753_v5  ;;  %2605 = vmatprep.mubr.bf16.mxu1 %v10721_v63 }
 0x1de   : > { %v2409_v37 = vpop.f32.mrf.mxu1  ;;  %v10965_v57 = vpop.f32.mrf.mxu0 }
 0x1df   : > { %15481 = vst [vmem:[#allocation52_spill] sm:$0xff] %v10962_v41  ;;  %v15487_v41 = vld [vmem:[#allocation62_spill] sm:$0xff] }
 0x1e0   : > { %v2410_v17 = vpop.f32.mrf.mxu1  ;;  %v1786_v36 = vpop.f32.mrf.mxu0 }
 0x1e1   : > { %v10968_v31 = vadd.f32 %v2410_v17, %v10764_v1 }
 0x1e2   : > { %v2412_v9 = vpop.f32.mrf.mxu1  ;;  %v10970_v27 = vpop.f32.mrf.mxu0  ;;  %8759 = vmatmul.mubr.bf16.gmra.mxu0 %v15483_v58 }
 0x1e3   : > { %15482 = vst [vmem:[#allocation49_spill] sm:$0xff] %v10968_v31  ;;  %8762 = vmatprep.mubr.bf16.mxu0 %v15484_v43 }
 0x1e4   : > { %v2415_v30 = vpop.f32.mrf.mxu1  ;;  %2606 = vmatmul.mubr.bf16.gmra.mxu1 %v10398_v34  ;;  %v1791_v5 = vpop.f32.mrf.mxu0  ;;  %v15488_v34 = vld [vmem:[#allocation66_spill] sm:$0xff] }
 0x1e5   : > { %v10976_v62 = vadd.f32 %v2415_v30, %v10777_v48  ;;  %2613 = vmatprep.mubr.bf16.mxu1 %v10745_v15 }
 0x1e6   : > { %v2417_v37 = vpop.f32.mrf.mxu1  ;;  %v10979_v36 = vpop.f32.mrf.mxu0 }
 0x1e7   : > { %15485 = vst [vmem:[#allocation55_spill] sm:$0xff] %v10976_v62  ;;  %v15491_v62 = vld [vmem:[#allocation68_spill] sm:$0xff] }
 0x1e8   : > { %v2418_v1 = vpop.f32.mrf.mxu1  ;;  %v1794_v17 = vpop.f32.mrf.mxu0 }
 0x1e9   : > { %v10982_v9 = vadd.f32 %v2418_v1, %v10787_v61 }
 0x1ea   : > { %v2420_v63 = vpop.f32.mrf.mxu1  ;;  %v10984_v31 = vpop.f32.mrf.mxu0  ;;  %8763 = vmatmul.mubr.bf16.gmra.mxu0 %v15487_v41 }
 0x1eb   : > { %15486 = vst [vmem:[#allocation59_spill] sm:$0xff] %v10982_v9  ;;  %8766 = vmatprep.mubr.bf16.mxu0 %v15488_v34 }
 0x1ec   : > { %v2423_v5 = vpop.f32.mrf.mxu1  ;;  %2614 = vmatmul.mubr.bf16.gmra.mxu1 %v10422_v6  ;;  %v1799_v48 = vpop.f32.mrf.mxu0  ;;  %v15492_v6 = vld [vmem:[#allocation74_spill] sm:$0xff] }
 0x1ed   : > { %v10990_v30 = vadd.f32 %v2423_v5, %v10798_v56  ;;  %2621 = vmatprep.mubr.bf16.mxu1 %v10769_v25 }
 0x1ee   : > { %v2425_v37 = vpop.f32.mrf.mxu1  ;;  %v10993_v17 = vpop.f32.mrf.mxu0 }
 0x1ef   : > { %15489 = vst [vmem:[#allocation62_spill] sm:$0xff] %v10990_v30  ;;  %v15494_v37 = vld [vmem:[#allocation33_spill] sm:$0xff] }
 0x1f0   : > { %v2426_v61 = vpop.f32.mrf.mxu1  ;;  %v1802_v63 = vpop.f32.mrf.mxu0 }
 0x1f1   : > { %v10996_v1 = vadd.f32 %v2426_v61, %v10808_v55 }
 0x1f2   : > { %v2428_v15 = vpop.f32.mrf.mxu1  ;;  %v10998_v9 = vpop.f32.mrf.mxu0  ;;  %8767 = vmatmul.mubr.bf16.gmra.mxu0 %v15491_v62 }
 0x1f3   : > { %15490 = vst [vmem:[#allocation66_spill] sm:$0xff] %v10996_v1  ;;  %8770 = vmatprep.mubr.bf16.mxu0 %v15492_v6  ;;  %v15496_v6 = vld [vmem:[#allocation76_spill] sm:$0xff] }
 0x1f4   : > { %v2431_v48 = vpop.f32.mrf.mxu1  ;;  %2622 = vmatmul.mubr.bf16.gmra.mxu1 %v10431_v26  ;;  %v1807_v56 = vpop.f32.mrf.mxu0  ;;  %v15497_v26 = vld [vmem:[#allocation80_spill] sm:$0xff] }
 0x1f5   : > { %v11004_v5 = vadd.f32 %v2431_v48, %v10816_v16  ;;  %3143 = vmatprep.mubr.bf16.mxu1 %v15494_v37  ;;  %v15498_v16 = vld [vmem:[#allocation13_spill] sm:$0xff] }
 0x1f6   : > { %v2433_v63 = vpop.f32.mrf.mxu1  ;;  %v11007_v25 = vpop.f32.mrf.mxu0 }
 0x1f7   : > { %15493 = vst [vmem:[#allocation139_spill] sm:$0xff] %v11004_v5  ;;  %v15500_v63 = vld [vmem:[#allocation37_spill] sm:$0xff] }
 0x1f8   : > { %v2434_v55 = vpop.f32.mrf.mxu1  ;;  %v1810_v15 = vpop.f32.mrf.mxu0 }
 0x1f9   : > { %v11010_v61 = vadd.f32 %v2434_v55, %v10826_v7 }
 0x1fa   : > { %v2436_v1 = vpop.f32.mrf.mxu1  ;;  %v11012_v30 = vpop.f32.mrf.mxu0  ;;  %8771 = vmatmul.mubr.bf16.gmra.mxu0 %v15496_v6 }
 0x1fb   : > { %15495 = vst [vmem:[#allocation33_spill] sm:$0xff] %v11010_v61  ;;  %8774 = vmatprep.mubr.bf16.mxu0 %v15497_v26  ;;  %v15502_v26 = vld [vmem:[#allocation82_spill] sm:$0xff] }
 0x1fc   : > { %v2439_v56 = vpop.f32.mrf.mxu1  ;;  %3144 = vmatmul.mubr.bf16.vlgmr.msra.gmra.mxu1 %v15498_v16  ;;  %v1815_v48 = vpop.f32.mrf.mxu0  ;;  %v15503_v16 = vld [vmem:[#allocation77_spill] sm:$0xff] }
 0x1fd   : > { %v11018_v37 = vadd.f32 %v2439_v56, %v10834_v18  ;;  %3151 = vmatprep.mubr.bf16.mxu1 %v15500_v63  ;;  %v2015_v48 = vadd.f32 %v15503_v16, %v10851_v22  ;;  %v15504_v18 = vld [vmem:[#allocation85_spill] sm:$0xff]  ;;  %v15505_v63 = vld [vmem:[#allocation16_spill] sm:$0xff] }
 0x1fe   : > { %v2441_v15 = vpop.f32.mrf.mxu1  ;;  %v11021_v5 = vpop.f32.mrf.mxu0 }
 0x1ff   : > { %15499 = vst [vmem:[#allocation13_spill] sm:$0xff] %v11018_v37 }
 0x200   : > { %v2442_v7 = vpop.f32.mrf.mxu1  ;;  %v1818_v1 = vpop.f32.mrf.mxu0 }
 0x201   : > { %v11024_v55 = vadd.f32 %v2442_v7, %v10845_v23  ;;  %v15506_v1 = vld [vmem:[#allocation43_spill] sm:$0xff] }
 0x202   : > { %v2444_v61 = vpop.f32.mrf.mxu1  ;;  %v11026_v6 = vpop.f32.mrf.mxu0  ;;  %8775 = vmatmul.mubr.bf16.gmra.mxu0 %v15502_v26 }
 0x203   : > { %15501 = vst [vmem:[#allocation37_spill] sm:$0xff] %v11024_v55  ;;  %8778 = vmatprep.mubr.bf16.mxu0 %v15504_v18  ;;  %v15507_v61 = vld [vmem:[#allocation100_spill] sm:$0xff]  ;;  %v15508_v18 = vld [vmem:[#allocation86_spill] sm:$0xff] }
 0x204   : > { %v2447_v56 = vpop.f32.mrf.mxu1  ;;  %3152 = vmatmul.mubr.bf16.gmra.mxu1 %v15505_v63  ;;  %v1823_v15 = vpop.f32.mrf.mxu0  ;;  %v2018_v55 = vadd.f32 %v15507_v61, %v10861_v42  ;;  %v15511_v42 = vld [vmem:[#allocation46_spill] sm:$0xff] }
 0x205   : > { %v11033_v37 = vadd.f32 %v2447_v56, %v2015_v48  ;;  %3159 = vmatprep.mubr.bf16.mxu1 %v15506_v1  ;;  %v2023_v48 = vadd.f32 %v10689_v44, %v10867_v21  ;;  %v15509_v56 = vld [vmem:[#allocation90_spill] sm:$0xff] }
 0x206   : > { %v2449_v23 = vpop.f32.mrf.mxu1  ;;  %v11036_v7 = vpop.f32.mrf.mxu0  ;;  %v15510_v15 = vld [vmem:[#allocation18_spill] sm:$0xff] }
 0x208   : > { %v2450_v26 = vpop.f32.mrf.mxu1  ;;  %v1826_v62 = vpop.f32.mrf.mxu0 }
 0x209   : > { %v11040_v49 = vadd.f32 %v2450_v26, %v2018_v55  ;;  %v2026_v55 = vadd.f32 %v10701_v29, %v10877_v11  ;;  %v15516_v29 = vld [vmem:[#allocation53_spill] sm:$0xff] }
 0x20a   : > { %v2452_v22 = vpop.f32.mrf.mxu1  ;;  %v11042_v16 = vpop.f32.mrf.mxu0  ;;  %8779 = vmatmul.mubr.bf16.gmra.mxu0 %v15508_v18 }
 0x20b   : > { %8782 = vmatprep.mubr.bf16.mxu0 %v15509_v56  ;;  %v15513_v56 = vld [vmem:[#allocation91_spill] sm:$0xff] }
 0x20c   : > { %v2455_v63 = vpop.f32.mrf.mxu1  ;;  %3160 = vmatmul.mubr.bf16.gmra.mxu1 %v15510_v15  ;;  %v1831_v1 = vpop.f32.mrf.mxu0 }
 0x20d   : > { %v11049_v23 = vadd.f32 %v2455_v63, %v2023_v48  ;;  %3167 = vmatprep.mubr.bf16.mxu1 %v15511_v42  ;;  %v15514_v48 = vld [vmem:[#allocation102_spill] sm:$0xff]  ;;  %v15515_v1 = vld [vmem:[#allocation19_spill] sm:$0xff] }
 0x20e   : > { %v2457_v26 = vpop.f32.mrf.mxu1  ;;  %v11052_v62 = vpop.f32.mrf.mxu0  ;;  %v2031_v63 = vadd.f32 %v15514_v48, %v10883_v2  ;;  %v2039_v48 = vadd.f32 %v10713_v38, %v10900_v32  ;;  %v15521_v32 = vld [vmem:[#allocation105_spill] sm:$0xff] }
 0x210   : > { %v2458_v61 = vpop.f32.mrf.mxu1  ;;  %v1834_v22 = vpop.f32.mrf.mxu0 }
 0x211   : > { %v11056_v18 = vadd.f32 %v2458_v61, %v2026_v55  ;;  %v15517_v61 = vld [vmem:[#allocation103_spill] sm:$0xff] }
 0x212   : > { %v2460_v21 = vpop.f32.mrf.mxu1  ;;  %v11058_v44 = vpop.f32.mrf.mxu0  ;;  %8783 = vmatmul.mubr.bf16.gmra.mxu0 %v15513_v56  ;;  %v2034_v22 = vadd.f32 %v15517_v61, %v10893_v47  ;;  %v15519_v47 = vld [vmem:[#allocation58_spill] sm:$0xff] }
 0x213   : > { %15512 = vst [vmem:[#allocation77_spill] sm:$0xff] %v11056_v18  ;;  %8802 = vmatprep.mubr.bf16.mxu0 %v15432_v8 }
 0x214   : > { %v2463_v15 = vpop.f32.mrf.mxu1  ;;  %3168 = vmatmul.mubr.bf16.gmra.mxu1 %v15515_v1  ;;  %v1839_v42 = vpop.f32.mrf.mxu0 }
 0x215   : > { %v11065_v26 = vadd.f32 %v2463_v15, %v2031_v63  ;;  %3175 = vmatprep.mubr.bf16.mxu1 %v15516_v29  ;;  %v15518_v15 = vld [vmem:[#allocation22_spill] sm:$0xff] }
 0x216   : > { %v2465_v11 = vpop.f32.mrf.mxu1  ;;  %v11068_v55 = vpop.f32.mrf.mxu0 }
 0x217   : > { %v2042_v11 = vadd.f32 %v10725_v51, %v10909_v28  ;;  %v15523_v51 = vld [vmem:[#allocation65_spill] sm:$0xff] }
 0x218   : > { %v2466_v21 = vpop.f32.mrf.mxu1  ;;  %v1842_v18 = vpop.f32.mrf.mxu0 }
 0x219   : > { %v11072_v56 = vadd.f32 %v2466_v21, %v2034_v22  ;;  %v2047_v21 = vadd.f32 %v15521_v32, %v10914_v60 }
 0x21a   : > { %v2468_v2 = vpop.f32.mrf.mxu1  ;;  %v11074_v8 = vpop.f32.mrf.mxu0  ;;  %8803 = vmatmul.mubr.bf16.vlgmr.msra.gmra.mxu0 %v15442_v53 }
 0x21b   : > { %8806 = vmatprep.mubr.bf16.mxu0 %v15443_v13 }
 0x21c   : > { %v2471_v63 = vpop.f32.mrf.mxu1  ;;  %3176 = vmatmul.mubr.bf16.gmra.mxu1 %v15518_v15  ;;  %v1847_v1 = vpop.f32.mrf.mxu0 }
 0x21d   : > { %v11081_v42 = vadd.f32 %v2471_v63, %v2039_v48  ;;  %3183 = vmatprep.mubr.bf16.mxu1 %v15519_v47  ;;  %v15522_v48 = vld [vmem:[#allocation23_spill] sm:$0xff]  ;;  %v15524_v47 = vld [vmem:[#allocation106_spill] sm:$0xff] }
 0x21e   : > { %v2473_v18 = vpop.f32.mrf.mxu1  ;;  %v11084_v29 = vpop.f32.mrf.mxu0 }
 0x21f   : > { %v2050_v18 = vadd.f32 %v15524_v47, %v10923_v39  ;;  %v15527_v39 = vld [vmem:[#allocation72_spill] sm:$0xff] }
 0x220   : > { %v2474_v53 = vpop.f32.mrf.mxu1  ;;  %v1850_v61 = vpop.f32.mrf.mxu0 }
 0x221   : > { %v11088_v22 = vadd.f32 %v2474_v53, %v2042_v11  ;;  %v15525_v61 = vld [vmem:[#allocation109_spill] sm:$0xff] }
 0x222   : > { %v2476_v38 = vpop.f32.mrf.mxu1  ;;  %v11090_v13 = vpop.f32.mrf.mxu0  ;;  %8807 = vmatmul.mubr.bf16.gmra.mxu0 %v15448_v0 }
 0x223   : > { %15520 = vst [vmem:[#allocation16_spill] sm:$0xff] %v11088_v22  ;;  %8810 = vmatprep.mubr.bf16.mxu0 %v15449_v19  ;;  %v2055_v38 = vadd.f32 %v15525_v61, %v10928_v40  ;;  %v15573_v22 = vld [vmem:[#allocation55_spill] sm:$0xff] }
 0x224   : > { %v2479_v2 = vpop.f32.mrf.mxu1  ;;  %3184 = vmatmul.mubr.bf16.gmra.mxu1 %v15522_v48  ;;  %v1855_v63 = vpop.f32.mrf.mxu0 }
 0x225   : > { %v11097_v15 = vadd.f32 %v2479_v2, %v2047_v21  ;;  %3191 = vmatprep.mubr.bf16.mxu1 %v15523_v51  ;;  %v15526_v21 = vld [vmem:[#allocation26_spill] sm:$0xff] }
 0x226   : > { %v2481_v28 = vpop.f32.mrf.mxu1  ;;  %v11100_v1 = vpop.f32.mrf.mxu0 }
 0x227   : > { %v2058_v28 = vadd.f32 %v10749_v33, %v10937_v10  ;;  %v15532_v33 = vld [vmem:[#allocation79_spill] sm:$0xff] }
 0x228   : > { %v2482_v0 = vpop.f32.mrf.mxu1  ;;  %v1858_v11 = vpop.f32.mrf.mxu0 }
 0x229   : > { %v11104_v53 = vadd.f32 %v2482_v0, %v2050_v18  ;;  %v15529_v0 = vld [vmem:[#allocation108_spill] sm:$0xff] }
 0x22a   : > { %v2484_v60 = vpop.f32.mrf.mxu1  ;;  %v11106_v19 = vpop.f32.mrf.mxu0  ;;  %8811 = vmatmul.mubr.bf16.gmra.mxu0 %v15455_v45  ;;  %v2063_v11 = vadd.f32 %v15529_v0, %v10942_v12 }
 0x22b   : > { %8814 = vmatprep.mubr.bf16.mxu0 %v15456_v24  ;;  %v15530_v60 = vld [vmem:[#allocation32_spill] sm:$0xff] }
 0x22c   : > { %v2487_v32 = vpop.f32.mrf.mxu1  ;;  %3192 = vmatmul.mubr.bf16.gmra.mxu1 %v15526_v21  ;;  %v1863_v2 = vpop.f32.mrf.mxu0 }
 0x22d   : > { %v11113_v48 = vadd.f32 %v2487_v32, %v2055_v38  ;;  %3199 = vmatprep.mubr.bf16.mxu1 %v15527_v39  ;;  %v15531_v38 = vld [vmem:[#allocation27_spill] sm:$0xff]  ;;  %v15533_v39 = vld [vmem:[#allocation110_spill] sm:$0xff] }
 0x22e   : > { %v2489_v63 = vpop.f32.mrf.mxu1  ;;  %v11116_v51 = vpop.f32.mrf.mxu0 }
 0x22f   : > { %v2066_v63 = vadd.f32 %v15533_v39, %v10951_v59  ;;  %v15536_v59 = vld [vmem:[#allocation84_spill] sm:$0xff] }
 0x230   : > { %v2490_v45 = vpop.f32.mrf.mxu1  ;;  %v1866_v47 = vpop.f32.mrf.mxu0 }
 0x231   : > { %v11120_v18 = vadd.f32 %v2490_v45, %v2058_v28 }
 0x232   : > { %v2492_v40 = vpop.f32.mrf.mxu1  ;;  %v11122_v24 = vpop.f32.mrf.mxu0  ;;  %8815 = vmatmul.mubr.bf16.gmra.mxu0 %v15463_v54 }
 0x233   : > { %15528 = vst [vmem:[#allocation43_spill] sm:$0xff] %v11120_v18  ;;  %8818 = vmatprep.mubr.bf16.mxu0 %v15530_v60  ;;  %v15534_v40 = vld [vmem:[#allocation113_spill] sm:$0xff]  ;;  %v15535_v60 = vld [vmem:[#allocation28_spill] sm:$0xff]  ;;  %v15569_v18 = vld [vmem:[#allocation42_spill] sm:$0xff] }
 0x234   : > { %v2495_v61 = vpop.f32.mrf.mxu1  ;;  %3200 = vmatmul.mubr.bf16.gmra.mxu1 %v15531_v38  ;;  %v1871_v32 = vpop.f32.mrf.mxu0  ;;  %v2071_v0 = vadd.f32 %v15534_v40, %v10956_v20 }
 0x235   : > { %v11129_v21 = vadd.f32 %v2495_v61, %v2063_v11  ;;  %3207 = vmatprep.mubr.bf16.mxu1 %v15532_v33 }
 0x236   : > { %v2497_v10 = vpop.f32.mrf.mxu1  ;;  %v11132_v2 = vpop.f32.mrf.mxu0 }
 0x237   : > { %v15537_v10 = vld [vmem:[#allocation116_spill] sm:$0xff] }
 0x238   : > { %v2498_v54 = vpop.f32.mrf.mxu1  ;;  %v1874_v28 = vpop.f32.mrf.mxu0  ;;  %v2074_v39 = vadd.f32 %v15537_v10, %v10965_v57  ;;  %v15541_v57 = vld [vmem:[#allocation89_spill] sm:$0xff] }
 0x239   : > { %v11136_v45 = vadd.f32 %v2498_v54, %v2066_v63  ;;  %v15539_v28 = vld [vmem:[#allocation112_spill] sm:$0xff] }
 0x23a   : > { %v2500_v12 = vpop.f32.mrf.mxu1  ;;  %v11138_v47 = vpop.f32.mrf.mxu0  ;;  %8819 = vmatmul.mubr.bf16.gmra.mxu0 %v15469_v3 }
 0x23b   : > { %8822 = vmatprep.mubr.bf16.mxu0 %v15470_v50  ;;  %v2079_v12 = vadd.f32 %v15539_v28, %v10970_v27  ;;  %v15544_v28 = vld [vmem:[#allocation48_spill] sm:$0xff] }
 0x23c   : > { %v2503_v11 = vpop.f32.mrf.mxu1  ;;  %3208 = vmatmul.mubr.bf16.gmra.mxu1 %v15535_v60  ;;  %v1879_v61 = vpop.f32.mrf.mxu0 }
 0x23d   : > { %v11145_v38 = vadd.f32 %v2503_v11, %v2071_v0  ;;  %3215 = vmatprep.mubr.bf16.mxu1 %v15536_v59  ;;  %v15540_v0 = vld [vmem:[#allocation31_spill] sm:$0xff] }
 0x23e   : > { %v2505_v32 = vpop.f32.mrf.mxu1  ;;  %v11148_v33 = vpop.f32.mrf.mxu0 }
 0x23f   : > { %v15542_v32 = vld [vmem:[#allocation114_spill] sm:$0xff] }
 0x240   : > { %v2506_v3 = vpop.f32.mrf.mxu1  ;;  %v1882_v63 = vpop.f32.mrf.mxu0  ;;  %v2082_v10 = vadd.f32 %v15542_v32, %v10979_v36  ;;  %v15546_v36 = vld [vmem:[#allocation93_spill] sm:$0xff] }
 0x241   : > { %v11152_v54 = vadd.f32 %v2506_v3, %v2074_v39  ;;  %v15543_v63 = vld [vmem:[#allocation118_spill] sm:$0xff]  ;;  %v15547_v32 = vld [vmem:[#allocation121_spill] sm:$0xff] }
 0x242   : > { %v2508_v20 = vpop.f32.mrf.mxu1  ;;  %v11154_v50 = vpop.f32.mrf.mxu0  ;;  %8823 = vmatmul.mubr.bf16.gmra.mxu0 %v15473_v46 }
 0x243   : > { %15538 = vst [vmem:[#allocation100_spill] sm:$0xff] %v11152_v54  ;;  %8826 = vmatprep.mubr.bf16.mxu0 %v15474_v52  ;;  %v2087_v20 = vadd.f32 %v15543_v63, %v10984_v31 }
 0x244   : > { %v2511_v40 = vpop.f32.mrf.mxu1  ;;  %3216 = vmatmul.mubr.bf16.gmra.mxu1 %v15540_v0  ;;  %v1887_v11 = vpop.f32.mrf.mxu0 }
 0x245   : > { %v11161_v60 = vadd.f32 %v2511_v40, %v2079_v12  ;;  %3223 = vmatprep.mubr.bf16.mxu1 %v15541_v57  ;;  %v15545_v40 = vld [vmem:[#allocation34_spill] sm:$0xff] }
 0x246   : > { %v2513_v61 = vpop.f32.mrf.mxu1  ;;  %v11164_v59 = vpop.f32.mrf.mxu0 }
 0x248   : > { %v2514_v46 = vpop.f32.mrf.mxu1  ;;  %v1890_v39 = vpop.f32.mrf.mxu0 }
 0x249   : > { %v11168_v3 = vadd.f32 %v2514_v46, %v2082_v10  ;;  %v2090_v10 = vadd.f32 %v15547_v32, %v10993_v17  ;;  %v15551_v17 = vld [vmem:[#allocation95_spill] sm:$0xff] }
 0x24a   : > { %v2516_v27 = vpop.f32.mrf.mxu1  ;;  %v11170_v52 = vpop.f32.mrf.mxu0  ;;  %8827 = vmatmul.mubr.bf16.gmra.mxu0 %v15477_v35 }
 0x24b   : > { %8830 = vmatprep.mubr.bf16.mxu0 %v15544_v28 }
 0x24c   : > { %v2519_v12 = vpop.f32.mrf.mxu1  ;;  %3224 = vmatmul.mubr.bf16.gmra.mxu1 %v15545_v40  ;;  %v1895_v0 = vpop.f32.mrf.mxu0  ;;  %v15550_v40 = vld [vmem:[#allocation36_spill] sm:$0xff] }
 0x24d   : > { %v11177_v11 = vadd.f32 %v2519_v12, %v2087_v20  ;;  %3231 = vmatprep.mubr.bf16.mxu1 %v15546_v36  ;;  %v15549_v20 = vld [vmem:[#allocation117_spill] sm:$0xff] }
 0x24e   : > { %v2521_v57 = vpop.f32.mrf.mxu1  ;;  %v11180_v61 = vpop.f32.mrf.mxu0  ;;  %v2095_v28 = vadd.f32 %v15549_v20, %v10998_v9  ;;  %v15553_v20 = vld [vmem:[#allocation123_spill] sm:$0xff] }
 0x250   : > { %v2522_v46 = vpop.f32.mrf.mxu1  ;;  %v1898_v39 = vpop.f32.mrf.mxu0 }
 0x251   : > { %v11184_v27 = vadd.f32 %v2522_v46, %v2090_v10  ;;  %v15552_v10 = vld [vmem:[#allocation119_spill] sm:$0xff] }
 0x252   : > { %v2524_v31 = vpop.f32.mrf.mxu1  ;;  %v11186_v63 = vpop.f32.mrf.mxu0  ;;  %8831 = vmatmul.mubr.bf16.gmra.mxu0 %v15477_v35  ;;  %v2098_v46 = vadd.f32 %v15552_v10, %v11007_v25  ;;  %v15556_v10 = vld [vmem:[#allocation30_spill] sm:$0xff] }
 0x253   : > { %15548 = vst [vmem:[#allocation18_spill] sm:$0xff] %v11184_v27  ;;  %8834 = vmatprep.mubr.bf16.mxu0 %v15478_v4 }
 0x254   : > { %v2527_v12 = vpop.f32.mrf.mxu1  ;;  %3232 = vmatmul.mubr.bf16.gmra.mxu1 %v15550_v40  ;;  %v1903_v0 = vpop.f32.mrf.mxu0 }
 0x255   : > { %v11193_v36 = vadd.f32 %v2527_v12, %v2095_v28  ;;  %3239 = vmatprep.mubr.bf16.mxu1 %v15551_v17  ;;  %v2103_v28 = vadd.f32 %v15553_v20, %v11012_v30  ;;  %v15554_v12 = vld [vmem:[#allocation35_spill] sm:$0xff]  ;;  %v15558_v30 = vld [vmem:[#allocation125_spill] sm:$0xff] }
 0x256   : > { %v2529_v57 = vpop.f32.mrf.mxu1  ;;  %v11196_v32 = vpop.f32.mrf.mxu0  ;;  %v15555_v17 = vld [vmem:[#allocation39_spill] sm:$0xff] }
 0x258   : > { %v2530_v35 = vpop.f32.mrf.mxu1  ;;  %v1906_v39 = vpop.f32.mrf.mxu0 }
 0x259   : > { %v11200_v31 = vadd.f32 %v2530_v35, %v2098_v46  ;;  %v15557_v35 = vld [vmem:[#allocation96_spill] sm:$0xff] }
 0x25a   : > { %v2532_v9 = vpop.f32.mrf.mxu1  ;;  %v8724_v4 = vpop.f32.mrf.mxu0  ;;  %8835 = vmatmul.mubr.bf16.gmra.mxu0 %v15483_v58 }
 0x25b   : > { %v11206_v40 = vadd.f32 %v8724_v4, %v15554_v12  ;;  %8838 = vmatprep.mubr.bf16.mxu0 %v15484_v43  ;;  %v2106_v9 = vadd.f32 %v15558_v30, %v11021_v5  ;;  %v15559_v4 = vld [vmem:[#allocation38_spill] sm:$0xff] }
 0x25c   : > { %v2535_v0 = vpop.f32.mrf.mxu1  ;;  %3240 = vmatmul.mubr.bf16.gmra.mxu1 %v15555_v17  ;;  %v2664_v25 = vpop.f32.mrf.mxu0  ;;  %v15561_v17 = vld [vmem:[#allocation138_spill] sm:$0xff] }
 0x25d   : > { %v11210_v57 = vadd.f32 %v2535_v0, %v2103_v28  ;;  %v11213_v46 = vadd.f32 %v2664_v25, %v15556_v10  ;;  %3247 = vmatprep.mubr.bf16.mxu1 %v15557_v35  ;;  %v15562_v10 = vld [vmem:[#allocation122_spill] sm:$0xff] }
 0x25e   : > { %v2537_v58 = vpop.f32.mrf.mxu1  ;;  %v8725_v39 = vpop.f32.mrf.mxu0 }
 0x25f   : > { %v11219_v20 = vadd.f32 %v8725_v39, %v15559_v4  ;;  %v2111_v58 = vadd.f32 %v15562_v10, %v11026_v6  ;;  %v15563_v39 = vld [vmem:[#allocation41_spill] sm:$0xff]  ;;  %v15564_v4 = vld [vmem:[#allocation40_spill] sm:$0xff] }
 0x260   : > { %v2538_v43 = vpop.f32.mrf.mxu1  ;;  %v2667_v12 = vpop.f32.mrf.mxu0  ;;  %v15567_v6 = vld [vmem:[#allocation124_spill] sm:$0xff] }
 0x261   : > { %v11221_v27 = vadd.f32 %v2538_v43, %v2106_v9  ;;  %v11224_v28 = vadd.f32 %v2667_v12, %v15561_v17  ;;  %v15566_v12 = vld [vmem:[#allocation97_spill] sm:$0xff] }
 0x262   : > { %v2540_v0 = vpop.f32.mrf.mxu1  ;;  %v8728_v25 = vpop.f32.mrf.mxu0  ;;  %8839 = vmatmul.mubr.bf16.gmra.mxu0 %v15487_v41 }
 0x263   : > { %15560 = vst [vmem:[#allocation46_spill] sm:$0xff] %v11221_v27  ;;  %v11230_v54 = vadd.f32 %v8728_v25, %v10948_v14  ;;  %8842 = vmatprep.mubr.bf16.mxu0 %v15488_v34  ;;  %v2114_v0 = vadd.f32 %v15567_v6, %v11036_v7  ;;  %v15568_v14 = vld [vmem:[#allocation45_spill] sm:$0xff]  ;;  %v15575_v7 = vld [vmem:[#allocation74_spill] sm:$0xff]  ;;  %v15576_v6 = vld [vmem:[#allocation44_spill] sm:$0xff] }
 0x264   : > { %v2543_v5 = vpop.f32.mrf.mxu1  ;;  %3248 = vmatmul.mubr.bf16.gmra.mxu1 %v15563_v39  ;;  %v2680_v30 = vpop.f32.mrf.mxu0 }
 0x265   : > { %v11234_v9 = vadd.f32 %v2543_v5, %v2111_v58  ;;  %v11237_v43 = vadd.f32 %v2680_v30, %v15564_v4  ;;  %3255 = vmatprep.mubr.bf16.mxu1 %v15566_v12  ;;  %v15571_v4 = vld [vmem:[#allocation68_spill] sm:$0xff]  ;;  %v15572_v12 = vld [vmem:[#allocation126_spill] sm:$0xff] }
 0x266   : > { %v2545_v41 = vpop.f32.mrf.mxu1  ;;  %v8729_v17 = vpop.f32.mrf.mxu0 }
 0x267   : > { %15565 = vst [vmem:[#allocation102_spill] sm:$0xff] %v11237_v43  ;;  %v11243_v25 = vadd.f32 %v8729_v17, %v15568_v14  ;;  %v2119_v41 = vadd.f32 %v15572_v12, %v11042_v16  ;;  %v15579_v16 = vld [vmem:[#allocation128_spill] sm:$0xff] }
 0x268   : > { %v2546_v34 = vpop.f32.mrf.mxu1  ;;  %v2683_v10 = vpop.f32.mrf.mxu0 }
 0x269   : > { %v11245_v27 = vadd.f32 %v2546_v34, %v2114_v0  ;;  %v11248_v58 = vadd.f32 %v2683_v10, %v15569_v18  ;;  %v15577_v18 = vld [vmem:[#allocation52_spill] sm:$0xff] }
 0x26a   : > { %v2548_v5 = vpop.f32.mrf.mxu1  ;;  %v8732_v30 = vpop.f32.mrf.mxu0  ;;  %8843 = vmatmul.mubr.bf16.gmra.mxu0 %v15571_v4  ;;  %v2122_v4 = vadd.f32 %v15579_v16, %v11052_v62  ;;  %v15587_v62 = vld [vmem:[#allocation80_spill] sm:$0xff] }
 0x26b   : > { %15570 = vst [vmem:[#allocation19_spill] sm:$0xff] %v11248_v58  ;;  %v11254_v43 = vadd.f32 %v8732_v30, %v15573_v22  ;;  %8846 = vmatprep.mubr.bf16.mxu0 %v15575_v7  ;;  %v15580_v22 = vld [vmem:[#allocation59_spill] sm:$0xff] }
 0x26c   : > { %v2551_v17 = vpop.f32.mrf.mxu1  ;;  %3256 = vmatmul.mubr.bf16.gmra.mxu1 %v15576_v6  ;;  %v2696_v0 = vpop.f32.mrf.mxu0  ;;  %v15582_v6 = vld [vmem:[#allocation49_spill] sm:$0xff] }
 0x26d   : > { %15574 = vst [vmem:[#allocation53_spill] sm:$0xff] %v11254_v43  ;;  %v11258_v14 = vadd.f32 %v2551_v17, %v2119_v41  ;;  %v11261_v34 = vadd.f32 %v2696_v0, %v15577_v18  ;;  %3263 = vmatprep.mubr.bf16.mxu1 %v15557_v35  ;;  %v15583_v18 = vld [vmem:[#allocation76_spill] sm:$0xff]  ;;  %v15584_v35 = vld [vmem:[#allocation15_spill] sm:$0xff] }
 0x26e   : > { %v2553_v10 = vpop.f32.mrf.mxu1  ;;  %v8733_v5 = vpop.f32.mrf.mxu0 }
 0x26f   : > { %15578 = vst [vmem:[#allocation103_spill] sm:$0xff] %v11261_v34  ;;  %v11267_v30 = vadd.f32 %v8733_v5, %v15580_v22  ;;  %v2127_v10 = vadd.f32 %v15584_v35, %v11058_v44  ;;  %v15585_v34 = vld [vmem:[#allocation139_spill] sm:$0xff]  ;;  %v15588_v22 = vld [vmem:[#allocation62_spill] sm:$0xff] }
 0x270   : > { %v2554_v12 = vpop.f32.mrf.mxu1  ;;  %v2699_v7 = vpop.f32.mrf.mxu0  ;;  %v15590_v44 = vld [vmem:[#allocation127_spill] sm:$0xff] }
 0x271   : > { %v11269_v43 = vadd.f32 %v2554_v12, %v2122_v4  ;;  %v11272_v41 = vadd.f32 %v2699_v7, %v15582_v6  ;;  %v15589_v7 = vld [vmem:[#allocation98_spill] sm:$0xff]  ;;  %v9252_v6 = vld [vmem:[#allocation7 + $0x178] sm:$0xff]  }
 0x272   : > { %v2556_v17 = vpop.f32.mrf.mxu1  ;;  %v8736_v0 = vpop.f32.mrf.mxu0  ;;  %8847 = vmatmul.mubr.bf16.gmra.mxu0 %v15583_v18  ;;  %8866 = vmatprep.subr.bf16.mxu1 %v9252_v6 }
 0x273   : > { %15581 = vst [vmem:[#allocation22_spill] sm:$0xff] %v11269_v43  ;;  %v11278_v58 = vadd.f32 %v8736_v0, %v15585_v34  ;;  %8850 = vmatprep.mubr.bf16.mxu0 %v15587_v62  ;;  %v2130_v34 = vadd.f32 %v15590_v44, %v11068_v55  ;;  %v15591_v0 = vld [vmem:[#allocation33_spill] sm:$0xff]  ;;  %8867 = vmatpush3.bf16.msra.mxu1 %v9252_v6  ;;  %v15594_v43 = vld [vmem:[#allocation82_spill] sm:$0xff] }
 0x274   : > { %v2559_v5 = vpop.f32.mrf.mxu1  ;;  %3264 = vmatmul.mubr.bf16.gmra.mxu1 %v15563_v39  ;;  %v2712_v16 = vpop.f32.mrf.mxu0 }
 0x275   : > { %15586 = vst [vmem:[#allocation58_spill] sm:$0xff] %v11278_v58  ;;  %v11282_v4 = vadd.f32 %v2559_v5, %v2127_v10  ;;  %v11285_v12 = vadd.f32 %v2712_v16, %v15588_v22  ;;  %3271 = vmatprep.mubr.bf16.mxu1 %v15589_v7  ;;  %v15593_v5 = vld [vmem:[#allocation66_spill] sm:$0xff] }
 0x276   : > { %v2561_v17 = vpop.f32.mrf.mxu1  ;;  %v8737_v18 = vpop.f32.mrf.mxu0 }
 0x277   : > { %v11291_v35 = vadd.f32 %v8737_v18, %v15591_v0  ;;  %v15595_v17 = vld [vmem:[#allocation129_spill] sm:$0xff]  ;;  %v15597_v0 = vld [vmem:[#allocation47_spill] sm:$0xff] }
 0x278   : > { %v2562_v62 = vpop.f32.mrf.mxu1  ;;  %v2715_v39 = vpop.f32.mrf.mxu0  ;;  %v2135_v58 = vadd.f32 %v15595_v17, %v11074_v8  ;;  %v15596_v18 = vld [vmem:[#allocation85_spill] sm:$0xff]  ;;  %v15600_v8 = vld [vmem:[#allocation131_spill] sm:$0xff] }
 0x279   : > { %15592 = vst [vmem:[#allocation105_spill] sm:$0xff] %v11291_v35  ;;  %v11293_v10 = vadd.f32 %v2562_v62, %v2130_v34  ;;  %v11296_v16 = vadd.f32 %v2715_v39, %v15593_v5  ;;  %v15598_v62 = vld [vmem:[#allocation13_spill] sm:$0xff]  ;;  %v15599_v5 = vld [vmem:[#allocation50_spill] sm:$0xff] }
 0x27a   : > { %v2564_v22 = vpop.f32.mrf.mxu1  ;;  %v8740_v7 = vpop.f32.mrf.mxu0  ;;  %8851 = vmatmul.mubr.bf16.gmra.mxu0 %v15594_v43  ;;  %v9253_v43 = vld [vmem:[#allocation7 + $0xf8] sm:$0xff]  }
 0x27b   : > { %v11302_v55 = vadd.f32 %v8740_v7, %v11033_v37  ;;  %8854 = vmatprep.mubr.bf16.mxu0 %v15596_v18  ;;  %v2138_v37 = vadd.f32 %v15600_v8, %v11084_v29  ;;  %5498 = vmatpush1.bf16.msra.mxu0 %v9253_v43  ;;  %v15607_v43 = vld [vmem:[#allocation51_spill] sm:$0xff] }
 0x27c   : > { %v2567_v44 = vpop.f32.mrf.mxu1  ;;  %3272 = vmatmul.mubr.bf16.gmra.mxu1 %v15597_v0  ;;  %v2728_v6 = vpop.f32.mrf.mxu0 }
 0x27d   : > { %v11306_v34 = vadd.f32 %v2567_v44, %v2135_v58  ;;  %v11309_v39 = vadd.f32 %v2728_v6, %v15598_v62  ;;  %3279 = vmatprep.mubr.bf16.mxu1 %v15599_v5  ;;  %v15602_v58 = vmov 0   ;;  %v15604_v62 = vld [vmem:[#allocation86_spill] sm:$0xff] }
 0x27e   : > { %v2569_v22 = vpop.f32.mrf.mxu1  ;;  %v8741_v35 = vpop.f32.mrf.mxu0  ;;  %5499 = vmatprep.subr.bf16.mxu0 %v15602_v58  ;;  %v15605_v5 = vld [vmem:[#allocation14_spill] sm:$0xff] }
 0x27f   : > { %v11315_v7 = vadd.f32 %v8741_v35, %v11040_v49  ;;  %v2143_v22 = vadd.f32 %v15605_v5, %v11090_v13  ;;  %v15606_v49 = vld [vmem:[#allocation90_spill] sm:$0xff] }
 0x280   : > { %v2570_v17 = vpop.f32.mrf.mxu1  ;;  %v11317_v18 = vpop.f32.mrf.mxu0  ;;  %v15609_v13 = vld [vmem:[#allocation130_spill] sm:$0xff] }
 0x281   : > { %15601 = vst [vmem:[#allocation23_spill] sm:$0xff] %v11315_v7  ;;  %v11320_v44 = vadd.f32 %v2570_v17, %v2138_v37  ;;  %v15608_v17 = vld [vmem:[#allocation99_spill] sm:$0xff] }
 0x282   : > { %v2572_v0 = vpop.f32.mrf.mxu1  ;;  %v8744_v6 = vpop.f32.mrf.mxu0  ;;  %8855 = vmatmul.mubr.bf16.gmra.mxu0 %v15604_v62 }
 0x283   : > { %15603 = vst [vmem:[#allocation65_spill] sm:$0xff] %v11320_v44  ;;  %v11326_v29 = vadd.f32 %v8744_v6, %v11065_v26  ;;  %8858 = vmatprep.mubr.bf16.mxu0 %v15606_v49  ;;  %v9254_v44 = vld [vmem:[#allocation7 + $0xf0] sm:$0xff]   ;;  %v2146_v26 = vadd.f32 %v15609_v13, %v11100_v1 }
 0x284   : > { %v2575_v35 = vpop.f32.mrf.mxu1  ;;  %3280 = vmatmul.mubr.bf16.gmra.mxu1 %v15607_v43  ;;  %v2744_v8 = vpop.f32.mrf.mxu0  ;;  %5500 = vmatpush1.bf16.msra.mxu0 %v9254_v44  ;;  %v15611_v43 = vld [vmem:[#allocation91_spill] sm:$0xff]  ;;  %v15614_v13 = vld [vmem:[#allocation54_spill] sm:$0xff] }
 0x285   : > { %v11330_v7 = vadd.f32 %v2575_v35, %v2143_v22  ;;  %v11333_v37 = vadd.f32 %v2744_v8, %v11049_v23  ;;  %3287 = vmatprep.mubr.bf16.mxu1 %v15608_v17  ;;  %5501 = vmatprep.subr.bf16.mxu0 %v15602_v58  ;;  %v15612_v8 = vld [vmem:[#allocation20_spill] sm:$0xff] }
 0x286   : > { %v2577_v0 = vpop.f32.mrf.mxu1  ;;  %v8745_v62 = vpop.f32.mrf.mxu0  ;;  %v2151_v17 = vadd.f32 %v15612_v8, %v11106_v19 }
 0x287   : > { %v11339_v6 = vadd.f32 %v8745_v62, %v11072_v56  ;;  %v15613_v56 = vld [vmem:[#allocation94_spill] sm:$0xff]  ;;  %v9255_v0 = vld [vmem:[#allocation7 + $0xe8] sm:$0xff]  }
 0x288   : > { %v2578_v5 = vpop.f32.mrf.mxu1  ;;  %v11341_v49 = vpop.f32.mrf.mxu0  ;;  %5502 = vmatpush1.bf16.msra.mxu0 %v9255_v0 }
 0x289   : > { %15610 = vst [vmem:[#allocation106_spill] sm:$0xff] %v11339_v6  ;;  %v11343_v22 = vadd.f32 %v2578_v5, %v2146_v26  ;;  %5503 = vmatprep.subr.bf16.mxu0 %v15602_v58 }
 0x28a   : > { %v2580_v23 = vpop.f32.mrf.mxu1  ;;  %v8748_v35 = vpop.f32.mrf.mxu0  ;;  %8859 = vmatmul.mubr.bf16.gmra.mxu0 %v15611_v43 }
 0x28b   : > { %v11350_v1 = vadd.f32 %v8748_v35, %v11097_v15  ;;  %8862 = vmatprep.mubr.bf16.mxu0 %v15613_v56  ;;  %v15615_v23 = vld [vmem:[#allocation57_spill] sm:$0xff] }
 0x28c   : > { %v2583_v62 = vpop.f32.mrf.mxu1  ;;  %3288 = vmatmul.mubr.bf16.gmra.mxu1 %v15614_v13  ;;  %v2760_v44 = vpop.f32.mrf.mxu0  ;;  %v15616_v15 = vld [vmem:[#allocation133_spill] sm:$0xff] }
 0x28d   : > { %v11354_v26 = vadd.f32 %v2583_v62, %v2151_v17  ;;  %v11357_v5 = vadd.f32 %v2760_v44, %v11081_v42  ;;  %3295 = vmatprep.mubr.bf16.mxu1 %v15615_v23  ;;  %v2154_v35 = vadd.f32 %v15616_v15, %v11116_v51  ;;  %v9256_v23 = vld [vmem:[#allocation7 + $0xe0] sm:$0xff]  }
 0x28e   : > { %v2585_v6 = vpop.f32.mrf.mxu1  ;;  %v8749_v19 = vpop.f32.mrf.mxu0  ;;  %v15619_v15 = vld [vmem:[#allocation56_spill] sm:$0xff]  ;;  %5504 = vmatpush1.bf16.msra.mxu0 %v9256_v23 }
 0x28f   : > { %v11364_v8 = vadd.f32 %v8749_v19, %v11104_v53  ;;  %v15618_v6 = vld [vmem:[#allocation17_spill] sm:$0xff]  ;;  %5505 = vmatprep.subr.bf16.mxu0 %v15602_v58  ;;  %v15622_v23 = vld [vmem:[#allocation24_spill] sm:$0xff] }
 0x290   : > { %v2586_v56 = vpop.f32.mrf.mxu1  ;;  %v11366_v13 = vpop.f32.mrf.mxu0  ;;  %v2159_v0 = vadd.f32 %v15618_v6, %v11122_v24  ;;  %v15621_v24 = vld [vmem:[#allocation132_spill] sm:$0xff]  ;;  %v9257_v6 = vld [vmem:[#allocation7 + $0x170] sm:$0xff]  }
 0x291   : > { %v11368_v17 = vadd.f32 %v2586_v56, %v2154_v35  ;;  %v15620_v56 = vld [vmem:[#allocation61_spill] sm:$0xff]  ;;  %8868 = vmatprep.subr.bf16.mxu1 %v9257_v6 }
 0x292   : > { %v2588_v42 = vpop.f32.mrf.mxu1  ;;  %v8752_v62 = vpop.f32.mrf.mxu0  ;;  %8863 = vmatmul.mubr.bf16.gmra.mxu0 %v15611_v43  ;;  %8869 = vmatpush3.bf16.msra.mxu1 %v9257_v6 }
 0x293   : > { %15617 = vst [vmem:[#allocation109_spill] sm:$0xff] %v11368_v17  ;;  %v11374_v44 = vadd.f32 %v8752_v62, %v11129_v21  ;;  %v2162_v21 = vadd.f32 %v15621_v24, %v11132_v2  ;;  %v9258_v2 = vld [vmem:[#allocation7 + $0xd8] sm:$0xff]  }
 0x294   : > { %v2591_v51 = vpop.f32.mrf.mxu1  ;;  %3296 = vmatmul.mubr.bf16.gmra.mxu1 %v15619_v15  ;;  %v2776_v53 = vpop.f32.mrf.mxu0  ;;  %5506 = vmatpush1.bf16.msra.mxu0 %v9258_v2 }
 0x295   : > { %v11377_v19 = vadd.f32 %v2591_v51, %v2159_v0  ;;  %v11380_v35 = vadd.f32 %v2776_v53, %v11113_v48  ;;  %3303 = vmatprep.mubr.bf16.mxu1 %v15620_v56  ;;  %v2167_v56 = vadd.f32 %v15622_v23, %v11138_v47  ;;  %5507 = vmatprep.subr.bf16.mxu0 %v15602_v58  ;;  %v15627_v47 = vld [vmem:[#allocation135_spill] sm:$0xff] }
 0x296   : > { %v2593_v43 = vpop.f32.mrf.mxu1  ;;  %v8753_v42 = vpop.f32.mrf.mxu0 }
 0x297   : > { %v11387_v62 = vadd.f32 %v8753_v42, %v11136_v45  ;;  %v15624_v45 = vld [vmem:[#allocation60_spill] sm:$0xff] }
 0x298   : > { %v2594_v15 = vpop.f32.mrf.mxu1  ;;  %v11389_v0 = vpop.f32.mrf.mxu0 }
 0x299   : > { %v11391_v51 = vadd.f32 %v2594_v15, %v2162_v21  ;;  %v15626_v15 = vld [vmem:[#allocation64_spill] sm:$0xff] }
 0x29a   : > { %v2596_v48 = vpop.f32.mrf.mxu1  ;;  %v8756_v53 = vpop.f32.mrf.mxu0 }
 0x29b   : > { %v11396_v43 = vadd.f32 %v8756_v53, %v11161_v60  ;;  %v2170_v60 = vadd.f32 %v15627_v47, %v11148_v33  ;;  %v15631_v47 = vld [vmem:[#allocation67_spill] sm:$0xff] }
 0x29c   : > { %v2599_v24 = vpop.f32.mrf.mxu1  ;;  %3304 = vmatmul.mubr.bf16.gmra.mxu1 %v15624_v45  ;;  %v2792_v42 = vpop.f32.mrf.mxu0 }
 0x29d   : > { %15623 = vst [vmem:[#allocation26_spill] sm:$0xff] %v11396_v43  ;;  %v11399_v17 = vadd.f32 %v2599_v24, %v2167_v56  ;;  %v11402_v21 = vadd.f32 %v2792_v42, %v11145_v38  ;;  %3311 = vmatprep.mubr.bf16.mxu1 %v15626_v15  ;;  %v15628_v42 = vld [vmem:[#allocation21_spill] sm:$0xff] }
 0x29e   : > { %v2601_v6 = vpop.f32.mrf.mxu1  ;;  %v8757_v48 = vpop.f32.mrf.mxu0  ;;  %v2175_v2 = vadd.f32 %v15628_v42, %v11154_v50  ;;  %v15632_v50 = vld [vmem:[#allocation134_spill] sm:$0xff] }
 0x29f   : > { %15625 = vst [vmem:[#allocation72_spill] sm:$0xff] %v11402_v21  ;;  %v11409_v53 = vadd.f32 %v8757_v48, %v11168_v3  ;;  %v9259_v6 = vld [vmem:[#allocation7 + $0xd0] sm:$0xff]   ;;  %v15630_v21 = vld [vmem:[#allocation63_spill] sm:$0xff] }
 0x2a0   : > { %v2602_v23 = vpop.f32.mrf.mxu1  ;;  %v11411_v45 = vpop.f32.mrf.mxu0  ;;  %5508 = vmatpush1.bf16.msra.mxu0 %v9259_v6 }
 0x2a1   : > { %v11413_v56 = vadd.f32 %v2602_v23, %v2170_v60  ;;  %5509 = vmatprep.subr.bf16.mxu0 %v15602_v58 }
 0x2a2   : > { %v2604_v38 = vpop.f32.mrf.mxu1  ;;  %v8760_v24 = vpop.f32.mrf.mxu0 }
 0x2a3   : > { %v11418_v15 = vadd.f32 %v8760_v24, %v11193_v36  ;;  %v2178_v36 = vadd.f32 %v15632_v50, %v11164_v59  ;;  %v15637_v50 = vld [vmem:[#allocation70_spill] sm:$0xff] }
 0x2a4   : > { %v2607_v43 = vpop.f32.mrf.mxu1  ;;  %3312 = vmatmul.mubr.bf16.gmra.mxu1 %v15630_v21  ;;  %v2808_v33 = vpop.f32.mrf.mxu0 }
 0x2a5   : > { %15629 = vst [vmem:[#allocation108_spill] sm:$0xff] %v11418_v15  ;;  %v11421_v3 = vadd.f32 %v2607_v43, %v2175_v2  ;;  %v11424_v48 = vadd.f32 %v2808_v33, %v11177_v11  ;;  %3319 = vmatprep.mubr.bf16.mxu1 %v15631_v47  ;;  %v15633_v2 = vld [vmem:[#allocation29_spill] sm:$0xff] }
 0x2a6   : > { %v2609_v60 = vpop.f32.mrf.mxu1  ;;  %v8761_v23 = vpop.f32.mrf.mxu0  ;;  %v2183_v6 = vadd.f32 %v15633_v2, %v11170_v52  ;;  %v9260_v47 = vld [vmem:[#allocation7 + $0xc8] sm:$0xff]  }
 0x2a7   : > { %v11431_v38 = vadd.f32 %v8761_v23, %v11200_v31  ;;  %v15635_v15 = vld [vmem:[#allocation69_spill] sm:$0xff]  ;;  %5510 = vmatpush1.bf16.msra.mxu0 %v9260_v47 }
 0x2a8   : > { %v2610_v21 = vpop.f32.mrf.mxu1  ;;  %v11433_v24 = vpop.f32.mrf.mxu0  ;;  %5511 = vmatprep.subr.bf16.mxu0 %v15602_v58  ;;  %v15638_v52 = vld [vmem:[#allocation137_spill] sm:$0xff] }
 0x2a9   : > { %v11435_v43 = vadd.f32 %v2610_v21, %v2178_v36 }
 0x2aa   : > { %v2612_v11 = vpop.f32.mrf.mxu1  ;;  %v8764_v42 = vpop.f32.mrf.mxu0 }
 0x2ab   : > { %v11440_v33 = vadd.f32 %v8764_v42, %v11234_v9  ;;  %v2186_v9 = vadd.f32 %v15638_v52, %v11180_v61  ;;  %v15645_v52 = vld [vmem:[#allocation73_spill] sm:$0xff] }
 0x2ac   : > { %v2615_v60 = vpop.f32.mrf.mxu1  ;;  %3320 = vmatmul.mubr.bf16.gmra.mxu1 %v15635_v15  ;;  %v2824_v59 = vpop.f32.mrf.mxu0 }
 0x2ad   : > { %15634 = vst [vmem:[#allocation32_spill] sm:$0xff] %v11440_v33  ;;  %v11443_v31 = vadd.f32 %v2615_v60, %v2183_v6  ;;  %v11446_v23 = vadd.f32 %v2824_v59, %v11210_v57  ;;  %3327 = vmatprep.mubr.bf16.mxu1 %v15637_v50  ;;  %v15641_v60 = vld [vmem:[#allocation25_spill] sm:$0xff]  ;;  %v9261_v50 = vld [vmem:[#allocation7 + $0xc0] sm:$0xff]   ;;  %v15643_v33 = vld [vmem:[#allocation71_spill] sm:$0xff] }
 0x2ae   : > { %v2617_v36 = vpop.f32.mrf.mxu1  ;;  %v8765_v21 = vpop.f32.mrf.mxu0  ;;  %v2191_v47 = vadd.f32 %v15641_v60, %v11186_v63  ;;  %5512 = vmatpush1.bf16.msra.mxu0 %v9261_v50  ;;  %v15646_v63 = vld [vmem:[#allocation136_spill] sm:$0xff] }
 0x2af   : > { %15636 = vst [vmem:[#allocation27_spill] sm:$0xff] %v11446_v23  ;;  %v11453_v11 = vadd.f32 %v8765_v21, %v11245_v27  ;;  %5513 = vmatprep.subr.bf16.mxu0 %v15602_v58 }
 0x2b0   : > { %v2618_v15 = vpop.f32.mrf.mxu1  ;;  %v11455_v42 = vpop.f32.mrf.mxu0 }
 0x2b1   : > { %15639 = vst [vmem:[#allocation79_spill] sm:$0xff] %v11453_v11  ;;  %v11457_v2 = vadd.f32 %v2618_v15, %v2186_v9  ;;  %v9264_v11 = vld [vmem:[#allocation7 + $0x130] sm:$0xff]  }
 0x2b2   : > { %v2620_v57 = vpop.f32.mrf.mxu1  ;;  %v8768_v6 = vpop.f32.mrf.mxu0 }
 0x2b3   : > { %15640 = vst [vmem:[#allocation110_spill] sm:$0xff] %v11457_v2  ;;  %v11462_v59 = vadd.f32 %v8768_v6, %v11282_v4  ;;  %v2194_v4 = vadd.f32 %v15646_v63, %v11196_v32  ;;  %v9262_v6 = vld [vmem:[#allocation7 + $0x168] sm:$0xff]  }
 0x2b4   : > { %v2623_v36 = vpop.f32.mrf.mxu1  ;;  %3328 = vmatmul.mubr.bf16.gmra.mxu1 %v15643_v33  ;;  %v2840_v61 = vpop.f32.mrf.mxu0  ;;  %8870 = vmatprep.subr.bf16.mxu1 %v9262_v6 }
 0x2b5   : > { %15642 = vst [vmem:[#allocation113_spill] sm:$0xff] %v11462_v59  ;;  %v2624_v27 = vadd.f32 %v2623_v36, %v2191_v47  ;;  %v11466_v21 = vadd.f32 %v2840_v61, %v11258_v14  ;;  %3335 = vmatprep.mubr.bf16.mxu1 %v15645_v52  ;;  %8871 = vmatpush3.bf16.msra.mxu1 %v9262_v6  ;;  %v9263_v61 = vld [vmem:[#allocation7 + $0x138] sm:$0xff]  }
 0x2b6   : > { %v2625_v9 = vpop.f32.mrf.mxu1  ;;  %v8769_v15 = vpop.f32.mrf.mxu0  ;;  %5514 = vmatpush2.bf16.msra.mxu0 %v9263_v61 }
 0x2b7   : > { %15644 = vst [vmem:[#allocation28_spill] sm:$0xff] %v11466_v21  ;;  %v11473_v57 = vadd.f32 %v8769_v15, %v11293_v10  ;;  %v15649_v9 = vld [vmem:[#allocation75_spill] sm:$0xff]  ;;  %v15651_v15 = vld [vmem:[#allocation101_spill] sm:$0xff]  ;;  %5515 = vmatprep.subr.bf16.mxu0 %v15602_v58 }
 0x2b8   : > { %v2626_v33 = vpop.f32.mrf.mxu1  ;;  %v11475_v60 = vpop.f32.mrf.mxu0 }
 0x2b9   : > { %15647 = vst [vmem:[#allocation84_spill] sm:$0xff] %v11473_v57  ;;  %v2627_v47 = vadd.f32 %v2626_v33, %v2194_v4 }
 0x2ba   : > { %v2628_v14 = vpop.f32.mrf.mxu1  ;;  %v8772_v36 = vpop.f32.mrf.mxu0  ;;  %5516 = vmatpush2.bf16.msra.mxu0 %v9264_v11 }
 0x2bb   : > { %v11478_v50 = vadd.f32 %v8772_v36, %v11330_v7  ;;  %5517 = vmatprep.subr.bf16.mxu0 %v15602_v58 }
 0x2bc   : > { %v3145_v52 = vpop.f32.mrf.mxu1  ;;  %3336 = vmatmul.mubr.bf16.gmra.mxu1 %v15649_v9  ;;  %v2856_v32 = vpop.f32.mrf.mxu0 }
 0x2bd   : > { %15648 = vst [vmem:[#allocation116_spill] sm:$0xff] %v11478_v50  ;;  %v11482_v10 = vadd.f32 %v2856_v32, %v11306_v34  ;;  %3343 = vmatprep.mubr.bf16.mxu1 %v15651_v15  ;;  %v15654_v32 = vld [vmem:[#allocation78_spill] sm:$0xff] }
 0x2be   : > { %v3147_v63 = vpop.f32.mrf.mxu1  ;;  %v8773_v4 = vpop.f32.mrf.mxu0 }
 0x2bf   : > { %15650 = vst [vmem:[#allocation112_spill] sm:$0xff] %v11482_v10  ;;  %v11487_v6 = vadd.f32 %v8773_v4, %v11343_v22  ;;  %v15656_v63 = vld [vmem:[#allocation104_spill] sm:$0xff] }
 0x2c0   : > { %v3148_v7 = vpop.f32.mrf.mxu1  ;;  %v11489_v33 = vpop.f32.mrf.mxu0 }
 0x2c1   : > { %15652 = vst [vmem:[#allocation31_spill] sm:$0xff] %v11487_v6 }
 0x2c2   : > { %v3150_v14 = vpop.f32.mrf.mxu1  ;;  %v8776_v36 = vpop.f32.mrf.mxu0 }
 0x2c3   : > { %v11492_v9 = vadd.f32 %v8776_v36, %v11377_v19 }
 0x2c4   : > { %v3153_v34 = vpop.f32.mrf.mxu1  ;;  %3344 = vmatmul.mubr.bf16.gmra.mxu1 %v15654_v32  ;;  %v2872_v15 = vpop.f32.mrf.mxu0 }
 0x2c5   : > { %15653 = vst [vmem:[#allocation89_spill] sm:$0xff] %v11492_v9  ;;  %v11496_v61 = vadd.f32 %v2872_v15, %v11354_v26  ;;  %3351 = vmatprep.mubr.bf16.mxu1 %v15656_v63  ;;  %v15659_v9 = vld [vmem:[#allocation81_spill] sm:$0xff] }
 0x2c6   : > { %v3155_v2 = vpop.f32.mrf.mxu1  ;;  %v8777_v22 = vpop.f32.mrf.mxu0 }
 0x2c7   : > { %15655 = vst [vmem:[#allocation114_spill] sm:$0xff] %v11496_v61  ;;  %v11500_v4 = vadd.f32 %v8777_v22, %v11391_v51  ;;  %v15661_v2 = vld [vmem:[#allocation107_spill] sm:$0xff] }
 0x2c8   : > { %v3156_v6 = vpop.f32.mrf.mxu1  ;;  %v11502_v14 = vpop.f32.mrf.mxu0 }
 0x2c9   : > { %15657 = vst [vmem:[#allocation118_spill] sm:$0xff] %v11500_v4 }
 0x2ca   : > { %v3158_v50 = vpop.f32.mrf.mxu1  ;;  %v8780_v19 = vpop.f32.mrf.mxu0 }
 0x2cb   : > { %v11505_v36 = vadd.f32 %v8780_v19, %v11421_v3 }
 0x2cc   : > { %v3161_v32 = vpop.f32.mrf.mxu1  ;;  %3352 = vmatmul.mubr.bf16.gmra.mxu1 %v15659_v9  ;;  %v2888_v26 = vpop.f32.mrf.mxu0  ;;  %v15664_v9 = vld [vmem:[#allocation83_spill] sm:$0xff] }
 0x2cd   : > { %15658 = vst [vmem:[#allocation48_spill] sm:$0xff] %v11505_v36  ;;  %v11509_v15 = vadd.f32 %v2888_v26, %v11399_v17  ;;  %3359 = vmatprep.mubr.bf16.mxu1 %v15661_v2  ;;  %v15666_v26 = vld [vmem:[#allocation111_spill] sm:$0xff] }
 0x2ce   : > { %v3163_v63 = vpop.f32.mrf.mxu1  ;;  %v8781_v51 = vpop.f32.mrf.mxu0 }
 0x2cf   : > { %15660 = vst [vmem:[#allocation34_spill] sm:$0xff] %v11509_v15  ;;  %v11513_v22 = vadd.f32 %v8781_v51, %v11435_v43 }
 0x2d0   : > { %v3164_v4 = vpop.f32.mrf.mxu1  ;;  %v11515_v50 = vpop.f32.mrf.mxu0 }
 0x2d1   : > { %15662 = vst [vmem:[#allocation93_spill] sm:$0xff] %v11513_v22 }
 0x2d2   : > { %v3166_v61 = vpop.f32.mrf.mxu1  ;;  %v8784_v3 = vpop.f32.mrf.mxu0 }
 0x2d3   : > { %v11517_v19 = vadd.f32 %v8784_v3, %v2624_v27 }
 0x2d4   : > { %v3169_v36 = vpop.f32.mrf.mxu1  ;;  %3360 = vmatmul.mubr.bf16.gmra.mxu1 %v15664_v9  ;;  %v2904_v10 = vpop.f32.mrf.mxu0 }
 0x2d5   : > { %15663 = vst [vmem:[#allocation121_spill] sm:$0xff] %v11517_v19  ;;  %v11521_v17 = vadd.f32 %v2904_v10, %v11443_v31  ;;  %3367 = vmatprep.mubr.bf16.mxu1 %v15666_v26  ;;  %v15669_v19 = vld [vmem:[#allocation87_spill] sm:$0xff] }
 0x2d6   : > { %v3171_v2 = vpop.f32.mrf.mxu1  ;;  %v8785_v63 = vpop.f32.mrf.mxu0  ;;  %v15670_v10 = vld [vmem:[#allocation115_spill] sm:$0xff] }
 0x2d7   : > { %15665 = vst [vmem:[#allocation117_spill] sm:$0xff] %v11521_v17  ;;  %v11524_v43 = vadd.f32 %v8785_v63, %v2627_v47 }
 0x2d8   : > { %v3172_v51 = vpop.f32.mrf.mxu1  ;;  %v11526_v22 = vpop.f32.mrf.mxu0 }
 0x2d9   : > { %15667 = vst [vmem:[#allocation36_spill] sm:$0xff] %v11524_v43  ;;  %15668 = vst [vmem:[#allocation95_spill] sm:$0xff] %v11526_v22 }
 0x2da   : > { %v3174_v61 = vpop.f32.mrf.mxu1  ;;  %v8804_v15 = vpop.f32.mrf.mxu0 }
 0x2db   : > { %v3443_v27 = vadd.f32 %v8804_v15, %v3153_v34 }
 0x2dc   : > { %v3177_v3 = vpop.f32.mrf.mxu1  ;;  %3368 = vmatmul.mubr.bf16.gmra.mxu1 %v15669_v19  ;;  %v3434_v9 = vpop.f32.mrf.mxu0 }
 0x2dd   : > { %v11530_v57 = vadd.f32 %v3443_v27, %v11206_v40  ;;  %v3435_v31 = vadd.f32 %v3434_v9, %v3145_v52  ;;  %3375 = vmatprep.mubr.bf16.mxu1 %v15670_v10 }
 0x2de   : > { %v3179_v26 = vpop.f32.mrf.mxu1  ;;  %v8805_v2 = vpop.f32.mrf.mxu0 }
 0x2df   : > { %v11534_v47 = vadd.f32 %v3435_v31, %v11213_v46  ;;  %v3446_v63 = vadd.f32 %v8805_v2, %v3156_v6  ;;  %v15671_v46 = vld [vmem:[#allocation88_spill] sm:$0xff]  ;;  %v3831_v2 = vmul.f32 %v11530_v57, %v11530_v57 }
 0x2e0   : > { %v11536_v43 = vpop.f32.mrf.mxu1  ;;  %v3437_v61 = vpop.f32.mrf.mxu0 }
 0x2e1   : > { %v11539_v34 = vadd.f32 %v3446_v63, %v11219_v20  ;;  %v3438_v15 = vadd.f32 %v3437_v61, %v3148_v7  ;;  %v3829_v27 = vmul.f32 %v11534_v47, %v11534_v47 }
 0x2e2   : > { %v3182_v19 = vpop.f32.mrf.mxu1  ;;  %v8808_v22 = vpop.f32.mrf.mxu0 }
 0x2e3   : > { %v11542_v40 = vadd.f32 %v3438_v15, %v11224_v28  ;;  %v3459_v52 = vadd.f32 %v8808_v22, %v3169_v36  ;;  %v15672_v28 = vld [vmem:[#allocation120_spill] sm:$0xff]  ;;  %v15673_v15 = vld [vmem:[#allocation102_spill] sm:$0xff] }
 0x2e4   : > { %v3185_v9 = vpop.f32.mrf.mxu1  ;;  %3376 = vmatmul.mubr.bf16.gmra.mxu1 %v15671_v46  ;;  %v3450_v6 = vpop.f32.mrf.mxu0 }
 0x2e5   : > { %v3753_v31 = vadd.f32 %v11542_v40, %v11534_v47  ;;  %v3830_v20 = vmul.f32 %v11542_v40, %v11542_v40  ;;  %v11552_v7 = vadd.f32 %v3459_v52, %v11230_v54  ;;  %v3451_v26 = vadd.f32 %v3450_v6, %v3161_v32  ;;  %3383 = vmatprep.mubr.bf16.mxu1 %v15672_v28 }
 0x2e6   : > { %v3187_v36 = vpop.f32.mrf.mxu1  ;;  %v8809_v22 = vpop.f32.mrf.mxu0  ;;  %v3832_v54 = vmul.f32 %v11539_v34, %v11539_v34 }
 0x2e7   : > { %v3754_v63 = vadd.f32 %v3753_v31, %v11530_v57  ;;  %v3893_v61 = vadd.f32 %v3830_v20, %v3829_v27  ;;  %v11559_v19 = vadd.f32 %v3451_v26, %v15673_v15  ;;  %v3462_v17 = vadd.f32 %v8809_v22, %v3172_v51  ;;  %v15674_v26 = vld [vmem:[#allocation19_spill] sm:$0xff] }
 0x2e8   : > { %v3188_v59 = vpop.f32.mrf.mxu1  ;;  %v3453_v21 = vpop.f32.mrf.mxu0 }
 0x2e9   : > { %v3894_v32 = vadd.f32 %v3893_v61, %v3831_v2  ;;  %v3755_v52 = vadd.f32 %v3754_v63, %v11539_v34  ;;  %v3454_v6 = vadd.f32 %v3453_v21, %v3164_v4  ;;  %v3833_v28 = vmul.f32 %v11559_v19, %v11559_v19  ;;  %v15675_v61 = vld [vmem:[#allocation92_spill] sm:$0xff] }
 0x2ea   : > { %v11567_v36 = vadd.f32 %v3462_v17, %v11243_v25  ;;  %v3190_v27 = vpop.f32.mrf.mxu1  ;;  %v8812_v31 = vpop.f32.mrf.mxu0  ;;  %v15676_v17 = vld [vmem:[#allocation53_spill] sm:$0xff] }
 0x2eb   : > { %v3756_v20 = vadd.f32 %v3755_v52, %v11559_v19  ;;  %v3895_v51 = vadd.f32 %v3894_v32, %v3832_v54  ;;  %v11571_v22 = vadd.f32 %v3454_v6, %v15674_v26  ;;  %v3475_v15 = vadd.f32 %v8812_v31, %v3185_v9  ;;  %v9267_v9 = vld [vmem:[#allocation7 + $0x160] sm:$0xff]   ;;  %v15677_v26 = vld [vmem:[#allocation103_spill] sm:$0xff] }
 0x2ec   : > { %v3193_v2 = vpop.f32.mrf.mxu1  ;;  %3384 = vmatmul.mubr.bf16.gmra.mxu1 %v15675_v61  ;;  %v3466_v21 = vpop.f32.mrf.mxu0  ;;  %v3835_v6 = vmul.f32 %v11552_v7, %v11552_v7  ;;  %8872 = vmatprep.subr.bf16.mxu1 %v9267_v9 }
 0x2ed   : > { %v3896_v4 = vadd.f32 %v3895_v51, %v3833_v28  ;;  %v3757_v63 = vadd.f32 %v3756_v20, %v11571_v22  ;;  %v3834_v25 = vmul.f32 %v11571_v22, %v11571_v22  ;;  %v11578_v27 = vadd.f32 %v3475_v15, %v15676_v17  ;;  %3391 = vmatprep.mubr.bf16.mxu1 %v15670_v10  ;;  %v9265_v20 = vld [vmem:[#allocation7 + $0x128] sm:$0xff]  }
 0x2ee   : > { %v3467_v54 = vadd.f32 %v3466_v21, %v3177_v3  ;;  %v3195_v32 = vpop.f32.mrf.mxu1  ;;  %v8813_v52 = vpop.f32.mrf.mxu0  ;;  %v3836_v51 = vmul.f32 %v11567_v36, %v11567_v36  ;;  %8873 = vmatpush3.bf16.msra.mxu1 %v9267_v9  ;;  %5518 = vmatpush2.bf16.msra.mxu0 %v9265_v20 }
 0x2ef   : > { %v3758_v28 = vadd.f32 %v3757_v63, %v11552_v7  ;;  %v3897_v31 = vadd.f32 %v3896_v4, %v3834_v25  ;;  %v3478_v21 = vadd.f32 %v8813_v52, %v3188_v59  ;;  %5519 = vmatprep.subr.bf16.mxu0 %v15602_v58 }
 0x2f0   : > { %v11588_v15 = vadd.f32 %v3467_v54, %v15677_v26  ;;  %v3196_v3 = vpop.f32.mrf.mxu1  ;;  %v3469_v10 = vpop.f32.mrf.mxu0 }
 0x2f1   : > { %v3898_v11 = vadd.f32 %v3897_v31, %v3835_v6  ;;  %v3759_v61 = vadd.f32 %v3758_v28, %v11567_v36  ;;  %v3470_v17 = vadd.f32 %v3469_v10, %v11536_v43  ;;  %v9266_v6 = vld [vmem:[#allocation7 + $0x120] sm:$0xff]   ;;  %v11601_v52 = vadd.f32 %v3478_v21, %v11267_v30 }
 0x2f2   : > { %v3198_v4 = vpop.f32.mrf.mxu1  ;;  %v8816_v63 = vpop.f32.mrf.mxu0  ;;  %v3837_v32 = vmul.f32 %v11588_v15, %v11588_v15  ;;  %5520 = vmatpush2.bf16.msra.mxu0 %v9266_v6  ;;  %v3839_v10 = vmul.f32 %v11578_v27, %v11578_v27 }
 0x2f3   : > { %v3760_v25 = vadd.f32 %v3759_v61, %v11588_v15  ;;  %v3899_v54 = vadd.f32 %v3898_v11, %v3836_v51  ;;  %v11596_v26 = vadd.f32 %v3470_v17, %v11272_v41  ;;  %5521 = vmatprep.subr.bf16.mxu0 %v15602_v58  ;;  %v9268_v61 = vld [vmem:[#allocation7 + $0x118] sm:$0xff]  }
 0x2f4   : > { %v3201_v28 = vpop.f32.mrf.mxu1  ;;  %3392 = vmatmul.mubr.bf16.gmra.mxu1 %v15671_v46  ;;  %v3482_v59 = vpop.f32.mrf.mxu0 }
 0x2f5   : > { %v3900_v43 = vadd.f32 %v3899_v54, %v3837_v32  ;;  %v3761_v9 = vadd.f32 %v3760_v25, %v11596_v26  ;;  %v3838_v31 = vmul.f32 %v11596_v26, %v11596_v26  ;;  %v3483_v20 = vadd.f32 %v3482_v59, %v3193_v2 }
 0x2f6   : > { %v3203_v51 = vpop.f32.mrf.mxu1  ;;  %v8817_v41 = vpop.f32.mrf.mxu0  ;;  %v3840_v2 = vmul.f32 %v11601_v52, %v11601_v52  ;;  %v3491_v25 = vadd.f32 %v8816_v63, %v3201_v28  ;;  %5522 = vmatpush2.bf16.msra.mxu0 %v9268_v61  ;;  %v15679_v28 = vld [vmem:[#allocation58_spill] sm:$0xff] }
 0x2f7   : > { %v3762_v11 = vadd.f32 %v3761_v9, %v11578_v27  ;;  %v3901_v46 = vadd.f32 %v3900_v43, %v3838_v31  ;;  %v11611_v30 = vadd.f32 %v3483_v20, %v11285_v12  ;;  %5523 = vmatprep.subr.bf16.mxu0 %v15602_v58  ;;  %v9270_v31 = vld [vmem:[#allocation7 + $0x158] sm:$0xff]  }
 0x2f8   : > { %v3204_v21 = vpop.f32.mrf.mxu1  ;;  %v3485_v17 = vpop.f32.mrf.mxu0  ;;  %8874 = vmatprep.subr.bf16.mxu1 %v9270_v31 }
 0x2f9   : > { %v3902_v4 = vadd.f32 %v3901_v46, %v3839_v10  ;;  %v3763_v32 = vadd.f32 %v3762_v11, %v11601_v52  ;;  %v3486_v54 = vadd.f32 %v3485_v17, %v3196_v3  ;;  %v3841_v9 = vmul.f32 %v11611_v30, %v11611_v30  ;;  %v9269_v46 = vld [vmem:[#allocation7 + $0x110] sm:$0xff]   ;;  %8875 = vmatpush3.bf16.msra.mxu1 %v9270_v31  ;;  %v9272_v31 = vld [vmem:[#allocation7 + $0x108] sm:$0xff]  }
 0x2fa   : > { %v3206_v6 = vpop.f32.mrf.mxu1  ;;  %v8820_v59 = vpop.f32.mrf.mxu0  ;;  %v11624_v10 = vadd.f32 %v3491_v25, %v15679_v28  ;;  %v3494_v11 = vadd.f32 %v8817_v41, %v3204_v21  ;;  %5524 = vmatpush2.bf16.msra.mxu0 %v9269_v46  ;;  %v15680_v21 = vld [vmem:[#allocation105_spill] sm:$0xff] }
 0x2fb   : > { %v3764_v43 = vadd.f32 %v3763_v32, %v11611_v30  ;;  %v3903_v12 = vadd.f32 %v3902_v4, %v3840_v2  ;;  %v11621_v20 = vadd.f32 %v3486_v54, %v11296_v16  ;;  %v9271_v16 = vld [vmem:[#allocation7 + $0x150] sm:$0xff]   ;;  %5525 = vmatprep.subr.bf16.mxu0 %v15602_v58 }
 0x2fc   : > { %v3209_v51 = vpop.f32.mrf.mxu1  ;;  %v3498_v63 = vpop.f32.mrf.mxu0  ;;  %v3843_v41 = vmul.f32 %v11624_v10, %v11624_v10  ;;  %v11633_v25 = vadd.f32 %v3494_v11, %v15680_v21  ;;  %8876 = vmatprep.subr.bf16.mxu1 %v9271_v16 }
 0x2fd   : > { %15678 = vst [vmem:[#allocation119_spill] sm:$0xff] %v11621_v20  ;;  %v3904_v3 = vadd.f32 %v3903_v12, %v3841_v9  ;;  %v3765_v61 = vadd.f32 %v3764_v43, %v11621_v20  ;;  %v3842_v17 = vmul.f32 %v11621_v20, %v11621_v20  ;;  %v3499_v9 = vadd.f32 %v3498_v63, %v3209_v51 }
 0x2fe   : > { %v3211_v2 = vpop.f32.mrf.mxu1  ;;  %v8821_v4 = vpop.f32.mrf.mxu0  ;;  %8877 = vmatpush3.bf16.msra.mxu1 %v9271_v16  ;;  %5526 = vmatpush2.bf16.msra.mxu0 %v9272_v31  ;;  %v3844_v11 = vmul.f32 %v11633_v25, %v11633_v25  ;;  %v9274_v16 = vld [vmem:[#allocation7 + $0x140] sm:$0xff]  }
 0x2ff   : > { %v3905_v32 = vadd.f32 %v3904_v3, %v3842_v17  ;;  %v3766_v43 = vadd.f32 %v3765_v61, %v11624_v10  ;;  %v9273_v17 = vld [vmem:[#allocation7 + $0x148] sm:$0xff]   ;;  %v11641_v21 = vadd.f32 %v3499_v9, %v11309_v39  ;;  %5527 = vmatprep.subr.bf16.mxu0 %v15602_v58 }
 0x300   : > { %v3212_v54 = vpop.f32.mrf.mxu1  ;;  %v3501_v6 = vpop.f32.mrf.mxu0  ;;  %v15681_v2 = vld [vmem:[#allocation37_spill] sm:$0xff]  ;;  %8878 = vmatprep.subr.bf16.mxu1 %v9273_v17 }
 0x301   : > { %v3906_v46 = vadd.f32 %v3905_v32, %v3843_v41  ;;  %v3502_v3 = vadd.f32 %v3501_v6, %v3212_v54  ;;  %v2732_v23 = vadd.f32 %v11317_v18, %v15681_v2  ;;  %15682 = vst [vmem:[#allocation123_spill] sm:$0xff] %v11641_v21  ;;  %v3767_v51 = vadd.f32 %v3766_v43, %v11633_v25  ;;  %v9275_v32 = vld [vmem:[#allocation7 + $0x100] sm:$0xff]  }
 0x302   : > { %v3214_v12 = vpop.f32.mrf.mxu1  ;;  %v8824_v28 = vpop.f32.mrf.mxu0  ;;  %8879 = vmatpush3.bf16.msra.mxu1 %v9273_v17  ;;  %5528 = vmatpush2.bf16.msra.mxu0 %v9275_v32  ;;  %v3845_v43 = vmul.f32 %v11641_v21, %v11641_v21 }
 0x303   : > { %v3907_v54 = vadd.f32 %v3906_v46, %v3844_v11  ;;  %v11645_v18 = vadd.f32 %v3502_v3, %v2732_v23  ;;  %8880 = vmatprep.subr.bf16.mxu1 %v9274_v16  ;;  %v3768_v39 = vadd.f32 %v3767_v51, %v11641_v21  ;;  %v15685_v46 = vld [vmem:[#allocation23_spill] sm:$0xff] }
 0x304   : > { %v3217_v20 = vpop.f32.mrf.mxu1  ;;  %v3514_v61 = vpop.f32.mrf.mxu0 }
 0x305   : > { %15683 = vst [vmem:[#allocation35_spill] sm:$0xff] %v11645_v18  ;;  %v3507_v6 = vadd.f32 %v8820_v59, %v3217_v20  ;;  %v3908_v2 = vadd.f32 %v3907_v54, %v3845_v43  ;;  %v3846_v17 = vmul.f32 %v11645_v18, %v11645_v18  ;;  %v3769_v20 = vadd.f32 %v3768_v39, %v11645_v18 }
 0x306   : > { %v3219_v63 = vpop.f32.mrf.mxu1  ;;  %v8825_v31 = vpop.f32.mrf.mxu0  ;;  %8881 = vmatpush3.bf16.msra.mxu1 %v9274_v16 }
 0x307   : > { %v11653_v23 = vadd.f32 %v3507_v6, %v11302_v55  ;;  %6219 = vmatprep.subr.bf16.mxu1 %v15602_v58  ;;  %v11660_v63 = vld [vmem:[#allocation7 + $0xb8] sm:$0xff]   ;;  %v3909_v16 = vadd.f32 %v3908_v2, %v3846_v17  ;;  %v15689_v6 = vld [vmem:[#allocation77_spill] sm:$0xff] }
 0x308   : > { %v3220_v41 = vpop.f32.mrf.mxu1  ;;  %v3517_v51 = vpop.f32.mrf.mxu0  ;;  %15687 = vst [vmem:[#allocation96_spill] sm:$0xff] %v11660_v63  ;;  %8946 = vmatprep.subr.bf16.mxu0 %v11660_v63 }
 0x309   : > { %v3510_v9 = vadd.f32 %v8821_v4, %v3220_v41  ;;  %15684 = vst [vmem:[#allocation39_spill] sm:$0xff] %v11653_v23  ;;  %v3847_v32 = vmul.f32 %v11653_v23, %v11653_v23  ;;  %v2748_v41 = vadd.f32 %v11341_v49, %v15689_v6  ;;  %v3770_v39 = vadd.f32 %v3769_v20, %v11653_v23 }
 0x30a   : > { %v3222_v12 = vpop.f32.mrf.mxu1 }
 0x30b   : > { %v11658_v3 = vadd.f32 %v3510_v9, %v15685_v46  ;;  %v8828_v12 = vpop.f32.mrf.mxu0  ;;  %v3910_v2 = vadd.f32 %v3909_v16, %v3847_v32 }
 0x30c   : > { %v3225_v59 = vpop.f32.mrf.mxu1 }
 0x30d   : > { %15686 = vst [vmem:[#allocation30_spill] sm:$0xff] %v11658_v3  ;;  %v3515_v11 = vadd.f32 %v3514_v61, %v3225_v59  ;;  %v3848_v61 = vmul.f32 %v11658_v3, %v11658_v3  ;;  %v3771_v17 = vadd.f32 %v3770_v39, %v11658_v3 }
 0x30e   : > { %v3227_v4 = vpop.f32.mrf.mxu1 }
 0x30f   : > { %v11665_v55 = vadd.f32 %v3515_v11, %v11333_v37  ;;  %v3911_v11 = vadd.f32 %v3910_v2, %v3848_v61 }
 0x310   : > { %v3228_v54 = vpop.f32.mrf.mxu1 }
 0x311   : > { %15688 = vst [vmem:[#allocation125_spill] sm:$0xff] %v11665_v55  ;;  %v3518_v43 = vadd.f32 %v3517_v51, %v3228_v54  ;;  %v3849_v37 = vmul.f32 %v11665_v55, %v11665_v55  ;;  %v3772_v49 = vadd.f32 %v3771_v17, %v11665_v55  ;;  %v3530_v51 = vpop.f32.mrf.mxu0 }
 0x312   : > { %v3230_v9 = vpop.f32.mrf.mxu1 }
 0x313   : > { %v11676_v59 = vadd.f32 %v3518_v43, %v2748_v41  ;;  %v3912_v54 = vadd.f32 %v3911_v11, %v3849_v37  ;;  %v8829_v17 = vpop.f32.mrf.mxu0 }
 0x314   : > { %v3233_v46 = vpop.f32.mrf.mxu1 }
 0x315   : > { %v3850_v20 = vmul.f32 %v11676_v59, %v11676_v59  ;;  %v3523_v4 = vadd.f32 %v8824_v28, %v3233_v46  ;;  %v3773_v16 = vadd.f32 %v3772_v49, %v11676_v59  ;;  %v15690_v28 = vld [vmem:[#allocation106_spill] sm:$0xff] }
 0x316   : > { %v3235_v6 = vpop.f32.mrf.mxu1 }
 0x317   : > { %v11683_v32 = vadd.f32 %v3523_v4, %v11326_v29  ;;  %v3913_v9 = vadd.f32 %v3912_v54, %v3850_v20  ;;  %v3533_v4 = vpop.f32.mrf.mxu0 }
 0x318   : > { %v3236_v39 = vpop.f32.mrf.mxu1 }
 0x319   : > { %v3774_v41 = vadd.f32 %v3773_v16, %v11683_v32  ;;  %v3851_v61 = vmul.f32 %v11683_v32, %v11683_v32  ;;  %v3526_v43 = vadd.f32 %v8825_v31, %v3236_v39  ;;  %v15691_v16 = vld [vmem:[#allocation16_spill] sm:$0xff] }
 0x31a   : > { %v3238_v2 = vpop.f32.mrf.mxu1  ;;  %v2764_v39 = vadd.f32 %v11366_v13, %v15691_v16 }
 0x31b   : > { %v3914_v58 = vadd.f32 %v3913_v9, %v3851_v61  ;;  %v11689_v46 = vadd.f32 %v3526_v43, %v15690_v28 }
 0x31c   : > { %v3241_v37 = vpop.f32.mrf.mxu1 }
 0x31d   : > { %v3775_v11 = vadd.f32 %v3774_v41, %v11689_v46  ;;  %v3852_v29 = vmul.f32 %v11689_v46, %v11689_v46  ;;  %v3531_v49 = vadd.f32 %v3530_v51, %v3241_v37  ;;  %v8832_v37 = vpop.f32.mrf.mxu0 }
 0x31e   : > { %v3243_v20 = vpop.f32.mrf.mxu1 }
 0x31f   : > { %v3915_v6 = vadd.f32 %v3914_v58, %v3852_v29  ;;  %v11695_v54 = vadd.f32 %v3531_v49, %v11357_v5  ;;  %v3546_v16 = vpop.f32.mrf.mxu0 }
 0x320   : > { %v3244_v31 = vpop.f32.mrf.mxu1 }
 0x321   : > { %v3776_v9 = vadd.f32 %v3775_v11, %v11695_v54  ;;  %v3853_v61 = vmul.f32 %v11695_v54, %v11695_v54  ;;  %v3534_v41 = vadd.f32 %v3533_v4, %v3244_v31 }
 0x322   : > { %v3246_v43 = vpop.f32.mrf.mxu1 }
 0x323   : > { %v3916_v2 = vadd.f32 %v3915_v6, %v3853_v61  ;;  %v11702_v28 = vadd.f32 %v3534_v41, %v2764_v39 }
 0x324   : > { %v3249_v51 = vpop.f32.mrf.mxu1 }
 0x325   : > { %v3777_v58 = vadd.f32 %v3776_v9, %v11702_v28  ;;  %v3854_v5 = vmul.f32 %v11702_v28, %v11702_v28  ;;  %v3539_v29 = vadd.f32 %v8828_v12, %v3249_v51  ;;  %v8833_v12 = vpop.f32.mrf.mxu0 }
 0x326   : > { %v3251_v49 = vpop.f32.mrf.mxu1 }
 0x327   : > { %v3917_v13 = vadd.f32 %v3916_v2, %v3854_v5  ;;  %v11708_v11 = vadd.f32 %v3539_v29, %v11350_v1  ;;  %v3549_v29 = vpop.f32.mrf.mxu0  ;;  %v15692_v49 = vld [vmem:[#allocation43_spill] sm:$0xff] }
 0x328   : > { %v3252_v20 = vpop.f32.mrf.mxu1 }
 0x329   : > { %v3778_v4 = vadd.f32 %v3777_v58, %v11708_v11  ;;  %v3855_v6 = vmul.f32 %v11708_v11, %v11708_v11  ;;  %v3542_v31 = vadd.f32 %v8829_v17, %v3252_v20 }
 0x32a   : > { %v3254_v39 = vpop.f32.mrf.mxu1 }
 0x32b   : > { %v3918_v61 = vadd.f32 %v3917_v13, %v3855_v6  ;;  %v11714_v9 = vadd.f32 %v3542_v31, %v11364_v8  ;;  %v2780_v13 = vadd.f32 %v11389_v0, %v15692_v49  ;;  %v8836_v31 = vpop.f32.mrf.mxu0 }
 0x32c   : > { %v3257_v41 = vpop.f32.mrf.mxu1 }
 0x32d   : > { %v3779_v43 = vadd.f32 %v3778_v4, %v11714_v9  ;;  %v3856_v1 = vmul.f32 %v11714_v9, %v11714_v9  ;;  %v3547_v2 = vadd.f32 %v3546_v16, %v3257_v41  ;;  %v3562_v0 = vpop.f32.mrf.mxu0 }
 0x32e   : > { %v3259_v51 = vpop.f32.mrf.mxu1 }
 0x32f   : > { %v3919_v5 = vadd.f32 %v3918_v61, %v3856_v1  ;;  %v11720_v58 = vadd.f32 %v3547_v2, %v11380_v35 }
 0x330   : > { %v3260_v17 = vpop.f32.mrf.mxu1 }
 0x331   : > { %v3780_v8 = vadd.f32 %v3779_v43, %v11720_v58  ;;  %v3857_v20 = vmul.f32 %v11720_v58, %v11720_v58  ;;  %v3550_v4 = vadd.f32 %v3549_v29, %v3260_v17 }
 0x332   : > { %v3262_v6 = vpop.f32.mrf.mxu1 }
 0x333   : > { %v3920_v39 = vadd.f32 %v3919_v5, %v3857_v20  ;;  %v11727_v16 = vadd.f32 %v3550_v4, %v2780_v13  ;;  %v8837_v20 = vpop.f32.mrf.mxu0 }
 0x334   : > { %v3265_v61 = vpop.f32.mrf.mxu1 }
 0x335   : > { %v3781_v35 = vadd.f32 %v3780_v8, %v11727_v16  ;;  %v3858_v41 = vmul.f32 %v11727_v16, %v11727_v16  ;;  %v3555_v1 = vadd.f32 %v8832_v37, %v3265_v61 }
 0x336   : > { %v3267_v2 = vpop.f32.mrf.mxu1 }
 0x337   : > { %v3921_v51 = vadd.f32 %v3920_v39, %v3858_v41  ;;  %v11733_v43 = vadd.f32 %v3555_v1, %v11374_v44  ;;  %v3565_v41 = vpop.f32.mrf.mxu0  ;;  %v15693_v2 = vld [vmem:[#allocation72_spill] sm:$0xff] }
 0x338   : > { %v3268_v49 = vpop.f32.mrf.mxu1 }
 0x339   : > { %v3782_v29 = vadd.f32 %v3781_v35, %v11733_v43  ;;  %v3859_v5 = vmul.f32 %v11733_v43, %v11733_v43  ;;  %v3558_v17 = vadd.f32 %v8833_v12, %v3268_v49  ;;  %v15695_v49 = vld [vmem:[#allocation100_spill] sm:$0xff] }
 0x33a   : > { %v3270_v13 = vpop.f32.mrf.mxu1 }
 0x33b   : > { %v3922_v8 = vadd.f32 %v3921_v51, %v3859_v5  ;;  %v11739_v4 = vadd.f32 %v3558_v17, %v11387_v62  ;;  %v2796_v51 = vadd.f32 %v11411_v45, %v15695_v49  ;;  %v8840_v45 = vpop.f32.mrf.mxu0 }
 0x33c   : > { %v3273_v37 = vpop.f32.mrf.mxu1 }
 0x33d   : > { %v3783_v6 = vadd.f32 %v3782_v29, %v11739_v4  ;;  %v3860_v44 = vmul.f32 %v11739_v4, %v11739_v4  ;;  %v3563_v39 = vadd.f32 %v3562_v0, %v3273_v37 }
 0x33e   : > { %v3275_v61 = vpop.f32.mrf.mxu1 }
 0x33f   : > { %v3784_v35 = vrot.slane %v3783_v6, 4  ;;  %v3923_v1 = vadd.f32 %v3922_v8, %v3860_v44  ;;  %v11745_v63 = vadd.f32 %v3563_v39, %v15693_v2  ;;  %v15697_v2 = vld [vmem:[#allocation26_spill] sm:$0xff] }
 0x340   : > { %v3276_v12 = vpop.f32.mrf.mxu1 }
 0x341   : > { %15694 = vst [vmem:[#allocation38_spill] sm:$0xff] %v11745_v63  ;;  %v3785_v62 = vadd.f32 %v3784_v35, %v3783_v6  ;;  %v3924_v5 = vrot.slane %v3923_v1, 4  ;;  %v3566_v17 = vadd.f32 %v3565_v41, %v3276_v12 }
 0x342   : > { %v3278_v13 = vpop.f32.mrf.mxu1 }
 0x343   : > { %v3786_v29 = vrot.slane %v3785_v62, 2  ;;  %v3925_v55 = vadd.f32 %v3924_v5, %v3923_v1  ;;  %v11749_v3 = vadd.f32 %v3566_v17, %v2796_v51 }
 0x344   : > { %v3281_v0 = vpop.f32.mrf.mxu1 }
 0x345   : > { %15696 = vst [vmem:[#allocation138_spill] sm:$0xff] %v11749_v3  ;;  %v3787_v37 = vadd.f32 %v3786_v29, %v3785_v62  ;;  %v3926_v61 = vrot.slane %v3925_v55, 2  ;;  %v3571_v23 = vadd.f32 %v8836_v31, %v3281_v0  ;;  %v3862_v31 = vmul.f32 %v11749_v3, %v11749_v3  ;;  %v15700_v0 = vld [vmem:[#allocation18_spill] sm:$0xff] }
 0x346   : > { %v3283_v8 = vpop.f32.mrf.mxu1 }
 0x347   : > { %v3788_v44 = vrot.slane %v3787_v37, 1  ;;  %v3927_v39 = vadd.f32 %v3926_v61, %v3925_v55  ;;  %v11752_v18 = vadd.f32 %v3571_v23, %v15697_v2  ;;  %v3578_v55 = vpop.f32.mrf.mxu0  ;;  %v3790_v61 = vadd.f32 %v11749_v3, %v11745_v63 }
 0x348   : > { %v3284_v21 = vpop.f32.mrf.mxu1 }
 0x349   : > { %15698 = vst [vmem:[#allocation122_spill] sm:$0xff] %v11752_v18  ;;  %v3789_v6 = vadd.f32 %v3788_v44, %v3787_v37  ;;  %v3928_v35 = vrot.slane %v3927_v39, 1  ;;  %v3574_v41 = vadd.f32 %v8837_v20, %v3284_v21  ;;  %v3863_v29 = vmul.f32 %v11752_v18, %v11752_v18  ;;  %v8841_v8 = vpop.f32.mrf.mxu0 }
 0x34a   : > { %v3286_v12 = vpop.f32.mrf.mxu1  ;;  %v2812_v37 = vadd.f32 %v11433_v24, %v15700_v0  ;;  %v15704_v24 = vld [vmem:[#allocation109_spill] sm:$0xff] }
 0x34b   : > { %v11754_v49 = vmul.f32 0.00390625, %v3789_v6  ;;  %v3929_v1 = vadd.f32 %v3928_v35, %v3927_v39  ;;  %v11757_v51 = vadd.f32 %v3574_v41, %v11409_v53  ;;  %v3861_v53 = vmul.f32 %v11745_v63, %v11745_v63  ;;  %v15701_v39 = vld [vmem:[#allocation46_spill] sm:$0xff] }
 0x34c   : > { %v3289_v62 = vpop.f32.mrf.mxu1  ;;  %v11777_v2 = vadd.f32 %v11455_v42, %v15701_v39  ;;  %v15702_v6 = vld [vmem:[#allocation22_spill] sm:$0xff]  ;;  %v3791_v42 = vadd.f32 %v3790_v61, %v11752_v18 }
 0x34d   : > { %15699 = vst [vmem:[#allocation41_spill] sm:$0xff] %v11757_v51  ;;  %v3967_v5 = vmul.f32 0.00390625, %v3929_v1  ;;  %v3969_v23 = vmul.f32 %v11754_v49, %v11754_v49  ;;  %v4003_v17 = vsub.f32 %v11733_v43, %v11754_v49  ;;  %v4004_v21 = vsub.f32 %v11739_v4, %v11754_v49  ;;  %v15703_v1 = vld [vmem:[#allocation65_spill] sm:$0xff] }
 0x34e   : > { %v3291_v20 = vpop.f32.mrf.mxu1  ;;  %v11781_v35 = vadd.f32 %v11475_v60, %v15702_v6  ;;  %v3930_v12 = vadd.f32 %v3862_v31, %v3861_v53  ;;  %v3581_v53 = vpop.f32.mrf.mxu0  ;;  %v3977_v6 = vsub.f32 %v11559_v19, %v11754_v49  ;;  %v15708_v19 = vld [vmem:[#allocation108_spill] sm:$0xff]  ;;  %v15715_v31 = vld [vmem:[#allocation30_spill] sm:$0xff]  ;;  %v15717_v60 = vld [vmem:[#allocation125_spill] sm:$0xff] }
 0x34f   : > { %v3971_v13 = vsub.f32 %v3967_v5, %v3969_v23  ;;  %v11785_v5 = vadd.f32 %v11489_v33, %v15703_v1  ;;  %v11789_v23 = vadd.f32 %v11502_v14, %v15704_v24  ;;  %v11793_v20 = vadd.f32 %v11515_v50, %v11413_v56 }
 0x350   : > { %v3292_v44 = vpop.f32.mrf.mxu1  ;;  %v3931_v33 = vadd.f32 %v3930_v12, %v3863_v29  ;;  %v3975_v12 = vsub.f32 %v11530_v57, %v11754_v49  ;;  %v3864_v24 = vmul.f32 %v11757_v51, %v11757_v51  ;;  %v11822_v50 = vpop.f32.mrf.mxu0  ;;  %v3976_v29 = vsub.f32 %v11539_v34, %v11754_v49 }
 0x351   : > { %v4037_v41 = vadd.f32 1e-05, %v3971_v13  ;;  %15705 = vst [vmem:[#allocation40_spill] sm:$0xff] %v11793_v20  ;;  %v3978_v57 = vsub.f32 %v11571_v22, %v11754_v49  ;;  %v3979_v1 = vsub.f32 %v11552_v7, %v11754_v49  ;;  %v3792_v14 = vadd.f32 %v3791_v42, %v11757_v51  ;;  %v15714_v13 = vld [vmem:[#allocation39_spill] sm:$0xff] }
 0x352   : > { %v3294_v0 = vpop.f32.mrf.mxu1  ;;  %v3980_v34 = vsub.f32 %v11567_v36, %v11754_v49  ;;  %v3981_v22 = vsub.f32 %v11588_v15, %v11754_v49  ;;  %v3982_v36 = vsub.f32 %v11596_v26, %v11754_v49  ;;  %v3984_v15 = vsub.f32 %v11601_v52, %v11754_v49 }
 0x353   : > { %9324 = vrsqrt.f32 %v4037_v41  ;;  %v3579_v0 = vadd.f32 %v3578_v55, %v3289_v62  ;;  %v3582_v41 = vadd.f32 %v3581_v53, %v3292_v44  ;;  %v3932_v53 = vadd.f32 %v3931_v33, %v3864_v24 }
 0x354   : > { %v3297_v61 = vpop.f32.mrf.mxu1  ;;  %v3985_v26 = vsub.f32 %v11611_v30, %v11754_v49  ;;  %v3988_v52 = vsub.f32 %v11633_v25, %v11754_v49 }
 0x355   : > { %v3587_v56 = vadd.f32 %v8840_v45, %v3297_v61  ;;  %v11834_v62 = vadd.f32 %v3579_v0, %v11424_v48  ;;  %v3594_v61 = vpop.f32.mrf.mxu0 }
 0x356   : > { %v3299_v39 = vpop.f32.mrf.mxu1 }
 0x357   : > { %15706 = vst [vmem:[#allocation97_spill] sm:$0xff] %v11834_v62  ;;  %v11838_v39 = vadd.f32 %v3582_v41, %v2812_v37  ;;  %v11841_v44 = vadd.f32 %v3587_v56, %v15708_v19  ;;  %v3793_v7 = vadd.f32 %v3792_v14, %v11834_v62  ;;  %v3865_v48 = vmul.f32 %v11834_v62, %v11834_v62  ;;  %v15712_v19 = vld [vmem:[#allocation123_spill] sm:$0xff] }
 0x358   : > { %v3300_v55 = vpop.f32.mrf.mxu1  ;;  %v3983_v37 = vsub.f32 %v11578_v27, %v11754_v49  ;;  %v15711_v27 = vld [vmem:[#allocation119_spill] sm:$0xff] }
 0x359   : > { %15707 = vst [vmem:[#allocation124_spill] sm:$0xff] %v11838_v39  ;;  %15709 = vst [vmem:[#allocation45_spill] sm:$0xff] %v11841_v44  ;;  %v3590_v45 = vadd.f32 %v8841_v8, %v3300_v55  ;;  %v3866_v8 = vmul.f32 %v11838_v39, %v11838_v39  ;;  %v3933_v33 = vadd.f32 %v3932_v53, %v3865_v48 }
 0x35a   : > { %v3302_v42 = vpop.f32.mrf.mxu1  ;;  %v3794_v14 = vadd.f32 %v3793_v7, %v11838_v39  ;;  %v3867_v41 = vmul.f32 %v11841_v44, %v11841_v44  ;;  %v3986_v0 = vsub.f32 %v15711_v27, %v11754_v49  ;;  %v3991_v27 = vsub.f32 %v15714_v13, %v11754_v49 }
 0x35b   : > { %v11855_v56 = vadd.f32 %v3590_v45, %v11431_v38  ;;  %v3987_v38 = vsub.f32 %v11624_v10, %v11754_v49  ;;  %v3989_v45 = vsub.f32 %v15712_v19, %v11754_v49  ;;  %v3934_v53 = vadd.f32 %v3933_v33, %v3866_v8  ;;  %v15713_v42 = vld [vmem:[#allocation35_spill] sm:$0xff] }
 0x35c   : > { %v3305_v24 = vpop.f32.mrf.mxu1  ;;  %v3795_v7 = vadd.f32 %v3794_v14, %v11841_v44  ;;  %v3990_v30 = vsub.f32 %v15713_v42, %v11754_v49  ;;  %v3992_v10 = vsub.f32 %v15715_v31, %v11754_v49  ;;  %v3993_v19 = vsub.f32 %v15717_v60, %v11754_v49 }
 0x35d   : > { %15710 = vst [vmem:[#allocation42_spill] sm:$0xff] %v11855_v56  ;;  %v3595_v55 = vadd.f32 %v3594_v61, %v3305_v24  ;;  %v15716_v61 = vld [vmem:[#allocation27_spill] sm:$0xff]  ;;  %v11884_v8 = vadd.f32 %v3934_v53, %v3867_v41  ;;  %v11891_v14 = vmul.f32 %v11855_v56, %v11855_v56  ;;  %v15718_v60 = vsub.f32 %v11534_v47, %v11754_v49 }
 0x35e   : > { %v3307_v48 = vpop.f32.mrf.mxu1  ;;  %v11887_v33 = vadd.f32 %v3795_v7, %v11855_v56  ;;  %v15719_v53 = vsub.f32 %v11542_v40, %v11754_v49 }
 0x35f   : > { %v11880_v24 = vadd.f32 %v3595_v55, %v15716_v61 }
 0x360   : > { %v9325_v25 = vpop.eup %9324  ;;  %v11893_v13 = vpop.f32.mrf.mxu1 }
 0x361   : > { %v4071_v31 = vmul.f32 %v9325_v25, %v4003_v17  ;;  %v4072_v55 = vmul.f32 %v9325_v25, %v4004_v21  ;;  %v11904_v41 = vmul.f32 %v9325_v25, %v15718_v60  ;;  %v11909_v7 = vmul.f32 %v9325_v25, %v15719_v53 }
 0x362   : > { %v11911_v48 = vmul.f32 %v9325_v25, %v3975_v12  ;;  %v11913_v42 = vmul.f32 %v9325_v25, %v3976_v29  ;;  %v11915_v43 = vmul.f32 %v9325_v25, %v3977_v6  ;;  %v11917_v17 = vmul.f32 %v9325_v25, %v3978_v57  ;;  %v3310_v4 = vpop.f32.mrf.mxu1 }
 0x363   : > { %v4135_v21 = vmax.f32 %v4071_v31, 0.0  ;;  %v4136_v61 = vmax.f32 %v4072_v55, 0.0  ;;  %v11919_v56 = vmul.f32 %v9325_v25, %v3979_v1  ;;  %v11921_v47 = vmul.f32 %v9325_v25, %v3980_v34 }
 0x364   : > { %v11923_v60 = vmul.f32 %v9325_v25, %v3981_v22  ;;  %v11925_v40 = vmul.f32 %v9325_v25, %v3982_v36  ;;  %v11927_v53 = vmul.f32 %v9325_v25, %v3983_v37  ;;  %v11929_v12 = vmul.f32 %v9325_v25, %v3984_v15  ;;  %v11931_v29 = vpop.f32.mrf.mxu1 }
 0x365   : > { %v11933_v6 = vpack.c.bf16 %v4136_v61, %v4135_v21  ;;  %v11935_v57 = vmul.f32 %v9325_v25, %v3985_v26  ;;  %v11937_v31 = vmul.f32 %v9325_v25, %v3986_v0  ;;  %v11939_v1 = vmul.f32 %v9325_v25, %v3987_v38  ;;  %v11951_v61 = vpop.f32.mrf.mxu0 }
 0x366   : > { %v11941_v34 = vmul.f32 %v9325_v25, %v3988_v52  ;;  %v11943_v22 = vmul.f32 %v9325_v25, %v3989_v45  ;;  %v11945_v36 = vmul.f32 %v9325_v25, %v3990_v30  ;;  %v11947_v37 = vmul.f32 %v9325_v25, %v3991_v27  ;;  %v3315_v15 = vpop.f32.mrf.mxu1 }
 0x367   : > { %15720 = vst [vmem:[#allocation68_spill] sm:$0xff] %v11933_v6  ;;  %v4060_v21 = vmul.f32 %v9325_v25, %v3992_v10  ;;  %v4061_v26 = vmul.f32 %v9325_v25, %v3993_v19  ;;  %v15721_v0 = vsub.f32 %v11676_v59, %v11754_v49  ;;  %v15722_v52 = vsub.f32 %v11683_v32, %v11754_v49 }
 0x368   : > { %v15723_v30 = vsub.f32 %v11689_v46, %v11754_v49  ;;  %v15724_v15 = vsub.f32 %v11695_v54, %v11754_v49  ;;  %v11965_v10 = vpop.f32.mrf.mxu1  ;;  %v15725_v19 = vsub.f32 %v11702_v28, %v11754_v49  ;;  %v15726_v59 = vsub.f32 %v11708_v11, %v11754_v49 }
 0x369   : > { %v4062_v38 = vmul.f32 %v9325_v25, %v15721_v0  ;;  %v4063_v45 = vmul.f32 %v9325_v25, %v15722_v52  ;;  %v15727_v32 = vsub.f32 %v11714_v9, %v11754_v49  ;;  %v15728_v46 = vsub.f32 %v11720_v58, %v11754_v49 }
 0x36a   : > { %v4064_v27 = vmul.f32 %v9325_v25, %v15723_v30  ;;  %v4065_v4 = vmul.f32 %v9325_v25, %v15724_v15  ;;  %v4066_v55 = vmul.f32 %v9325_v25, %v15725_v19  ;;  %v4067_v0 = vmul.f32 %v9325_v25, %v15726_v59  ;;  %v3318_v11 = vpop.f32.mrf.mxu1 }
 0x36b   : > { %v4068_v52 = vmul.f32 %v9325_v25, %v15727_v32  ;;  %v4069_v30 = vmul.f32 %v9325_v25, %v15728_v46  ;;  %v15729_v54 = vsub.f32 %v11727_v16, %v11754_v49  ;;  %v4105_v44 = vmax.f32 %v11904_v41, 0.0  ;;  %v11989_v46 = vpop.f32.mrf.mxu0 }
 0x36c   : > { %v4106_v28 = vmax.f32 %v11909_v7, 0.0  ;;  %v4107_v19 = vmax.f32 %v11911_v48, 0.0  ;;  %v4108_v59 = vmax.f32 %v11913_v42, 0.0  ;;  %v4109_v9 = vmax.f32 %v11915_v43, 0.0  ;;  %v11995_v7 = vpop.f32.mrf.mxu1 }
 0x36d   : > { %v4070_v15 = vmul.f32 %v9325_v25, %v15729_v54  ;;  %v4110_v32 = vmax.f32 %v11917_v17, 0.0  ;;  %v4111_v58 = vmax.f32 %v11919_v56, 0.0  ;;  %v4112_v16 = vmax.f32 %v11921_v47, 0.0  ;;  %v12001_v17 = vpop.f32.mrf.mxu0 }
 0x36e   : > { %v4113_v49 = vmax.f32 %v11923_v60, 0.0  ;;  %v4114_v25 = vmax.f32 %v11925_v40, 0.0  ;;  %v4115_v41 = vmax.f32 %v11927_v53, 0.0  ;;  %v4116_v48 = vmax.f32 %v11929_v12, 0.0  ;;  %v3323_v54 = vpop.f32.mrf.mxu1 }
 0x36f   : > { %v4117_v42 = vmax.f32 %v11935_v57, 0.0  ;;  %v4118_v43 = vmax.f32 %v11937_v31, 0.0  ;;  %v4119_v56 = vmax.f32 %v11939_v1, 0.0  ;;  %v4120_v47 = vmax.f32 %v11941_v34, 0.0 }
 0x370   : > { %v4121_v60 = vmax.f32 %v11943_v22, 0.0  ;;  %v4122_v40 = vmax.f32 %v11945_v36, 0.0  ;;  %v4123_v53 = vmax.f32 %v11947_v37, 0.0  ;;  %v4124_v11 = vmax.f32 %v4060_v21, 0.0  ;;  %v3324_v1 = vpop.f32.mrf.mxu1  ;;  %v3610_v22 = vpop.f32.mrf.mxu0 }
 0x371   : > { %v4125_v39 = vmax.f32 %v4061_v26, 0.0  ;;  %v4126_v12 = vmax.f32 %v4062_v38, 0.0  ;;  %v4127_v62 = vmax.f32 %v4063_v45, 0.0  ;;  %v4128_v57 = vmax.f32 %v4064_v27, 0.0 }
 0x372   : > { %v4129_v51 = vmax.f32 %v4065_v4, 0.0  ;;  %v4130_v31 = vmax.f32 %v4066_v55, 0.0  ;;  %v4131_v18 = vmax.f32 %v4067_v0, 0.0  ;;  %v4132_v3 = vmax.f32 %v4068_v52, 0.0  ;;  %v3326_v26 = vpop.f32.mrf.mxu1 }
 0x373   : > { %v4133_v63 = vmax.f32 %v4069_v30, 0.0  ;;  %v4134_v6 = vmax.f32 %v4070_v15, 0.0  ;;  %v12007_v34 = vpack.c.bf16 %v4106_v28, %v4105_v44  ;;  %v4170_v20 = vpack.c.bf16 %v4108_v59, %v4107_v19 }
 0x374   : > { %v12009_v36 = vpack.c.bf16 %v4110_v32, %v4109_v9  ;;  %v12011_v37 = vpack.c.bf16 %v4112_v16, %v4111_v58  ;;  %v12013_v21 = vpack.c.bf16 %v4114_v25, %v4113_v49  ;;  %v12015_v38 = vpack.c.bf16 %v4116_v48, %v4115_v41  ;;  %v12031_v30 = vpop.f32.mrf.mxu1  ;;  %v12038_v9 = vpop.f32.mrf.mxu0 }
 0x375   : > { %v12017_v4 = vpack.c.bf16 %v4118_v43, %v4117_v42  ;;  %v12019_v55 = vpack.c.bf16 %v4120_v47, %v4119_v56  ;;  %v12021_v45 = vpack.c.bf16 %v4122_v40, %v4121_v60  ;;  %v12023_v27 = vpack.c.bf16 %v4124_v11, %v4123_v53  ;;  %v15737_v42 = vld [vmem:[#allocation113_spill] sm:$0xff] }
 0x376   : > { %v12025_v44 = vpack.c.bf16 %v4126_v12, %v4125_v39  ;;  %v12027_v0 = vpack.c.bf16 %v4128_v57, %v4127_v62  ;;  %v12029_v52 = vpack.c.bf16 %v4130_v31, %v4129_v51  ;;  %v12033_v15 = vpack.c.bf16 %v4132_v3, %v4131_v18  ;;  %v3331_v58 = vpop.f32.mrf.mxu1  ;;  %v3613_v60 = vpop.f32.mrf.mxu0 }
 0x377   : > { %v12035_v28 = vpack.c.bf16 %v4134_v6, %v4133_v63  ;;  %v4202_v19 = vshrl.u32 %v4170_v20, 16  ;;  %v4211_v59 = vshrl.u32 %v12011_v37, 16  ;;  %v15128_v32 = vshrl.u32 %v12015_v38, 16 }
 0x378   : > { %v4330_v3 = vshll.u32 %v4170_v20, 16  ;;  %v4342_v63 = vshll.u32 %v12011_v37, 16  ;;  %v4350_v6 = vshll.u32 %v12015_v38, 16  ;;  %v12051_v48 = vpop.f32.mrf.mxu1  ;;  %v3936_v20 = vadd.f32 %v11884_v8, %v11891_v14 }
 0x379   : > { %v4329_v56 = vrot.slane %v4202_v19, 7  ;;  %v3797_v40 = vadd.f32 %v11887_v33, %v11880_v24  ;;  %v3869_v53 = vmul.f32 %v11880_v24, %v11880_v24  ;;  %v3598_v54 = vadd.f32 %v11989_v46, %v11893_v13 }
 0x37a   : > { %v4521_v47 = vrot.slane %v4330_v3, 7  ;;  %v3334_v11 = vpop.f32.mrf.mxu1  ;;  %v3603_v57 = vadd.f32 %v11822_v50, %v11931_v29  ;;  %v3606_v31 = vadd.f32 %v11951_v61, %v11965_v10  ;;  %v3611_v26 = vadd.f32 %v3610_v22, %v11995_v7  ;;  %v15733_v29 = vld [vmem:[#allocation79_spill] sm:$0xff]  ;;  %v15734_v10 = vld [vmem:[#allocation28_spill] sm:$0xff] }
 0x37b   : > { %v4332_v12 = vor.u32 %v4330_v3, %v4329_v56  ;;  %v3937_v8 = vadd.f32 %v3936_v20, %v3869_v53  ;;  %v12069_v14 = vadd.f32 %v3598_v54, %v11777_v2  ;;  %v3614_v33 = vadd.f32 %v3613_v60, %v3324_v1  ;;  %v15732_v3 = vld [vmem:[#allocation32_spill] sm:$0xff] }
 0x37c   : > { %v4205_v58 = vshrl.u32 %v12007_v34, 16  ;;  %v12072_v43 = vpop.f32.mrf.mxu1  ;;  %v12079_v50 = vadd.f32 %v3603_v57, %v15732_v3  ;;  %v12082_v61 = vadd.f32 %v3606_v31, %v15733_v29  ;;  %v12085_v7 = vadd.f32 %v3611_v26, %v15734_v10 }
 0x37d   : > { %v12076_v46 = vsel %vm9730_vm2, %v4202_v19, %v4332_v12  ;;  %v3798_v2 = vadd.f32 %v3797_v40, %v12069_v14  ;;  %v3870_v1 = vmul.f32 %v12069_v14, %v12069_v14  ;;  %v12091_v22 = vadd.f32 %v3614_v33, %v11781_v35 }
 0x37e   : > { %15731 = vst [vmem:[#allocation126_spill] sm:$0xff] %v12076_v46  ;;  %v4333_v60 = vrot.slane %v4205_v58, 7  ;;  %v3339_v19 = vpop.f32.mrf.mxu1  ;;  %v3871_v20 = vmul.f32 %v12079_v50, %v12079_v50  ;;  %v3872_v53 = vmul.f32 %v12082_v61, %v12082_v61  ;;  %v3873_v54 = vmul.f32 %v12085_v7, %v12085_v7 }
 0x37f   : > { %v4334_v11 = vshll.u32 %v12007_v34, 16  ;;  %v3938_v40 = vadd.f32 %v3937_v8, %v3870_v1  ;;  %v3799_v12 = vadd.f32 %v3798_v2, %v12079_v50  ;;  %v3874_v35 = vmul.f32 %v12091_v22, %v12091_v22 }
 0x380   : > { %v4617_v57 = vsel %vm9730_vm2, %v4329_v56, %v4521_v47  ;;  %v12105_v31 = vpop.f32.mrf.mxu1  ;;  %v5129_v3 = vrot.slane %v12076_v46, 1  ;;  %v4208_v34 = vshrl.u32 %v12009_v36, 16  ;;  %v4338_v8 = vshll.u32 %v12009_v36, 16 }
 0x381   : > { %v4336_v26 = vor.u32 %v4334_v11, %v4333_v60  ;;  %v4522_v33 = vrot.slane %v4334_v11, 7  ;;  %v5130_v29 = vrot.slane %v4617_v57, 1  ;;  %v3939_v10 = vadd.f32 %v3938_v40, %v3871_v20  ;;  %v12122_v11 = vpop.f32.mrf.mxu0 }
 0x382   : > { %v3800_v19 = vadd.f32 %v3799_v12, %v12082_v61  ;;  %v3342_v2 = vpop.f32.mrf.mxu1  ;;  %v3619_v20 = vadd.f32 %v12001_v17, %v12031_v30  ;;  %v4657_v41 = vshll.u32 %v4617_v57, 16 }
 0x383   : > { %v12113_v1 = vsel %vm9730_vm2, %v4205_v58, %v4336_v26  ;;  %v4618_v56 = vsel %vm9730_vm2, %v4333_v60, %v4522_v33  ;;  %v12118_v47 = vsel %vm1250_vm3, %v5129_v3, %v5130_v29  ;;  %v3940_v40 = vadd.f32 %v3939_v10, %v3872_v53 }
 0x384   : > { %15735 = vst [vmem:[#allocation55_spill] sm:$0xff] %v12113_v1  ;;  %15736 = vst [vmem:[#allocation74_spill] sm:$0xff] %v12118_v47  ;;  %v3801_v12 = vadd.f32 %v3800_v19, %v12085_v7  ;;  %v5132_v36 = vrot.slane %v12113_v1, 1  ;;  %v5133_v2 = vrot.slane %v4618_v56, 1  ;;  %v12126_v18 = vpop.f32.mrf.mxu1  ;;  %v4337_v58 = vrot.slane %v4208_v34, 7 }
 0x385   : > { %v4523_v26 = vrot.slane %v4338_v8, 7  ;;  %v12129_v60 = vadd.f32 %v3619_v20, %v15737_v42  ;;  %v4662_v33 = vshrl.u32 %v12113_v1, 16  ;;  %v3941_v3 = vadd.f32 %v3940_v40, %v3873_v54  ;;  %v3626_v54 = vpop.f32.mrf.mxu0 }
 0x386   : > { %v3802_v17 = vadd.f32 %v3801_v12, %v12091_v22  ;;  %v12134_v30 = vsel %vm1250_vm3, %v5132_v36, %v5133_v2  ;;  %v4664_v53 = vshll.u32 %v12113_v1, 16  ;;  %v3347_v29 = vpop.f32.mrf.mxu1  ;;  %v4340_v10 = vor.u32 %v4338_v8, %v4337_v58 }
 0x387   : > { %15738 = vst [vmem:[#allocation44_spill] sm:$0xff] %v12134_v30  ;;  %8882 = vmatprep.mubr.bf16.mxu1 %v12134_v30  ;;  %v12140_v19 = vsel %vm9730_vm2, %v4337_v58, %v4523_v26  ;;  %v3875_v42 = vmul.f32 %v12129_v60, %v12129_v60  ;;  %v4669_v20 = vshll.u32 %v4618_v56, 16  ;;  %v3942_v40 = vadd.f32 %v3941_v3, %v3874_v35 }
 0x388   : > { %8883 = vmatmul.mubr.bf16.vlgmr.msra.gmra.mxu1 %v12118_v47  ;;  %v5136_v12 = vrot.slane %v12140_v19, 1  ;;  %v3803_v36 = vadd.f32 %v3802_v17, %v12129_v60  ;;  %v4666_v2 = vrot.slane %v4664_v53, 1  ;;  %v12147_v29 = vpop.f32.mrf.mxu1  ;;  %v12151_v8 = vsel %vm9730_vm2, %v4208_v34, %v4340_v10  ;;  %v12162_v10 = vpop.f32.mrf.mxu0 }
 0x389   : > { %15739 = vst [vmem:[#allocation52_spill] sm:$0xff] %v12151_v8  ;;  %v4671_v58 = vrot.slane %v4669_v20, 1  ;;  %v4650_v26 = vshrl.u32 %v12076_v46, 16  ;;  %v4652_v56 = vshll.u32 %v12076_v46, 16  ;;  %v5135_v35 = vrot.slane %v12151_v8, 1 }
 0x38a   : > { %v3943_v3 = vadd.f32 %v3942_v40, %v3875_v42  ;;  %v4667_v16 = vor.u32 %v4666_v2, %v4662_v33  ;;  %v3350_v51 = vpop.f32.mrf.mxu1  ;;  %v3622_v17 = vadd.f32 %v12038_v9, %v12051_v48  ;;  %v4341_v53 = vrot.slane %v4211_v59, 7  ;;  %v9277_v9 = vld [vmem:[#allocation7 + $0xb0] sm:$0xff]   ;;  %v15742_v40 = vld [vmem:[#allocation84_spill] sm:$0xff] }
 0x38b   : > { %v4654_v25 = vrot.slane %v4652_v56, 1  ;;  %v4524_v34 = vrot.slane %v4342_v63, 7  ;;  %v12165_v20 = vsel %vm1250_vm3, %v5135_v35, %v5136_v12  ;;  %v4659_v57 = vrot.slane %v4657_v41, 1 }
 0x38c   : > { %15740 = vst [vmem:[#allocation128_spill] sm:$0xff] %v12165_v20  ;;  %v12168_v42 = vsel %vm769_vm4, %v4667_v16, %v4671_v58  ;;  %v4214_v51 = vshrl.u32 %v12013_v21, 16  ;;  %v12171_v33 = vpop.f32.mrf.mxu1  ;;  %8886 = vmatprep.mubr.bf16.mxu1 %v12165_v20  ;;  %v12176_v2 = vadd.f32 %v3622_v17, %v15742_v40  ;;  %v4344_v12 = vor.u32 %v4342_v63, %v4341_v53  ;;  %v15744_v17 = vld [vmem:[#allocation96_spill] sm:$0xff] }
 0x38d   : > { %15741 = vst [vmem:[#allocation59_spill] sm:$0xff] %v12168_v42  ;;  %5529 = vmatprep.mubr.bf16.mxu0 %v12168_v42  ;;  %v4655_v48 = vor.u32 %v4654_v25, %v4650_v26  ;;  %v4346_v16 = vshll.u32 %v12013_v21, 16  ;;  %v12184_v41 = vsel %vm9730_vm2, %v4341_v53, %v4524_v34  ;;  %v3627_v56 = vadd.f32 %v3626_v54, %v12072_v43  ;;  %v3629_v43 = vpop.f32.mrf.mxu0 }
 0x38e   : > { %5530 = vmatmul.mubr.bf16.vlgmr.msra.gmra.mxu0 %v12113_v1  ;;  %v4345_v58 = vrot.slane %v4214_v51, 7  ;;  %v4674_v35 = vshrl.u32 %v12151_v8, 16  ;;  %v3355_v25 = vpop.f32.mrf.mxu1  ;;  %v3804_v63 = vadd.f32 %v3803_v36, %v12176_v2  ;;  %v3876_v21 = vmul.f32 %v12176_v2, %v12176_v2  ;;  %v9278_v36 = vld [vmem:[#allocation7 + $0xa8] sm:$0xff]  }
 0x38f   : > { %v12189_v26 = vsel %vm769_vm4, %v4655_v48, %v4659_v57  ;;  %8947 = vmatpush3.bf16.msra.mxu0 %v15744_v17  ;;  %v12199_v53 = vsel %vm9730_vm2, %v4211_v59, %v4344_v12  ;;  %v5139_v34 = vrot.slane %v12184_v41, 1  ;;  %v4525_v48 = vrot.slane %v4346_v16, 7  ;;  %v15746_v17 = vld [vmem:[#allocation112_spill] sm:$0xff] }
 0x390   : > { %15743 = vst [vmem:[#allocation49_spill] sm:$0xff] %v12189_v26  ;;  %15745 = vst [vmem:[#allocation76_spill] sm:$0xff] %v12199_v53  ;;  %5537 = vmatprep.mubr.bf16.mxu0 %v12189_v26  ;;  %v5138_v54 = vrot.slane %v12199_v53, 1  ;;  %v4348_v57 = vor.u32 %v4346_v16, %v4345_v58  ;;  %v12204_v40 = vpop.f32.mrf.mxu1  ;;  %8948 = vmatprep.subr.bf16.mxu0 %v9277_v9  ;;  %v3944_v25 = vadd.f32 %v3943_v3, %v3876_v21 }
 0x391   : > { %v12207_v37 = vadd.f32 %v3627_v56, %v15746_v17  ;;  %v4676_v59 = vshll.u32 %v12151_v8, 16  ;;  %v4681_v12 = vshll.u32 %v12140_v19, 16  ;;  %v12220_v16 = vsel %vm9730_vm2, %v4345_v58, %v4525_v48  ;;  %v9279_v48 = vld [vmem:[#allocation7 + $0xa0] sm:$0xff]  }
 0x392   : > { %v12212_v62 = vsel %vm1250_vm3, %v5138_v54, %v5139_v34  ;;  %v12216_v49 = vsel %vm9730_vm2, %v4214_v51, %v4348_v57  ;;  %v3630_v3 = vadd.f32 %v3629_v43, %v12105_v31  ;;  %v3358_v21 = vpop.f32.mrf.mxu1  ;;  %v5142_v19 = vrot.slane %v12220_v16, 1  ;;  %v9280_v51 = vld [vmem:[#allocation7 + $0x38] sm:$0xff]  }
 0x393   : > { %15747 = vst [vmem:[#allocation15_spill] sm:$0xff] %v12212_v62  ;;  %15748 = vst [vmem:[#allocation139_spill] sm:$0xff] %v12216_v49  ;;  %8887 = vmatmul.mubr.bf16.gmra.mxu1 %v12212_v62  ;;  %v5141_v56 = vrot.slane %v12216_v49, 1  ;;  %v3805_v54 = vadd.f32 %v3804_v63, %v12207_v37  ;;  %v3877_v34 = vmul.f32 %v12207_v37, %v12207_v37  ;;  %8949 = vmatpush3.bf16.msra.mxu0 %v9277_v9 }
 0x394   : > { %v4678_v57 = vrot.slane %v4676_v59, 1  ;;  %v4683_v17 = vrot.slane %v4681_v12, 1  ;;  %v12230_v58 = vadd.f32 %v3630_v3, %v11785_v5  ;;  %v4349_v31 = vrot.slane %v15128_v32, 7  ;;  %v12234_v43 = vpop.f32.mrf.mxu1  ;;  %8950 = vmatprep.subr.bf16.mxu0 %v9278_v36  ;;  %6220 = vmatpush1.bf16.msra.mxu1 %v9280_v51 }
 0x395   : > { %v12237_v21 = vsel %vm1250_vm3, %v5141_v56, %v5142_v19  ;;  %v3945_v63 = vadd.f32 %v3944_v25, %v3877_v34  ;;  %v4526_v9 = vrot.slane %v4350_v6, 7  ;;  %v4220_v59 = vshrl.u32 %v12017_v4, 16  ;;  %v12248_v19 = vpop.f32.mrf.mxu0 }
 0x396   : > { %15749 = vst [vmem:[#allocation80_spill] sm:$0xff] %v12237_v21  ;;  %8890 = vmatprep.mubr.bf16.mxu1 %v12237_v21  ;;  %5538 = vmatmul.mubr.bf16.gmra.mxu0 %v12076_v46  ;;  %v4679_v5 = vor.u32 %v4678_v57, %v4674_v35  ;;  %v3806_v12 = vadd.f32 %v3805_v54, %v12230_v58  ;;  %v4354_v56 = vshll.u32 %v12017_v4, 16  ;;  %v3363_v25 = vpop.f32.mrf.mxu1  ;;  %v15750_v54 = vmov 0  }
 0x397   : > { %v3878_v3 = vmul.f32 %v12230_v58, %v12230_v58  ;;  %v4352_v34 = vor.u32 %v4350_v6, %v4349_v31  ;;  %v12254_v51 = vsel %vm9730_vm2, %v4349_v31, %v4526_v9  ;;  %v4353_v39 = vrot.slane %v4220_v59, 7  ;;  %8951 = vmatpush3.bf16.msra.mxu0 %v9278_v36  ;;  %6221 = vmatprep.subr.bf16.mxu1 %v15750_v54  ;;  %v9281_v6 = vld [vmem:[#allocation7 + $0x98] sm:$0xff]   ;;  %v15754_v36 = vld [vmem:[#allocation116_spill] sm:$0xff]  ;;  %v9282_v9 = vld [vmem:[#allocation7 + $0x30] sm:$0xff]   ;;  %v3642_v20 = vpop.f32.mrf.mxu0 }
 0x398   : > { %v3635_v35 = vadd.f32 %v12122_v11, %v12126_v18  ;;  %v12260_v57 = vsel %vm769_vm4, %v4679_v5, %v4683_v17  ;;  %v5145_v25 = vrot.slane %v12254_v51, 1  ;;  %v4527_v32 = vrot.slane %v4354_v56, 7  ;;  %v12263_v21 = vpop.f32.mrf.mxu1  ;;  %8952 = vmatprep.subr.bf16.mxu0 %v9279_v48  ;;  %6222 = vmatpush1.bf16.msra.mxu1 %v9282_v9 }
 0x399   : > { %15751 = vst [vmem:[#allocation62_spill] sm:$0xff] %v12260_v57  ;;  %v3946_v4 = vadd.f32 %v3945_v63, %v3878_v3  ;;  %5545 = vmatprep.mubr.bf16.mxu0 %v12260_v57  ;;  %v15752_v31 = vshrl.u32 %v12015_v38, 16  ;;  %v4356_v11 = vor.u32 %v4354_v56, %v4353_v39  ;;  %v4686_v63 = vshrl.u32 %v12199_v53, 16  ;;  %6223 = vmatprep.subr.bf16.mxu1 %v15750_v54 }
 0x39a   : > { %v12273_v17 = vadd.f32 %v3635_v35, %v15754_v36  ;;  %v12279_v3 = vsel %vm9730_vm2, %v4353_v39, %v4527_v32  ;;  %v4688_v62 = vshll.u32 %v12199_v53, 16  ;;  %v4693_v38 = vshll.u32 %v12184_v41, 16 }
 0x39b   : > { %v12270_v18 = vsel %vm9730_vm2, %v15752_v31, %v4352_v34  ;;  %v3366_v34 = vpop.f32.mrf.mxu1  ;;  %v12285_v56 = vsel %vm9730_vm2, %v4220_v59, %v4356_v11  ;;  %v5148_v35 = vrot.slane %v12279_v3, 1  ;;  %8953 = vmatpush3.bf16.msra.mxu0 %v9279_v48  ;;  %v15757_v48 = vshrl.u32 %v12019_v55, 16 }
 0x39c   : > { %15753 = vst [vmem:[#allocation98_spill] sm:$0xff] %v12270_v18  ;;  %v5144_v5 = vrot.slane %v12270_v18, 1  ;;  %15755 = vst [vmem:[#allocation127_spill] sm:$0xff] %v12285_v56  ;;  %v3807_v31 = vadd.f32 %v3806_v12, %v12273_v17  ;;  %v3879_v36 = vmul.f32 %v12273_v17, %v12273_v17  ;;  %v5147_v39 = vrot.slane %v12285_v56, 1  ;;  %8954 = vmatprep.subr.bf16.mxu0 %v9281_v6 }
 0x39d   : > { %v4690_v41 = vrot.slane %v4688_v62, 1  ;;  %v4695_v34 = vrot.slane %v4693_v38, 1  ;;  %v12295_v30 = vpop.f32.mrf.mxu1  ;;  %v3638_v12 = vadd.f32 %v12162_v10, %v12147_v29  ;;  %v4357_v11 = vrot.slane %v15757_v48, 7  ;;  %v15760_v10 = vld [vmem:[#allocation31_spill] sm:$0xff] }
 0x39e   : > { %v12292_v32 = vsel %vm1250_vm3, %v5144_v5, %v5145_v25  ;;  %v3947_v59 = vadd.f32 %v3946_v4, %v3879_v36  ;;  %v15758_v25 = vshll.u32 %v12019_v55, 16  ;;  %v9283_v5 = vld [vmem:[#allocation7 + $0x28] sm:$0xff]   ;;  %v12306_v62 = vsel %vm1250_vm3, %v5147_v39, %v5148_v35  ;;  %5546 = vmatmul.mubr.bf16.gmra.mxu0 %v12151_v8  ;;  %v12311_v36 = vpop.f32.mrf.mxu0 }
 0x39f   : > { %15756 = vst [vmem:[#allocation33_spill] sm:$0xff] %v12292_v32  ;;  %8891 = vmatmul.mubr.bf16.gmra.mxu1 %v12292_v32  ;;  %15759 = vst [vmem:[#allocation66_spill] sm:$0xff] %v12306_v62  ;;  %v4691_v38 = vor.u32 %v4690_v41, %v4686_v63  ;;  %v4226_v47 = vshrl.u32 %v12021_v45, 16  ;;  %v4362_v4 = vshll.u32 %v12021_v45, 16  ;;  %v3371_v29 = vpop.f32.mrf.mxu1  ;;  %v12315_v48 = vadd.f32 %v3638_v12, %v15760_v10 }
 0x3a0   : > { %v4528_v9 = vrot.slane %v15758_v25, 7  ;;  %8894 = vmatprep.mubr.bf16.mxu1 %v12306_v62  ;;  %v4360_v32 = vor.u32 %v15758_v25, %v4357_v11  ;;  %v3643_v63 = vadd.f32 %v3642_v20, %v12171_v33  ;;  %8955 = vmatpush3.bf16.msra.mxu0 %v9281_v6  ;;  %v15763_v20 = vshrl.u32 %v12019_v55, 16  ;;  %v3645_v25 = vpop.f32.mrf.mxu0 }
 0x3a1   : > { %15761 = vst [vmem:[#allocation82_spill] sm:$0xff] %v12315_v48  ;;  %v12325_v39 = vsel %vm769_vm4, %v4691_v38, %v4695_v34  ;;  %v4361_v41 = vrot.slane %v4226_v47, 7  ;;  %v4529_v29 = vrot.slane %v4362_v4, 7  ;;  %v12328_v62 = vpop.f32.mrf.mxu1  ;;  %6224 = vmatpush1.bf16.msra.mxu1 %v9283_v5  ;;  %v3808_v12 = vadd.f32 %v3807_v31, %v12315_v48  ;;  %v15764_v34 = vld [vmem:[#allocation114_spill] sm:$0xff]  ;;  %v9284_v38 = vld [vmem:[#allocation7 + $0x20] sm:$0xff]  }
 0x3a2   : > { %v12321_v35 = vsel %vm9730_vm2, %v4357_v11, %v4528_v9  ;;  %15762 = vst [vmem:[#allocation129_spill] sm:$0xff] %v12325_v39  ;;  %5553 = vmatprep.mubr.bf16.mxu0 %v12325_v39  ;;  %v3880_v11 = vmul.f32 %v12315_v48, %v12315_v48  ;;  %v12338_v33 = vsel %vm9730_vm2, %v15763_v20, %v4360_v32  ;;  %v4698_v31 = vshrl.u32 %v12216_v49, 16  ;;  %v12375_v57 = vpop.f32.mrf.mxu0 }
 0x3a3   : > { %v5151_v45 = vrot.slane %v12321_v35, 1  ;;  %v12341_v9 = vadd.f32 %v3643_v63, %v15764_v34  ;;  %v5150_v6 = vrot.slane %v12338_v33, 1  ;;  %v4364_v5 = vor.u32 %v4362_v4, %v4361_v41  ;;  %v3374_v39 = vpop.f32.mrf.mxu1  ;;  %6225 = vmatprep.subr.bf16.mxu1 %v15750_v54 }
 0x3a4   : > { %v12346_v10 = vsel %vm9730_vm2, %v4361_v41, %v4529_v29  ;;  %v3948_v55 = vadd.f32 %v3947_v59, %v3880_v11  ;;  %v4700_v29 = vshll.u32 %v12216_v49, 16  ;;  %v4705_v39 = vshll.u32 %v12220_v16, 16 }
 0x3a5   : > { %v5154_v32 = vrot.slane %v12346_v10, 1  ;;  %v3809_v63 = vadd.f32 %v3808_v12, %v12341_v9  ;;  %v3881_v20 = vmul.f32 %v12341_v9, %v12341_v9  ;;  %v12355_v4 = vsel %vm1250_vm3, %v5150_v6, %v5151_v45  ;;  %v12363_v34 = vpop.f32.mrf.mxu1  ;;  %6226 = vmatpush1.bf16.msra.mxu1 %v9284_v38 }
 0x3a6   : > { %15765 = vst [vmem:[#allocation85_spill] sm:$0xff] %v12355_v4  ;;  %v12359_v41 = vsel %vm9730_vm2, %v4226_v47, %v4364_v5  ;;  %v3646_v11 = vadd.f32 %v3645_v25, %v12204_v40  ;;  %v15766_v45 = vshrl.u32 %v12023_v27, 16  ;;  %6227 = vmatprep.subr.bf16.mxu1 %v15750_v54  ;;  %v9285_v47 = vld [vmem:[#allocation7 + $0x18] sm:$0xff]   ;;  %5554 = vmatmul.mubr.bf16.gmra.mxu0 %v12199_v53  ;;  %v4702_v5 = vrot.slane %v4700_v29, 1 }
 0x3a7   : > { %8895 = vmatmul.mubr.bf16.gmra.mxu1 %v12355_v4  ;;  %v5153_v59 = vrot.slane %v12359_v41, 1  ;;  %v3949_v12 = vadd.f32 %v3948_v55, %v3881_v20  ;;  %v4707_v16 = vrot.slane %v4705_v39, 1  ;;  %v15767_v8 = vshll.u32 %v12023_v27, 16  ;;  %v3379_v55 = vpop.f32.mrf.mxu1 }
 0x3a8   : > { %v4365_v6 = vrot.slane %v15766_v45, 7  ;;  %v4232_v4 = vshrl.u32 %v12025_v44, 16  ;;  %v12381_v25 = vadd.f32 %v3646_v11, %v11789_v23  ;;  %v4370_v29 = vshll.u32 %v12025_v44, 16 }
 0x3a9   : > { %v4530_v38 = vrot.slane %v15767_v8, 7  ;;  %v12378_v40 = vsel %vm1250_vm3, %v5153_v59, %v5154_v32  ;;  %v15769_v20 = vmov %v15767_v8  ;;  %v4703_v39 = vor.u32 %v4702_v5, %v4698_v31  ;;  %v12393_v59 = vpop.f32.mrf.mxu1  ;;  %6228 = vmatpush1.bf16.msra.mxu1 %v9285_v47  ;;  %v9286_v5 = vld [vmem:[#allocation7 + $0x10] sm:$0xff]  }
 0x3aa   : > { %15768 = vst [vmem:[#allocation47_spill] sm:$0xff] %v12378_v40  ;;  %v4368_v45 = vor.u32 %v15769_v20, %v4365_v6  ;;  %8898 = vmatprep.mubr.bf16.mxu1 %v12378_v40  ;;  %v4369_v53 = vrot.slane %v4232_v4, 7  ;;  %v3651_v32 = vadd.f32 %v12248_v19, %v12234_v43  ;;  %v3810_v23 = vadd.f32 %v3809_v63, %v12381_v25  ;;  %v15773_v20 = vld [vmem:[#allocation89_spill] sm:$0xff] }
 0x3ab   : > { %v12389_v8 = vsel %vm9730_vm2, %v4365_v6, %v4530_v38  ;;  %v3882_v11 = vmul.f32 %v12381_v25, %v12381_v25  ;;  %v15770_v44 = vshrl.u32 %v12023_v27, 16  ;;  %6229 = vmatprep.subr.bf16.mxu1 %v15750_v54  ;;  %v12407_v43 = vsel %vm769_vm4, %v4703_v39, %v4707_v16  ;;  %v3658_v38 = vpop.f32.mrf.mxu0  ;;  %v3382_v55 = vpop.f32.mrf.mxu1 }
 0x3ac   : > { %v5157_v6 = vrot.slane %v12389_v8, 1  ;;  %15772 = vst [vmem:[#allocation50_spill] sm:$0xff] %v12407_v43  ;;  %v4372_v63 = vor.u32 %v4370_v29, %v4369_v53  ;;  %v4531_v47 = vrot.slane %v4370_v29, 7  ;;  %5561 = vmatprep.mubr.bf16.mxu0 %v12407_v43  ;;  %v4712_v40 = vshll.u32 %v12270_v18, 16 }
 0x3ad   : > { %v12402_v31 = vsel %vm9730_vm2, %v15770_v44, %v4368_v45  ;;  %v3950_v27 = vadd.f32 %v3949_v12, %v3882_v11  ;;  %v12412_v45 = vadd.f32 %v3651_v32, %v15773_v20  ;;  %v4710_v44 = vshrl.u32 %v12270_v18, 16  ;;  %v12428_v39 = vpop.f32.mrf.mxu1  ;;  %6230 = vmatpush1.bf16.msra.mxu1 %v9286_v5  ;;  %v12442_v55 = vpop.f32.mrf.mxu0 }
 0x3ae   : > { %15771 = vst [vmem:[#allocation13_spill] sm:$0xff] %v12402_v31  ;;  %v5156_v19 = vrot.slane %v12402_v31, 1  ;;  %v12421_v16 = vsel %vm9730_vm2, %v4232_v4, %v4372_v63  ;;  %v12425_v29 = vsel %vm9730_vm2, %v4369_v53, %v4531_v47  ;;  %v4717_v12 = vshll.u32 %v12254_v51, 16  ;;  %6231 = vmatprep.subr.bf16.mxu1 %v15750_v54  ;;  %v9287_v53 = vld [vmem:[#allocation7 + $0x8] sm:$0xff]   ;;  %5562 = vmatmul.mubr.bf16.gmra.mxu0 %v12216_v49 }
 0x3af   : > { %v5159_v32 = vrot.slane %v12421_v16, 1  ;;  %v5160_v11 = vrot.slane %v12425_v29, 1  ;;  %v3883_v4 = vmul.f32 %v12412_v45, %v12412_v45  ;;  %v4714_v51 = vrot.slane %v4712_v40, 1  ;;  %v3387_v20 = vpop.f32.mrf.mxu1 }
 0x3b0   : > { %v12417_v1 = vsel %vm1250_vm3, %v5156_v19, %v5157_v6  ;;  %v3811_v6 = vadd.f32 %v3810_v23, %v12412_v45  ;;  %v4719_v19 = vrot.slane %v4717_v12, 1  ;;  %v3654_v5 = vadd.f32 %v12311_v36, %v12263_v21  ;;  %v15778_v12 = vld [vmem:[#allocation118_spill] sm:$0xff] }
 0x3b1   : > { %15774 = vst [vmem:[#allocation131_spill] sm:$0xff] %v12417_v1  ;;  %8899 = vmatmul.mubr.bf16.gmra.mxu1 %v12417_v1  ;;  %v15775_v63 = vshrl.u32 %v12027_v0, 16  ;;  %v12445_v23 = vsel %vm1250_vm3, %v5159_v32, %v5160_v11  ;;  %v3951_v1 = vadd.f32 %v3950_v27, %v3883_v4  ;;  %v15777_v43 = vshll.u32 %v12027_v0, 16  ;;  %v12457_v46 = vpop.f32.mrf.mxu1  ;;  %v9288_v11 = vld [vmem:[#allocation7] sm:$0xff]  }
 0x3b2   : > { %15776 = vst [vmem:[#allocation86_spill] sm:$0xff] %v12445_v23  ;;  %v4238_v49 = vshrl.u32 %v12029_v52, 16  ;;  %8902 = vmatprep.mubr.bf16.mxu1 %v12445_v23  ;;  %v4715_v40 = vor.u32 %v4714_v51, %v4710_v44  ;;  %v12452_v21 = vadd.f32 %v3654_v5, %v15778_v12  ;;  %v4378_v20 = vshll.u32 %v12029_v52, 16  ;;  %6232 = vmatpush1.bf16.msra.mxu1 %v9287_v53  ;;  %v15783_v12 = vld [vmem:[#allocation34_spill] sm:$0xff] }
 0x3b3   : > { %v4373_v47 = vrot.slane %v15775_v63, 7  ;;  %v4532_v42 = vrot.slane %v15777_v43, 7  ;;  %v15779_v36 = vmov %v15777_v43  ;;  %v3659_v32 = vadd.f32 %v3658_v38, %v12295_v30  ;;  %6233 = vmatprep.subr.bf16.mxu1 %v15750_v54  ;;  %v3661_v30 = vpop.f32.mrf.mxu0  ;;  %v3390_v38 = vpop.f32.mrf.mxu1 }
 0x3b4   : > { %v4377_v43 = vrot.slane %v4238_v49, 7  ;;  %v4722_v44 = vshrl.u32 %v12285_v56, 16  ;;  %v12467_v4 = vsel %vm769_vm4, %v4715_v40, %v4719_v19  ;;  %v3812_v52 = vadd.f32 %v3811_v6, %v12452_v21 }
 0x3b5   : > { %v4376_v63 = vor.u32 %v15779_v36, %v4373_v47  ;;  %v12461_v27 = vsel %vm9730_vm2, %v4373_v47, %v4532_v42  ;;  %15780 = vst [vmem:[#allocation14_spill] sm:$0xff] %v12467_v4  ;;  %v3884_v53 = vmul.f32 %v12452_v21, %v12452_v21  ;;  %v15781_v51 = vshrl.u32 %v12027_v0, 16  ;;  %5569 = vmatprep.mubr.bf16.mxu0 %v12467_v4 }
 0x3b6   : > { %v5163_v19 = vrot.slane %v12461_v27, 1  ;;  %v4380_v47 = vor.u32 %v4378_v20, %v4377_v43  ;;  %v4533_v40 = vrot.slane %v4378_v20, 7  ;;  %v12482_v36 = vadd.f32 %v3659_v32, %v15783_v12  ;;  %6234 = vmatpush1.bf16.msra.mxu1 %v9288_v11  ;;  %v9289_v32 = vld [vmem:[#allocation7 + $0x78] sm:$0xff]   ;;  %5570 = vmatmul.mubr.bf16.gmra.mxu0 %v12270_v18  ;;  %v12520_v18 = vpop.f32.mrf.mxu0 }
 0x3b7   : > { %v12476_v42 = vsel %vm9730_vm2, %v15781_v51, %v4376_v63  ;;  %v3952_v6 = vadd.f32 %v3951_v1, %v3884_v53  ;;  %v4724_v0 = vshll.u32 %v12285_v56, 16  ;;  %v4729_v23 = vshll.u32 %v12279_v3, 16  ;;  %v12486_v63 = vpop.f32.mrf.mxu1  ;;  %6235 = vmatprep.subr.bf16.mxu1 %v15750_v54 }
 0x3b8   : > { %15782 = vst [vmem:[#allocation90_spill] sm:$0xff] %v12476_v42  ;;  %v5162_v5 = vrot.slane %v12476_v42, 1  ;;  %v12493_v38 = vsel %vm9730_vm2, %v4238_v49, %v4380_v47  ;;  %v12497_v1 = vsel %vm9730_vm2, %v4377_v43, %v4533_v40  ;;  %v3662_v20 = vadd.f32 %v3661_v30, %v12328_v62  ;;  %v15785_v62 = vld [vmem:[#allocation40_spill] sm:$0xff] }
 0x3b9   : > { %v5165_v3 = vrot.slane %v12493_v38, 1  ;;  %v5166_v11 = vrot.slane %v12497_v1, 1  ;;  %v3813_v53 = vadd.f32 %v3812_v52, %v12482_v36  ;;  %v3885_v49 = vmul.f32 %v12482_v36, %v12482_v36  ;;  %v3395_v43 = vpop.f32.mrf.mxu1 }
 0x3ba   : > { %v12489_v51 = vsel %vm1250_vm3, %v5162_v5, %v5163_v19  ;;  %v4726_v5 = vrot.slane %v4724_v0, 1  ;;  %v4731_v19 = vrot.slane %v4729_v23, 1  ;;  %v12509_v30 = vadd.f32 %v3662_v20, %v15785_v62  ;;  %6236 = vmatpush2.bf16.msra.mxu1 %v9289_v32  ;;  %v9290_v23 = vld [vmem:[#allocation7 + $0x90] sm:$0xff]  }
 0x3bb   : > { %15784 = vst [vmem:[#allocation51_spill] sm:$0xff] %v12489_v51  ;;  %8903 = vmatmul.mubr.bf16.gmra.mxu1 %v12489_v51  ;;  %v15786_v47 = vshrl.u32 %v12033_v15, 16  ;;  %v12514_v12 = vsel %vm1250_vm3, %v5165_v3, %v5166_v11  ;;  %v3953_v51 = vadd.f32 %v3952_v6, %v3885_v49  ;;  %v15788_v52 = vshll.u32 %v12033_v15, 16  ;;  %v12522_v0 = vpop.f32.mrf.mxu1  ;;  %v9291_v49 = vld [vmem:[#allocation7 + $0x70] sm:$0xff]   ;;  %6237 = vmatprep.subr.bf16.mxu1 %v15750_v54 }
 0x3bc   : > { %15787 = vst [vmem:[#allocation99_spill] sm:$0xff] %v12514_v12  ;;  %v15789_v26 = vshrl.u32 %v12035_v28, 16  ;;  %8906 = vmatprep.mubr.bf16.mxu1 %v12514_v12  ;;  %v4727_v20 = vor.u32 %v4726_v5, %v4722_v44  ;;  %v3814_v43 = vadd.f32 %v3813_v53, %v12509_v30  ;;  %v3886_v6 = vmul.f32 %v12509_v30, %v12509_v30 }
 0x3bd   : > { %v4381_v40 = vrot.slane %v15786_v47, 7  ;;  %v4534_v4 = vrot.slane %v15788_v52, 7  ;;  %v15790_v3 = vmov %v15788_v52  ;;  %v15791_v62 = vshll.u32 %v12035_v28, 16  ;;  %v3398_v53 = vpop.f32.mrf.mxu1  ;;  %8956 = vmatprep.subr.bf16.mxu0 %v9290_v23 }
 0x3be   : > { %v4385_v48 = vrot.slane %v15789_v26, 7  ;;  %v3667_v44 = vadd.f32 %v12375_v57, %v12363_v34  ;;  %v12542_v5 = vsel %vm769_vm4, %v4727_v20, %v4731_v19  ;;  %8957 = vmatpush3.bf16.msra.mxu0 %v9290_v23  ;;  %v15796_v34 = vshrl.u32 %v12035_v28, 16  ;;  %6238 = vmatpush2.bf16.msra.mxu1 %v9291_v49 }
 0x3bf   : > { %v4384_v11 = vor.u32 %v15790_v3, %v4381_v40  ;;  %v12532_v26 = vsel %vm9730_vm2, %v4381_v40, %v4534_v4  ;;  %v15792_v47 = vmov %v15791_v62  ;;  %15793 = vst [vmem:[#allocation130_spill] sm:$0xff] %v12542_v5  ;;  %v3954_v3 = vadd.f32 %v3953_v51, %v3886_v6  ;;  %5577 = vmatprep.mubr.bf16.mxu0 %v12542_v5  ;;  %v15798_v51 = vld [vmem:[#allocation48_spill] sm:$0xff]  ;;  %v3674_v6 = vpop.f32.mrf.mxu0 }
 0x3c0   : > { %v4388_v32 = vor.u32 %v15791_v62, %v4385_v48  ;;  %v4535_v52 = vrot.slane %v15792_v47, 7  ;;  %v15794_v4 = vshrl.u32 %v12033_v15, 16  ;;  %v5169_v62 = vrot.slane %v12532_v26, 1  ;;  %6239 = vmatprep.subr.bf16.mxu1 %v15750_v54  ;;  %5578 = vmatmul.mubr.bf16.gmra.mxu0 %v12285_v56 }
 0x3c1   : > { %v12564_v20 = vadd.f32 %v3667_v44, %v15798_v51  ;;  %v4734_v47 = vshrl.u32 %v12338_v33, 16  ;;  %v4736_v28 = vshll.u32 %v12338_v33, 16  ;;  %v4741_v49 = vshll.u32 %v12321_v35, 16 }
 0x3c2   : > { %v12548_v40 = vsel %vm9730_vm2, %v15794_v4, %v4384_v11  ;;  %v12557_v19 = vsel %vm9730_vm2, %v15796_v34, %v4388_v32  ;;  %v12561_v15 = vsel %vm9730_vm2, %v4385_v48, %v4535_v52  ;;  %v9292_v32 = vld [vmem:[#allocation7 + $0x68] sm:$0xff]   ;;  %v3670_v34 = vadd.f32 %v12442_v55, %v12393_v59 }
 0x3c3   : > { %15795 = vst [vmem:[#allocation91_spill] sm:$0xff] %v12548_v40  ;;  %v5168_v57 = vrot.slane %v12548_v40, 1  ;;  %15797 = vst [vmem:[#allocation20_spill] sm:$0xff] %v12557_v19  ;;  %v5171_v23 = vrot.slane %v12557_v19, 1  ;;  %v5172_v11 = vrot.slane %v12561_v15, 1  ;;  %v3815_v48 = vadd.f32 %v3814_v43, %v12564_v20  ;;  %6240 = vmatpush2.bf16.msra.mxu1 %v9292_v32 }
 0x3c4   : > { %v3887_v52 = vmul.f32 %v12564_v20, %v12564_v20  ;;  %v4738_v4 = vrot.slane %v4736_v28, 1  ;;  %v4743_v12 = vrot.slane %v4741_v49, 1  ;;  %v3675_v35 = vadd.f32 %v3674_v6, %v12428_v39  ;;  %6241 = vmatprep.subr.bf16.mxu1 %v15750_v54 }
 0x3c5   : > { %v12572_v53 = vsel %vm1250_vm3, %v5168_v57, %v5169_v62  ;;  %v12581_v44 = vsel %vm1250_vm3, %v5171_v23, %v5172_v11  ;;  %v15801_v62 = vld [vmem:[#allocation68_spill] sm:$0xff]  ;;  %v15804_v11 = vld [vmem:[#allocation93_spill] sm:$0xff]  ;;  %v4748_v6 = vshll.u32 %v12359_v41, 16 }
 0x3c6   : > { %15799 = vst [vmem:[#allocation94_spill] sm:$0xff] %v12572_v53  ;;  %8907 = vmatmul.mubr.bf16.gmra.mxu1 %v12572_v53  ;;  %15800 = vst [vmem:[#allocation54_spill] sm:$0xff] %v12581_v44  ;;  %v15802_v57 = vshrl.u32 %v15801_v62, 16  ;;  %v3955_v43 = vadd.f32 %v3954_v3, %v3887_v52  ;;  %v15803_v56 = vshll.u32 %v15801_v62, 16  ;;  %v8865_v53 = vpop.f32.mrf.mxu0  ;;  %v4739_v23 = vor.u32 %v4738_v4, %v4734_v47  ;;  %v9293_v3 = vld [vmem:[#allocation7 + $0x60] sm:$0xff]  }
 0x3c7   : > { %8910 = vmatprep.mubr.bf16.mxu1 %v12581_v44  ;;  %v12592_v28 = vadd.f32 %v3670_v34, %v15804_v11  ;;  %v4753_v47 = vshll.u32 %v12346_v10, 16  ;;  %v15808_v34 = vshrl.u32 %v15801_v62, 16  ;;  %6242 = vmatpush2.bf16.msra.mxu1 %v9293_v3  ;;  %v15811_v11 = vld [vmem:[#allocation95_spill] sm:$0xff]  ;;  %v3683_v3 = vadd.f32 %v12520_v18, %v12486_v63 }
 0x3c8   : > { %v4389_v51 = vrot.slane %v15802_v57, 7  ;;  %v4536_v5 = vrot.slane %v15803_v56, 7  ;;  %v15805_v59 = vmov %v15803_v56  ;;  %v4746_v57 = vshrl.u32 %v12359_v41, 16  ;;  %v15806_v56 = vld [vmem:[#allocation117_spill] sm:$0xff]  ;;  %6243 = vmatprep.subr.bf16.mxu1 %v15750_v54 }
 0x3c9   : > { %v12603_v39 = vadd.f32 %v3675_v35, %v15806_v56  ;;  %v12608_v32 = vsel %vm769_vm4, %v4739_v23, %v4743_v12  ;;  %v3816_v49 = vadd.f32 %v3815_v48, %v12592_v28  ;;  %v3888_v4 = vmul.f32 %v12592_v28, %v12592_v28  ;;  %v3677_v35 = vpop.f32.mrf.mxu0  ;;  %v15810_v23 = vld [vmem:[#allocation110_spill] sm:$0xff] }
 0x3ca   : > { %v4392_v55 = vor.u32 %v15805_v59, %v4389_v51  ;;  %v12600_v52 = vsel %vm9730_vm2, %v4389_v51, %v4536_v5  ;;  %15807 = vst [vmem:[#allocation57_spill] sm:$0xff] %v12608_v32  ;;  %5585 = vmatprep.mubr.bf16.mxu0 %v12608_v32  ;;  %v4750_v48 = vrot.slane %v4748_v6, 1  ;;  %v2908_v59 = vadd.f32 %v15811_v11, %v15810_v23 }
 0x3cb   : > { %v5175_v10 = vrot.slane %v12600_v52, 1  ;;  %v3889_v12 = vmul.f32 %v12603_v39, %v12603_v39  ;;  %v3956_v62 = vadd.f32 %v3955_v43, %v3888_v4  ;;  %v3817_v56 = vadd.f32 %v3816_v49, %v12603_v39  ;;  %5586 = vmatmul.mubr.bf16.gmra.mxu0 %v12338_v33  ;;  %v15813_v4 = vld [vmem:[#allocation121_spill] sm:$0xff] }
 0x3cc   : > { %v12617_v5 = vsel %vm9730_vm2, %v15808_v34, %v4392_v55  ;;  %v3678_v55 = vadd.f32 %v3677_v35, %v12457_v46  ;;  %v9294_v34 = vld [vmem:[#allocation7 + $0x58] sm:$0xff]   ;;  %v4751_v32 = vor.u32 %v4750_v48, %v4746_v57  ;;  %v4755_v13 = vrot.slane %v4753_v47, 1 }
 0x3cd   : > { %15809 = vst [vmem:[#allocation133_spill] sm:$0xff] %v12617_v5  ;;  %v5174_v51 = vrot.slane %v12617_v5, 1  ;;  %v3957_v43 = vadd.f32 %v3956_v62, %v3889_v12  ;;  %v4760_v46 = vshll.u32 %v12402_v31, 16  ;;  %v3686_v57 = vadd.f32 %v8865_v53, %v12522_v0  ;;  %6244 = vmatpush2.bf16.msra.mxu1 %v9294_v34  ;;  %v9296_v62 = vld [vmem:[#allocation7 + $0x48] sm:$0xff]  }
 0x3ce   : > { %v12636_v6 = vadd.f32 %v3678_v55, %v2908_v59  ;;  %v12640_v49 = vsel %vm769_vm4, %v4751_v32, %v4755_v13  ;;  %v4758_v47 = vshrl.u32 %v12402_v31, 16  ;;  %6245 = vmatprep.subr.bf16.mxu1 %v15750_v54  ;;  %v9295_v13 = vld [vmem:[#allocation7 + $0x50] sm:$0xff]   ;;  %v4772_v0 = vshll.u32 %v12421_v16, 16 }
 0x3cf   : > { %v12630_v44 = vsel %vm1250_vm3, %v5174_v51, %v5175_v10  ;;  %v12643_v51 = vadd.f32 %v3683_v3, %v15813_v4  ;;  %v4765_v10 = vshll.u32 %v12389_v8, 16  ;;  %5593 = vmatprep.mubr.bf16.mxu0 %v12640_v49  ;;  %v4762_v12 = vrot.slane %v4760_v46, 1  ;;  %v15814_v8 = vld [vmem:[#allocation36_spill] sm:$0xff] }
 0x3d0   : > { %15812 = vst [vmem:[#allocation17_spill] sm:$0xff] %v12630_v44  ;;  %8911 = vmatmul.mubr.bf16.gmra.mxu1 %v12630_v44  ;;  %v3818_v18 = vadd.f32 %v3817_v56, %v12636_v6  ;;  %v3890_v63 = vmul.f32 %v12636_v6, %v12636_v6  ;;  %v12656_v35 = vadd.f32 %v3686_v57, %v15814_v8  ;;  %v4774_v3 = vrot.slane %v4772_v0, 1 }
 0x3d1   : > { %v3891_v32 = vmul.f32 %v12643_v51, %v12643_v51  ;;  %v4763_v23 = vor.u32 %v4762_v12, %v4758_v47  ;;  %v4767_v11 = vrot.slane %v4765_v10, 1  ;;  %6246 = vmatpush2.bf16.msra.mxu1 %v9295_v13  ;;  %v4770_v4 = vshrl.u32 %v12421_v16, 16 }
 0x3d2   : > { %v3958_v53 = vadd.f32 %v3957_v43, %v3890_v63  ;;  %v3819_v48 = vadd.f32 %v3818_v18, %v12643_v51  ;;  %v3892_v59 = vmul.f32 %v12656_v35, %v12656_v35  ;;  %6247 = vmatprep.subr.bf16.mxu1 %v15750_v54  ;;  %v4777_v10 = vshll.u32 %v12425_v29, 16  ;;  %v9297_v63 = vld [vmem:[#allocation7 + $0x40] sm:$0xff]  }
 0x3d3   : > { %5594 = vmatmul.mubr.bf16.gmra.mxu0 %v12359_v41  ;;  %v12666_v34 = vsel %vm769_vm4, %v4763_v23, %v4767_v11  ;;  %v4775_v47 = vor.u32 %v4774_v3, %v4770_v4  ;;  %v4784_v12 = vshll.u32 %v12476_v42, 16 }
 0x3d4   : > { %v3959_v56 = vadd.f32 %v3958_v53, %v3891_v32  ;;  %v3820_v55 = vadd.f32 %v3819_v48, %v12656_v35  ;;  %5601 = vmatprep.mubr.bf16.mxu0 %v12666_v34  ;;  %v4779_v8 = vrot.slane %v4777_v10, 1 }
 0x3d5   : > { %6248 = vmatpush2.bf16.msra.mxu1 %v9296_v62  ;;  %v4786_v29 = vrot.slane %v4784_v12, 1  ;;  %v4789_v62 = vshll.u32 %v12461_v27, 16 }
 0x3d6   : > { %v3821_v43 = vrot.slane %v3820_v55, 4  ;;  %v3960_v46 = vadd.f32 %v3959_v56, %v3892_v59  ;;  %6249 = vmatprep.subr.bf16.mxu1 %v15750_v54  ;;  %v12675_v48 = vsel %vm769_vm4, %v4775_v47, %v4779_v8  ;;  %v4782_v59 = vshrl.u32 %v12476_v42, 16 }
 0x3d7   : > { %v4796_v56 = vshll.u32 %v12493_v38, 16  ;;  %v4808_v8 = vshll.u32 %v12548_v40, 16 }
 0x3d8   : > { %v3822_v57 = vadd.f32 %v3821_v43, %v3820_v55  ;;  %v3961_v18 = vrot.slane %v3960_v46, 4  ;;  %v9298_v55 = vld [vmem:[#allocation7 + $0x88] sm:$0xff]  }
 0x3d9   : > { %6250 = vmatpush2.bf16.msra.mxu1 %v9297_v63  ;;  %8958 = vmatprep.subr.bf16.mxu0 %v9298_v55  ;;  %v4801_v63 = vshll.u32 %v12497_v1, 16  ;;  %v4794_v1 = vshrl.u32 %v12493_v38, 16 }
 0x3da   : > { %v3823_v13 = vrot.slane %v3822_v57, 2  ;;  %v3962_v32 = vadd.f32 %v3961_v18, %v3960_v46  ;;  %v4787_v46 = vor.u32 %v4786_v29, %v4782_v59  ;;  %8959 = vmatpush3.bf16.msra.mxu0 %v9298_v55  ;;  %v4798_v18 = vrot.slane %v4796_v56, 1 }
 0x3db   : > { %5602 = vmatmul.mubr.bf16.gmra.mxu0 %v12402_v31  ;;  %v4806_v59 = vshrl.u32 %v12548_v40, 16  ;;  %v4813_v56 = vshll.u32 %v12532_v26, 16  ;;  %v4818_v55 = vshrl.u32 %v12557_v19, 16  ;;  %v4830_v26 = vshrl.u32 %v12617_v5, 16 }
 0x3dc   : > { %v3824_v0 = vadd.f32 %v3823_v13, %v3822_v57  ;;  %v3963_v53 = vrot.slane %v3962_v32, 2  ;;  %5609 = vmatprep.mubr.bf16.mxu0 %v12675_v48  ;;  %v4791_v57 = vrot.slane %v4789_v62, 1  ;;  %v4810_v62 = vrot.slane %v4808_v8, 1 }
 0x3de   : > { %v3825_v23 = vrot.slane %v3824_v0, 1  ;;  %v3964_v11 = vadd.f32 %v3963_v53, %v3962_v32  ;;  %v12692_v32 = vsel %vm769_vm4, %v4787_v46, %v4791_v57  ;;  %v4820_v53 = vshll.u32 %v12557_v19, 16 }
 0x3e0   : > { %v3826_v3 = vadd.f32 %v3825_v23, %v3824_v0  ;;  %v3965_v43 = vrot.slane %v3964_v11, 1  ;;  %v4799_v23 = vor.u32 %v4798_v18, %v4794_v1  ;;  %v4822_v46 = vrot.slane %v4820_v53, 1 }
 0x3e1   : > { %v4811_v53 = vor.u32 %v4810_v62, %v4806_v59  ;;  %v15819_v59 = vld [vmem:[#allocation138_spill] sm:$0xff] }
 0x3e2   : > { %v12681_v4 = vmul.f32 0.00390625, %v3826_v3  ;;  %v3966_v10 = vadd.f32 %v3965_v43, %v3964_v11  ;;  %v4803_v11 = vrot.slane %v4801_v63, 1  ;;  %v4825_v3 = vshll.u32 %v12561_v15, 16 }
 0x3e3   : > { %5610 = vmatmul.mubr.bf16.gmra.mxu0 %v12421_v16  ;;  %v4815_v63 = vrot.slane %v4813_v56, 1 }
 0x3e4   : > { %v3968_v47 = vmul.f32 0.00390625, %v3966_v10  ;;  %v3970_v12 = vmul.f32 %v12681_v4, %v12681_v4  ;;  %v4035_v27 = vsub.f32 %v12643_v51, %v12681_v4  ;;  %v4036_v13 = vsub.f32 %v12656_v35, %v12681_v4  ;;  %5617 = vmatprep.mubr.bf16.mxu0 %v12692_v32 }
 0x3e5   : > { %v4832_v10 = vshll.u32 %v12617_v5, 16  ;;  %v12725_v1 = vsel %vm769_vm4, %v4799_v23, %v4803_v11  ;;  %v12731_v8 = vsel %vm769_vm4, %v4811_v53, %v4815_v63  ;;  %v15818_v11 = vld [vmem:[#allocation38_spill] sm:$0xff]  ;;  %v4006_v62 = vsub.f32 %v15819_v59, %v12681_v4  ;;  %v15823_v63 = vld [vmem:[#allocation124_spill] sm:$0xff] }
 0x3e6   : > { %v3972_v0 = vsub.f32 %v3968_v47, %v3970_v12  ;;  %15815 = vst [vmem:[#allocation56_spill] sm:$0xff] %v12725_v1  ;;  %v4837_v47 = vshll.u32 %v12600_v52, 16  ;;  %v4827_v12 = vrot.slane %v4825_v3, 1  ;;  %15816 = vst [vmem:[#allocation61_spill] sm:$0xff] %v12731_v8  ;;  %v4005_v57 = vsub.f32 %v15818_v11, %v12681_v4  ;;  %v15820_v52 = vld [vmem:[#allocation122_spill] sm:$0xff] }
 0x3e7   : > { %v4834_v15 = vrot.slane %v4832_v10, 1  ;;  %v4007_v56 = vsub.f32 %v15820_v52, %v12681_v4  ;;  %v4014_v11 = vsub.f32 %v12069_v14, %v12681_v4  ;;  %v4015_v59 = vsub.f32 %v12079_v50, %v12681_v4 }
 0x3e8   : > { %v4038_v29 = vadd.f32 1e-05, %v3972_v0  ;;  %v4839_v23 = vrot.slane %v4837_v47, 1  ;;  %v15825_v47 = vld [vmem:[#allocation42_spill] sm:$0xff]  ;;  %v4016_v52 = vsub.f32 %v12082_v61, %v12681_v4  ;;  %v4020_v14 = vsub.f32 %v12176_v2, %v12681_v4 }
 0x3e9   : > { %v4835_v18 = vor.u32 %v4834_v15, %v4830_v26  ;;  %v15824_v26 = vld [vmem:[#allocation45_spill] sm:$0xff]  ;;  %v4012_v53 = vsub.f32 %v15825_v47, %v12681_v4  ;;  %v4021_v61 = vsub.f32 %v12207_v37, %v12681_v4 }
 0x3ea   : > { %9326 = vrsqrt.f32 %v4038_v29  ;;  %v4823_v29 = vor.u32 %v4822_v46, %v4818_v55  ;;  %v15821_v55 = vld [vmem:[#allocation41_spill] sm:$0xff]  ;;  %v4011_v15 = vsub.f32 %v15824_v26, %v12681_v4 }
 0x3eb   : > { %5618 = vmatmul.mubr.bf16.gmra.mxu0 %v12476_v42  ;;  %v4008_v3 = vsub.f32 %v15821_v55, %v12681_v4  ;;  %v15822_v46 = vld [vmem:[#allocation97_spill] sm:$0xff]  ;;  %v4017_v55 = vsub.f32 %v12085_v7, %v12681_v4  ;;  %v4023_v7 = vsub.f32 %v12273_v17, %v12681_v4 }
 0x3ec   : > { %5625 = vmatprep.mubr.bf16.mxu0 %v12725_v1  ;;  %v12734_v0 = vsel %vm769_vm4, %v4823_v29, %v4827_v12  ;;  %v4009_v10 = vsub.f32 %v15822_v46, %v12681_v4  ;;  %v4010_v12 = vsub.f32 %v15823_v63, %v12681_v4  ;;  %v4013_v29 = vsub.f32 %v11880_v24, %v12681_v4 }
 0x3ed   : > { %15817 = vst [vmem:[#allocation132_spill] sm:$0xff] %v12734_v0  ;;  %v4018_v46 = vsub.f32 %v12091_v22, %v12681_v4  ;;  %v4019_v24 = vsub.f32 %v12129_v60, %v12681_v4  ;;  %v4022_v63 = vsub.f32 %v12230_v58, %v12681_v4  ;;  %v15826_v22 = vld [vmem:[#allocation82_spill] sm:$0xff] }
 0x3ee   : > { %v4024_v26 = vsub.f32 %v15826_v22, %v12681_v4 }
 0x3f3   : > { %5626 = vmatmul.mubr.bf16.gmra.mxu0 %v12493_v38 }
 0x3f4   : > { %5633 = vmatprep.mubr.bf16.mxu0 %v12731_v8 }
 0x3f7   : > { %v9327_v50 = vpop.eup %9326 }
 0x3f8   : > { %v4103_v60 = vmul.f32 %v9327_v50, %v4035_v27  ;;  %v4104_v2 = vmul.f32 %v9327_v50, %v4036_v13  ;;  %v12784_v47 = vmul.f32 %v9327_v50, %v4005_v57  ;;  %v12786_v37 = vmul.f32 %v9327_v50, %v4006_v62 }
 0x3f9   : > { %v12788_v43 = vmul.f32 %v9327_v50, %v4007_v56  ;;  %v12790_v58 = vmul.f32 %v9327_v50, %v4008_v3  ;;  %v12792_v17 = vmul.f32 %v9327_v50, %v4009_v10  ;;  %v12794_v44 = vmul.f32 %v9327_v50, %v4010_v12 }
 0x3fa   : > { %v4167_v22 = vmax.f32 %v4103_v60, 0.0  ;;  %v4168_v8 = vmax.f32 %v4104_v2, 0.0  ;;  %v12796_v51 = vmul.f32 %v9327_v50, %v4011_v15  ;;  %v12798_v27 = vmul.f32 %v9327_v50, %v4012_v53 }
 0x3fb   : > { %v12800_v35 = vmul.f32 %v9327_v50, %v4013_v29  ;;  %v12802_v13 = vmul.f32 %v9327_v50, %v4014_v11  ;;  %v12804_v57 = vmul.f32 %v9327_v50, %v4015_v59  ;;  %v12806_v62 = vmul.f32 %v9327_v50, %v4016_v52  ;;  %5634 = vmatmul.mubr.bf16.gmra.mxu0 %v12548_v40 }
 0x3fc   : > { %v12808_v56 = vpack.c.bf16 %v4168_v8, %v4167_v22  ;;  %v12810_v3 = vmul.f32 %v9327_v50, %v4017_v55  ;;  %v12812_v10 = vmul.f32 %v9327_v50, %v4018_v46  ;;  %v12814_v12 = vmul.f32 %v9327_v50, %v4019_v24  ;;  %5641 = vmatprep.mubr.bf16.mxu0 %v12734_v0 }
 0x3fd   : > { %v4088_v15 = vmul.f32 %v9327_v50, %v4020_v14  ;;  %v4089_v60 = vmul.f32 %v9327_v50, %v4021_v61  ;;  %v4090_v53 = vmul.f32 %v9327_v50, %v4022_v63  ;;  %v4091_v2 = vmul.f32 %v9327_v50, %v4023_v7  ;;  %v9299_v7 = vld [vmem:[#allocation7 + $0x80] sm:$0xff]  }
 0x3fe   : > { %v4092_v29 = vmul.f32 %v9327_v50, %v4024_v26  ;;  %v15827_v11 = vsub.f32 %v12341_v9, %v12681_v4  ;;  %v12822_v8 = vsel %vm769_vm4, %v4835_v18, %v4839_v23  ;;  %v15829_v52 = vsub.f32 %v12381_v25, %v12681_v4  ;;  %8960 = vmatprep.subr.bf16.mxu0 %v9299_v7 }
 0x3ff   : > { %15828 = vst [vmem:[#allocation24_spill] sm:$0xff] %v12822_v8  ;;  %v15830_v46 = vsub.f32 %v12412_v45, %v12681_v4  ;;  %v15831_v14 = vsub.f32 %v12452_v21, %v12681_v4  ;;  %v15832_v9 = vsub.f32 %v12482_v36, %v12681_v4  ;;  %v15833_v18 = vsub.f32 %v12509_v30, %v12681_v4 }
 0x400   : > { %v4093_v59 = vmul.f32 %v9327_v50, %v15827_v11  ;;  %v4094_v55 = vmul.f32 %v9327_v50, %v15829_v52  ;;  %v15834_v25 = vsub.f32 %v12564_v20, %v12681_v4  ;;  %v15835_v45 = vsub.f32 %v12592_v28, %v12681_v4  ;;  %8961 = vmatpush3.bf16.msra.mxu0 %v9299_v7 }
 0x401   : > { %v4095_v24 = vmul.f32 %v9327_v50, %v15830_v46  ;;  %v4096_v61 = vmul.f32 %v9327_v50, %v15831_v14  ;;  %v4097_v63 = vmul.f32 %v9327_v50, %v15832_v9  ;;  %v4098_v23 = vmul.f32 %v9327_v50, %v15833_v18  ;;  %6989 = vmatprep.subr.bf16.mxu0 %v15750_v54 }
 0x402   : > { %v4099_v26 = vmul.f32 %v9327_v50, %v15834_v25  ;;  %v4100_v22 = vmul.f32 %v9327_v50, %v15835_v45  ;;  %v15836_v21 = vsub.f32 %v12603_v39, %v12681_v4  ;;  %v15837_v36 = vsub.f32 %v12636_v6, %v12681_v4 }
 0x403   : > { %v4137_v46 = vmax.f32 %v12784_v47, 0.0  ;;  %v4138_v30 = vmax.f32 %v12786_v37, 0.0  ;;  %v4139_v14 = vmax.f32 %v12788_v43, 0.0  ;;  %v4140_v20 = vmax.f32 %v12790_v58, 0.0  ;;  %5642 = vmatmul.mubr.bf16.gmra.mxu0 %v12557_v19 }
 0x404   : > { %v4101_v11 = vmul.f32 %v9327_v50, %v15836_v21  ;;  %v4102_v52 = vmul.f32 %v9327_v50, %v15837_v36  ;;  %v4141_v28 = vmax.f32 %v12792_v17, 0.0  ;;  %v4142_v9 = vmax.f32 %v12794_v44, 0.0  ;;  %5649 = vmatprep.mubr.bf16.mxu0 %v12822_v8 }
 0x405   : > { %v4143_v39 = vmax.f32 %v12796_v51, 0.0  ;;  %v4144_v18 = vmax.f32 %v12798_v27, 0.0  ;;  %v4145_v6 = vmax.f32 %v12800_v35, 0.0  ;;  %v4146_v4 = vmax.f32 %v12802_v13, 0.0 }
 0x406   : > { %v4147_v50 = vmax.f32 %v12804_v57, 0.0  ;;  %v4148_v43 = vmax.f32 %v12806_v62, 0.0  ;;  %v4149_v47 = vmax.f32 %v12810_v3, 0.0  ;;  %v4150_v37 = vmax.f32 %v12812_v10, 0.0 }
 0x407   : > { %v4151_v44 = vmax.f32 %v12814_v12, 0.0  ;;  %v4152_v58 = vmax.f32 %v4088_v15, 0.0  ;;  %v4153_v17 = vmax.f32 %v4089_v60, 0.0  ;;  %v4154_v51 = vmax.f32 %v4090_v53, 0.0 }
 0x408   : > { %v4155_v27 = vmax.f32 %v4091_v2, 0.0  ;;  %v4156_v35 = vmax.f32 %v4092_v29, 0.0  ;;  %v4157_v13 = vmax.f32 %v4093_v59, 0.0  ;;  %v4158_v7 = vmax.f32 %v4094_v55, 0.0 }
 0x409   : > { %v4159_v57 = vmax.f32 %v4095_v24, 0.0  ;;  %v4160_v25 = vmax.f32 %v4096_v61, 0.0  ;;  %v4161_v62 = vmax.f32 %v4097_v63, 0.0  ;;  %v4162_v45 = vmax.f32 %v4098_v23, 0.0 }
 0x40a   : > { %v4163_v3 = vmax.f32 %v4099_v26, 0.0  ;;  %v4164_v21 = vmax.f32 %v4100_v22, 0.0  ;;  %v4165_v10 = vmax.f32 %v4101_v11, 0.0  ;;  %v4166_v36 = vmax.f32 %v4102_v52, 0.0 }
 0x40b   : > { %v4185_v12 = vpack.c.bf16 %v4138_v30, %v4137_v46  ;;  %v4186_v15 = vpack.c.bf16 %v4140_v20, %v4139_v14  ;;  %v4187_v60 = vpack.c.bf16 %v4142_v9, %v4141_v28  ;;  %v12869_v53 = vpack.c.bf16 %v4144_v18, %v4143_v39  ;;  %5650 = vmatmul.mubr.bf16.gmra.mxu0 %v12617_v5 }
 0x40c   : > { %v12871_v2 = vpack.c.bf16 %v4146_v4, %v4145_v6  ;;  %v12873_v29 = vpack.c.bf16 %v4148_v43, %v4147_v50  ;;  %v12875_v59 = vpack.c.bf16 %v4150_v37, %v4149_v47  ;;  %v12877_v55 = vpack.c.bf16 %v4152_v58, %v4151_v44 }
 0x40d   : > { %v12879_v24 = vpack.c.bf16 %v4154_v51, %v4153_v17  ;;  %v12881_v61 = vpack.c.bf16 %v4156_v35, %v4155_v27  ;;  %v12883_v63 = vpack.c.bf16 %v4158_v7, %v4157_v13  ;;  %v12885_v23 = vpack.c.bf16 %v4160_v25, %v4159_v57 }
 0x40e   : > { %v12887_v26 = vpack.c.bf16 %v4162_v45, %v4161_v62  ;;  %v12889_v22 = vpack.c.bf16 %v4164_v21, %v4163_v3  ;;  %v12891_v11 = vpack.c.bf16 %v4166_v36, %v4165_v10  ;;  %v4250_v52 = vshrl.u32 %v4186_v15, 16 }
 0x40f   : > { %v4394_v46 = vshll.u32 %v4186_v15, 16  ;;  %v4259_v30 = vshrl.u32 %v12869_v53, 16  ;;  %v4406_v14 = vshll.u32 %v12869_v53, 16  ;;  %v4253_v20 = vshrl.u32 %v4185_v12, 16 }
 0x410   : > { %v4398_v28 = vshll.u32 %v4185_v12, 16  ;;  %v4393_v9 = vrot.slane %v4250_v52, 7  ;;  %v4256_v18 = vshrl.u32 %v4187_v60, 16  ;;  %v4402_v6 = vshll.u32 %v4187_v60, 16 }
 0x411   : > { %v4537_v39 = vrot.slane %v4394_v46, 7  ;;  %v4265_v4 = vshrl.u32 %v12873_v29, 16  ;;  %v4397_v50 = vrot.slane %v4253_v20, 7  ;;  %v4414_v51 = vshll.u32 %v12873_v29, 16 }
 0x412   : > { %v4538_v43 = vrot.slane %v4398_v28, 7  ;;  %v4396_v47 = vor.u32 %v4394_v46, %v4393_v9  ;;  %v4401_v58 = vrot.slane %v4256_v18, 7  ;;  %v4539_v17 = vrot.slane %v4402_v6, 7 }
 0x413   : > { %v4633_v44 = vsel %vm9730_vm2, %v4393_v9, %v4537_v39  ;;  %v4400_v27 = vor.u32 %v4398_v28, %v4397_v50  ;;  %v4405_v13 = vrot.slane %v4259_v30, 7  ;;  %v4540_v62 = vrot.slane %v4406_v14, 7  ;;  %v12926_v28 = vld [vmem:[#allocation7 + $0x238] sm:$0xff]  }
 0x414   : > { %v4634_v35 = vsel %vm9730_vm2, %v4397_v50, %v4538_v43  ;;  %v12904_v7 = vsel %vm9730_vm2, %v4250_v52, %v4396_v47  ;;  %v4404_v57 = vor.u32 %v4402_v6, %v4401_v58  ;;  %v12908_v25 = vsel %vm9730_vm2, %v4401_v58, %v4539_v17  ;;  %9026 = vmatprep.subr.bf16.mxu1 %v12926_v28 }
 0x415   : > { %15839 = vst [vmem:[#allocation60_spill] sm:$0xff] %v12904_v7  ;;  %v12912_v45 = vsel %vm9730_vm2, %v4253_v20, %v4400_v27  ;;  %v5177_v3 = vrot.slane %v12904_v7, 1  ;;  %v5178_v21 = vrot.slane %v4633_v44, 1  ;;  %v4861_v10 = vshll.u32 %v4634_v35, 16 }
 0x416   : > { %v5180_v36 = vrot.slane %v12912_v45, 1  ;;  %v5181_v12 = vrot.slane %v4634_v35, 1  ;;  %v12918_v15 = vsel %vm9730_vm2, %v4256_v18, %v4404_v57  ;;  %v4856_v60 = vshll.u32 %v12912_v45, 16 }
 0x417   : > { %15840 = vst [vmem:[#allocation64_spill] sm:$0xff] %v12918_v15  ;;  %v12922_v53 = vsel %vm1250_vm3, %v5177_v3, %v5178_v21  ;;  %v5183_v52 = vrot.slane %v12918_v15, 1  ;;  %v5184_v46 = vrot.slane %v12908_v25, 1  ;;  %v4849_v20 = vshll.u32 %v4633_v44, 16 }
 0x418   : > { %15841 = vst [vmem:[#allocation135_spill] sm:$0xff] %v12922_v53  ;;  %v12929_v9 = vsel %vm1250_vm3, %v5180_v36, %v5181_v12  ;;  %v4854_v39 = vshrl.u32 %v12912_v45, 16  ;;  %v4858_v6 = vrot.slane %v4856_v60, 1  ;;  %v4844_v18 = vshll.u32 %v12904_v7, 16 }
 0x419   : > { %8914 = vmatprep.mubr.bf16.mxu1 %v12929_v9  ;;  %v4863_v50 = vrot.slane %v4861_v10, 1  ;;  %v4842_v43 = vshrl.u32 %v12904_v7, 16  ;;  %v4408_v47 = vor.u32 %v4406_v14, %v4405_v13  ;;  %v4262_v58 = vshrl.u32 %v12871_v2, 16 }
 0x41a   : > { %8915 = vmatmul.mubr.bf16.gmra.mxu1 %v12922_v53  ;;  %v12939_v44 = vsel %vm1250_vm3, %v5183_v52, %v5184_v46  ;;  %v4859_v17 = vor.u32 %v4858_v6, %v4854_v39  ;;  %v4846_v27 = vrot.slane %v4844_v18, 1  ;;  %v4410_v35 = vshll.u32 %v12871_v2, 16 }
 0x41b   : > { %15842 = vst [vmem:[#allocation21_spill] sm:$0xff] %v12939_v44  ;;  %8918 = vmatprep.mubr.bf16.mxu1 %v12939_v44  ;;  %v12945_v57 = vsel %vm9730_vm2, %v4259_v30, %v4408_v47  ;;  %v12949_v14 = vsel %vm9730_vm2, %v4405_v13, %v4540_v62  ;;  %v4409_v3 = vrot.slane %v4262_v58, 7  ;;  %v4868_v21 = vshll.u32 %v12918_v15, 16 }
 0x41c   : > { %15843 = vst [vmem:[#allocation63_spill] sm:$0xff] %v12945_v57  ;;  %v12953_v10 = vsel %vm769_vm4, %v4859_v17, %v4863_v50  ;;  %v4847_v36 = vor.u32 %v4846_v27, %v4842_v43  ;;  %v4851_v12 = vrot.slane %v4849_v20, 1  ;;  %v4541_v60 = vrot.slane %v4410_v35, 7 }
 0x41d   : > { %5657 = vmatprep.mubr.bf16.mxu0 %v12953_v10  ;;  %v5186_v2 = vrot.slane %v12945_v57, 1  ;;  %v4412_v52 = vor.u32 %v4410_v35, %v4409_v3  ;;  %v4870_v30 = vrot.slane %v4868_v21, 1  ;;  %v4413_v46 = vrot.slane %v4265_v4, 7 }
 0x41e   : > { %v4271_v13 = vshrl.u32 %v12877_v55, 16  ;;  %5658 = vmatmul.mubr.bf16.gmra.mxu0 %v12912_v45  ;;  %v12962_v62 = vsel %vm769_vm4, %v4847_v36, %v4851_v12  ;;  %v5187_v39 = vrot.slane %v12949_v14, 1  ;;  %v12967_v20 = vsel %vm9730_vm2, %v4409_v3, %v4541_v60 }
 0x41f   : > { %15844 = vst [vmem:[#allocation67_spill] sm:$0xff] %v12962_v62  ;;  %5665 = vmatprep.mubr.bf16.mxu0 %v12962_v62  ;;  %v12972_v6 = vsel %vm9730_vm2, %v4262_v58, %v4412_v52  ;;  %v4866_v18 = vshrl.u32 %v12918_v15, 16  ;;  %v4873_v50 = vshll.u32 %v12908_v25, 16  ;;  %v4542_v43 = vrot.slane %v4414_v51, 7 }
 0x420   : > { %15845 = vst [vmem:[#allocation134_spill] sm:$0xff] %v12972_v6  ;;  %v5189_v47 = vrot.slane %v12972_v6, 1  ;;  %v5190_v17 = vrot.slane %v12967_v20, 1  ;;  %v4416_v27 = vor.u32 %v4414_v51, %v4413_v46  ;;  %v4268_v35 = vshrl.u32 %v12875_v59, 16 }
 0x421   : > { %v12980_v3 = vsel %vm1250_vm3, %v5186_v2, %v5187_v39  ;;  %v4871_v21 = vor.u32 %v4870_v30, %v4866_v18  ;;  %v4418_v36 = vshll.u32 %v12875_v59, 16  ;;  %v4880_v12 = vshll.u32 %v12945_v57, 16 }
 0x422   : > { %15846 = vst [vmem:[#allocation29_spill] sm:$0xff] %v12980_v3  ;;  %8919 = vmatmul.mubr.bf16.gmra.mxu1 %v12980_v3  ;;  %v12985_v58 = vsel %vm1250_vm3, %v5189_v47, %v5190_v17  ;;  %v12991_v25 = vsel %vm9730_vm2, %v4265_v4, %v4416_v27  ;;  %v4417_v51 = vrot.slane %v4268_v35, 7  ;;  %v4422_v60 = vshll.u32 %v12877_v55, 16 }
 0x423   : > { %15847 = vst [vmem:[#allocation69_spill] sm:$0xff] %v12985_v58  ;;  %15848 = vst [vmem:[#allocation70_spill] sm:$0xff] %v12991_v25  ;;  %8922 = vmatprep.mubr.bf16.mxu1 %v12985_v58  ;;  %v4543_v2 = vrot.slane %v4418_v36, 7  ;;  %v4421_v59 = vrot.slane %v4271_v13, 7  ;;  %v4875_v52 = vrot.slane %v4873_v50, 1  ;;  %v12998_v30 = vsel %vm9730_vm2, %v4413_v46, %v4542_v43 }
 0x424   : > { %v4420_v39 = vor.u32 %v4418_v36, %v4417_v51  ;;  %v4274_v29 = vshrl.u32 %v12879_v24, 16  ;;  %v4277_v4 = vshrl.u32 %v12881_v61, 16  ;;  %v5192_v18 = vrot.slane %v12991_v25, 1 }
 0x425   : > { %v13005_v47 = vsel %vm9730_vm2, %v4417_v51, %v4543_v2  ;;  %v4424_v55 = vor.u32 %v4422_v60, %v4421_v59  ;;  %v13009_v50 = vsel %vm769_vm4, %v4871_v21, %v4875_v52  ;;  %v4882_v43 = vrot.slane %v4880_v12, 1 }
 0x426   : > { %5666 = vmatmul.mubr.bf16.gmra.mxu0 %v12904_v7  ;;  %15849 = vst [vmem:[#allocation137_spill] sm:$0xff] %v13009_v50  ;;  %v13013_v46 = vsel %vm9730_vm2, %v4268_v35, %v4420_v39  ;;  %v5193_v17 = vrot.slane %v12998_v30, 1  ;;  %v4878_v36 = vshrl.u32 %v12945_v57, 16  ;;  %v4425_v51 = vrot.slane %v4274_v29, 7 }
 0x427   : > { %15850 = vst [vmem:[#allocation25_spill] sm:$0xff] %v13013_v46  ;;  %5673 = vmatprep.mubr.bf16.mxu0 %v13009_v50  ;;  %v5195_v27 = vrot.slane %v13013_v46, 1  ;;  %v5196_v2 = vrot.slane %v13005_v47, 1  ;;  %v4885_v5 = vshll.u32 %v12949_v14, 16  ;;  %v4544_v21 = vrot.slane %v4422_v60, 7 }
 0x428   : > { %v4426_v52 = vshll.u32 %v12879_v24, 16  ;;  %v13023_v35 = vsel %vm1250_vm3, %v5192_v18, %v5193_v17  ;;  %v13027_v12 = vsel %vm9730_vm2, %v4271_v13, %v4424_v55  ;;  %v4892_v39 = vshll.u32 %v12972_v6, 16 }
 0x429   : > { %15851 = vst [vmem:[#allocation71_spill] sm:$0xff] %v13023_v35  ;;  %15852 = vst [vmem:[#allocation73_spill] sm:$0xff] %v13027_v12  ;;  %v4429_v8 = vrot.slane %v4277_v4, 7  ;;  %v13032_v58 = vsel %vm1250_vm3, %v5195_v27, %v5196_v2  ;;  %v4883_v50 = vor.u32 %v4882_v43, %v4878_v36  ;;  %v4430_v24 = vshll.u32 %v12881_v61, 16 }
 0x42a   : > { %8923 = vmatmul.mubr.bf16.gmra.mxu1 %v13023_v35  ;;  %15853 = vst [vmem:[#allocation136_spill] sm:$0xff] %v13032_v58  ;;  %v4428_v14 = vor.u32 %v4426_v52, %v4425_v51  ;;  %v4545_v60 = vrot.slane %v4426_v52, 7  ;;  %v4280_v18 = vshrl.u32 %v12883_v63, 16  ;;  %v4887_v17 = vrot.slane %v4885_v5, 1 }
 0x42b   : > { %8926 = vmatprep.mubr.bf16.mxu1 %v13032_v58  ;;  %v13039_v13 = vsel %vm9730_vm2, %v4421_v59, %v4544_v21  ;;  %v5198_v55 = vrot.slane %v13027_v12, 1  ;;  %v4894_v61 = vrot.slane %v4892_v39, 1  ;;  %v4432_v36 = vor.u32 %v4430_v24, %v4429_v8 }
 0x42c   : > { %v13044_v27 = vsel %vm9730_vm2, %v4274_v29, %v4428_v14  ;;  %v13048_v43 = vsel %vm9730_vm2, %v4425_v51, %v4545_v60  ;;  %v4434_v2 = vshll.u32 %v12883_v63, 16  ;;  %v4283_v5 = vshrl.u32 %v12885_v23, 16 }
 0x42d   : > { %v13054_v59 = vsel %vm769_vm4, %v4883_v50, %v4887_v17  ;;  %v5201_v21 = vrot.slane %v13044_v27, 1  ;;  %v4433_v52 = vrot.slane %v4280_v18, 7  ;;  %v5199_v29 = vrot.slane %v13039_v13, 1 }
 0x42e   : > { %5674 = vmatmul.mubr.bf16.gmra.mxu0 %v12918_v15  ;;  %15854 = vst [vmem:[#allocation75_spill] sm:$0xff] %v13054_v59  ;;  %v4890_v51 = vshrl.u32 %v12972_v6, 16  ;;  %v5202_v39 = vrot.slane %v13048_v43, 1  ;;  %v4897_v63 = vshll.u32 %v12967_v20, 16  ;;  %v4546_v14 = vrot.slane %v4430_v24, 7 }
 0x42f   : > { %5681 = vmatprep.mubr.bf16.mxu0 %v13054_v59  ;;  %v4436_v60 = vor.u32 %v4434_v2, %v4433_v52  ;;  %v13063_v58 = vsel %vm1250_vm3, %v5198_v55, %v5199_v29  ;;  %v13067_v17 = vsel %vm9730_vm2, %v4277_v4, %v4432_v36  ;;  %v4547_v15 = vrot.slane %v4434_v2, 7 }
 0x430   : > { %15855 = vst [vmem:[#allocation101_spill] sm:$0xff] %v13063_v58  ;;  %v4895_v50 = vor.u32 %v4894_v61, %v4890_v51  ;;  %v13071_v59 = vsel %vm1250_vm3, %v5201_v21, %v5202_v39  ;;  %v4904_v35 = vshll.u32 %v12991_v25, 16  ;;  %v4437_v3 = vrot.slane %v4283_v5, 7 }
 0x431   : > { %15856 = vst [vmem:[#allocation78_spill] sm:$0xff] %v13071_v59  ;;  %v4286_v20 = vshrl.u32 %v12887_v26, 16  ;;  %v13078_v24 = vsel %vm9730_vm2, %v4280_v18, %v4436_v60  ;;  %v4438_v4 = vshll.u32 %v12885_v23, 16  ;;  %v4899_v55 = vrot.slane %v4897_v63, 1 }
 0x432   : > { %8927 = vmatmul.mubr.bf16.gmra.mxu1 %v13063_v58  ;;  %15857 = vst [vmem:[#allocation104_spill] sm:$0xff] %v13078_v24  ;;  %v13083_v61 = vsel %vm9730_vm2, %v4429_v8, %v4546_v14  ;;  %v4289_v2 = vshrl.u32 %v12889_v22, 16  ;;  %v5204_v21 = vrot.slane %v13067_v17, 1  ;;  %v13089_v29 = vsel %vm9730_vm2, %v4433_v52, %v4547_v15 }
 0x433   : > { %8930 = vmatprep.mubr.bf16.mxu1 %v13071_v59  ;;  %v4441_v36 = vrot.slane %v4286_v20, 7  ;;  %v4442_v51 = vshll.u32 %v12887_v26, 16  ;;  %v13094_v23 = vsel %vm769_vm4, %v4895_v50, %v4899_v55  ;;  %v5207_v18 = vrot.slane %v13078_v24, 1 }
 0x434   : > { %15858 = vst [vmem:[#allocation81_spill] sm:$0xff] %v13094_v23  ;;  %v4906_v8 = vrot.slane %v4904_v35, 1  ;;  %v4440_v39 = vor.u32 %v4438_v4, %v4437_v3  ;;  %v4292_v63 = vshrl.u32 %v12891_v11, 16  ;;  %v5205_v14 = vrot.slane %v13083_v61, 1 }
 0x435   : > { %v4444_v60 = vor.u32 %v4442_v51, %v4441_v36  ;;  %v5208_v15 = vrot.slane %v13089_v29, 1  ;;  %v4902_v26 = vshrl.u32 %v12991_v25, 16  ;;  %v4909_v52 = vshll.u32 %v12998_v30, 16 }
 0x436   : > { %5682 = vmatmul.mubr.bf16.gmra.mxu0 %v12945_v57  ;;  %v4548_v59 = vrot.slane %v4438_v4, 7  ;;  %v13104_v50 = vsel %vm1250_vm3, %v5204_v21, %v5205_v14  ;;  %v4549_v55 = vrot.slane %v4442_v51, 7  ;;  %v4916_v35 = vshll.u32 %v13013_v46, 16 }
 0x437   : > { %5689 = vmatprep.mubr.bf16.mxu0 %v13094_v23  ;;  %15859 = vst [vmem:[#allocation107_spill] sm:$0xff] %v13104_v50  ;;  %v13109_v23 = vsel %vm1250_vm3, %v5207_v18, %v5208_v15  ;;  %v4907_v57 = vor.u32 %v4906_v8, %v4902_v26  ;;  %v13113_v58 = vsel %vm9730_vm2, %v4283_v5, %v4440_v39  ;;  %v4445_v44 = vrot.slane %v4289_v2, 7 }
 0x438   : > { %15860 = vst [vmem:[#allocation83_spill] sm:$0xff] %v13109_v23  ;;  %15861 = vst [vmem:[#allocation111_spill] sm:$0xff] %v13113_v58  ;;  %v13118_v30 = vsel %vm9730_vm2, %v4286_v20, %v4444_v60  ;;  %v4449_v4 = vrot.slane %v4292_v63, 7  ;;  %v4446_v21 = vshll.u32 %v12889_v22, 16  ;;  %v4911_v51 = vrot.slane %v4909_v52, 1 }
 0x439   : > { %v13123_v18 = vsel %vm9730_vm2, %v4437_v3, %v4548_v59  ;;  %v4450_v8 = vshll.u32 %v12891_v11, 16  ;;  %v5210_v5 = vrot.slane %v13113_v58, 1  ;;  %v13129_v39 = vsel %vm9730_vm2, %v4441_v36, %v4549_v55 }
 0x43a   : > { %8931 = vmatmul.mubr.bf16.gmra.mxu1 %v13104_v50  ;;  %v4918_v14 = vrot.slane %v4916_v35, 1  ;;  %v4295_v20 = vshrl.u32 %v12808_v56, 16  ;;  %v13134_v22 = vsel %vm769_vm4, %v4907_v57, %v4911_v51  ;;  %v5213_v60 = vrot.slane %v13118_v30, 1 }
 0x43b   : > { %8934 = vmatprep.mubr.bf16.mxu1 %v13109_v23  ;;  %15862 = vst [vmem:[#allocation87_spill] sm:$0xff] %v13134_v22  ;;  %v4448_v3 = vor.u32 %v4446_v21, %v4445_v44  ;;  %v5211_v11 = vrot.slane %v13123_v18, 1  ;;  %v4914_v59 = vshrl.u32 %v13013_v46, 16  ;;  %v4452_v15 = vor.u32 %v4450_v8, %v4449_v4 }
 0x43c   : > { %v5214_v36 = vrot.slane %v13129_v39, 1  ;;  %v4921_v26 = vshll.u32 %v13005_v47, 16  ;;  %v4550_v52 = vrot.slane %v4446_v21, 7  ;;  %v4551_v35 = vrot.slane %v4450_v8, 7 }
 0x43d   : > { %v13143_v55 = vsel %vm1250_vm3, %v5210_v5, %v5211_v11  ;;  %v4919_v57 = vor.u32 %v4918_v14, %v4914_v59  ;;  %v13151_v23 = vsel %vm9730_vm2, %v4289_v2, %v4448_v3  ;;  %v13157_v47 = vsel %vm9730_vm2, %v4292_v63, %v4452_v15 }
 0x43e   : > { %5690 = vmatmul.mubr.bf16.gmra.mxu0 %v12972_v6  ;;  %v13147_v51 = vsel %vm1250_vm3, %v5213_v60, %v5214_v36  ;;  %15864 = vst [vmem:[#allocation88_spill] sm:$0xff] %v13151_v23  ;;  %v4453_v6 = vrot.slane %v4295_v20, 7  ;;  %v4454_v21 = vshll.u32 %v12808_v56, 16  ;;  %v4923_v8 = vrot.slane %v4921_v26, 1 }
 0x43f   : > { %5697 = vmatprep.mubr.bf16.mxu0 %v13134_v22  ;;  %15863 = vst [vmem:[#allocation115_spill] sm:$0xff] %v13147_v51  ;;  %v4928_v22 = vshll.u32 %v13027_v12, 16  ;;  %v13162_v5 = vsel %vm9730_vm2, %v4445_v44, %v4550_v52  ;;  %v5216_v14 = vrot.slane %v13151_v23, 1  ;;  %v13167_v2 = vsel %vm9730_vm2, %v4449_v4, %v4551_v35 }
 0x440   : > { %v13171_v60 = vsel %vm769_vm4, %v4919_v57, %v4923_v8  ;;  %v5219_v63 = vrot.slane %v13157_v47, 1  ;;  %v4456_v56 = vor.u32 %v4454_v21, %v4453_v6  ;;  %v5217_v44 = vrot.slane %v13162_v5, 1 }
 0x441   : > { %v4930_v3 = vrot.slane %v4928_v22, 1  ;;  %v5220_v11 = vrot.slane %v13167_v2, 1  ;;  %v4926_v59 = vshrl.u32 %v13027_v12, 16  ;;  %v4933_v4 = vshll.u32 %v13039_v13, 16 }
 0x442   : > { %8935 = vmatmul.mubr.bf16.gmra.mxu1 %v13143_v55  ;;  %v4552_v15 = vrot.slane %v4454_v21, 7  ;;  %v13180_v36 = vsel %vm1250_vm3, %v5216_v14, %v5217_v44  ;;  %v13188_v52 = vsel %vm9730_vm2, %v4295_v20, %v4456_v56  ;;  %v4940_v57 = vshll.u32 %v13044_v27, 16 }
 0x443   : > { %8938 = vmatprep.mubr.bf16.mxu1 %v13147_v51  ;;  %15865 = vst [vmem:[#allocation120_spill] sm:$0xff] %v13180_v36  ;;  %v13184_v26 = vsel %vm1250_vm3, %v5219_v63, %v5220_v11  ;;  %v4931_v22 = vor.u32 %v4930_v3, %v4926_v59  ;;  %15867 = vst [vmem:[#allocation19_spill] sm:$0xff] %v13188_v52  ;;  %v4935_v35 = vrot.slane %v4933_v4, 1  ;;  %v5222_v21 = vrot.slane %v13188_v52, 1  ;;  %v15870_v59 = vld [vmem:[#allocation49_spill] sm:$0xff] }
 0x444   : > { %15866 = vst [vmem:[#allocation102_spill] sm:$0xff] %v13184_v26  ;;  %v13194_v13 = vsel %vm9730_vm2, %v4453_v6, %v4552_v15  ;;  %v4942_v14 = vrot.slane %v4940_v57, 1  ;;  %v4938_v3 = vshrl.u32 %v13044_v27, 16  ;;  %v4945_v56 = vshll.u32 %v13048_v43, 16 }
 0x445   : > { %v13199_v8 = vsel %vm769_vm4, %v4931_v22, %v4935_v35  ;;  %v5223_v20 = vrot.slane %v13194_v13, 1  ;;  %v4952_v11 = vshll.u32 %v13067_v17, 16 }
 0x446   : > { %5698 = vmatmul.mubr.bf16.gmra.mxu0 %v12991_v25  ;;  %15868 = vst [vmem:[#allocation92_spill] sm:$0xff] %v13199_v8  ;;  %v4943_v44 = vor.u32 %v4942_v14, %v4938_v3  ;;  %v4947_v4 = vrot.slane %v4945_v56, 1  ;;  %v4950_v14 = vshrl.u32 %v13067_v17, 16 }
 0x447   : > { %5705 = vmatprep.mubr.bf16.mxu0 %v13171_v60  ;;  %v13206_v6 = vsel %vm1250_vm3, %v5222_v21, %v5223_v20  ;;  %v4954_v35 = vrot.slane %v4952_v11, 1  ;;  %v4957_v20 = vshll.u32 %v13083_v61, 16  ;;  %v9310_v61 = vld [vmem:[#allocation7 + $0x228] sm:$0xff]  }
 0x448   : > { %v8884_v63 = vpop.f32.mrf.mxu1  ;;  %15869 = vst [vmem:[#allocation53_spill] sm:$0xff] %v13206_v6  ;;  %v13215_v43 = vsel %vm769_vm4, %v4943_v44, %v4947_v4  ;;  %v4964_v44 = vshll.u32 %v13078_v24, 16  ;;  %v15876_v4 = vld [vmem:[#allocation59_spill] sm:$0xff] }
 0x449   : > { %15872 = vst [vmem:[#allocation58_spill] sm:$0xff] %v13215_v43  ;;  %v4959_v11 = vrot.slane %v4957_v20, 1  ;;  %v4969_v20 = vshll.u32 %v13089_v29, 16 }
 0x44a   : > { %8939 = vmatmul.mubr.bf16.gmra.mxu1 %v13180_v36  ;;  %v5820_v37 = vpop.f32.mrf.mxu1 }
 0x44b   : > { %8942 = vmatprep.mubr.bf16.mxu1 %v13184_v26 }
 0x44c   : > { %v8885_v22 = vpop.f32.mrf.mxu1 }
 0x44e   : > { %5706 = vmatmul.mubr.bf16.gmra.mxu0 %v13013_v46  ;;  %v5531_v15 = vpop.f32.mrf.mxu0  ;;  %v13220_v3 = vpop.f32.mrf.mxu1 }
 0x44f   : > { %5713 = vmatprep.mubr.bf16.mxu0 %v13199_v8  ;;  %v13211_v57 = vadd.f32 %v5820_v37, %v5531_v15  ;;  %15873 = vst [vmem:[#allocation105_spill] sm:$0xff] %v13220_v3  ;;  %v15875_v37 = vld [vmem:[#allocation126_spill] sm:$0xff]  ;;  %v4955_v15 = vor.u32 %v4954_v35, %v4950_v14  ;;  %v4966_v35 = vrot.slane %v4964_v44, 1 }
 0x450   : > { %v5533_v21 = vpop.f32.mrf.mxu0 }
 0x451   : > { %15871 = vst [vmem:[#allocation103_spill] sm:$0xff] %v13211_v57  ;;  %v13232_v3 = vsel %vm769_vm4, %v4955_v15, %v4959_v11  ;;  %v4976_v15 = vshll.u32 %v13113_v58, 16 }
 0x452   : > { %8943 = vmatmul.mubr.bf16.gmra.mxu1 %v13206_v6  ;;  %v13222_v56 = vpop.f32.mrf.mxu0  ;;  %v9305_v6 = vld [vmem:[#allocation7 + $0x230] sm:$0xff]  }
 0x453   : > { %6251 = vmatprep.mubr.bf16.mxu1 %v15870_v59  ;;  %15874 = vst [vmem:[#allocation37_spill] sm:$0xff] %v13222_v56  ;;  %v8888_v21 = vpop.f32.mrf.mxu1 }
 0x454   : > { %v5536_v57 = vpop.f32.mrf.mxu0 }
 0x455   : > { %v5836_v14 = vpop.f32.mrf.mxu1 }
 0x456   : > { %5714 = vmatmul.mubr.bf16.gmra.mxu0 %v13027_v12 }
 0x457   : > { %5721 = vmatprep.mubr.bf16.mxu0 %v13215_v43  ;;  %v5539_v43 = vpop.f32.mrf.mxu0  ;;  %v8889_v44 = vpop.f32.mrf.mxu1 }
 0x458   : > { %v13228_v12 = vadd.f32 %v8884_v63, %v5539_v43  ;;  %v15878_v63 = vld [vmem:[#allocation55_spill] sm:$0xff] }
 0x459   : > { %v5541_v57 = vpop.f32.mrf.mxu0 }
 0x45a   : > { %6252 = vmatmul.mubr.bf16.vlgmr.msra.gmra.mxu1 %v15875_v37  ;;  %15877 = vst [vmem:[#allocation23_spill] sm:$0xff] %v13228_v12 }
 0x45b   : > { %6259 = vmatprep.mubr.bf16.mxu1 %v15876_v4  ;;  %9027 = vmatpush3.bf16.msra.mxu1 %v12926_v28  ;;  %v4962_v28 = vshrl.u32 %v13078_v24, 16  ;;  %v5542_v4 = vpop.f32.mrf.mxu0 }
 0x45c   : > { %9028 = vmatprep.subr.bf16.mxu1 %v9305_v6  ;;  %v13237_v56 = vadd.f32 %v8885_v22, %v5542_v4  ;;  %v4978_v22 = vrot.slane %v4976_v15, 1 }
 0x45d   : > { %v4967_v43 = vor.u32 %v4966_v35, %v4962_v28  ;;  %v5544_v12 = vpop.f32.mrf.mxu0  ;;  %v4974_v35 = vshrl.u32 %v13113_v58, 16 }
 0x45e   : > { %5722 = vmatmul.mubr.bf16.gmra.mxu0 %v13044_v27  ;;  %v13249_v12 = vpop.f32.mrf.mxu1 }
 0x45f   : > { %5729 = vmatprep.mubr.bf16.mxu0 %v13232_v3  ;;  %9029 = vmatpush3.bf16.msra.mxu1 %v9305_v6  ;;  %v4971_v6 = vrot.slane %v4969_v20, 1  ;;  %v5547_v11 = vpop.f32.mrf.mxu0  ;;  %15881 = vst [vmem:[#allocation16_spill] sm:$0xff] %v13249_v12 }
 0x460   : > { %9030 = vmatprep.subr.bf16.mxu1 %v9310_v61  ;;  %v13242_v57 = vadd.f32 %v5836_v14, %v5547_v11  ;;  %v4979_v14 = vor.u32 %v4978_v22, %v4974_v35  ;;  %v8892_v15 = vpop.f32.mrf.mxu1  ;;  %v4986_v35 = vshrl.u32 %v13118_v30, 16 }
 0x461   : > { %v13246_v29 = vsel %vm769_vm4, %v4967_v43, %v4971_v6  ;;  %v5549_v4 = vpop.f32.mrf.mxu0  ;;  %v15883_v43 = vld [vmem:[#allocation62_spill] sm:$0xff] }
 0x462   : > { %6260 = vmatmul.mubr.bf16.gmra.mxu1 %v15878_v63  ;;  %15879 = vst [vmem:[#allocation77_spill] sm:$0xff] %v13242_v57  ;;  %15880 = vst [vmem:[#allocation106_spill] sm:$0xff] %v13246_v29  ;;  %v4988_v63 = vshll.u32 %v13118_v30, 16  ;;  %v5852_v22 = vpop.f32.mrf.mxu1 }
 0x463   : > { %6267 = vmatprep.mubr.bf16.mxu1 %v15870_v59  ;;  %9031 = vmatpush3.bf16.msra.mxu1 %v9310_v61  ;;  %v4981_v61 = vshll.u32 %v13123_v18, 16  ;;  %v13253_v28 = vpop.f32.mrf.mxu0 }
 0x464   : > { %15882 = vst [vmem:[#allocation43_spill] sm:$0xff] %v13253_v28  ;;  %v4990_v18 = vrot.slane %v4988_v63, 1  ;;  %v8893_v63 = vpop.f32.mrf.mxu1 }
 0x465   : > { %v5552_v20 = vpop.f32.mrf.mxu0  ;;  %v4983_v6 = vrot.slane %v4981_v61, 1  ;;  %v15887_v61 = vld [vmem:[#allocation52_spill] sm:$0xff] }
 0x466   : > { %5730 = vmatmul.mubr.bf16.gmra.mxu0 %v13067_v17  ;;  %v4993_v20 = vshll.u32 %v13129_v39, 16 }
 0x467   : > { %5737 = vmatprep.mubr.bf16.mxu0 %v13246_v29  ;;  %v5555_v11 = vpop.f32.mrf.mxu0  ;;  %v13262_v12 = vsel %vm769_vm4, %v4979_v14, %v4983_v6  ;;  %v15888_v14 = vld [vmem:[#allocation129_spill] sm:$0xff] }
 0x468   : > { %v13258_v4 = vadd.f32 %v8888_v21, %v5555_v11  ;;  %15885 = vst [vmem:[#allocation100_spill] sm:$0xff] %v13262_v12  ;;  %v4991_v21 = vor.u32 %v4990_v18, %v4986_v35  ;;  %v13279_v18 = vpop.f32.mrf.mxu1  ;;  %v4998_v35 = vshrl.u32 %v13151_v23, 16 }
 0x469   : > { %v5557_v28 = vpop.f32.mrf.mxu0  ;;  %15891 = vst [vmem:[#allocation22_spill] sm:$0xff] %v13279_v18 }
 0x46a   : > { %6268 = vmatmul.mubr.bf16.gmra.mxu1 %v15875_v37  ;;  %15884 = vst [vmem:[#allocation72_spill] sm:$0xff] %v13258_v4  ;;  %v5000_v4 = vshll.u32 %v13151_v23, 16  ;;  %v4995_v28 = vrot.slane %v4993_v20, 1  ;;  %v9315_v20 = vld [vmem:[#allocation7 + $0x220] sm:$0xff]  }
 0x46b   : > { %6275 = vmatprep.mubr.bf16.mxu1 %v15883_v43  ;;  %v5558_v29 = vpop.f32.mrf.mxu0  ;;  %9032 = vmatprep.subr.bf16.mxu1 %v9315_v20 }
 0x46c   : > { %v13267_v57 = vadd.f32 %v8889_v44, %v5558_v29  ;;  %v13276_v39 = vsel %vm769_vm4, %v4991_v21, %v4995_v28  ;;  %v5002_v44 = vrot.slane %v5000_v4, 1  ;;  %v5012_v21 = vshll.u32 %v13157_v47, 16  ;;  %v15894_v4 = vld [vmem:[#allocation50_spill] sm:$0xff]  ;;  %9033 = vmatpush3.bf16.msra.mxu1 %v9315_v20  ;;  %v8896_v28 = vpop.f32.mrf.mxu1 }
 0x46d   : > { %v5560_v11 = vpop.f32.mrf.mxu0  ;;  %15890 = vst [vmem:[#allocation46_spill] sm:$0xff] %v13276_v39 }
 0x46e   : > { %5738 = vmatmul.mubr.bf16.gmra.mxu0 %v13078_v24  ;;  %15886 = vst [vmem:[#allocation26_spill] sm:$0xff] %v13267_v57  ;;  %v5005_v11 = vshll.u32 %v13162_v5, 16 }
 0x46f   : > { %5745 = vmatprep.mubr.bf16.mxu0 %v13262_v12  ;;  %v5563_v6 = vpop.f32.mrf.mxu0 }
 0x470   : > { %v13272_v12 = vadd.f32 %v5852_v22, %v5563_v6  ;;  %v15893_v22 = vld [vmem:[#allocation76_spill] sm:$0xff]  ;;  %v5003_v6 = vor.u32 %v5002_v44, %v4998_v35  ;;  %v5010_v44 = vshrl.u32 %v13157_v47, 16  ;;  %v5017_v35 = vshll.u32 %v13167_v2, 16 }
 0x471   : > { %v5565_v29 = vpop.f32.mrf.mxu0 }
 0x472   : > { %6276 = vmatmul.mubr.bf16.gmra.mxu1 %v15887_v61  ;;  %15889 = vst [vmem:[#allocation18_spill] sm:$0xff] %v13272_v12  ;;  %v5007_v29 = vrot.slane %v5005_v11, 1  ;;  %v15898_v11 = vld [vmem:[#allocation139_spill] sm:$0xff] }
 0x473   : > { %6283 = vmatprep.mubr.bf16.mxu1 %v15888_v14  ;;  %v13283_v57 = vpop.f32.mrf.mxu0 }
 0x474   : > { %15892 = vst [vmem:[#allocation65_spill] sm:$0xff] %v13283_v57  ;;  %v13292_v5 = vsel %vm769_vm4, %v5003_v6, %v5007_v29  ;;  %v5014_v57 = vrot.slane %v5012_v21, 1  ;;  %v15899_v6 = vld [vmem:[#allocation14_spill] sm:$0xff] }
 0x475   : > { %v5568_v12 = vpop.f32.mrf.mxu0  ;;  %15896 = vst [vmem:[#allocation108_spill] sm:$0xff] %v13292_v5 }
 0x476   : > { %5746 = vmatmul.mubr.bf16.gmra.mxu0 %v13113_v58  ;;  %v5868_v12 = vpop.f32.mrf.mxu1 }
 0x477   : > { %5753 = vmatprep.mubr.bf16.mxu0 %v13276_v39  ;;  %v5571_v18 = vpop.f32.mrf.mxu0 }
 0x478   : > { %v13288_v39 = vadd.f32 %v8892_v15, %v5571_v18  ;;  %v5015_v15 = vor.u32 %v5014_v57, %v5010_v44  ;;  %v8897_v21 = vpop.f32.mrf.mxu1  ;;  %v5022_v44 = vshrl.u32 %v13188_v52, 16 }
 0x479   : > { %v5573_v58 = vpop.f32.mrf.mxu0 }
 0x47a   : > { %6284 = vmatmul.mubr.bf16.gmra.mxu1 %v15893_v22  ;;  %15895 = vst [vmem:[#allocation109_spill] sm:$0xff] %v13288_v39  ;;  %v5024_v39 = vshll.u32 %v13188_v52, 16  ;;  %v5019_v58 = vrot.slane %v5017_v35, 1  ;;  %v13309_v57 = vpop.f32.mrf.mxu1  ;;  %v15904_v35 = vld [vmem:[#allocation98_spill] sm:$0xff] }
 0x47b   : > { %6291 = vmatprep.mubr.bf16.mxu1 %v15894_v4  ;;  %v5574_v20 = vpop.f32.mrf.mxu0  ;;  %15902 = vst [vmem:[#allocation39_spill] sm:$0xff] %v13309_v57 }
 0x47c   : > { %v13297_v24 = vadd.f32 %v8893_v63, %v5574_v20  ;;  %v13306_v2 = vsel %vm769_vm4, %v5015_v15, %v5019_v58  ;;  %v5026_v63 = vrot.slane %v5024_v39, 1  ;;  %v8900_v15 = vpop.f32.mrf.mxu1 }
 0x47d   : > { %v5576_v18 = vpop.f32.mrf.mxu0  ;;  %15901 = vst [vmem:[#allocation35_spill] sm:$0xff] %v13306_v2 }
 0x47e   : > { %5754 = vmatmul.mubr.bf16.gmra.mxu0 %v13118_v30  ;;  %15897 = vst [vmem:[#allocation119_spill] sm:$0xff] %v13297_v24  ;;  %v5029_v18 = vshll.u32 %v13194_v13, 16  ;;  %v5884_v13 = vpop.f32.mrf.mxu1 }
 0x47f   : > { %5761 = vmatprep.mubr.bf16.mxu0 %v13292_v5 }
 0x480   : > { %v5579_v29 = vpop.f32.mrf.mxu0  ;;  %v5031_v58 = vrot.slane %v5029_v18, 1  ;;  %v8901_v18 = vpop.f32.mrf.mxu1 }
 0x481   : > { %v13302_v5 = vadd.f32 %v5868_v12, %v5579_v29  ;;  %v5027_v12 = vor.u32 %v5026_v63, %v5022_v44  ;;  %v15908_v63 = vld [vmem:[#allocation127_spill] sm:$0xff] }
 0x482   : > { %6292 = vmatmul.mubr.bf16.gmra.mxu1 %v15898_v11  ;;  %v5581_v20 = vpop.f32.mrf.mxu0 }
 0x483   : > { %6299 = vmatprep.mubr.bf16.mxu1 %v15899_v6  ;;  %15900 = vst [vmem:[#allocation123_spill] sm:$0xff] %v13302_v5  ;;  %v15905_v5 = vld [vmem:[#allocation130_spill] sm:$0xff]  ;;  %v13321_v57 = vsel %vm769_vm4, %v5027_v12, %v5031_v58 }
 0x484   : > { %v13313_v24 = vpop.f32.mrf.mxu0  ;;  %15906 = vst [vmem:[#allocation27_spill] sm:$0xff] %v13321_v57  ;;  %v15911_v58 = vld [vmem:[#allocation74_spill] sm:$0xff] }
 0x485   : > { %15903 = vst [vmem:[#allocation30_spill] sm:$0xff] %v13313_v24 }
 0x486   : > { %5762 = vmatmul.mubr.bf16.gmra.mxu0 %v13151_v23  ;;  %v5584_v29 = vpop.f32.mrf.mxu0 }
 0x487   : > { %5769 = vmatprep.mubr.bf16.mxu0 %v13306_v2  ;;  %v15909_v29 = vld [vmem:[#allocation57_spill] sm:$0xff] }
 0x48a   : > { %6300 = vmatmul.mubr.bf16.gmra.mxu1 %v15904_v35 }
 0x48b   : > { %6307 = vmatprep.mubr.bf16.mxu1 %v15905_v5  ;;  %v5587_v39 = vpop.f32.mrf.mxu0 }
 0x48c   : > { %v13317_v20 = vadd.f32 %v8896_v28, %v5587_v39 }
 0x48d   : > { %v5589_v2 = vpop.f32.mrf.mxu0 }
 0x48e   : > { %5770 = vmatmul.mubr.bf16.gmra.mxu0 %v13157_v47  ;;  %v13332_v2 = vpop.f32.mrf.mxu1 }
 0x48f   : > { %5777 = vmatprep.mubr.bf16.mxu0 %v13321_v57  ;;  %v5590_v24 = vpop.f32.mrf.mxu0  ;;  %15912 = vst [vmem:[#allocation79_spill] sm:$0xff] %v13332_v2  ;;  %v9302_v2 = vld [vmem:[#allocation7 + $0x1b0] sm:$0xff]  }
 0x490   : > { %v13324_v23 = vadd.f32 %v8897_v21, %v5590_v24  ;;  %v9320_v24 = vld [vmem:[#allocation7 + $0x218] sm:$0xff]  }
 0x491   : > { %v5592_v44 = vpop.f32.mrf.mxu0  ;;  %9034 = vmatprep.subr.bf16.mxu1 %v9320_v24 }
 0x492   : > { %15907 = vst [vmem:[#allocation125_spill] sm:$0xff] %v13324_v23  ;;  %6308 = vmatmul.mubr.bf16.gmra.mxu1 %v15908_v63  ;;  %v9301_v44 = vld [vmem:[#allocation7 + $0x1b8] sm:$0xff]  }
 0x493   : > { %6315 = vmatprep.mubr.bf16.mxu1 %v15909_v29  ;;  %v5595_v28 = vpop.f32.mrf.mxu0  ;;  %9035 = vmatpush3.bf16.msra.mxu1 %v9320_v24 }
 0x494   : > { %v13328_v39 = vadd.f32 %v5884_v13, %v5595_v28  ;;  %v8904_v13 = vpop.f32.mrf.mxu1 }
 0x495   : > { %v5597_v12 = vpop.f32.mrf.mxu0 }
 0x496   : > { %15910 = vst [vmem:[#allocation32_spill] sm:$0xff] %v13328_v39  ;;  %5778 = vmatmul.mubr.bf16.gmra.mxu0 %v13188_v52  ;;  %v15915_v12 = vld [vmem:[#allocation44_spill] sm:$0xff] }
 0x497   : > { %8962 = vmatprep.mubr.bf16.mxu0 %v15911_v58  ;;  %v13334_v57 = vpop.f32.mrf.mxu0 }
 0x498   : > { %15913 = vst [vmem:[#allocation28_spill] sm:$0xff] %v13334_v57  ;;  %v5900_v57 = vpop.f32.mrf.mxu1 }
 0x499   : > { %v5600_v21 = vpop.f32.mrf.mxu0 }
 0x49a   : > { %6316 = vmatmul.mubr.bf16.gmra.mxu1 %v12338_v33 }
 0x49b   : > { %6323 = vmatprep.mubr.bf16.mxu1 %v12640_v49  ;;  %v5603_v28 = vpop.f32.mrf.mxu0 }
 0x49c   : > { %v13338_v39 = vadd.f32 %v8900_v15, %v5603_v28  ;;  %v9303_v15 = vld [vmem:[#allocation7 + $0x1a8] sm:$0xff]   ;;  %v8905_v28 = vpop.f32.mrf.mxu1 }
 0x49d   : > { %v5605_v52 = vpop.f32.mrf.mxu0 }
 0x49e   : > { %15914 = vst [vmem:[#allocation113_spill] sm:$0xff] %v13338_v39  ;;  %8963 = vmatmul.mubr.bf16.vlgmr.msra.gmra.mxu0 %v15915_v12 }
 0x49f   : > { %8966 = vmatprep.mubr.bf16.mxu0 %v15911_v58  ;;  %6990 = vmatpush1.bf16.msra.mxu0 %v9301_v44  ;;  %v5606_v21 = vpop.f32.mrf.mxu0  ;;  %v15918_v44 = vld [vmem:[#allocation128_spill] sm:$0xff]  ;;  %v15919_v58 = vld [vmem:[#allocation15_spill] sm:$0xff] }
 0x4a0   : > { %6991 = vmatprep.subr.bf16.mxu0 %v15750_v54  ;;  %v13343_v23 = vadd.f32 %v8901_v18, %v5606_v21  ;;  %v9304_v18 = vld [vmem:[#allocation7 + $0x1a0] sm:$0xff]   ;;  %v13352_v21 = vpop.f32.mrf.mxu1 }
 0x4a1   : > { %v5608_v24 = vpop.f32.mrf.mxu0  ;;  %15920 = vst [vmem:[#allocation112_spill] sm:$0xff] %v13352_v21 }
 0x4a2   : > { %15916 = vst [vmem:[#allocation84_spill] sm:$0xff] %v13343_v23  ;;  %6324 = vmatmul.mubr.bf16.gmra.mxu1 %v12359_v41  ;;  %v15924_v23 = vld [vmem:[#allocation33_spill] sm:$0xff] }
 0x4a3   : > { %6331 = vmatprep.mubr.bf16.mxu1 %v12666_v34  ;;  %6992 = vmatpush1.bf16.msra.mxu0 %v9302_v2  ;;  %v5611_v12 = vpop.f32.mrf.mxu0 }
 0x4a4   : > { %6993 = vmatprep.subr.bf16.mxu0 %v15750_v54  ;;  %v13348_v52 = vadd.f32 %v5900_v57, %v5611_v12  ;;  %v9306_v57 = vld [vmem:[#allocation7 + $0x198] sm:$0xff]   ;;  %v8908_v12 = vpop.f32.mrf.mxu1 }
 0x4a5   : > { %v5613_v39 = vpop.f32.mrf.mxu0 }
 0x4a6   : > { %15917 = vst [vmem:[#allocation96_spill] sm:$0xff] %v13348_v52  ;;  %8967 = vmatmul.mubr.bf16.gmra.mxu0 %v15918_v44 }
 0x4a7   : > { %8970 = vmatprep.mubr.bf16.mxu0 %v15919_v58  ;;  %6994 = vmatpush1.bf16.msra.mxu0 %v9303_v15  ;;  %v13354_v24 = vpop.f32.mrf.mxu0  ;;  %v15923_v15 = vld [vmem:[#allocation80_spill] sm:$0xff]  ;;  %v5916_v58 = vpop.f32.mrf.mxu1 }
 0x4a8   : > { %15921 = vst [vmem:[#allocation116_spill] sm:$0xff] %v13354_v24  ;;  %6995 = vmatprep.subr.bf16.mxu0 %v15750_v54  ;;  %v9307_v24 = vld [vmem:[#allocation7 + $0x190] sm:$0xff]  }
 0x4a9   : > { %v5616_v2 = vpop.f32.mrf.mxu0 }
 0x4aa   : > { %6332 = vmatmul.mubr.bf16.gmra.mxu1 %v12402_v31 }
 0x4ab   : > { %6339 = vmatprep.mubr.bf16.mxu1 %v12675_v48  ;;  %6996 = vmatpush1.bf16.msra.mxu0 %v9304_v18  ;;  %v5619_v52 = vpop.f32.mrf.mxu0 }
 0x4ac   : > { %6997 = vmatprep.subr.bf16.mxu0 %v15750_v54  ;;  %v13360_v39 = vadd.f32 %v8904_v13, %v5619_v52  ;;  %v9308_v13 = vld [vmem:[#allocation7 + $0x188] sm:$0xff]   ;;  %v8909_v52 = vpop.f32.mrf.mxu1 }
 0x4ad   : > { %v5621_v21 = vpop.f32.mrf.mxu0 }
 0x4ae   : > { %15922 = vst [vmem:[#allocation31_spill] sm:$0xff] %v13360_v39  ;;  %8971 = vmatmul.mubr.bf16.gmra.mxu0 %v15923_v15  ;;  %v15928_v15 = vld [vmem:[#allocation85_spill] sm:$0xff] }
 0x4af   : > { %8974 = vmatprep.mubr.bf16.mxu0 %v15924_v23  ;;  %6998 = vmatpush1.bf16.msra.mxu0 %v9306_v57  ;;  %v5622_v31 = vpop.f32.mrf.mxu0  ;;  %v15927_v57 = vld [vmem:[#allocation66_spill] sm:$0xff] }
 0x4b0   : > { %6999 = vmatprep.subr.bf16.mxu0 %v15750_v54  ;;  %v13365_v2 = vadd.f32 %v8905_v28, %v5622_v31  ;;  %v9309_v31 = vld [vmem:[#allocation7 + $0x180] sm:$0xff]   ;;  %v13374_v28 = vpop.f32.mrf.mxu1 }
 0x4b1   : > { %v5624_v18 = vpop.f32.mrf.mxu0  ;;  %15929 = vst [vmem:[#allocation118_spill] sm:$0xff] %v13374_v28  ;;  %v15932_v28 = vld [vmem:[#allocation47_spill] sm:$0xff] }
 0x4b2   : > { %15925 = vst [vmem:[#allocation114_spill] sm:$0xff] %v13365_v2  ;;  %6340 = vmatmul.mubr.bf16.gmra.mxu1 %v12421_v16 }
 0x4b3   : > { %6347 = vmatprep.mubr.bf16.mxu1 %v12692_v32  ;;  %7000 = vmatpush1.bf16.msra.mxu0 %v9307_v24  ;;  %v5627_v39 = vpop.f32.mrf.mxu0  ;;  %v9321_v24 = vld [vmem:[#allocation7 + $0x210] sm:$0xff]  }
 0x4b4   : > { %7001 = vmatprep.subr.bf16.mxu0 %v15750_v54  ;;  %v13370_v21 = vadd.f32 %v5916_v58, %v5627_v39  ;;  %9036 = vmatprep.subr.bf16.mxu1 %v9321_v24  ;;  %v9311_v58 = vld [vmem:[#allocation7 + $0x1f8] sm:$0xff]  }
 0x4b5   : > { %v5629_v23 = vpop.f32.mrf.mxu0  ;;  %9037 = vmatpush3.bf16.msra.mxu1 %v9321_v24 }
 0x4b6   : > { %15926 = vst [vmem:[#allocation89_spill] sm:$0xff] %v13370_v21  ;;  %8975 = vmatmul.mubr.bf16.gmra.mxu0 %v15927_v57  ;;  %v8912_v23 = vpop.f32.mrf.mxu1  ;;  %v15933_v21 = vld [vmem:[#allocation131_spill] sm:$0xff]  ;;  %v15935_v57 = vld [vmem:[#allocation61_spill] sm:$0xff] }
 0x4b7   : > { %8978 = vmatprep.mubr.bf16.mxu0 %v15928_v15  ;;  %7002 = vmatpush1.bf16.msra.mxu0 %v9308_v13  ;;  %v13376_v18 = vpop.f32.mrf.mxu0 }
 0x4b8   : > { %15930 = vst [vmem:[#allocation34_spill] sm:$0xff] %v13376_v18  ;;  %7003 = vmatprep.subr.bf16.mxu0 %v15750_v54 }
 0x4b9   : > { %v5632_v2 = vpop.f32.mrf.mxu0 }
 0x4ba   : > { %6348 = vmatmul.mubr.bf16.gmra.mxu1 %v12476_v42  ;;  %v9312_v42 = vld [vmem:[#allocation7 + $0x1f0] sm:$0xff]   ;;  %v5932_v2 = vpop.f32.mrf.mxu1 }
 0x4bb   : > { %6355 = vmatprep.mubr.bf16.mxu1 %v12725_v1  ;;  %7004 = vmatpush1.bf16.msra.mxu0 %v9309_v31  ;;  %v5635_v39 = vpop.f32.mrf.mxu0 }
 0x4bc   : > { %7005 = vmatprep.subr.bf16.mxu0 %v15750_v54  ;;  %v13382_v13 = vadd.f32 %v8908_v12, %v5635_v39  ;;  %v9313_v12 = vld [vmem:[#allocation7 + $0x1e8] sm:$0xff]   ;;  %v8913_v24 = vpop.f32.mrf.mxu1 }
 0x4bd   : > { %v5637_v18 = vpop.f32.mrf.mxu0 }
 0x4be   : > { %15931 = vst [vmem:[#allocation40_spill] sm:$0xff] %v13382_v13  ;;  %8979 = vmatmul.mubr.bf16.gmra.mxu0 %v15932_v28 }
 0x4bf   : > { %8982 = vmatprep.mubr.bf16.mxu0 %v15933_v21  ;;  %7006 = vmatpush2.bf16.msra.mxu0 %v9311_v58  ;;  %v5638_v15 = vpop.f32.mrf.mxu0  ;;  %v15937_v58 = vld [vmem:[#allocation86_spill] sm:$0xff]  ;;  %v15938_v21 = vld [vmem:[#allocation51_spill] sm:$0xff] }
 0x4c0   : > { %7007 = vmatprep.subr.bf16.mxu0 %v15750_v54  ;;  %v13387_v31 = vadd.f32 %v8909_v52, %v5638_v15  ;;  %v9314_v15 = vld [vmem:[#allocation7 + $0x1e0] sm:$0xff]   ;;  %v5935_v52 = vpop.f32.mrf.mxu1 }
 0x4c1   : > { %v5640_v1 = vpop.f32.mrf.mxu0 }
 0x4c2   : > { %15934 = vst [vmem:[#allocation48_spill] sm:$0xff] %v13387_v31  ;;  %6356 = vmatmul.mubr.bf16.gmra.mxu1 %v12493_v38 }
 0x4c3   : > { %6363 = vmatprep.mubr.bf16.mxu1 %v15935_v57  ;;  %7008 = vmatpush2.bf16.msra.mxu0 %v9312_v42  ;;  %v5643_v39 = vpop.f32.mrf.mxu0 }
 0x4c4   : > { %7009 = vmatprep.subr.bf16.mxu0 %v15750_v54  ;;  %v13392_v18 = vadd.f32 %v5932_v2, %v5643_v39  ;;  %v9316_v2 = vld [vmem:[#allocation7 + $0x1d8] sm:$0xff]  }
 0x4c5   : > { %v5645_v13 = vpop.f32.mrf.mxu0 }
 0x4c6   : > { %15936 = vst [vmem:[#allocation68_spill] sm:$0xff] %v13392_v18  ;;  %8983 = vmatmul.mubr.bf16.gmra.mxu0 %v15937_v58 }
 0x4c7   : > { %8986 = vmatprep.mubr.bf16.mxu0 %v15938_v21  ;;  %7010 = vmatpush2.bf16.msra.mxu0 %v9313_v12  ;;  %v5646_v31 = vpop.f32.mrf.mxu0  ;;  %v15941_v12 = vld [vmem:[#allocation99_spill] sm:$0xff]  ;;  %v15942_v21 = vld [vmem:[#allocation94_spill] sm:$0xff] }
 0x4c8   : > { %7011 = vmatprep.subr.bf16.mxu0 %v15750_v54  ;;  %v13397_v1 = vadd.f32 %v5935_v52, %v5646_v31  ;;  %v9317_v31 = vld [vmem:[#allocation7 + $0x1d0] sm:$0xff]  }
 0x4c9   : > { %v5648_v42 = vpop.f32.mrf.mxu0 }
 0x4ca   : > { %15939 = vst [vmem:[#allocation93_spill] sm:$0xff] %v13397_v1  ;;  %6364 = vmatmul.mubr.bf16.gmra.mxu1 %v12548_v40 }
 0x4cb   : > { %6371 = vmatprep.mubr.bf16.mxu1 %v12734_v0  ;;  %7012 = vmatpush2.bf16.msra.mxu0 %v9314_v15  ;;  %v5651_v39 = vpop.f32.mrf.mxu0 }
 0x4cc   : > { %7013 = vmatprep.subr.bf16.mxu0 %v15750_v54  ;;  %v13402_v13 = vadd.f32 %v8912_v23, %v5651_v39  ;;  %v9318_v23 = vld [vmem:[#allocation7 + $0x1c8] sm:$0xff]  }
 0x4cd   : > { %v5653_v18 = vpop.f32.mrf.mxu0  ;;  %v9322_v39 = vld [vmem:[#allocation7 + $0x208] sm:$0xff]  }
 0x4ce   : > { %15940 = vst [vmem:[#allocation117_spill] sm:$0xff] %v13402_v13  ;;  %8987 = vmatmul.mubr.bf16.gmra.mxu0 %v15941_v12  ;;  %9038 = vmatprep.subr.bf16.mxu1 %v9322_v39  ;;  %v15944_v18 = vld [vmem:[#allocation54_spill] sm:$0xff]  ;;  %v15952_v12 = vld [vmem:[#allocation69_spill] sm:$0xff] }
 0x4cf   : > { %8990 = vmatprep.mubr.bf16.mxu0 %v15942_v21  ;;  %7014 = vmatpush2.bf16.msra.mxu0 %v9316_v2  ;;  %v5654_v52 = vpop.f32.mrf.mxu0  ;;  %v9319_v2 = vld [vmem:[#allocation7 + $0x1c0] sm:$0xff]   ;;  %v15947_v21 = vld [vmem:[#allocation21_spill] sm:$0xff] }
 0x4d0   : > { %7015 = vmatprep.subr.bf16.mxu0 %v15750_v54  ;;  %v13407_v42 = vadd.f32 %v8913_v24, %v5654_v52  ;;  %9039 = vmatpush3.bf16.msra.mxu1 %v9322_v39  ;;  %v9323_v24 = vld [vmem:[#allocation7 + $0x200] sm:$0xff]  }
 0x4d1   : > { %v5656_v15 = vpop.f32.mrf.mxu0  ;;  %9040 = vmatprep.subr.bf16.mxu1 %v9323_v24 }
 0x4d2   : > { %15943 = vst [vmem:[#allocation110_spill] sm:$0xff] %v13407_v42  ;;  %6372 = vmatmul.mubr.bf16.gmra.mxu1 %v12557_v19 }
 0x4d3   : > { %6379 = vmatprep.mubr.bf16.mxu1 %v12962_v62  ;;  %7016 = vmatpush2.bf16.msra.mxu0 %v9317_v31 }
 0x4d4   : > { %7017 = vmatprep.subr.bf16.mxu0 %v15750_v54  ;;  %9041 = vmatpush3.bf16.msra.mxu1 %v9323_v24 }
 0x4d6   : > { %8991 = vmatmul.mubr.bf16.gmra.mxu0 %v15944_v18 }
 0x4d7   : > { %8994 = vmatprep.mubr.bf16.mxu0 %v12922_v53  ;;  %7018 = vmatpush2.bf16.msra.mxu0 %v9318_v23 }
 0x4d8   : > { %7019 = vmatprep.subr.bf16.mxu0 %v15750_v54 }
 0x4da   : > { %v8916_v52 = vpop.f32.mrf.mxu1  ;;  %6380 = vmatmul.mubr.bf16.gmra.mxu1 %v12904_v7 }
 0x4db   : > { %6387 = vmatprep.mubr.bf16.mxu1 %v12953_v10  ;;  %7020 = vmatpush2.bf16.msra.mxu0 %v9319_v2 }
 0x4dc   : > { %v5948_v31 = vpop.f32.mrf.mxu1 }
 0x4de   : > { %v5659_v15 = vpop.f32.mrf.mxu0  ;;  %v8917_v42 = vpop.f32.mrf.mxu1  ;;  %8995 = vmatmul.mubr.bf16.gmra.mxu0 %v12929_v9 }
 0x4df   : > { %v13418_v39 = vadd.f32 %v5948_v31, %v5659_v15  ;;  %8998 = vmatprep.mubr.bf16.mxu0 %v12922_v53  ;;  %v15949_v31 = vld [vmem:[#allocation29_spill] sm:$0xff] }
 0x4e0   : > { %v5661_v23 = vpop.f32.mrf.mxu0  ;;  %v5951_v13 = vpop.f32.mrf.mxu1 }
 0x4e1   : > { %15945 = vst [vmem:[#allocation95_spill] sm:$0xff] %v13418_v39 }
 0x4e2   : > { %v5662_v54 = vpop.f32.mrf.mxu0  ;;  %v8920_v1 = vpop.f32.mrf.mxu1  ;;  %6388 = vmatmul.mubr.bf16.gmra.mxu1 %v12912_v45 }
 0x4e3   : > { %v13422_v18 = vadd.f32 %v5951_v13, %v5662_v54  ;;  %6395 = vmatprep.mubr.bf16.mxu1 %v12962_v62  ;;  %v15951_v13 = vld [vmem:[#allocation137_spill] sm:$0xff] }
 0x4e4   : > { %v5664_v10 = vpop.f32.mrf.mxu0  ;;  %v5964_v2 = vpop.f32.mrf.mxu1 }
 0x4e5   : > { %15946 = vst [vmem:[#allocation121_spill] sm:$0xff] %v13422_v18 }
 0x4e6   : > { %v5667_v24 = vpop.f32.mrf.mxu0  ;;  %v8921_v19 = vpop.f32.mrf.mxu1  ;;  %8999 = vmatmul.mubr.bf16.gmra.mxu0 %v15947_v21 }
 0x4e7   : > { %v13426_v9 = vadd.f32 %v8916_v52, %v5667_v24  ;;  %9002 = vmatprep.mubr.bf16.mxu0 %v15949_v31  ;;  %v15954_v24 = vld [vmem:[#allocation71_spill] sm:$0xff] }
 0x4e8   : > { %v5669_v15 = vpop.f32.mrf.mxu0  ;;  %v5967_v23 = vpop.f32.mrf.mxu1 }
 0x4e9   : > { %15948 = vst [vmem:[#allocation36_spill] sm:$0xff] %v13426_v9 }
 0x4ea   : > { %v5670_v39 = vpop.f32.mrf.mxu0  ;;  %v8924_v53 = vpop.f32.mrf.mxu1  ;;  %6396 = vmatmul.mubr.bf16.gmra.mxu1 %v12904_v7  ;;  %v15955_v7 = vld [vmem:[#allocation64_spill] sm:$0xff] }
 0x4eb   : > { %v13430_v45 = vadd.f32 %v8917_v42, %v5670_v39  ;;  %6403 = vmatprep.mubr.bf16.mxu1 %v15951_v13  ;;  %v15957_v39 = vld [vmem:[#allocation75_spill] sm:$0xff] }
 0x4ec   : > { %v5672_v54 = vpop.f32.mrf.mxu0  ;;  %v5980_v10 = vpop.f32.mrf.mxu1 }
 0x4ed   : > { %15950 = vst [vmem:[#allocation38_spill] sm:$0xff] %v13430_v45 }
 0x4ee   : > { %v5675_v18 = vpop.f32.mrf.mxu0  ;;  %v8925_v62 = vpop.f32.mrf.mxu1  ;;  %9003 = vmatmul.mubr.bf16.gmra.mxu0 %v15952_v12 }
 0x4ef   : > { %v13434_v52 = vadd.f32 %v5964_v2, %v5675_v18  ;;  %9006 = vmatprep.mubr.bf16.mxu0 %v15954_v24  ;;  %v15958_v18 = vld [vmem:[#allocation136_spill] sm:$0xff] }
 0x4f0   : > { %v5677_v15 = vpop.f32.mrf.mxu0  ;;  %v5983_v9 = vpop.f32.mrf.mxu1 }
 0x4f1   : > { %15953 = vst [vmem:[#allocation138_spill] sm:$0xff] %v13434_v52  ;;  %v15960_v15 = vld [vmem:[#allocation101_spill] sm:$0xff] }
 0x4f2   : > { %v5678_v31 = vpop.f32.mrf.mxu0  ;;  %v13437_v21 = vpop.f32.mrf.mxu1  ;;  %6404 = vmatmul.mubr.bf16.gmra.mxu1 %v15955_v7 }
 0x4f3   : > { %v13440_v42 = vadd.f32 %v5967_v23, %v5678_v31  ;;  %6411 = vmatprep.mubr.bf16.mxu1 %v15957_v39  ;;  %v15961_v31 = vld [vmem:[#allocation63_spill] sm:$0xff] }
 0x4f4   : > { %v5680_v54 = vpop.f32.mrf.mxu0  ;;  %v5996_v45 = vpop.f32.mrf.mxu1 }
 0x4f5   : > { %15956 = vst [vmem:[#allocation122_spill] sm:$0xff] %v13440_v42  ;;  %v15963_v54 = vld [vmem:[#allocation81_spill] sm:$0xff] }
 0x4f6   : > { %v5683_v13 = vpop.f32.mrf.mxu0  ;;  %v13443_v0 = vpop.f32.mrf.mxu1  ;;  %9007 = vmatmul.mubr.bf16.gmra.mxu0 %v15958_v18 }
 0x4f7   : > { %v13446_v2 = vadd.f32 %v8920_v1, %v5683_v13  ;;  %9010 = vmatprep.mubr.bf16.mxu0 %v15960_v15  ;;  %v15964_v1 = vld [vmem:[#allocation78_spill] sm:$0xff] }
 0x4f8   : > { %v5685_v52 = vpop.f32.mrf.mxu0  ;;  %v5999_v24 = vpop.f32.mrf.mxu1 }
 0x4f9   : > { %15959 = vst [vmem:[#allocation41_spill] sm:$0xff] %v13446_v2 }
 0x4fa   : > { %v5686_v12 = vpop.f32.mrf.mxu0  ;;  %v13449_v40 = vpop.f32.mrf.mxu1  ;;  %6412 = vmatmul.mubr.bf16.gmra.mxu1 %v15961_v31 }
 0x4fb   : > { %v13452_v23 = vadd.f32 %v8921_v19, %v5686_v12  ;;  %6419 = vmatprep.mubr.bf16.mxu1 %v15963_v54  ;;  %v15966_v19 = vld [vmem:[#allocation134_spill] sm:$0xff] }
 0x4fc   : > { %v5688_v42 = vpop.f32.mrf.mxu0  ;;  %v6012_v39 = vpop.f32.mrf.mxu1 }
 0x4fd   : > { %15962 = vst [vmem:[#allocation97_spill] sm:$0xff] %v13452_v23  ;;  %v15968_v42 = vld [vmem:[#allocation87_spill] sm:$0xff] }
 0x4fe   : > { %v5691_v7 = vpop.f32.mrf.mxu0  ;;  %v13455_v58 = vpop.f32.mrf.mxu1  ;;  %9011 = vmatmul.mubr.bf16.gmra.mxu0 %v15964_v1 }
 0x4ff   : > { %v13458_v13 = vadd.f32 %v5980_v10, %v5691_v7  ;;  %9014 = vmatprep.mubr.bf16.mxu0 %v13104_v50  ;;  %v15969_v10 = vld [vmem:[#allocation83_spill] sm:$0xff] }
 0x500   : > { %v5693_v52 = vpop.f32.mrf.mxu0  ;;  %v13461_v2 = vpop.f32.mrf.mxu1 }
 0x501   : > { %15965 = vst [vmem:[#allocation124_spill] sm:$0xff] %v13458_v13 }
 0x502   : > { %v5694_v15 = vpop.f32.mrf.mxu0  ;;  %v13463_v31 = vpop.f32.mrf.mxu1  ;;  %6420 = vmatmul.mubr.bf16.gmra.mxu1 %v15966_v19 }
 0x503   : > { %v13466_v12 = vadd.f32 %v5983_v9, %v5694_v15  ;;  %6427 = vmatprep.mubr.bf16.mxu1 %v15968_v42 }
 0x504   : > { %v5696_v23 = vpop.f32.mrf.mxu0  ;;  %v13469_v54 = vpop.f32.mrf.mxu1 }
 0x505   : > { %15967 = vst [vmem:[#allocation45_spill] sm:$0xff] %v13466_v12 }
 0x506   : > { %v5699_v1 = vpop.f32.mrf.mxu0  ;;  %v13471_v7 = vpop.f32.mrf.mxu1  ;;  %9015 = vmatmul.mubr.bf16.gmra.mxu0 %v15969_v10 }
 0x507   : > { %v13474_v52 = vadd.f32 %v8924_v53, %v5699_v1  ;;  %9018 = vmatprep.mubr.bf16.mxu0 %v13143_v55 }
 0x508   : > { %v5701_v13 = vpop.f32.mrf.mxu0  ;;  %v13477_v50 = vpop.f32.mrf.mxu1 }
 0x509   : > { %15970 = vst [vmem:[#allocation42_spill] sm:$0xff] %v13474_v52 }
 0x50a   : > { %v5702_v19 = vpop.f32.mrf.mxu0  ;;  %v13479_v9 = vpop.f32.mrf.mxu1  ;;  %6428 = vmatmul.mubr.bf16.gmra.mxu1 %v12991_v25 }
 0x50b   : > { %v13482_v15 = vadd.f32 %v8925_v62, %v5702_v19  ;;  %6435 = vmatprep.mubr.bf16.mxu1 %v13171_v60 }
 0x50c   : > { %v5704_v23 = vpop.f32.mrf.mxu0  ;;  %v13485_v12 = vpop.f32.mrf.mxu1 }
 0x50d   : > { %15971 = vst [vmem:[#allocation82_spill] sm:$0xff] %v13482_v15 }
 0x50e   : > { %v5707_v10 = vpop.f32.mrf.mxu0  ;;  %v13487_v53 = vpop.f32.mrf.mxu1  ;;  %9019 = vmatmul.mubr.bf16.gmra.mxu0 %v13147_v51 }
 0x50f   : > { %v13490_v1 = vadd.f32 %v5996_v45, %v5707_v10  ;;  %9022 = vmatprep.mubr.bf16.mxu0 %v13180_v36 }
 0x510   : > { %v5709_v13 = vpop.f32.mrf.mxu0  ;;  %v13493_v52 = vpop.f32.mrf.mxu1 }
 0x511   : > { %15972 = vst [vmem:[#allocation12_spill] sm:$0xff] %v13490_v1  ;;  %v15978_v1 = vld [vmem:[#allocation103_spill] sm:$0xff] }
 0x512   : > { %v5710_v25 = vpop.f32.mrf.mxu0  ;;  %v13495_v62 = vpop.f32.mrf.mxu1  ;;  %6436 = vmatmul.mubr.bf16.gmra.mxu1 %v13013_v46 }
 0x513   : > { %15973 = vst [vmem:[#allocation49_spill] sm:$0xff] %v13495_v62  ;;  %v13498_v19 = vadd.f32 %v5999_v24, %v5710_v25  ;;  %6443 = vmatprep.mubr.bf16.mxu1 %v13199_v8 }
 0x514   : > { %v5712_v23 = vpop.f32.mrf.mxu0  ;;  %v13501_v15 = vpop.f32.mrf.mxu1 }
 0x515   : > { %15974 = vst [vmem:[#allocation126_spill] sm:$0xff] %v13498_v19  ;;  %v15977_v19 = vld [vmem:[#allocation73_spill] sm:$0xff] }
 0x516   : > { %v5715_v51 = vpop.f32.mrf.mxu0  ;;  %v13503_v45 = vpop.f32.mrf.mxu1  ;;  %9023 = vmatmul.mubr.bf16.gmra.mxu0 %v13184_v26 }
 0x517   : > { %15975 = vst [vmem:[#allocation59_spill] sm:$0xff] %v13503_v45  ;;  %v13507_v10 = vadd.f32 %v13437_v21, %v5715_v51  ;;  %7021 = vmatprep.mubr.bf16.mxu0 %v15870_v59  ;;  %v15979_v45 = vld [vmem:[#allocation58_spill] sm:$0xff]  ;;  %v15980_v21 = vld [vmem:[#allocation37_spill] sm:$0xff] }
 0x518   : > { %v5717_v13 = vpop.f32.mrf.mxu0  ;;  %v13510_v62 = vpop.f32.mrf.mxu1 }
 0x519   : > { %15976 = vst [vmem:[#allocation55_spill] sm:$0xff] %v13507_v10  ;;  %v15981_v10 = vld [vmem:[#allocation105_spill] sm:$0xff] }
 0x51a   : > { %v5718_v25 = vpop.f32.mrf.mxu0  ;;  %v6253_v24 = vpop.f32.mrf.mxu1  ;;  %6444 = vmatmul.mubr.bf16.gmra.mxu1 %v15977_v19  ;;  %v5824_v59 = vadd.f32 %v15981_v10, %v15980_v21  ;;  %v15982_v10 = vld [vmem:[#allocation23_spill] sm:$0xff] }
 0x51b   : > { %v13514_v23 = vadd.f32 %v13443_v0, %v5718_v25  ;;  %v13517_v8 = vadd.f32 %v6253_v24, %v15978_v1  ;;  %6451 = vmatprep.mubr.bf16.mxu1 %v15979_v45 }
 0x51c   : > { %v5720_v26 = vpop.f32.mrf.mxu0  ;;  %v6255_v51 = vpop.f32.mrf.mxu1 }
 0x51e   : > { %v5723_v13 = vpop.f32.mrf.mxu0  ;;  %v6256_v46 = vpop.f32.mrf.mxu1  ;;  %7022 = vmatmul.mubr.bf16.vlgmr.msra.gmra.mxu0 %v15875_v37 }
 0x51f   : > { %v13523_v36 = vadd.f32 %v6012_v39, %v5723_v13  ;;  %v13525_v19 = vadd.f32 %v6256_v46, %v5824_v59  ;;  %7029 = vmatprep.mubr.bf16.mxu0 %v15883_v43 }
 0x520   : > { %v5725_v0 = vpop.f32.mrf.mxu0  ;;  %v6258_v1 = vpop.f32.mrf.mxu1 }
 0x522   : > { %v5726_v25 = vpop.f32.mrf.mxu0  ;;  %v6261_v24 = vpop.f32.mrf.mxu1  ;;  %6452 = vmatmul.mubr.bf16.gmra.mxu1 %v13044_v27 }
 0x523   : > { %v13530_v26 = vadd.f32 %v13461_v2, %v5726_v25  ;;  %v13533_v51 = vadd.f32 %v6261_v24, %v15982_v10  ;;  %6459 = vmatprep.mubr.bf16.mxu1 %v13232_v3  ;;  %v15983_v24 = vld [vmem:[#allocation77_spill] sm:$0xff] }
 0x524   : > { %v5728_v37 = vpop.f32.mrf.mxu0  ;;  %v6263_v39 = vpop.f32.mrf.mxu1 }
 0x525   : > { %v15986_v39 = vld [vmem:[#allocation16_spill] sm:$0xff] }
 0x526   : > { %v5731_v46 = vpop.f32.mrf.mxu0  ;;  %v6264_v21 = vpop.f32.mrf.mxu1  ;;  %7030 = vmatmul.mubr.bf16.gmra.mxu0 %v15887_v61  ;;  %v15984_v61 = vld [vmem:[#allocation106_spill] sm:$0xff] }
 0x527   : > { %v13538_v43 = vadd.f32 %v13449_v40, %v5731_v46  ;;  %v13541_v59 = vadd.f32 %v6264_v21, %v13237_v56  ;;  %7037 = vmatprep.mubr.bf16.mxu0 %v15888_v14  ;;  %v15985_v56 = vld [vmem:[#allocation43_spill] sm:$0xff] }
 0x528   : > { %v5733_v2 = vpop.f32.mrf.mxu0  ;;  %v6266_v13 = vpop.f32.mrf.mxu1  ;;  %v5840_v46 = vadd.f32 %v15986_v39, %v15985_v56  ;;  %v15990_v56 = vld [vmem:[#allocation72_spill] sm:$0xff] }
 0x52a   : > { %v5734_v0 = vpop.f32.mrf.mxu0  ;;  %v6269_v1 = vpop.f32.mrf.mxu1  ;;  %6460 = vmatmul.mubr.bf16.gmra.mxu1 %v13067_v17 }
 0x52b   : > { %v13546_v25 = vadd.f32 %v13455_v58, %v5734_v0  ;;  %v13549_v10 = vadd.f32 %v6269_v1, %v15983_v24  ;;  %6467 = vmatprep.mubr.bf16.mxu1 %v15984_v61 }
 0x52c   : > { %v5736_v40 = vpop.f32.mrf.mxu0  ;;  %v6271_v37 = vpop.f32.mrf.mxu1 }
 0x52d   : > { %v15988_v40 = vld [vmem:[#allocation104_spill] sm:$0xff] }
 0x52e   : > { %v5739_v14 = vpop.f32.mrf.mxu0  ;;  %v6272_v21 = vpop.f32.mrf.mxu1  ;;  %7038 = vmatmul.mubr.bf16.gmra.mxu0 %v15893_v22  ;;  %v15991_v22 = vld [vmem:[#allocation100_spill] sm:$0xff] }
 0x52f   : > { %v13556_v2 = vadd.f32 %v13469_v54, %v5739_v14  ;;  %v13558_v13 = vadd.f32 %v6272_v21, %v5840_v46  ;;  %7045 = vmatprep.mubr.bf16.mxu0 %v15894_v4 }
 0x530   : > { %v5741_v58 = vpop.f32.mrf.mxu0  ;;  %v6274_v0 = vpop.f32.mrf.mxu1 }
 0x531   : > { %15987 = vst [vmem:[#allocation62_spill] sm:$0xff] %v13556_v2  ;;  %v15993_v58 = vld [vmem:[#allocation26_spill] sm:$0xff] }
 0x532   : > { %v5742_v1 = vpop.f32.mrf.mxu0  ;;  %v6277_v24 = vpop.f32.mrf.mxu1  ;;  %6468 = vmatmul.mubr.bf16.gmra.mxu1 %v15988_v40 }
 0x533   : > { %v13563_v37 = vadd.f32 %v13477_v50, %v5742_v1  ;;  %v13566_v39 = vadd.f32 %v6277_v24, %v15990_v56  ;;  %6475 = vmatprep.mubr.bf16.mxu1 %v15991_v22 }
 0x534   : > { %v5744_v54 = vpop.f32.mrf.mxu0  ;;  %v6279_v14 = vpop.f32.mrf.mxu1 }
 0x535   : > { %15989 = vst [vmem:[#allocation52_spill] sm:$0xff] %v13563_v37  ;;  %v15994_v37 = vld [vmem:[#allocation111_spill] sm:$0xff]  ;;  %v15995_v14 = vld [vmem:[#allocation18_spill] sm:$0xff] }
 0x536   : > { %v5747_v46 = vpop.f32.mrf.mxu0  ;;  %v6280_v21 = vpop.f32.mrf.mxu1  ;;  %7046 = vmatmul.mubr.bf16.gmra.mxu0 %v15898_v11  ;;  %v15996_v11 = vld [vmem:[#allocation46_spill] sm:$0xff] }
 0x537   : > { %v13571_v4 = vadd.f32 %v13463_v31, %v5747_v46  ;;  %v13574_v0 = vadd.f32 %v6280_v21, %v15993_v58  ;;  %7053 = vmatprep.mubr.bf16.mxu0 %v15899_v6  ;;  %v15997_v21 = vld [vmem:[#allocation65_spill] sm:$0xff]  ;;  %v15998_v58 = vld [vmem:[#allocation22_spill] sm:$0xff] }
 0x538   : > { %v5749_v50 = vpop.f32.mrf.mxu0  ;;  %v6282_v1 = vpop.f32.mrf.mxu1 }
 0x539   : > { %15992 = vst [vmem:[#allocation129_spill] sm:$0xff] %v13571_v4  ;;  %v5856_v4 = vadd.f32 %v15998_v58, %v15997_v21 }
 0x53a   : > { %v5750_v24 = vpop.f32.mrf.mxu0  ;;  %v6285_v56 = vpop.f32.mrf.mxu1  ;;  %6476 = vmatmul.mubr.bf16.gmra.mxu1 %v15994_v37 }
 0x53b   : > { %v13579_v54 = vadd.f32 %v13471_v7, %v5750_v24  ;;  %v13582_v2 = vadd.f32 %v6285_v56, %v15995_v14  ;;  %6483 = vmatprep.mubr.bf16.mxu1 %v15996_v11 }
 0x53c   : > { %v5752_v31 = vpop.f32.mrf.mxu0  ;;  %v6287_v46 = vpop.f32.mrf.mxu1 }
 0x53d   : > { %v16000_v46 = vld [vmem:[#allocation109_spill] sm:$0xff] }
 0x53e   : > { %v5755_v6 = vpop.f32.mrf.mxu0  ;;  %v6288_v50 = vpop.f32.mrf.mxu1  ;;  %7054 = vmatmul.mubr.bf16.gmra.mxu0 %v15904_v35  ;;  %v16001_v35 = vld [vmem:[#allocation108_spill] sm:$0xff] }
 0x53f   : > { %v13589_v1 = vadd.f32 %v13485_v12, %v5755_v6  ;;  %v13591_v37 = vadd.f32 %v6288_v50, %v5856_v4  ;;  %7061 = vmatprep.mubr.bf16.mxu0 %v15905_v5  ;;  %v16003_v50 = vld [vmem:[#allocation119_spill] sm:$0xff] }
 0x540   : > { %v5757_v7 = vpop.f32.mrf.mxu0  ;;  %v6290_v24 = vpop.f32.mrf.mxu1 }
 0x542   : > { %v5758_v56 = vpop.f32.mrf.mxu0  ;;  %v6293_v14 = vpop.f32.mrf.mxu1  ;;  %6484 = vmatmul.mubr.bf16.gmra.mxu1 %v13118_v30 }
 0x543   : > { %v13596_v31 = vadd.f32 %v13493_v52, %v5758_v56  ;;  %v13599_v21 = vadd.f32 %v6293_v14, %v16000_v46  ;;  %6491 = vmatprep.mubr.bf16.mxu1 %v16001_v35  ;;  %v16004_v46 = vld [vmem:[#allocation88_spill] sm:$0xff] }
 0x544   : > { %v5760_v12 = vpop.f32.mrf.mxu0  ;;  %v6295_v58 = vpop.f32.mrf.mxu1 }
 0x545   : > { %15999 = vst [vmem:[#allocation76_spill] sm:$0xff] %v13596_v31  ;;  %v16005_v58 = vld [vmem:[#allocation123_spill] sm:$0xff] }
 0x546   : > { %v5763_v4 = vpop.f32.mrf.mxu0  ;;  %v6296_v6 = vpop.f32.mrf.mxu1  ;;  %7062 = vmatmul.mubr.bf16.gmra.mxu0 %v15908_v63  ;;  %v16006_v63 = vld [vmem:[#allocation35_spill] sm:$0xff] }
 0x547   : > { %v13604_v5 = vadd.f32 %v13479_v9, %v5763_v4  ;;  %v13607_v7 = vadd.f32 %v6296_v6, %v16003_v50  ;;  %7069 = vmatprep.mubr.bf16.mxu0 %v15909_v29  ;;  %v16007_v6 = vld [vmem:[#allocation30_spill] sm:$0xff]  ;;  %v16008_v50 = vld [vmem:[#allocation39_spill] sm:$0xff] }
 0x548   : > { %v5765_v52 = vpop.f32.mrf.mxu0  ;;  %v6298_v24 = vpop.f32.mrf.mxu1 }
 0x549   : > { %16002 = vst [vmem:[#allocation50_spill] sm:$0xff] %v13604_v5  ;;  %v5872_v5 = vadd.f32 %v16008_v50, %v16007_v6 }
 0x54a   : > { %v5766_v56 = vpop.f32.mrf.mxu0  ;;  %v6301_v14 = vpop.f32.mrf.mxu1  ;;  %6492 = vmatmul.mubr.bf16.gmra.mxu1 %v16004_v46 }
 0x54b   : > { %v13612_v12 = vadd.f32 %v13487_v53, %v5766_v56  ;;  %v13615_v31 = vadd.f32 %v6301_v14, %v16005_v58  ;;  %6499 = vmatprep.mubr.bf16.mxu1 %v16006_v63 }
 0x54c   : > { %v5768_v9 = vpop.f32.mrf.mxu0  ;;  %v6303_v4 = vpop.f32.mrf.mxu1 }
 0x54e   : > { %v5771_v29 = vpop.f32.mrf.mxu0  ;;  %v6304_v52 = vpop.f32.mrf.mxu1  ;;  %7070 = vmatmul.mubr.bf16.gmra.mxu0 %v12338_v33  ;;  %v16009_v33 = vld [vmem:[#allocation74_spill] sm:$0xff] }
 0x54f   : > { %v13622_v24 = vadd.f32 %v13501_v15, %v5771_v29  ;;  %v13624_v46 = vadd.f32 %v6304_v52, %v5872_v5  ;;  %7077 = vmatprep.mubr.bf16.mxu0 %v12640_v49  ;;  %v16011_v49 = vld [vmem:[#allocation125_spill] sm:$0xff] }
 0x550   : > { %v5773_v53 = vpop.f32.mrf.mxu0  ;;  %v6306_v56 = vpop.f32.mrf.mxu1 }
 0x551   : > { %v16012_v56 = vld [vmem:[#allocation32_spill] sm:$0xff] }
 0x552   : > { %v5774_v14 = vpop.f32.mrf.mxu0  ;;  %v6309_v58 = vpop.f32.mrf.mxu1  ;;  %6500 = vmatmul.mubr.bf16.gmra.mxu1 %v13157_v47 }
 0x553   : > { %v13629_v9 = vadd.f32 %v13510_v62, %v5774_v14  ;;  %v13632_v4 = vadd.f32 %v6309_v58, %v13317_v20  ;;  %9042 = vmatprep.mubr.bf16.mxu1 %v16009_v33  ;;  %v16013_v58 = vld [vmem:[#allocation15_spill] sm:$0xff] }
 0x554   : > { %v5776_v15 = vpop.f32.mrf.mxu0  ;;  %v6311_v6 = vpop.f32.mrf.mxu1 }
 0x555   : > { %v16015_v6 = vld [vmem:[#allocation79_spill] sm:$0xff] }
 0x556   : > { %v13635_v5 = vpop.f32.mrf.mxu0  ;;  %v6312_v50 = vpop.f32.mrf.mxu1  ;;  %7078 = vmatmul.mubr.bf16.gmra.mxu0 %v12359_v41  ;;  %v16014_v41 = vld [vmem:[#allocation28_spill] sm:$0xff] }
 0x557   : > { %16010 = vst [vmem:[#allocation139_spill] sm:$0xff] %v13635_v5  ;;  %v13639_v29 = vadd.f32 %v6312_v50, %v16011_v49  ;;  %7085 = vmatprep.mubr.bf16.mxu0 %v12666_v34  ;;  %v5888_v50 = vadd.f32 %v16015_v6, %v16014_v41  ;;  %v16016_v34 = vld [vmem:[#allocation13_spill] sm:$0xff] }
 0x558   : > { %v5781_v52 = vpop.f32.mrf.mxu0  ;;  %v6314_v62 = vpop.f32.mrf.mxu1  ;;  %v16018_v41 = vld [vmem:[#allocation113_spill] sm:$0xff] }
 0x55a   : > { %v13642_v53 = vpop.f32.mrf.mxu0  ;;  %v6317_v20 = vpop.f32.mrf.mxu1  ;;  %9043 = vmatmul.mubr.bf16.vlgmr.msra.gmra.mxu1 %v15918_v44 }
 0x55b   : > { %v13646_v14 = vadd.f32 %v6317_v20, %v16012_v56  ;;  %9046 = vmatprep.mubr.bf16.mxu1 %v16013_v58 }
 0x55c   : > { %v5784_v33 = vpop.f32.mrf.mxu0  ;;  %v6319_v15 = vpop.f32.mrf.mxu1 }
 0x55d   : > { %v16017_v15 = vld [vmem:[#allocation80_spill] sm:$0xff] }
 0x55e   : > { %v6320_v49 = vpop.f32.mrf.mxu1  ;;  %v8964_v5 = vpop.f32.mrf.mxu0  ;;  %7086 = vmatmul.mubr.bf16.gmra.mxu0 %v16016_v34 }
 0x55f   : > { %v13652_v52 = vadd.f32 %v6320_v49, %v5888_v50  ;;  %v13655_v62 = vadd.f32 %v8964_v5, %v13533_v51  ;;  %7093 = vmatprep.mubr.bf16.mxu0 %v12675_v48  ;;  %v16019_v49 = vld [vmem:[#allocation33_spill] sm:$0xff] }
 0x560   : > { %v6322_v44 = vpop.f32.mrf.mxu1  ;;  %v6542_v20 = vpop.f32.mrf.mxu0 }
 0x561   : > { %v13659_v56 = vadd.f32 %v6542_v20, %v13517_v8  ;;  %v16020_v44 = vld [vmem:[#allocation84_spill] sm:$0xff] }
 0x562   : > { %v6325_v58 = vpop.f32.mrf.mxu1  ;;  %v8965_v33 = vpop.f32.mrf.mxu0  ;;  %9047 = vmatmul.mubr.bf16.gmra.mxu1 %v16017_v15 }
 0x563   : > { %v13663_v6 = vadd.f32 %v6325_v58, %v16018_v41  ;;  %v13666_v50 = vadd.f32 %v8965_v33, %v13541_v59  ;;  %9050 = vmatprep.mubr.bf16.mxu1 %v16019_v49  ;;  %v16023_v49 = vld [vmem:[#allocation66_spill] sm:$0xff] }
 0x564   : > { %v6327_v51 = vpop.f32.mrf.mxu1  ;;  %v6545_v5 = vpop.f32.mrf.mxu0 }
 0x565   : > { %v13670_v48 = vadd.f32 %v6545_v5, %v13525_v19  ;;  %v16024_v51 = vld [vmem:[#allocation96_spill] sm:$0xff] }
 0x566   : > { %v6328_v34 = vpop.f32.mrf.mxu1  ;;  %v8968_v8 = vpop.f32.mrf.mxu0  ;;  %7094 = vmatmul.mubr.bf16.gmra.mxu0 %v12421_v16 }
 0x567   : > { %v13674_v20 = vadd.f32 %v6328_v34, %v16020_v44  ;;  %v13677_v58 = vadd.f32 %v8968_v8, %v13566_v39  ;;  %7101 = vmatprep.mubr.bf16.mxu0 %v12692_v32  ;;  %v16025_v34 = vld [vmem:[#allocation85_spill] sm:$0xff]  ;;  %v16026_v32 = vld [vmem:[#allocation116_spill] sm:$0xff] }
 0x568   : > { %v6330_v59 = vpop.f32.mrf.mxu1  ;;  %v6558_v33 = vpop.f32.mrf.mxu0  ;;  %v16027_v44 = vld [vmem:[#allocation112_spill] sm:$0xff] }
 0x569   : > { %16021 = vst [vmem:[#allocation14_spill] sm:$0xff] %v13677_v58  ;;  %v13681_v15 = vadd.f32 %v6558_v33, %v13549_v10  ;;  %v5904_v59 = vadd.f32 %v16027_v44, %v16026_v32  ;;  %v16031_v44 = vld [vmem:[#allocation131_spill] sm:$0xff] }
 0x56a   : > { %v6333_v41 = vpop.f32.mrf.mxu1  ;;  %v8969_v19 = vpop.f32.mrf.mxu0  ;;  %9051 = vmatmul.mubr.bf16.gmra.mxu1 %v16023_v49 }
 0x56b   : > { %16022 = vst [vmem:[#allocation98_spill] sm:$0xff] %v13681_v15  ;;  %v13685_v5 = vadd.f32 %v6333_v41, %v16024_v51  ;;  %v13688_v16 = vadd.f32 %v8969_v19, %v13574_v0  ;;  %9054 = vmatprep.mubr.bf16.mxu1 %v16025_v34  ;;  %v16028_v15 = vld [vmem:[#allocation90_spill] sm:$0xff]  ;;  %v16029_v0 = vld [vmem:[#allocation56_spill] sm:$0xff] }
 0x56c   : > { %v6335_v39 = vpop.f32.mrf.mxu1  ;;  %v6561_v8 = vpop.f32.mrf.mxu0 }
 0x56d   : > { %v13694_v10 = vadd.f32 %v6561_v8, %v13558_v13  ;;  %v16030_v13 = vld [vmem:[#allocation31_spill] sm:$0xff] }
 0x56e   : > { %v6336_v33 = vpop.f32.mrf.mxu1  ;;  %v8972_v58 = vpop.f32.mrf.mxu0  ;;  %7102 = vmatmul.mubr.bf16.gmra.mxu0 %v16028_v15 }
 0x56f   : > { %v13697_v49 = vadd.f32 %v6336_v33, %v5904_v59  ;;  %v13700_v41 = vadd.f32 %v8972_v58, %v13599_v21  ;;  %7109 = vmatprep.mubr.bf16.mxu0 %v16029_v0 }
 0x570   : > { %v6338_v19 = vpop.f32.mrf.mxu1  ;;  %v6574_v51 = vpop.f32.mrf.mxu0 }
 0x571   : > { %v13704_v34 = vadd.f32 %v6574_v51, %v13582_v2  ;;  %v16032_v2 = vld [vmem:[#allocation114_spill] sm:$0xff] }
 0x572   : > { %v6341_v39 = vpop.f32.mrf.mxu1  ;;  %v8973_v32 = vpop.f32.mrf.mxu0  ;;  %9055 = vmatmul.mubr.bf16.gmra.mxu1 %v15932_v28 }
 0x573   : > { %v6342_v8 = vadd.f32 %v6341_v39, %v16030_v13  ;;  %v13709_v15 = vadd.f32 %v8973_v32, %v13607_v7  ;;  %9058 = vmatprep.mubr.bf16.mxu1 %v16031_v44  ;;  %v16035_v44 = vld [vmem:[#allocation89_spill] sm:$0xff] }
 0x574   : > { %v6343_v21 = vpop.f32.mrf.mxu1  ;;  %v6577_v58 = vpop.f32.mrf.mxu0 }
 0x575   : > { %v13713_v59 = vadd.f32 %v6577_v58, %v13591_v37  ;;  %v16034_v37 = vld [vmem:[#allocation86_spill] sm:$0xff]  ;;  %v16037_v58 = vld [vmem:[#allocation51_spill] sm:$0xff] }
 0x576   : > { %v6344_v33 = vpop.f32.mrf.mxu1  ;;  %v8976_v0 = vpop.f32.mrf.mxu0  ;;  %7110 = vmatmul.mubr.bf16.gmra.mxu0 %v12493_v38 }
 0x577   : > { %v6345_v19 = vadd.f32 %v6344_v33, %v16032_v2  ;;  %v13718_v28 = vadd.f32 %v8976_v0, %v13632_v4  ;;  %7117 = vmatprep.mubr.bf16.mxu0 %v15935_v57  ;;  %v16038_v0 = vld [vmem:[#allocation34_spill] sm:$0xff] }
 0x578   : > { %v6346_v7 = vpop.f32.mrf.mxu1  ;;  %v6590_v51 = vpop.f32.mrf.mxu0  ;;  %v16039_v57 = vld [vmem:[#allocation118_spill] sm:$0xff] }
 0x579   : > { %16033 = vst [vmem:[#allocation130_spill] sm:$0xff] %v13718_v28  ;;  %v13722_v39 = vadd.f32 %v6590_v51, %v13615_v31  ;;  %v5920_v2 = vadd.f32 %v16039_v57, %v16038_v0  ;;  %v16040_v28 = vld [vmem:[#allocation91_spill] sm:$0xff] }
 0x57a   : > { %v6349_v32 = vpop.f32.mrf.mxu1  ;;  %v8977_v13 = vpop.f32.mrf.mxu0  ;;  %9059 = vmatmul.mubr.bf16.gmra.mxu1 %v16034_v37  ;;  %v16044_v57 = vld [vmem:[#allocation99_spill] sm:$0xff] }
 0x57b   : > { %v6350_v21 = vadd.f32 %v6349_v32, %v16035_v44  ;;  %v13727_v38 = vadd.f32 %v8977_v13, %v13639_v29  ;;  %9062 = vmatprep.mubr.bf16.mxu1 %v16037_v58  ;;  %v16042_v29 = vld [vmem:[#allocation132_spill] sm:$0xff] }
 0x57c   : > { %v6351_v4 = vpop.f32.mrf.mxu1  ;;  %v6593_v33 = vpop.f32.mrf.mxu0 }
 0x57d   : > { %16036 = vst [vmem:[#allocation127_spill] sm:$0xff] %v13727_v38  ;;  %v13733_v7 = vadd.f32 %v6593_v33, %v13624_v46  ;;  %v16045_v46 = vld [vmem:[#allocation40_spill] sm:$0xff] }
 0x57e   : > { %v6352_v31 = vpop.f32.mrf.mxu1  ;;  %v8980_v51 = vpop.f32.mrf.mxu0  ;;  %7118 = vmatmul.mubr.bf16.gmra.mxu0 %v16040_v28  ;;  %v16047_v28 = vld [vmem:[#allocation94_spill] sm:$0xff] }
 0x57f   : > { %v6353_v37 = vadd.f32 %v6352_v31, %v5920_v2  ;;  %v13737_v32 = vadd.f32 %v8980_v51, %v13663_v6  ;;  %7125 = vmatprep.mubr.bf16.mxu0 %v16042_v29 }
 0x580   : > { %v6354_v13 = vpop.f32.mrf.mxu1  ;;  %v6606_v44 = vpop.f32.mrf.mxu0 }
 0x581   : > { %16041 = vst [vmem:[#allocation57_spill] sm:$0xff] %v13737_v32  ;;  %v13741_v58 = vadd.f32 %v6606_v44, %v13646_v14  ;;  %v16049_v14 = vld [vmem:[#allocation20_spill] sm:$0xff] }
 0x582   : > { %v6357_v4 = vpop.f32.mrf.mxu1  ;;  %v8981_v0 = vpop.f32.mrf.mxu0  ;;  %9063 = vmatmul.mubr.bf16.gmra.mxu1 %v16044_v57  ;;  %v16050_v44 = vld [vmem:[#allocation48_spill] sm:$0xff] }
 0x583   : > { %16043 = vst [vmem:[#allocation44_spill] sm:$0xff] %v13741_v58  ;;  %v6358_v33 = vadd.f32 %v6357_v4, %v16045_v46  ;;  %v13746_v38 = vadd.f32 %v8981_v0, %v13674_v20  ;;  %9066 = vmatprep.mubr.bf16.mxu1 %v16047_v28  ;;  %v16052_v57 = vld [vmem:[#allocation24_spill] sm:$0xff] }
 0x584   : > { %v6359_v6 = vpop.f32.mrf.mxu1  ;;  %v6609_v2 = vpop.f32.mrf.mxu0 }
 0x585   : > { %16046 = vst [vmem:[#allocation128_spill] sm:$0xff] %v13746_v38  ;;  %v13750_v31 = vadd.f32 %v6609_v2, %v13652_v52  ;;  %v16053_v6 = vld [vmem:[#allocation54_spill] sm:$0xff]  ;;  %v16054_v52 = vld [vmem:[#allocation68_spill] sm:$0xff] }
 0x586   : > { %v6360_v51 = vpop.f32.mrf.mxu1  ;;  %v8984_v13 = vpop.f32.mrf.mxu0  ;;  %7126 = vmatmul.mubr.bf16.gmra.mxu0 %v16049_v14 }
 0x587   : > { %16048 = vst [vmem:[#allocation47_spill] sm:$0xff] %v13750_v31  ;;  %v6361_v32 = vadd.f32 %v6360_v51, %v16050_v44  ;;  %v13754_v58 = vadd.f32 %v8984_v13, %v6342_v8  ;;  %7133 = vmatprep.mubr.bf16.mxu0 %v16052_v57  ;;  %v16056_v31 = vld [vmem:[#allocation17_spill] sm:$0xff] }
 0x588   : > { %v6362_v4 = vpop.f32.mrf.mxu1  ;;  %v6622_v20 = vpop.f32.mrf.mxu0 }
 0x589   : > { %16051 = vst [vmem:[#allocation61_spill] sm:$0xff] %v13754_v58  ;;  %v13758_v0 = vadd.f32 %v6622_v20, %v13685_v5  ;;  %v16057_v4 = vld [vmem:[#allocation133_spill] sm:$0xff] }
 0x58a   : > { %v6365_v46 = vpop.f32.mrf.mxu1  ;;  %v8985_v28 = vpop.f32.mrf.mxu0  ;;  %9067 = vmatmul.mubr.bf16.gmra.mxu1 %v16053_v6  ;;  %v16058_v5 = vld [vmem:[#allocation93_spill] sm:$0xff] }
 0x58b   : > { %v6366_v2 = vadd.f32 %v6365_v46, %v16054_v52  ;;  %v13762_v38 = vadd.f32 %v8985_v28, %v6345_v19  ;;  %9070 = vmatprep.mubr.bf16.mxu1 %v16056_v31 }
 0x58c   : > { %v6367_v51 = vpop.f32.mrf.mxu1  ;;  %v6625_v8 = vpop.f32.mrf.mxu0 }
 0x58d   : > { %16055 = vst [vmem:[#allocation136_spill] sm:$0xff] %v13762_v38  ;;  %v13766_v13 = vadd.f32 %v6625_v8, %v13697_v49  ;;  %v16060_v49 = vld [vmem:[#allocation117_spill] sm:$0xff]  ;;  %v16062_v38 = vld [vmem:[#allocation135_spill] sm:$0xff] }
 0x58e   : > { %v6368_v44 = vpop.f32.mrf.mxu1  ;;  %v8988_v57 = vpop.f32.mrf.mxu0  ;;  %7134 = vmatmul.mubr.bf16.gmra.mxu0 %v16057_v4 }
 0x58f   : > { %v6369_v20 = vadd.f32 %v6368_v44, %v16058_v5  ;;  %v13770_v58 = vadd.f32 %v8988_v57, %v6358_v33  ;;  %7141 = vmatprep.mubr.bf16.mxu0 %v16042_v29 }
 0x590   : > { %v6370_v46 = vpop.f32.mrf.mxu1  ;;  %v6638_v19 = vpop.f32.mrf.mxu0 }
 0x591   : > { %16059 = vst [vmem:[#allocation87_spill] sm:$0xff] %v13770_v58  ;;  %v13773_v28 = vadd.f32 %v6638_v19, %v6350_v21  ;;  %v16064_v21 = vld [vmem:[#allocation110_spill] sm:$0xff]  ;;  %v16066_v19 = vld [vmem:[#allocation67_spill] sm:$0xff] }
 0x592   : > { %v6373_v31 = vpop.f32.mrf.mxu1  ;;  %v8989_v52 = vpop.f32.mrf.mxu0  ;;  %9071 = vmatmul.mubr.bf16.gmra.mxu1 %v16053_v6 }
 0x593   : > { %v6374_v51 = vadd.f32 %v6373_v31, %v16060_v49  ;;  %v13777_v8 = vadd.f32 %v8989_v52, %v6361_v32  ;;  %9074 = vmatprep.mubr.bf16.mxu1 %v16062_v38  ;;  %v16068_v49 = vld [vmem:[#allocation21_spill] sm:$0xff] }
 0x594   : > { %v6375_v4 = vpop.f32.mrf.mxu1  ;;  %v6641_v44 = vpop.f32.mrf.mxu0 }
 0x595   : > { %16061 = vst [vmem:[#allocation103_spill] sm:$0xff] %v13777_v8  ;;  %v13780_v33 = vadd.f32 %v6641_v44, %v6353_v37  ;;  %v16069_v37 = vld [vmem:[#allocation95_spill] sm:$0xff]  ;;  %v16071_v8 = vld [vmem:[#allocation29_spill] sm:$0xff] }
 0x596   : > { %v6376_v57 = vpop.f32.mrf.mxu1  ;;  %v8992_v29 = vpop.f32.mrf.mxu0  ;;  %7142 = vmatmul.mubr.bf16.gmra.mxu0 %v16049_v14 }
 0x597   : > { %16063 = vst [vmem:[#allocation58_spill] sm:$0xff] %v13780_v33  ;;  %v6377_v5 = vadd.f32 %v6376_v57, %v16064_v21  ;;  %v13784_v46 = vadd.f32 %v8992_v29, %v6374_v51  ;;  %7149 = vmatprep.mubr.bf16.mxu0 %v16066_v19  ;;  %v16073_v19 = vld [vmem:[#allocation60_spill] sm:$0xff] }
 0x598   : > { %v6378_v6 = vpop.f32.mrf.mxu1  ;;  %v6654_v31 = vpop.f32.mrf.mxu0 }
 0x599   : > { %16065 = vst [vmem:[#allocation37_spill] sm:$0xff] %v13784_v46  ;;  %v13787_v32 = vadd.f32 %v6654_v31, %v6366_v2  ;;  %v16074_v2 = vld [vmem:[#allocation121_spill] sm:$0xff] }
 0x59a   : > { %v6381_v52 = vpop.f32.mrf.mxu1  ;;  %v8993_v38 = vpop.f32.mrf.mxu0  ;;  %9075 = vmatmul.mubr.bf16.gmra.mxu1 %v16068_v49  ;;  %v16075_v31 = vld [vmem:[#allocation137_spill] sm:$0xff] }
 0x59b   : > { %16067 = vst [vmem:[#allocation105_spill] sm:$0xff] %v13787_v32  ;;  %v6382_v4 = vadd.f32 %v6381_v52, %v16069_v37  ;;  %v13791_v44 = vadd.f32 %v8993_v38, %v6377_v5  ;;  %9078 = vmatprep.mubr.bf16.mxu1 %v16071_v8  ;;  %v16077_v38 = vld [vmem:[#allocation69_spill] sm:$0xff]  ;;  %v16078_v8 = vld [vmem:[#allocation36_spill] sm:$0xff] }
 0x59c   : > { %v6383_v14 = vpop.f32.mrf.mxu1  ;;  %v6657_v57 = vpop.f32.mrf.mxu0 }
 0x59d   : > { %16070 = vst [vmem:[#allocation23_spill] sm:$0xff] %v13791_v44  ;;  %v13794_v51 = vadd.f32 %v6657_v57, %v6369_v20  ;;  %v16079_v20 = vld [vmem:[#allocation71_spill] sm:$0xff] }
 0x59e   : > { %v6384_v29 = vpop.f32.mrf.mxu1  ;;  %v8996_v21 = vpop.f32.mrf.mxu0  ;;  %7150 = vmatmul.mubr.bf16.gmra.mxu0 %v16073_v19 }
 0x59f   : > { %16072 = vst [vmem:[#allocation77_spill] sm:$0xff] %v13794_v51  ;;  %v6385_v6 = vadd.f32 %v6384_v29, %v16074_v2  ;;  %7157 = vmatprep.mubr.bf16.mxu0 %v16075_v31 }
 0x5a0   : > { %v6386_v46 = vpop.f32.mrf.mxu1  ;;  %v6670_v49 = vpop.f32.mrf.mxu0 }
 0x5a1   : > { %v13799_v32 = vadd.f32 %v6670_v49, %v6382_v4  ;;  %v16082_v46 = vld [vmem:[#allocation64_spill] sm:$0xff]  ;;  %v16083_v4 = vld [vmem:[#allocation38_spill] sm:$0xff]  ;;  %v16084_v49 = vld [vmem:[#allocation75_spill] sm:$0xff] }
 0x5a2   : > { %v6389_v5 = vpop.f32.mrf.mxu1  ;;  %v8997_v52 = vpop.f32.mrf.mxu0  ;;  %9079 = vmatmul.mubr.bf16.gmra.mxu1 %v16077_v38 }
 0x5a3   : > { %16076 = vst [vmem:[#allocation106_spill] sm:$0xff] %v13799_v32  ;;  %v6390_v37 = vadd.f32 %v6389_v5, %v16078_v8  ;;  %9082 = vmatprep.mubr.bf16.mxu1 %v16079_v20 }
 0x5a4   : > { %v6391_v14 = vpop.f32.mrf.mxu1  ;;  %v6673_v57 = vpop.f32.mrf.mxu0 }
 0x5a5   : > { %v13804_v44 = vadd.f32 %v8996_v21, %v6390_v37  ;;  %v13806_v19 = vadd.f32 %v6673_v57, %v6385_v6  ;;  %v16086_v21 = vld [vmem:[#allocation138_spill] sm:$0xff]  ;;  %v16087_v6 = vld [vmem:[#allocation101_spill] sm:$0xff] }
 0x5a6   : > { %v6392_v29 = vpop.f32.mrf.mxu1  ;;  %v9000_v2 = vpop.f32.mrf.mxu0  ;;  %7158 = vmatmul.mubr.bf16.gmra.mxu0 %v16082_v46 }
 0x5a7   : > { %16080 = vst [vmem:[#allocation43_spill] sm:$0xff] %v13804_v44  ;;  %16081 = vst [vmem:[#allocation16_spill] sm:$0xff] %v13806_v19  ;;  %v6393_v31 = vadd.f32 %v6392_v29, %v16083_v4  ;;  %7165 = vmatprep.mubr.bf16.mxu0 %v16084_v49  ;;  %v16089_v4 = vld [vmem:[#allocation63_spill] sm:$0xff] }
 0x5a8   : > { %v6394_v32 = vpop.f32.mrf.mxu1  ;;  %v6686_v38 = vpop.f32.mrf.mxu0 }
 0x5a9   : > { %v13811_v51 = vadd.f32 %v8997_v52, %v6393_v31  ;;  %v16090_v32 = vld [vmem:[#allocation122_spill] sm:$0xff]  ;;  %v16091_v52 = vld [vmem:[#allocation81_spill] sm:$0xff] }
 0x5aa   : > { %v6397_v5 = vpop.f32.mrf.mxu1  ;;  %v9001_v8 = vpop.f32.mrf.mxu0  ;;  %9083 = vmatmul.mubr.bf16.gmra.mxu1 %v15958_v18 }
 0x5ab   : > { %16085 = vst [vmem:[#allocation104_spill] sm:$0xff] %v13811_v51  ;;  %v6398_v37 = vadd.f32 %v6397_v5, %v16086_v21  ;;  %9086 = vmatprep.mubr.bf16.mxu1 %v16087_v6  ;;  %v16093_v21 = vld [vmem:[#allocation78_spill] sm:$0xff]  ;;  %v16094_v6 = vld [vmem:[#allocation41_spill] sm:$0xff] }
 0x5ac   : > { %v6399_v20 = vpop.f32.mrf.mxu1  ;;  %v6689_v14 = vpop.f32.mrf.mxu0 }
 0x5ad   : > { %v13816_v57 = vadd.f32 %v6686_v38, %v6398_v37  ;;  %v16095_v38 = vld [vmem:[#allocation107_spill] sm:$0xff] }
 0x5ae   : > { %v6400_v46 = vpop.f32.mrf.mxu1  ;;  %v9004_v29 = vpop.f32.mrf.mxu0  ;;  %7166 = vmatmul.mubr.bf16.gmra.mxu0 %v16089_v4 }
 0x5af   : > { %16088 = vst [vmem:[#allocation72_spill] sm:$0xff] %v13816_v57  ;;  %v6401_v49 = vadd.f32 %v6400_v46, %v16090_v32  ;;  %7173 = vmatprep.mubr.bf16.mxu0 %v16091_v52  ;;  %v16097_v32 = vld [vmem:[#allocation134_spill] sm:$0xff]  ;;  %v16098_v52 = vld [vmem:[#allocation97_spill] sm:$0xff] }
 0x5b0   : > { %v6402_v31 = vpop.f32.mrf.mxu1  ;;  %v6702_v51 = vpop.f32.mrf.mxu0 }
 0x5b1   : > { %v13821_v44 = vadd.f32 %v6689_v14, %v6401_v49 }
 0x5b2   : > { %v6405_v18 = vpop.f32.mrf.mxu1  ;;  %v9005_v5 = vpop.f32.mrf.mxu0  ;;  %9087 = vmatmul.mubr.bf16.gmra.mxu1 %v16093_v21 }
 0x5b3   : > { %16092 = vst [vmem:[#allocation100_spill] sm:$0xff] %v13821_v44  ;;  %v6406_v20 = vadd.f32 %v6405_v18, %v16094_v6  ;;  %9090 = vmatprep.mubr.bf16.mxu1 %v16095_v38  ;;  %v16100_v6 = vld [vmem:[#allocation83_spill] sm:$0xff]  ;;  %v16101_v38 = vld [vmem:[#allocation124_spill] sm:$0xff] }
 0x5b4   : > { %v6407_v37 = vpop.f32.mrf.mxu1  ;;  %v6705_v57 = vpop.f32.mrf.mxu0 }
 0x5b5   : > { %v13826_v19 = vadd.f32 %v9000_v2, %v6406_v20 }
 0x5b6   : > { %v6408_v4 = vpop.f32.mrf.mxu1  ;;  %v9008_v46 = vpop.f32.mrf.mxu0  ;;  %7174 = vmatmul.mubr.bf16.gmra.mxu0 %v16097_v32 }
 0x5b7   : > { %16096 = vst [vmem:[#allocation26_spill] sm:$0xff] %v13826_v19  ;;  %v6409_v31 = vadd.f32 %v6408_v4, %v16098_v52  ;;  %7181 = vmatprep.mubr.bf16.mxu0 %v15968_v42  ;;  %v16103_v42 = vld [vmem:[#allocation70_spill] sm:$0xff]  ;;  %v16104_v52 = vld [vmem:[#allocation45_spill] sm:$0xff] }
 0x5b8   : > { %v6410_v14 = vpop.f32.mrf.mxu1  ;;  %v6718_v49 = vpop.f32.mrf.mxu0 }
 0x5b9   : > { %v13831_v44 = vadd.f32 %v9001_v8, %v6409_v31 }
 0x5ba   : > { %v6413_v21 = vpop.f32.mrf.mxu1  ;;  %v9009_v18 = vpop.f32.mrf.mxu0  ;;  %9091 = vmatmul.mubr.bf16.gmra.mxu1 %v16100_v6 }
 0x5bb   : > { %16099 = vst [vmem:[#allocation18_spill] sm:$0xff] %v13831_v44  ;;  %v6414_v37 = vadd.f32 %v6413_v21, %v16101_v38  ;;  %9094 = vmatprep.mubr.bf16.mxu1 %v13143_v55  ;;  %v16106_v55 = vld [vmem:[#allocation115_spill] sm:$0xff] }
 0x5bc   : > { %v6415_v2 = vpop.f32.mrf.mxu1  ;;  %v6721_v20 = vpop.f32.mrf.mxu0 }
 0x5bd   : > { %v13836_v19 = vadd.f32 %v6702_v51, %v6414_v37  ;;  %v16107_v51 = vld [vmem:[#allocation42_spill] sm:$0xff]  ;;  %v16108_v2 = vld [vmem:[#allocation120_spill] sm:$0xff] }
 0x5be   : > { %v6416_v32 = vpop.f32.mrf.mxu1  ;;  %v13838_v4 = vpop.f32.mrf.mxu0  ;;  %7182 = vmatmul.mubr.bf16.gmra.mxu0 %v16103_v42 }
 0x5bf   : > { %16102 = vst [vmem:[#allocation46_spill] sm:$0xff] %v13836_v19  ;;  %v6417_v8 = vadd.f32 %v6416_v32, %v16104_v52  ;;  %7189 = vmatprep.mubr.bf16.mxu0 %v13171_v60  ;;  %v16110_v60 = vld [vmem:[#allocation25_spill] sm:$0xff] }
 0x5c0   : > { %v6418_v31 = vpop.f32.mrf.mxu1  ;;  %v6734_v14 = vpop.f32.mrf.mxu0 }
 0x5c1   : > { %v13843_v6 = vadd.f32 %v6705_v57, %v6417_v8  ;;  %v16111_v57 = vld [vmem:[#allocation82_spill] sm:$0xff]  ;;  %v16112_v31 = vld [vmem:[#allocation92_spill] sm:$0xff] }
 0x5c2   : > { %v6421_v21 = vpop.f32.mrf.mxu1  ;;  %v13845_v38 = vpop.f32.mrf.mxu0  ;;  %9095 = vmatmul.mubr.bf16.gmra.mxu1 %v16106_v55 }
 0x5c3   : > { %16105 = vst [vmem:[#allocation65_spill] sm:$0xff] %v13843_v6  ;;  %v6422_v37 = vadd.f32 %v6421_v21, %v16107_v51  ;;  %9098 = vmatprep.mubr.bf16.mxu1 %v16108_v2  ;;  %v16116_v2 = vld [vmem:[#allocation53_spill] sm:$0xff] }
 0x5c4   : > { %v6423_v19 = vpop.f32.mrf.mxu1  ;;  %v6737_v44 = vpop.f32.mrf.mxu0 }
 0x5c5   : > { %v13850_v42 = vadd.f32 %v9004_v29, %v6422_v37  ;;  %v16114_v19 = vld [vmem:[#allocation102_spill] sm:$0xff]  ;;  %v16115_v29 = vld [vmem:[#allocation12_spill] sm:$0xff] }
 0x5c6   : > { %v6424_v32 = vpop.f32.mrf.mxu1  ;;  %v13852_v52 = vpop.f32.mrf.mxu0  ;;  %7190 = vmatmul.mubr.bf16.gmra.mxu0 %v16110_v60 }
 0x5c7   : > { %16109 = vst [vmem:[#allocation22_spill] sm:$0xff] %v13850_v42  ;;  %v6425_v8 = vadd.f32 %v6424_v32, %v16111_v57  ;;  %7197 = vmatprep.mubr.bf16.mxu0 %v16112_v31  ;;  %v16118_v31 = vld [vmem:[#allocation73_spill] sm:$0xff] }
 0x5c8   : > { %v6426_v6 = vpop.f32.mrf.mxu1  ;;  %v13857_v33 = vpop.f32.mrf.mxu0 }
 0x5c9   : > { %v13859_v55 = vadd.f32 %v9005_v5, %v6425_v8  ;;  %v16119_v5 = vld [vmem:[#allocation126_spill] sm:$0xff] }
 0x5ca   : > { %v6429_v21 = vpop.f32.mrf.mxu1  ;;  %v13861_v51 = vpop.f32.mrf.mxu0  ;;  %9099 = vmatmul.mubr.bf16.gmra.mxu1 %v16114_v19 }
 0x5cb   : > { %16113 = vst [vmem:[#allocation109_spill] sm:$0xff] %v13859_v55  ;;  %v6430_v37 = vadd.f32 %v6429_v21, %v16115_v29  ;;  %9102 = vmatprep.mubr.bf16.mxu1 %v16116_v2 }
 0x5cc   : > { %v6431_v42 = vpop.f32.mrf.mxu1  ;;  %v13866_v60 = vpop.f32.mrf.mxu0 }
 0x5cd   : > { %v13868_v32 = vadd.f32 %v6718_v49, %v6430_v37  ;;  %v16121_v49 = vld [vmem:[#allocation55_spill] sm:$0xff] }
 0x5ce   : > { %v6432_v57 = vpop.f32.mrf.mxu1  ;;  %v13870_v6 = vpop.f32.mrf.mxu0  ;;  %7198 = vmatmul.mubr.bf16.gmra.mxu0 %v16118_v31 }
 0x5cf   : > { %16117 = vst [vmem:[#allocation108_spill] sm:$0xff] %v13868_v32  ;;  %v6433_v8 = vadd.f32 %v6432_v57, %v16119_v5  ;;  %7205 = vmatprep.mubr.bf16.mxu0 %v15979_v45 }
 0x5d0   : > { %v6434_v55 = vpop.f32.mrf.mxu1  ;;  %v13875_v58 = vpop.f32.mrf.mxu0 }
 0x5d1   : > { %v13877_v21 = vadd.f32 %v6721_v20, %v6433_v8 }
 0x5d2   : > { %v6437_v29 = vpop.f32.mrf.mxu1  ;;  %v13879_v42 = vpop.f32.mrf.mxu0  ;;  %9103 = vmatmul.mubr.bf16.gmra.mxu1 %v16114_v19 }
 0x5d3   : > { %16120 = vst [vmem:[#allocation119_spill] sm:$0xff] %v13877_v21  ;;  %v6438_v37 = vadd.f32 %v6437_v29, %v16121_v49 }
 0x5d4   : > { %v6439_v2 = vpop.f32.mrf.mxu1  ;;  %v13883_v32 = vpop.f32.mrf.mxu0 }
 0x5d5   : > { %v13885_v31 = vadd.f32 %v9008_v46, %v6438_v37 }
 0x5d6   : > { %v6440_v57 = vpop.f32.mrf.mxu1  ;;  %v13887_v5 = vpop.f32.mrf.mxu0  ;;  %7206 = vmatmul.mubr.bf16.gmra.mxu0 %v13044_v27 }
 0x5d7   : > { %16122 = vst [vmem:[#allocation123_spill] sm:$0xff] %v13885_v31  ;;  %v6441_v45 = vadd.f32 %v6440_v57, %v13514_v23  ;;  %7213 = vmatprep.mubr.bf16.mxu0 %v13232_v3 }
 0x5d8   : > { %v6442_v20 = vpop.f32.mrf.mxu1  ;;  %v13892_v55 = vpop.f32.mrf.mxu0 }
 0x5d9   : > { %v13894_v19 = vadd.f32 %v9009_v18, %v6441_v45 }
 0x5da   : > { %v6445_v8 = vpop.f32.mrf.mxu1  ;;  %v13896_v29 = vpop.f32.mrf.mxu0 }
 0x5db   : > { %16123 = vst [vmem:[#allocation35_spill] sm:$0xff] %v13894_v19  ;;  %v6446_v46 = vadd.f32 %v6445_v8, %v13523_v36 }
 0x5dc   : > { %v6447_v49 = vpop.f32.mrf.mxu1  ;;  %v13899_v37 = vpop.f32.mrf.mxu0 }
 0x5dd   : > { %v13901_v2 = vadd.f32 %v6734_v14, %v6446_v46 }
 0x5de   : > { %v6448_v27 = vpop.f32.mrf.mxu1  ;;  %v13903_v31 = vpop.f32.mrf.mxu0  ;;  %7214 = vmatmul.mubr.bf16.gmra.mxu0 %v13067_v17 }
 0x5df   : > { %16124 = vst [vmem:[#allocation30_spill] sm:$0xff] %v13901_v2  ;;  %v6449_v3 = vadd.f32 %v6448_v27, %v13530_v26  ;;  %7221 = vmatprep.mubr.bf16.mxu0 %v15984_v61 }
 0x5e0   : > { %v6450_v23 = vpop.f32.mrf.mxu1  ;;  %v7025_v18 = vpop.f32.mrf.mxu0 }
 0x5e1   : > { %v13908_v57 = vadd.f32 %v6737_v44, %v6449_v3  ;;  %v16128_v23 = vld [vmem:[#allocation62_spill] sm:$0xff] }
 0x5e2   : > { %v6453_v45 = vpop.f32.mrf.mxu1  ;;  %v13910_v36 = vpop.f32.mrf.mxu0 }
 0x5e3   : > { %16125 = vst [vmem:[#allocation39_spill] sm:$0xff] %v13908_v57  ;;  %v6454_v20 = vadd.f32 %v6453_v45, %v13538_v43  ;;  %v16171_v57 = vld [vmem:[#allocation16_spill] sm:$0xff] }
 0x5e4   : > { %v6455_v14 = vpop.f32.mrf.mxu1  ;;  %v7028_v8 = vpop.f32.mrf.mxu0 }
 0x5e5   : > { %v13914_v46 = vadd.f32 %v13838_v4, %v6454_v20 }
 0x5e6   : > { %v6456_v49 = vpop.f32.mrf.mxu1  ;;  %v13916_v17 = vpop.f32.mrf.mxu0  ;;  %7222 = vmatmul.mubr.bf16.gmra.mxu0 %v15988_v40 }
 0x5e7   : > { %16126 = vst [vmem:[#allocation74_spill] sm:$0xff] %v13914_v46  ;;  %v6457_v26 = vadd.f32 %v6456_v49, %v13546_v25  ;;  %7229 = vmatprep.mubr.bf16.mxu0 %v15991_v22  ;;  %v16130_v25 = vld [vmem:[#allocation111_spill] sm:$0xff]  ;;  %v16131_v22 = vld [vmem:[#allocation52_spill] sm:$0xff] }
 0x5e8   : > { %v6458_v61 = vpop.f32.mrf.mxu1  ;;  %v7033_v44 = vpop.f32.mrf.mxu0 }
 0x5e9   : > { %v13922_v27 = vadd.f32 %v13845_v38, %v6457_v26 }
 0x5ea   : > { %v6461_v43 = vpop.f32.mrf.mxu1  ;;  %v13924_v3 = vpop.f32.mrf.mxu0 }
 0x5eb   : > { %16127 = vst [vmem:[#allocation125_spill] sm:$0xff] %v13922_v27  ;;  %v6462_v4 = vadd.f32 %v6461_v43, %v16128_v23  ;;  %v16133_v43 = vld [vmem:[#allocation129_spill] sm:$0xff] }
 0x5ec   : > { %v6463_v18 = vpop.f32.mrf.mxu1  ;;  %v7036_v45 = vpop.f32.mrf.mxu0 }
 0x5ed   : > { %v13928_v20 = vadd.f32 %v13857_v33, %v6462_v4 }
 0x5ee   : > { %v6464_v40 = vpop.f32.mrf.mxu1  ;;  %v13930_v14 = vpop.f32.mrf.mxu0  ;;  %7230 = vmatmul.mubr.bf16.gmra.mxu0 %v16130_v25 }
 0x5ef   : > { %16129 = vst [vmem:[#allocation32_spill] sm:$0xff] %v13928_v20  ;;  %v6465_v8 = vadd.f32 %v6464_v40, %v16131_v22  ;;  %7237 = vmatprep.mubr.bf16.mxu0 %v15996_v11 }
 0x5f0   : > { %v6466_v38 = vpop.f32.mrf.mxu1  ;;  %v7041_v49 = vpop.f32.mrf.mxu0 }
 0x5f1   : > { %v13936_v26 = vadd.f32 %v13866_v60, %v6465_v8 }
 0x5f2   : > { %v6469_v61 = vpop.f32.mrf.mxu1  ;;  %v13938_v44 = vpop.f32.mrf.mxu0 }
 0x5f3   : > { %16132 = vst [vmem:[#allocation15_spill] sm:$0xff] %v13936_v26  ;;  %v6470_v33 = vadd.f32 %v6469_v61, %v16133_v43 }
 0x5f4   : > { %v6471_v23 = vpop.f32.mrf.mxu1  ;;  %v7044_v4 = vpop.f32.mrf.mxu0 }
 0x5f5   : > { %v13942_v18 = vadd.f32 %v13852_v52, %v6470_v33 }
 0x5f6   : > { %v6472_v45 = vpop.f32.mrf.mxu1  ;;  %v13944_v25 = vpop.f32.mrf.mxu0  ;;  %7238 = vmatmul.mubr.bf16.gmra.mxu0 %v13118_v30 }
 0x5f7   : > { %16134 = vst [vmem:[#allocation28_spill] sm:$0xff] %v13942_v18  ;;  %v6473_v11 = vadd.f32 %v6472_v45, %v13579_v54  ;;  %7245 = vmatprep.mubr.bf16.mxu0 %v16001_v35  ;;  %v16137_v54 = vld [vmem:[#allocation88_spill] sm:$0xff] }
 0x5f8   : > { %v6474_v60 = vpop.f32.mrf.mxu1  ;;  %v7049_v40 = vpop.f32.mrf.mxu0  ;;  %v16138_v35 = vld [vmem:[#allocation76_spill] sm:$0xff] }
 0x5f9   : > { %v13950_v22 = vadd.f32 %v13861_v51, %v6473_v11  ;;  %v16140_v60 = vld [vmem:[#allocation50_spill] sm:$0xff] }
 0x5fa   : > { %v6477_v8 = vpop.f32.mrf.mxu1  ;;  %v13952_v38 = vpop.f32.mrf.mxu0 }
 0x5fb   : > { %16135 = vst [vmem:[#allocation79_spill] sm:$0xff] %v13950_v22  ;;  %v6478_v52 = vadd.f32 %v6477_v8, %v13589_v1 }
 0x5fc   : > { %v6479_v49 = vpop.f32.mrf.mxu1  ;;  %v7052_v61 = vpop.f32.mrf.mxu0 }
 0x5fd   : > { %v13956_v43 = vadd.f32 %v13875_v58, %v6478_v52 }
 0x5fe   : > { %v6480_v30 = vpop.f32.mrf.mxu1  ;;  %v13958_v33 = vpop.f32.mrf.mxu0  ;;  %7246 = vmatmul.mubr.bf16.gmra.mxu0 %v16137_v54  ;;  %v16142_v54 = vld [vmem:[#allocation27_spill] sm:$0xff] }
 0x5ff   : > { %16136 = vst [vmem:[#allocation13_spill] sm:$0xff] %v13956_v43  ;;  %v6481_v23 = vadd.f32 %v6480_v30, %v16138_v35  ;;  %7253 = vmatprep.mubr.bf16.mxu0 %v16006_v63 }
 0x600   : > { %v6482_v51 = vpop.f32.mrf.mxu1  ;;  %v7057_v4 = vpop.f32.mrf.mxu0 }
 0x601   : > { %v13964_v45 = vadd.f32 %v13883_v32, %v6481_v23 }
 0x602   : > { %v6485_v1 = vpop.f32.mrf.mxu1  ;;  %v13966_v11 = vpop.f32.mrf.mxu0 }
 0x603   : > { %16139 = vst [vmem:[#allocation80_spill] sm:$0xff] %v13964_v45  ;;  %v6486_v58 = vadd.f32 %v6485_v1, %v16140_v60 }
 0x604   : > { %v6487_v40 = vpop.f32.mrf.mxu1  ;;  %v7060_v8 = vpop.f32.mrf.mxu0 }
 0x605   : > { %v13970_v52 = vadd.f32 %v13870_v6, %v6486_v58 }
 0x606   : > { %v6488_v49 = vpop.f32.mrf.mxu1  ;;  %v13972_v61 = vpop.f32.mrf.mxu0  ;;  %7254 = vmatmul.mubr.bf16.gmra.mxu0 %v13157_v47 }
 0x607   : > { %16141 = vst [vmem:[#allocation113_spill] sm:$0xff] %v13970_v52  ;;  %v6489_v30 = vadd.f32 %v6488_v49, %v13612_v12  ;;  %7261 = vmatprep.mubr.bf16.mxu0 %v16142_v54  ;;  %v16145_v12 = vld [vmem:[#allocation19_spill] sm:$0xff] }
 0x608   : > { %v6490_v32 = vpop.f32.mrf.mxu1  ;;  %v7065_v35 = vpop.f32.mrf.mxu0  ;;  %v16146_v54 = vld [vmem:[#allocation139_spill] sm:$0xff] }
 0x609   : > { %v13978_v23 = vadd.f32 %v13879_v42, %v6489_v30  ;;  %v16147_v32 = vld [vmem:[#allocation49_spill] sm:$0xff] }
 0x60a   : > { %v6493_v51 = vpop.f32.mrf.mxu1  ;;  %v13980_v4 = vpop.f32.mrf.mxu0  ;;  %v6069_v35 = vadd.f32 %v16147_v32, %v16146_v54 }
 0x60b   : > { %16143 = vst [vmem:[#allocation33_spill] sm:$0xff] %v13978_v23  ;;  %v6494_v6 = vadd.f32 %v6493_v51, %v13622_v24  ;;  %v16166_v23 = vld [vmem:[#allocation77_spill] sm:$0xff] }
 0x60c   : > { %v6495_v1 = vpop.f32.mrf.mxu1  ;;  %v7068_v60 = vpop.f32.mrf.mxu0 }
 0x60d   : > { %v13984_v58 = vadd.f32 %v13892_v55, %v6494_v6 }
 0x60e   : > { %v6496_v40 = vpop.f32.mrf.mxu1  ;;  %v13986_v8 = vpop.f32.mrf.mxu0  ;;  %7262 = vmatmul.mubr.bf16.gmra.mxu0 %v16145_v12  ;;  %v16149_v12 = vld [vmem:[#allocation59_spill] sm:$0xff] }
 0x60f   : > { %16144 = vst [vmem:[#allocation84_spill] sm:$0xff] %v13984_v58  ;;  %v6497_v49 = vadd.f32 %v6496_v40, %v13629_v9  ;;  %7269 = vmatprep.mubr.bf16.mxu0 %v16006_v63  ;;  %v6072_v58 = vadd.f32 %v16149_v12, %v13642_v53 }
 0x610   : > { %v6498_v42 = vpop.f32.mrf.mxu1  ;;  %v7073_v30 = vpop.f32.mrf.mxu0 }
 0x611   : > { %v13994_v24 = vadd.f32 %v13899_v37, %v6497_v49 }
 0x612   : > { %v6501_v51 = vpop.f32.mrf.mxu1  ;;  %v13996_v55 = vpop.f32.mrf.mxu0 }
 0x613   : > { %16148 = vst [vmem:[#allocation66_spill] sm:$0xff] %v13994_v24  ;;  %v6502_v6 = vadd.f32 %v6501_v51, %v6069_v35 }
 0x614   : > { %v6503_v1 = vpop.f32.mrf.mxu1  ;;  %v7076_v60 = vpop.f32.mrf.mxu0 }
 0x615   : > { %v14001_v9 = vadd.f32 %v13887_v5, %v6502_v6 }
 0x616   : > { %v6504_v63 = vpop.f32.mrf.mxu1  ;;  %v14003_v40 = vpop.f32.mrf.mxu0  ;;  %7270 = vmatmul.mubr.bf16.gmra.mxu0 %v13157_v47 }
 0x617   : > { %16150 = vst [vmem:[#allocation96_spill] sm:$0xff] %v14001_v9  ;;  %v6505_v42 = vadd.f32 %v6504_v63, %v6072_v58 }
 0x618   : > { %v6506_v37 = vpop.f32.mrf.mxu1  ;;  %v7081_v49 = vpop.f32.mrf.mxu0 }
 0x619   : > { %v14007_v30 = vadd.f32 %v13896_v29, %v6505_v42 }
 0x61a   : > { %v14009_v54 = vpop.f32.mrf.mxu0  ;;  %v9044_v32 = vpop.f32.mrf.mxu1 }
 0x61b   : > { %16151 = vst [vmem:[#allocation85_spill] sm:$0xff] %v14007_v30  ;;  %v7321_v1 = vadd.f32 %v9044_v32, %v13916_v17 }
 0x61c   : > { %v7084_v35 = vpop.f32.mrf.mxu0  ;;  %v7312_v51 = vpop.f32.mrf.mxu1 }
 0x61d   : > { %v7313_v53 = vadd.f32 %v7312_v51, %v13903_v31  ;;  %v14023_v37 = vadd.f32 %v7321_v1, %v13655_v62  ;;  %v16152_v1 = vld [vmem:[#allocation98_spill] sm:$0xff] }
 0x61e   : > { %v14012_v5 = vpop.f32.mrf.mxu0  ;;  %v9045_v6 = vpop.f32.mrf.mxu1 }
 0x61f   : > { %v14016_v47 = vadd.f32 %v7313_v53, %v13659_v56  ;;  %v7324_v58 = vadd.f32 %v9045_v6, %v13924_v3 }
 0x620   : > { %v7089_v60 = vpop.f32.mrf.mxu0  ;;  %v7315_v29 = vpop.f32.mrf.mxu1 }
 0x621   : > { %v7316_v12 = vadd.f32 %v7315_v29, %v13910_v36  ;;  %v14029_v17 = vadd.f32 %v7324_v58, %v13666_v50  ;;  %v7707_v3 = vmul.f32 %v14016_v47, %v14016_v47  ;;  %v7709_v50 = vmul.f32 %v14023_v37, %v14023_v37 }
 0x622   : > { %v14020_v63 = vpop.f32.mrf.mxu0  ;;  %v9048_v42 = vpop.f32.mrf.mxu1 }
 0x623   : > { %v14026_v31 = vadd.f32 %v7316_v12, %v13670_v48  ;;  %v7337_v35 = vadd.f32 %v9048_v42, %v13944_v25  ;;  %v7710_v60 = vmul.f32 %v14029_v17, %v14029_v17 }
 0x624   : > { %v7092_v56 = vpop.f32.mrf.mxu0  ;;  %v7328_v49 = vpop.f32.mrf.mxu1 }
 0x625   : > { %v7631_v36 = vadd.f32 %v14026_v31, %v14016_v47  ;;  %v7708_v32 = vmul.f32 %v14026_v31, %v14026_v31  ;;  %v7329_v62 = vadd.f32 %v7328_v49, %v13930_v14  ;;  %v16153_v49 = vld [vmem:[#allocation14_spill] sm:$0xff] }
 0x626   : > { %v14039_v48 = vpop.f32.mrf.mxu0  ;;  %v9049_v51 = vpop.f32.mrf.mxu1  ;;  %v14053_v30 = vadd.f32 %v7337_v35, %v16153_v49 }
 0x627   : > { %v7632_v53 = vadd.f32 %v7631_v36, %v14023_v37  ;;  %v7771_v6 = vadd.f32 %v7708_v32, %v7707_v3  ;;  %v14045_v58 = vadd.f32 %v7329_v62, %v16152_v1  ;;  %v7340_v42 = vadd.f32 %v9049_v51, %v13952_v38 }
 0x628   : > { %v7097_v29 = vpop.f32.mrf.mxu0  ;;  %v7331_v12 = vpop.f32.mrf.mxu1 }
 0x629   : > { %v7772_v14 = vadd.f32 %v7771_v6, %v7709_v50  ;;  %v7633_v25 = vadd.f32 %v7632_v53, %v14029_v17  ;;  %v7332_v56 = vadd.f32 %v7331_v12, %v13938_v44  ;;  %v7711_v62 = vmul.f32 %v14045_v58, %v14045_v58 }
 0x62a   : > { %v14055_v36 = vpop.f32.mrf.mxu0  ;;  %v9052_v3 = vpop.f32.mrf.mxu1  ;;  %v14064_v44 = vadd.f32 %v7340_v42, %v13688_v16 }
 0x62b   : > { %v7634_v32 = vadd.f32 %v7633_v25, %v14045_v58  ;;  %v7773_v1 = vadd.f32 %v7772_v14, %v7710_v60  ;;  %v14061_v50 = vadd.f32 %v7332_v56, %v13694_v10  ;;  %v7353_v29 = vadd.f32 %v9052_v3, %v13972_v61 }
 0x62c   : > { %v7100_v53 = vpop.f32.mrf.mxu0  ;;  %v7344_v6 = vpop.f32.mrf.mxu1  ;;  %v7713_v10 = vmul.f32 %v14053_v30, %v14053_v30  ;;  %v7714_v61 = vmul.f32 %v14064_v44, %v14064_v44 }
 0x62d   : > { %v7774_v38 = vadd.f32 %v7773_v1, %v7711_v62  ;;  %v7635_v35 = vadd.f32 %v7634_v32, %v14061_v50  ;;  %v7712_v51 = vmul.f32 %v14061_v50, %v14061_v50  ;;  %v7345_v12 = vadd.f32 %v7344_v6, %v13958_v33 }
 0x62e   : > { %v14071_v25 = vpop.f32.mrf.mxu0  ;;  %v9053_v60 = vpop.f32.mrf.mxu1  ;;  %v14085_v1 = vadd.f32 %v7353_v29, %v13700_v41 }
 0x62f   : > { %v7636_v14 = vadd.f32 %v7635_v35, %v14053_v30  ;;  %v7775_v56 = vadd.f32 %v7774_v38, %v7712_v51  ;;  %v14077_v16 = vadd.f32 %v7345_v12, %v13704_v34  ;;  %v7356_v42 = vadd.f32 %v9053_v60, %v13980_v4 }
 0x630   : > { %v7105_v49 = vpop.f32.mrf.mxu0  ;;  %v7347_v32 = vpop.f32.mrf.mxu1 }
 0x631   : > { %v7776_v33 = vadd.f32 %v7775_v56, %v7713_v10  ;;  %v7637_v3 = vadd.f32 %v7636_v14, %v14064_v44  ;;  %v7348_v62 = vadd.f32 %v7347_v32, %v13966_v11  ;;  %v7715_v4 = vmul.f32 %v14077_v16, %v14077_v16 }
 0x632   : > { %v14087_v53 = vpop.f32.mrf.mxu0  ;;  %v9056_v6 = vpop.f32.mrf.mxu1  ;;  %v14096_v51 = vadd.f32 %v7356_v42, %v13709_v15  ;;  %v7717_v49 = vmul.f32 %v14085_v1, %v14085_v1 }
 0x633   : > { %v7638_v34 = vadd.f32 %v7637_v3, %v14077_v16  ;;  %v7777_v38 = vadd.f32 %v7776_v33, %v7714_v61  ;;  %v14093_v35 = vadd.f32 %v7348_v62, %v13713_v59  ;;  %v7369_v42 = vadd.f32 %v9056_v6, %v14003_v40  ;;  %v16154_v6 = vld [vmem:[#allocation130_spill] sm:$0xff] }
 0x634   : > { %v7108_v12 = vpop.f32.mrf.mxu0  ;;  %v7360_v11 = vpop.f32.mrf.mxu1  ;;  %v7718_v3 = vmul.f32 %v14096_v51, %v14096_v51 }
 0x635   : > { %v7778_v60 = vadd.f32 %v7777_v38, %v7715_v4  ;;  %v7639_v41 = vadd.f32 %v7638_v34, %v14093_v35  ;;  %v7716_v29 = vmul.f32 %v14093_v35, %v14093_v35  ;;  %v7361_v10 = vadd.f32 %v7360_v11, %v13986_v8 }
 0x636   : > { %v7111_v14 = vpop.f32.mrf.mxu0  ;;  %v9057_v56 = vpop.f32.mrf.mxu1 }
 0x637   : > { %v7640_v59 = vadd.f32 %v7639_v41, %v14085_v1  ;;  %v7779_v32 = vadd.f32 %v7778_v60, %v7716_v29  ;;  %v14106_v15 = vadd.f32 %v7361_v10, %v13722_v39  ;;  %v7372_v34 = vadd.f32 %v9057_v56, %v14009_v54 }
 0x638   : > { %v7113_v61 = vpop.f32.mrf.mxu0  ;;  %v7363_v33 = vpop.f32.mrf.mxu1  ;;  %v14118_v60 = vadd.f32 %v7369_v42, %v16154_v6 }
 0x639   : > { %v7780_v62 = vadd.f32 %v7779_v32, %v7717_v49  ;;  %v7641_v8 = vadd.f32 %v7640_v59, %v14096_v51  ;;  %v7364_v4 = vadd.f32 %v7363_v33, %v13996_v55  ;;  %v7719_v39 = vmul.f32 %v14106_v15, %v14106_v15  ;;  %v16155_v55 = vld [vmem:[#allocation127_spill] sm:$0xff] }
 0x63a   : > { %v7114_v38 = vpop.f32.mrf.mxu0  ;;  %v9060_v12 = vpop.f32.mrf.mxu1  ;;  %v14125_v56 = vadd.f32 %v7372_v34, %v16155_v55 }
 0x63b   : > { %v7642_v11 = vadd.f32 %v7641_v8, %v14106_v15  ;;  %v7781_v40 = vadd.f32 %v7780_v62, %v7718_v3  ;;  %v14121_v41 = vadd.f32 %v7364_v4, %v13733_v7  ;;  %v7385_v42 = vadd.f32 %v9060_v12, %v14039_v48  ;;  %v16156_v8 = vld [vmem:[#allocation44_spill] sm:$0xff] }
 0x63c   : > { %v7116_v29 = vpop.f32.mrf.mxu0  ;;  %v7376_v10 = vpop.f32.mrf.mxu1  ;;  %v7721_v7 = vmul.f32 %v14118_v60, %v14118_v60 }
 0x63d   : > { %v7782_v49 = vadd.f32 %v7781_v40, %v7719_v39  ;;  %v7377_v54 = vadd.f32 %v7376_v10, %v14012_v5  ;;  %v7643_v59 = vadd.f32 %v7642_v11, %v14121_v41  ;;  %v7720_v32 = vmul.f32 %v14121_v41, %v14121_v41  ;;  %v16157_v10 = vld [vmem:[#allocation57_spill] sm:$0xff] }
 0x63e   : > { %v7119_v61 = vpop.f32.mrf.mxu0  ;;  %v9061_v33 = vpop.f32.mrf.mxu1  ;;  %v7722_v39 = vmul.f32 %v14125_v56, %v14125_v56  ;;  %v14143_v55 = vadd.f32 %v7385_v42, %v16157_v10 }
 0x63f   : > { %v7644_v3 = vadd.f32 %v7643_v59, %v14118_v60  ;;  %v7783_v62 = vadd.f32 %v7782_v49, %v7720_v32  ;;  %v14135_v5 = vadd.f32 %v7377_v54, %v16156_v8  ;;  %v7388_v48 = vadd.f32 %v9061_v33, %v14055_v36  ;;  %v16158_v49 = vld [vmem:[#allocation47_spill] sm:$0xff] }
 0x640   : > { %v7121_v34 = vpop.f32.mrf.mxu0  ;;  %v7379_v4 = vpop.f32.mrf.mxu1 }
 0x641   : > { %v7380_v11 = vadd.f32 %v7379_v4, %v14020_v63  ;;  %v7784_v40 = vadd.f32 %v7783_v62, %v7721_v7  ;;  %v7645_v6 = vadd.f32 %v7644_v3, %v14125_v56  ;;  %v7723_v63 = vmul.f32 %v14135_v5, %v14135_v5  ;;  %v16159_v62 = vld [vmem:[#allocation128_spill] sm:$0xff] }
 0x642   : > { %v7122_v12 = vpop.f32.mrf.mxu0  ;;  %v9064_v29 = vpop.f32.mrf.mxu1  ;;  %v14155_v42 = vadd.f32 %v7388_v48, %v16159_v62 }
 0x643   : > { %v14146_v54 = vadd.f32 %v7380_v11, %v16158_v49  ;;  %v7646_v59 = vadd.f32 %v7645_v6, %v14135_v5  ;;  %v7785_v32 = vadd.f32 %v7784_v40, %v7722_v39  ;;  %v7725_v6 = vmul.f32 %v14143_v55, %v14143_v55 }
 0x644   : > { %v7124_v8 = vpop.f32.mrf.mxu0  ;;  %v7392_v7 = vpop.f32.mrf.mxu1  ;;  %v7401_v10 = vadd.f32 %v9064_v29, %v7111_v14  ;;  %v7726_v48 = vmul.f32 %v14155_v42, %v14155_v42  ;;  %v16160_v14 = vld [vmem:[#allocation61_spill] sm:$0xff] }
 0x645   : > { %v7724_v3 = vmul.f32 %v14146_v54, %v14146_v54  ;;  %v7393_v36 = vadd.f32 %v7392_v7, %v14071_v25  ;;  %v7786_v33 = vadd.f32 %v7785_v32, %v7723_v63  ;;  %v7647_v34 = vadd.f32 %v7646_v59, %v14146_v54 }
 0x646   : > { %v7127_v4 = vpop.f32.mrf.mxu0  ;;  %v9065_v11 = vpop.f32.mrf.mxu1  ;;  %v14172_v29 = vadd.f32 %v7401_v10, %v16160_v14 }
 0x647   : > { %v7648_v39 = vadd.f32 %v7647_v34, %v14143_v55  ;;  %v7787_v40 = vadd.f32 %v7786_v33, %v7724_v3  ;;  %v14162_v49 = vadd.f32 %v7393_v36, %v13758_v0  ;;  %v7404_v7 = vadd.f32 %v9065_v11, %v7114_v38 }
 0x648   : > { %v7129_v8 = vpop.f32.mrf.mxu0  ;;  %v7395_v25 = vpop.f32.mrf.mxu1 }
 0x649   : > { %v7396_v63 = vadd.f32 %v7395_v25, %v14087_v53  ;;  %v7788_v59 = vadd.f32 %v7787_v40, %v7725_v6  ;;  %v7649_v32 = vadd.f32 %v7648_v39, %v14155_v42  ;;  %v7727_v53 = vmul.f32 %v14162_v49, %v14162_v49  ;;  %v16161_v39 = vld [vmem:[#allocation136_spill] sm:$0xff] }
 0x64a   : > { %v7130_v62 = vpop.f32.mrf.mxu0  ;;  %v9068_v9 = vpop.f32.mrf.mxu1  ;;  %v14180_v40 = vadd.f32 %v7404_v7, %v16161_v39 }
 0x64b   : > { %v14169_v34 = vadd.f32 %v7396_v63, %v13766_v13  ;;  %v7650_v0 = vadd.f32 %v7649_v32, %v14162_v49  ;;  %v7789_v3 = vadd.f32 %v7788_v59, %v7726_v48  ;;  %v7417_v25 = vadd.f32 %v9068_v9, %v7127_v4 }
 0x64c   : > { %v7132_v36 = vpop.f32.mrf.mxu0  ;;  %v7408_v33 = vpop.f32.mrf.mxu1  ;;  %v7729_v63 = vmul.f32 %v14172_v29, %v14172_v29  ;;  %v7730_v7 = vmul.f32 %v14180_v40, %v14180_v40 }
 0x64d   : > { %v7728_v6 = vmul.f32 %v14169_v34, %v14169_v34  ;;  %v7409_v38 = vadd.f32 %v7408_v33, %v7119_v61  ;;  %v7790_v11 = vadd.f32 %v7789_v3, %v7727_v53  ;;  %v7651_v13 = vadd.f32 %v7650_v0, %v14169_v34  ;;  %v16162_v33 = vld [vmem:[#allocation87_spill] sm:$0xff] }
 0x64e   : > { %v7135_v10 = vpop.f32.mrf.mxu0  ;;  %v9069_v8 = vpop.f32.mrf.mxu1  ;;  %v14193_v39 = vadd.f32 %v7417_v25, %v16162_v33 }
 0x64f   : > { %v7652_v48 = vadd.f32 %v7651_v13, %v14172_v29  ;;  %v7791_v59 = vadd.f32 %v7790_v11, %v7728_v6  ;;  %v14187_v32 = vadd.f32 %v7409_v38, %v13773_v28  ;;  %v7420_v36 = vadd.f32 %v9069_v8, %v7130_v62  ;;  %v16163_v13 = vld [vmem:[#allocation58_spill] sm:$0xff] }
 0x650   : > { %v7137_v14 = vpop.f32.mrf.mxu0  ;;  %v7411_v61 = vpop.f32.mrf.mxu1 }
 0x651   : > { %v7412_v53 = vadd.f32 %v7411_v61, %v7122_v12  ;;  %v7792_v3 = vadd.f32 %v7791_v59, %v7729_v63  ;;  %v7653_v0 = vadd.f32 %v7652_v48, %v14180_v40  ;;  %v7731_v12 = vmul.f32 %v14187_v32, %v14187_v32  ;;  %v16164_v48 = vld [vmem:[#allocation103_spill] sm:$0xff] }
 0x652   : > { %v7138_v9 = vpop.f32.mrf.mxu0  ;;  %v9072_v4 = vpop.f32.mrf.mxu1  ;;  %v14204_v59 = vadd.f32 %v7420_v36, %v16164_v48 }
 0x653   : > { %v14196_v6 = vadd.f32 %v7412_v53, %v16163_v13  ;;  %v7654_v28 = vadd.f32 %v7653_v0, %v14187_v32  ;;  %v7793_v38 = vadd.f32 %v7792_v3, %v7730_v7  ;;  %v7733_v0 = vmul.f32 %v14193_v39, %v14193_v39  ;;  %v16165_v3 = vld [vmem:[#allocation105_spill] sm:$0xff] }
 0x654   : > { %v7140_v11 = vpop.f32.mrf.mxu0  ;;  %v7424_v14 = vpop.f32.mrf.mxu1  ;;  %v7734_v36 = vmul.f32 %v14204_v59, %v14204_v59 }
 0x655   : > { %v7732_v63 = vmul.f32 %v14196_v6, %v14196_v6  ;;  %v7425_v62 = vadd.f32 %v7424_v14, %v7135_v10  ;;  %v7794_v8 = vadd.f32 %v7793_v38, %v7731_v12  ;;  %v7655_v25 = vadd.f32 %v7654_v28, %v14196_v6 }
 0x656   : > { %v7143_v61 = vpop.f32.mrf.mxu0  ;;  %v9073_v53 = vpop.f32.mrf.mxu1 }
 0x657   : > { %v7656_v33 = vadd.f32 %v7655_v25, %v14193_v39  ;;  %v7795_v7 = vadd.f32 %v7794_v8, %v7732_v63  ;;  %v14211_v13 = vadd.f32 %v7425_v62, %v16165_v3  ;;  %v7433_v11 = vadd.f32 %v9072_v4, %v7143_v61  ;;  %v16167_v62 = vld [vmem:[#allocation37_spill] sm:$0xff] }
 0x658   : > { %v7145_v24 = vpop.f32.mrf.mxu0  ;;  %v7427_v10 = vpop.f32.mrf.mxu1 }
 0x659   : > { %v7428_v12 = vadd.f32 %v7427_v10, %v7138_v9  ;;  %v7796_v38 = vadd.f32 %v7795_v7, %v7733_v0  ;;  %v7657_v28 = vadd.f32 %v7656_v33, %v14204_v59  ;;  %v7735_v4 = vmul.f32 %v14211_v13, %v14211_v13 }
 0x65a   : > { %v7146_v14 = vpop.f32.mrf.mxu0  ;;  %v9076_v48 = vpop.f32.mrf.mxu1  ;;  %v14223_v9 = vadd.f32 %v7433_v11, %v16167_v62 }
 0x65b   : > { %v14217_v52 = vadd.f32 %v7428_v12, %v16166_v23  ;;  %v7436_v25 = vadd.f32 %v9073_v53, %v7146_v14  ;;  %v7658_v63 = vadd.f32 %v7657_v28, %v14211_v13  ;;  %v7797_v24 = vadd.f32 %v7796_v38, %v7734_v36  ;;  %v16168_v23 = vld [vmem:[#allocation23_spill] sm:$0xff]  ;;  %v16169_v14 = vld [vmem:[#allocation106_spill] sm:$0xff] }
 0x65c   : > { %v7148_v8 = vpop.f32.mrf.mxu0  ;;  %v7440_v61 = vpop.f32.mrf.mxu1  ;;  %v7737_v36 = vmul.f32 %v14223_v9, %v14223_v9 }
 0x65d   : > { %v7736_v0 = vmul.f32 %v14217_v52, %v14217_v52  ;;  %v7798_v33 = vadd.f32 %v7797_v24, %v7735_v4  ;;  %v7659_v7 = vadd.f32 %v7658_v63, %v14217_v52  ;;  %v14229_v3 = vadd.f32 %v7436_v25, %v16168_v23 }
 0x65e   : > { %v7151_v53 = vpop.f32.mrf.mxu0  ;;  %v9077_v10 = vpop.f32.mrf.mxu1 }
 0x65f   : > { %v7441_v12 = vadd.f32 %v7440_v61, %v7151_v53  ;;  %v7799_v38 = vadd.f32 %v7798_v33, %v7736_v0  ;;  %v7660_v11 = vadd.f32 %v7659_v7, %v14223_v9  ;;  %v7738_v63 = vmul.f32 %v14229_v3, %v14229_v3 }
 0x660   : > { %v7153_v28 = vpop.f32.mrf.mxu0  ;;  %v7443_v24 = vpop.f32.mrf.mxu1 }
 0x661   : > { %v14235_v62 = vadd.f32 %v7441_v12, %v16169_v14  ;;  %v7661_v4 = vadd.f32 %v7660_v11, %v14229_v3  ;;  %v7800_v25 = vadd.f32 %v7799_v38, %v7737_v36 }
 0x662   : > { %v7154_v8 = vpop.f32.mrf.mxu0  ;;  %v14240_v0 = vpop.f32.mrf.mxu1 }
 0x663   : > { %16170 = vst [vmem:[#allocation116_spill] sm:$0xff] %v14235_v62  ;;  %v7662_v23 = vrot.slane %v7661_v4, 4  ;;  %v7801_v61 = vadd.f32 %v7800_v25, %v7738_v63  ;;  %v7444_v38 = vadd.f32 %v7443_v24, %v7154_v8 }
 0x664   : > { %v7156_v53 = vpop.f32.mrf.mxu0  ;;  %v7456_v11 = vpop.f32.mrf.mxu1 }
 0x665   : > { %v7663_v45 = vadd.f32 %v7662_v23, %v7661_v4  ;;  %v7802_v43 = vrot.slane %v7801_v61, 4 }
 0x666   : > { %v7159_v33 = vpop.f32.mrf.mxu0  ;;  %v14242_v63 = vpop.f32.mrf.mxu1 }
 0x667   : > { %v7664_v7 = vrot.slane %v7663_v45, 2  ;;  %v7803_v28 = vadd.f32 %v7802_v43, %v7801_v61  ;;  %v14247_v43 = vadd.f32 %v7444_v38, %v16171_v57  ;;  %v16173_v57 = vld [vmem:[#allocation43_spill] sm:$0xff] }
 0x668   : > { %v7161_v12 = vpop.f32.mrf.mxu0 }
 0x669   : > { %v7665_v14 = vadd.f32 %v7664_v7, %v7663_v45  ;;  %v7804_v22 = vrot.slane %v7803_v28, 2  ;;  %16172 = vst [vmem:[#allocation112_spill] sm:$0xff] %v14247_v43  ;;  %v7449_v45 = vadd.f32 %v9076_v48, %v7159_v33 }
 0x66a   : > { %v7162_v18 = vpop.f32.mrf.mxu0 }
 0x66b   : > { %v7666_v26 = vrot.slane %v7665_v14, 1  ;;  %v7805_v20 = vadd.f32 %v7804_v22, %v7803_v28  ;;  %v7452_v48 = vadd.f32 %v9077_v10, %v7162_v18  ;;  %v16177_v22 = vld [vmem:[#allocation72_spill] sm:$0xff] }
 0x66c   : > { %v7164_v36 = vpop.f32.mrf.mxu0 }
 0x66d   : > { %v7667_v27 = vadd.f32 %v7666_v26, %v7665_v14  ;;  %v7806_v46 = vrot.slane %v7805_v20, 1  ;;  %v7459_v26 = vpop.f32.mrf.mxu1 }
 0x66e   : > { %v7167_v4 = vpop.f32.mrf.mxu0 }
 0x66f   : > { %v14244_v25 = vmul.f32 0.00390625, %v7667_v27  ;;  %v7807_v23 = vadd.f32 %v7806_v46, %v7805_v20  ;;  %v7740_v46 = vmul.f32 %v14247_v43, %v14247_v43  ;;  %v14258_v20 = vadd.f32 %v7449_v45, %v16173_v57  ;;  %v14266_v38 = vpop.f32.mrf.mxu1 }
 0x670   : > { %v7169_v53 = vpop.f32.mrf.mxu0  ;;  %v7457_v45 = vadd.f32 %v7456_v11, %v7167_v4 }
 0x671   : > { %v7845_v61 = vmul.f32 0.00390625, %v7807_v23  ;;  %v7847_v7 = vmul.f32 %v14244_v25, %v14244_v25  ;;  %16174 = vst [vmem:[#allocation90_spill] sm:$0xff] %v14258_v20 }
 0x672   : > { %v7170_v24 = vpop.f32.mrf.mxu0  ;;  %v14315_v2 = vadd.f32 %v7457_v45, %v16177_v22  ;;  %v7853_v22 = vsub.f32 %v14023_v37, %v14244_v25  ;;  %v7859_v37 = vsub.f32 %v14077_v16, %v14244_v25 }
 0x673   : > { %v7849_v8 = vsub.f32 %v7845_v61, %v7847_v7  ;;  %v7741_v61 = vmul.f32 %v14258_v20, %v14258_v20  ;;  %v7668_v7 = vadd.f32 %v14247_v43, %v14235_v62 }
 0x674   : > { %v7172_v28 = vpop.f32.mrf.mxu0 }
 0x675   : > { %v7915_v33 = vadd.f32 1e-05, %v7849_v8  ;;  %v7472_v8 = vpop.f32.mrf.mxu1  ;;  %v7669_v10 = vadd.f32 %v7668_v7, %v14258_v20 }
 0x676   : > { %v7175_v23 = vpop.f32.mrf.mxu0 }
 0x677   : > { %9328 = vrsqrt.f32 %v7915_v33  ;;  %v7739_v33 = vmul.f32 %v14235_v62, %v14235_v62  ;;  %v14309_v14 = vpop.f32.mrf.mxu1  ;;  %v16182_v62 = vsub.f32 %v14106_v15, %v14244_v25  ;;  %v16186_v15 = vsub.f32 %v14135_v5, %v14244_v25 }
 0x678   : > { %v7177_v28 = vpop.f32.mrf.mxu0  ;;  %v16190_v5 = vsub.f32 %v14162_v49, %v14244_v25  ;;  %v16194_v49 = vsub.f32 %v14187_v32, %v14244_v25  ;;  %v16198_v32 = vsub.f32 %v14211_v13, %v14244_v25 }
 0x679   : > { %v16175_v28 = vld [vmem:[#allocation104_spill] sm:$0xff]  ;;  %v7808_v57 = vadd.f32 %v7740_v46, %v7739_v33  ;;  %v7465_v46 = vadd.f32 %v14240_v0, %v7175_v23  ;;  %v14333_v45 = vpop.f32.mrf.mxu1  ;;  %v7856_v0 = vsub.f32 %v14061_v50, %v14244_v25 }
 0x67a   : > { %v7178_v18 = vpop.f32.mrf.mxu0  ;;  %v14307_v36 = vadd.f32 %v7452_v48, %v16175_v28  ;;  %v7460_v48 = vadd.f32 %v7459_v26, %v7170_v24  ;;  %v7855_v26 = vsub.f32 %v14045_v58, %v14244_v25  ;;  %v7862_v24 = vsub.f32 %v14096_v51, %v14244_v25 }
 0x67b   : > { %v14312_v27 = vadd.f32 %v7808_v57, %v7741_v61  ;;  %v7852_v61 = vsub.f32 %v14026_v31, %v14244_v25  ;;  %v7858_v31 = vsub.f32 %v14064_v44, %v14244_v25  ;;  %v14353_v58 = vmul.f32 %v14315_v2, %v14315_v2  ;;  %v16179_v44 = vld [vmem:[#allocation26_spill] sm:$0xff]  ;;  %v14369_v20 = vpop.f32.mrf.mxu1 }
 0x67c   : > { %v7180_v53 = vpop.f32.mrf.mxu0  ;;  %16176 = vst [vmem:[#allocation56_spill] sm:$0xff] %v14307_v36  ;;  %v14318_v11 = vadd.f32 %v7669_v10, %v14307_v36  ;;  %v14322_v4 = vmul.f32 %v14307_v36, %v14307_v36  ;;  %v14359_v57 = vadd.f32 %v7465_v46, %v16179_v44  ;;  %v14362_v16 = vadd.f32 %v14242_v63, %v7178_v18  ;;  %v9332_v63 = vld [vmem:[%s9709_s6 + $0xf8] sm:$0xff] }
 0x67d   : > { %v7851_v53 = vsub.f32 %v14016_v47, %v14244_v25  ;;  %v7857_v47 = vsub.f32 %v14053_v30, %v14244_v25  ;;  %v16178_v30 = vld [vmem:[#allocation100_spill] sm:$0xff]  ;;  %v16180_v51 = vsub.f32 %v14229_v3, %v14244_v25  ;;  %v16181_v3 = vsub.f32 %v14093_v35, %v14244_v25 }
 0x67e   : > { %v7183_v12 = vpop.f32.mrf.mxu0  ;;  %v14356_v7 = vadd.f32 %v7460_v48, %v16178_v30  ;;  %v16184_v35 = vsub.f32 %v14118_v60, %v14244_v25  ;;  %v16188_v60 = vsub.f32 %v14143_v55, %v14244_v25  ;;  %v16192_v55 = vsub.f32 %v14172_v29, %v14244_v25 }
 0x67f   : > { %v16196_v29 = vsub.f32 %v14193_v39, %v14244_v25  ;;  %v16200_v39 = vsub.f32 %v14223_v9, %v14244_v25 }
 0x680   : > { %v7185_v19 = vpop.f32.mrf.mxu0 }
 0x681   : > { %v7854_v19 = vsub.f32 %v14029_v17, %v14244_v25  ;;  %v7861_v17 = vsub.f32 %v14085_v1, %v14244_v25  ;;  %v14364_v1 = vadd.f32 %v7472_v8, %v7183_v12 }
 0x682   : > { %v14335_v10 = vpop.f32.mrf.mxu0 }
 0x684   : > { %v7188_v50 = vpop.f32.mrf.mxu0  ;;  %v9329_v23 = vpop.eup %9328 }
 0x685   : > { %v7950_v33 = vmul.f32 %v9329_v23, %v16180_v51  ;;  %v7919_v28 = vmul.f32 %v9329_v23, %v7851_v53  ;;  %v7920_v36 = vmul.f32 %v9329_v23, %v7852_v61  ;;  %v7921_v50 = vmul.f32 %v9329_v23, %v7853_v22 }
 0x686   : > { %v14371_v48 = vpop.f32.mrf.mxu0  ;;  %v7922_v30 = vmul.f32 %v9329_v23, %v7854_v19  ;;  %v7923_v46 = vmul.f32 %v9329_v23, %v7855_v26  ;;  %v7924_v44 = vmul.f32 %v9329_v23, %v7856_v0  ;;  %v7925_v43 = vmul.f32 %v9329_v23, %v7857_v47 }
 0x687   : > { %v8014_v18 = vadd.f32 %v9332_v63, %v7950_v33  ;;  %v7926_v12 = vmul.f32 %v9329_v23, %v7858_v31  ;;  %v7927_v8 = vmul.f32 %v9329_v23, %v7859_v37  ;;  %v7928_v51 = vmul.f32 %v9329_v23, %v16181_v3 }
 0x688   : > { %v7193_v53 = vpop.f32.mrf.mxu0  ;;  %v7929_v61 = vmul.f32 %v9329_v23, %v7861_v17  ;;  %v7930_v22 = vmul.f32 %v9329_v23, %v7862_v24  ;;  %v7931_v21 = vmul.f32 %v9329_v23, %v16182_v62  ;;  %v16183_v19 = vsub.f32 %v14121_v41, %v14244_v25  ;;  %v14400_v17 = vpop.f32.mrf.mxu1 }
 0x689   : > { %8078 = vst [vmem:[%s14385_s18 + $0xf8] sm:$0xff] %v8014_v18  ;;  %v7933_v0 = vmul.f32 %v9329_v23, %v16184_v35  ;;  %v16185_v47 = vsub.f32 %v14125_v56, %v14244_v25  ;;  %v7935_v62 = vmul.f32 %v9329_v23, %v16186_v15  ;;  %v16187_v41 = vsub.f32 %v14146_v54, %v14244_v25 }
 0x68a   : > { %v7932_v26 = vmul.f32 %v9329_v23, %v16183_v19  ;;  %v14402_v24 = vpop.f32.mrf.mxu0  ;;  %v7937_v33 = vmul.f32 %v9329_v23, %v16188_v60  ;;  %v16189_v56 = vsub.f32 %v14155_v42, %v14244_v25  ;;  %v14415_v54 = vmul.f32 %v9329_v23, %v16190_v5 }
 0x68b   : > { %v7934_v31 = vmul.f32 %v9329_v23, %v16185_v47  ;;  %v7936_v37 = vmul.f32 %v9329_v23, %v16187_v41  ;;  %v16191_v18 = vsub.f32 %v14169_v34, %v14244_v25  ;;  %v14425_v53 = vmul.f32 %v9329_v23, %v16192_v55 }
 0x68c   : > { %v14410_v63 = vmul.f32 %v9329_v23, %v16189_v56  ;;  %v16193_v42 = vsub.f32 %v14180_v40, %v14244_v25  ;;  %v14435_v35 = vmul.f32 %v9329_v23, %v16194_v49  ;;  %v16195_v34 = vsub.f32 %v14196_v6, %v14244_v25  ;;  %v7196_v15 = vpop.f32.mrf.mxu0  ;;  %v9335_v49 = vld [vmem:[%s9709_s6 + $0x10] sm:$0xff] }
 0x68d   : > { %v14420_v3 = vmul.f32 %v9329_v23, %v16191_v18  ;;  %v14445_v41 = vmul.f32 %v9329_v23, %v16196_v29  ;;  %v16197_v40 = vsub.f32 %v14204_v59, %v14244_v25  ;;  %v14455_v6 = vmul.f32 %v9329_v23, %v16198_v32  ;;  %v9333_v59 = vld [vmem:[%s9709_s6] sm:$0xff]  ;;  %v14470_v15 = vpop.f32.mrf.mxu1  ;;  %v9336_v29 = vld [vmem:[%s9709_s6 + $0x18] sm:$0xff]  ;;  %v9339_v32 = vld [vmem:[%s9709_s6 + $0x30] sm:$0xff] }
 0x68e   : > { %v14430_v19 = vmul.f32 %v9329_v23, %v16193_v42  ;;  %v14440_v47 = vmul.f32 %v9329_v23, %v16195_v34  ;;  %v16199_v56 = vsub.f32 %v14217_v52, %v14244_v25  ;;  %v14465_v18 = vmul.f32 %v9329_v23, %v16200_v39  ;;  %v9334_v42 = vld [vmem:[%s9709_s6 + $0x8] sm:$0xff]  ;;  %v14472_v52 = vpop.f32.mrf.mxu0  ;;  %v9337_v25 = vld [vmem:[%s9709_s6 + $0x20] sm:$0xff] }
 0x68f   : > { %v14450_v60 = vmul.f32 %v9329_v23, %v16197_v40  ;;  %v7983_v55 = vadd.f32 %v9333_v59, %v7919_v28  ;;  %v7984_v13 = vadd.f32 %v9334_v42, %v7920_v36  ;;  %v7985_v34 = vadd.f32 %v9335_v49, %v7921_v50  ;;  %v9338_v40 = vld [vmem:[%s9709_s6 + $0x28] sm:$0xff]  ;;  %v9341_v39 = vld [vmem:[%s9709_s6 + $0x40] sm:$0xff] }
 0x690   : > { %v14460_v5 = vmul.f32 %v9329_v23, %v16199_v56  ;;  %v7986_v9 = vadd.f32 %v9336_v29, %v7922_v30  ;;  %v7987_v23 = vadd.f32 %v9337_v25, %v7923_v46  ;;  %v7988_v28 = vadd.f32 %v9338_v40, %v7924_v44  ;;  %v9340_v56 = vld [vmem:[%s9709_s6 + $0x38] sm:$0xff]  ;;  %v9342_v42 = vld [vmem:[%s9709_s6 + $0x48] sm:$0xff]  ;;  %v9343_v30 = vld [vmem:[%s9709_s6 + $0x50] sm:$0xff] }
 0x691   : > { %v7989_v36 = vadd.f32 %v9339_v32, %v7925_v43  ;;  %v7990_v50 = vadd.f32 %v9340_v56, %v7926_v12  ;;  %v7991_v59 = vadd.f32 %v9341_v39, %v7927_v8  ;;  %v7992_v49 = vadd.f32 %v9342_v42, %v7928_v51  ;;  %8047 = vst [vmem:[%s14385_s18] sm:$0xff] %v7983_v55  ;;  %v7201_v43 = vpop.f32.mrf.mxu0  ;;  %v9344_v46 = vld [vmem:[%s9709_s6 + $0x58] sm:$0xff]  ;;  %v9345_v12 = vld [vmem:[%s9709_s6 + $0x60] sm:$0xff]  ;;  %v9346_v25 = vld [vmem:[%s9709_s6 + $0x68] sm:$0xff] }
 0x692   : > { %v7993_v29 = vadd.f32 %v9343_v30, %v7929_v61  ;;  %8048 = vst [vmem:[%s14385_s18 + $0x8] sm:$0xff] %v7984_v13  ;;  %8049 = vst [vmem:[%s14385_s18 + $0x10] sm:$0xff] %v7985_v34  ;;  %v7994_v44 = vadd.f32 %v9344_v46, %v7930_v22  ;;  %v7995_v8 = vadd.f32 %v9345_v12, %v7931_v21  ;;  %v9347_v40 = vld [vmem:[%s9709_s6 + $0x70] sm:$0xff]  ;;  %v9348_v55 = vld [vmem:[%s9709_s6 + $0x78] sm:$0xff] }
 0x693   : > { %v7996_v51 = vadd.f32 %v9346_v25, %v7932_v26  ;;  %v7997_v61 = vadd.f32 %v9347_v40, %v7933_v0  ;;  %8050 = vst [vmem:[%s14385_s18 + $0x18] sm:$0xff] %v7986_v9  ;;  %8051 = vst [vmem:[%s14385_s18 + $0x20] sm:$0xff] %v7987_v23  ;;  %v7998_v13 = vadd.f32 %v9348_v55, %v7934_v31  ;;  %v9349_v22 = vld [vmem:[%s9709_s6 + $0x80] sm:$0xff]  ;;  %v9350_v21 = vld [vmem:[%s9709_s6 + $0x88] sm:$0xff]  ;;  %v14501_v0 = vpop.f32.mrf.mxu1  ;;  %v14503_v31 = vpop.f32.mrf.mxu0 }
 0x694   : > { %8052 = vst [vmem:[%s14385_s18 + $0x28] sm:$0xff] %v7988_v28  ;;  %8053 = vst [vmem:[%s14385_s18 + $0x30] sm:$0xff] %v7989_v36  ;;  %v7999_v34 = vadd.f32 %v9349_v22, %v7935_v62  ;;  %v8000_v32 = vadd.f32 %v9350_v21, %v7936_v37  ;;  %v9351_v26 = vld [vmem:[%s9709_s6 + $0x90] sm:$0xff]  ;;  %v9352_v62 = vld [vmem:[%s9709_s6 + $0x98] sm:$0xff] }
 0x695   : > { %v8001_v56 = vadd.f32 %v9351_v26, %v7937_v33  ;;  %8054 = vst [vmem:[%s14385_s18 + $0x38] sm:$0xff] %v7990_v50  ;;  %8055 = vst [vmem:[%s14385_s18 + $0x40] sm:$0xff] %v7991_v59  ;;  %v8002_v37 = vadd.f32 %v9352_v62, %v14410_v63  ;;  %v9353_v9 = vld [vmem:[%s9709_s6 + $0xa0] sm:$0xff]  ;;  %v9354_v23 = vld [vmem:[%s9709_s6 + $0xa8] sm:$0xff]  ;;  %v14553_v12 = vpop.f32.mrf.mxu1 }
 0x696   : > { %8056 = vst [vmem:[%s14385_s18 + $0x48] sm:$0xff] %v7992_v49  ;;  %8057 = vst [vmem:[%s14385_s18 + $0x50] sm:$0xff] %v7993_v29  ;;  %v8003_v33 = vadd.f32 %v9353_v9, %v14415_v54  ;;  %v8004_v28 = vadd.f32 %v9354_v23, %v14420_v3  ;;  %v9355_v36 = vld [vmem:[%s9709_s6 + $0xb0] sm:$0xff]  ;;  %v9356_v63 = vld [vmem:[%s9709_s6 + $0xb8] sm:$0xff] }
 0x697   : > { %v8005_v50 = vadd.f32 %v9355_v36, %v14425_v53  ;;  %8058 = vst [vmem:[%s14385_s18 + $0x58] sm:$0xff] %v7994_v44  ;;  %8059 = vst [vmem:[%s14385_s18 + $0x60] sm:$0xff] %v7995_v8  ;;  %v8006_v39 = vadd.f32 %v9356_v63, %v14430_v19  ;;  %v9357_v54 = vld [vmem:[%s9709_s6 + $0xc0] sm:$0xff]  ;;  %v9358_v3 = vld [vmem:[%s9709_s6 + $0xc8] sm:$0xff]  ;;  %v7204_v19 = vpop.f32.mrf.mxu0  ;;  %v7476_v8 = vadd.f32 %v14333_v45, %v14335_v10 }
 0x698   : > { %8060 = vst [vmem:[%s14385_s18 + $0x68] sm:$0xff] %v7996_v51  ;;  %8061 = vst [vmem:[%s14385_s18 + $0x70] sm:$0xff] %v7997_v61  ;;  %v8007_v59 = vadd.f32 %v9357_v54, %v14435_v35  ;;  %v8008_v42 = vadd.f32 %v9358_v3, %v14440_v47  ;;  %v9359_v53 = vld [vmem:[%s9709_s6 + $0xd0] sm:$0xff]  ;;  %v9360_v35 = vld [vmem:[%s9709_s6 + $0xd8] sm:$0xff]  ;;  %v7745_v51 = vmul.f32 %v14359_v57, %v14359_v57 }
 0x699   : > { %v8009_v49 = vadd.f32 %v9359_v53, %v14445_v41  ;;  %8062 = vst [vmem:[%s14385_s18 + $0x78] sm:$0xff] %v7998_v13  ;;  %8063 = vst [vmem:[%s14385_s18 + $0x80] sm:$0xff] %v7999_v34  ;;  %v8010_v30 = vadd.f32 %v9360_v35, %v14450_v60  ;;  %v9361_v47 = vld [vmem:[%s9709_s6 + $0xe0] sm:$0xff]  ;;  %v9362_v43 = vld [vmem:[%s9709_s6 + $0xe8] sm:$0xff]  ;;  %v7810_v60 = vadd.f32 %v14312_v27, %v14322_v4  ;;  %v7207_v25 = vpop.f32.mrf.mxu0 }
 0x69a   : > { %8064 = vst [vmem:[%s14385_s18 + $0x88] sm:$0xff] %v8000_v32  ;;  %8065 = vst [vmem:[%s14385_s18 + $0x90] sm:$0xff] %v8001_v56  ;;  %v8011_v29 = vadd.f32 %v9361_v47, %v14455_v6  ;;  %v8012_v41 = vadd.f32 %v9362_v43, %v14460_v5  ;;  %v9363_v46 = vld [vmem:[%s9709_s6 + $0xf0] sm:$0xff]  ;;  %v7744_v6 = vmul.f32 %v14356_v7, %v14356_v7  ;;  %v16203_v22 = vld [vmem:[#allocation65_spill] sm:$0xff] }
 0x69b   : > { %v8013_v44 = vadd.f32 %v9363_v46, %v14465_v18  ;;  %8066 = vst [vmem:[%s14385_s18 + $0x98] sm:$0xff] %v8002_v37  ;;  %8067 = vst [vmem:[%s14385_s18 + $0xa0] sm:$0xff] %v8003_v33  ;;  %v16201_v5 = vld [vmem:[#allocation18_spill] sm:$0xff]  ;;  %v7671_v27 = vadd.f32 %v14318_v11, %v14315_v2  ;;  %v7811_v4 = vadd.f32 %v7810_v60, %v14353_v58  ;;  %v7209_v10 = vpop.f32.mrf.mxu0  ;;  %v7504_v11 = vpop.f32.mrf.mxu1 }
 0x69c   : > { %8068 = vst [vmem:[%s14385_s18 + $0xa8] sm:$0xff] %v8004_v28  ;;  %8069 = vst [vmem:[%s14385_s18 + $0xb0] sm:$0xff] %v8005_v50  ;;  %v14551_v18 = vadd.f32 %v14362_v16, %v16201_v5  ;;  %v16202_v16 = vld [vmem:[#allocation46_spill] sm:$0xff]  ;;  %v7481_v45 = vadd.f32 %v14266_v38, %v14371_v48  ;;  %v14576_v58 = vadd.f32 %v7476_v8, %v16203_v22 }
 0x69d   : > { %8070 = vst [vmem:[%s14385_s18 + $0xb8] sm:$0xff] %v8006_v39  ;;  %8071 = vst [vmem:[%s14385_s18 + $0xc0] sm:$0xff] %v8007_v59  ;;  %v14568_v40 = vadd.f32 %v14364_v1, %v16202_v16  ;;  %v7672_v61 = vadd.f32 %v7671_v27, %v14356_v7  ;;  %v7812_v55 = vadd.f32 %v7811_v4, %v7744_v6  ;;  %v7210_v21 = vpop.f32.mrf.mxu0  ;;  %v16204_v48 = vld [vmem:[#allocation22_spill] sm:$0xff]  ;;  %v9093_v33 = vpop.f32.mrf.mxu1 }
 0x69e   : > { %8072 = vst [vmem:[%s14385_s18 + $0xc8] sm:$0xff] %v8008_v42  ;;  %8073 = vst [vmem:[%s14385_s18 + $0xd0] sm:$0xff] %v8009_v49  ;;  %v7746_v13 = vmul.f32 %v14551_v18, %v14551_v18  ;;  %v7484_v34 = vadd.f32 %v14309_v14, %v14402_v24  ;;  %v14584_v26 = vadd.f32 %v7481_v45, %v16204_v48  ;;  %v16205_v24 = vld [vmem:[#allocation109_spill] sm:$0xff] }
 0x69f   : > { %8074 = vst [vmem:[%s14385_s18 + $0xd8] sm:$0xff] %v8010_v30  ;;  %8075 = vst [vmem:[%s14385_s18 + $0xe0] sm:$0xff] %v8011_v29  ;;  %v7673_v1 = vadd.f32 %v7672_v61, %v14359_v57  ;;  %v7813_v32 = vadd.f32 %v7812_v55, %v7745_v51  ;;  %v7747_v38 = vmul.f32 %v14568_v40, %v14568_v40  ;;  %v7212_v62 = vpop.f32.mrf.mxu0  ;;  %v7507_v42 = vpop.f32.mrf.mxu1  ;;  %v16208_v29 = vld [vmem:[#allocation123_spill] sm:$0xff]  ;;  %v16210_v61 = vld [vmem:[#allocation30_spill] sm:$0xff] }
 0x6a0   : > { %8076 = vst [vmem:[%s14385_s18 + $0xe8] sm:$0xff] %v8012_v41  ;;  %8077 = vst [vmem:[%s14385_s18 + $0xf0] sm:$0xff] %v8013_v44  ;;  %v7489_v56 = vadd.f32 %v14400_v17, %v14472_v52  ;;  %v7748_v14 = vmul.f32 %v14576_v58, %v14576_v58  ;;  %v14592_v23 = vadd.f32 %v7484_v34, %v16205_v24  ;;  %v16206_v52 = vld [vmem:[#allocation108_spill] sm:$0xff] }
 0x6a1   : > { %v7674_v37 = vadd.f32 %v7673_v1, %v14551_v18  ;;  %v7814_v9 = vadd.f32 %v7813_v32, %v7746_v13  ;;  %v7492_v28 = vadd.f32 %v14501_v0, %v14503_v31  ;;  %v7215_v36 = vpop.f32.mrf.mxu0  ;;  %v7749_v17 = vmul.f32 %v14584_v26, %v14584_v26  ;;  %v16207_v31 = vld [vmem:[#allocation119_spill] sm:$0xff]  ;;  %v9096_v60 = vpop.f32.mrf.mxu1 }
 0x6a2   : > { %v14600_v39 = vadd.f32 %v7489_v56, %v16206_v52  ;;  %v7497_v54 = vadd.f32 %v14369_v20, %v7207_v25  ;;  %v7750_v0 = vmul.f32 %v14592_v23, %v14592_v23  ;;  %v7500_v19 = vadd.f32 %v14470_v15, %v7210_v21  ;;  %v16209_v15 = vld [vmem:[#allocation35_spill] sm:$0xff] }
 0x6a3   : > { %v7675_v50 = vadd.f32 %v7674_v37, %v14568_v40  ;;  %v7815_v63 = vadd.f32 %v7814_v9, %v7747_v38  ;;  %v7217_v59 = vpop.f32.mrf.mxu0  ;;  %v14607_v49 = vadd.f32 %v7492_v28, %v16207_v31  ;;  %v7505_v44 = vadd.f32 %v7504_v11, %v7215_v36  ;;  %v7520_v11 = vpop.f32.mrf.mxu1  ;;  %v16211_v32 = vld [vmem:[#allocation39_spill] sm:$0xff] }
 0x6a4   : > { %v7751_v20 = vmul.f32 %v14600_v39, %v14600_v39  ;;  %v14614_v43 = vadd.f32 %v7497_v54, %v16208_v29  ;;  %v14620_v8 = vadd.f32 %v7500_v19, %v16209_v15 }
 0x6a5   : > { %v7676_v3 = vadd.f32 %v7675_v50, %v14576_v58  ;;  %v7816_v53 = vadd.f32 %v7815_v63, %v7748_v14  ;;  %v7218_v35 = vpop.f32.mrf.mxu0  ;;  %v7752_v5 = vmul.f32 %v14607_v49, %v14607_v49  ;;  %v14627_v55 = vadd.f32 %v7505_v44, %v16210_v61  ;;  %v9097_v24 = vpop.f32.mrf.mxu1 }
 0x6a6   : > { %v7508_v4 = vadd.f32 %v7507_v42, %v7218_v35  ;;  %v7753_v16 = vmul.f32 %v14614_v43, %v14614_v43  ;;  %v7754_v34 = vmul.f32 %v14620_v8, %v14620_v8 }
 0x6a7   : > { %v7677_v30 = vadd.f32 %v7676_v3, %v14584_v26  ;;  %v7817_v47 = vadd.f32 %v7816_v53, %v7749_v17  ;;  %v7220_v41 = vpop.f32.mrf.mxu0  ;;  %v7755_v9 = vmul.f32 %v14627_v55, %v14627_v55  ;;  %v16213_v17 = vld [vmem:[#allocation125_spill] sm:$0xff]  ;;  %v16214_v53 = vld [vmem:[#allocation32_spill] sm:$0xff]  ;;  %v7523_v31 = vpop.f32.mrf.mxu1 }
 0x6a8   : > { %v14634_v38 = vadd.f32 %v7508_v4, %v16211_v32 }
 0x6a9   : > { %v7678_v46 = vadd.f32 %v7677_v30, %v14592_v23  ;;  %v7818_v6 = vadd.f32 %v7817_v47, %v7750_v0  ;;  %v7223_v25 = vpop.f32.mrf.mxu0  ;;  %v9100_v15 = vpop.f32.mrf.mxu1 }
 0x6aa   : > { %v7513_v13 = vadd.f32 %v14553_v12, %v7223_v25  ;;  %v16212_v12 = vld [vmem:[#allocation74_spill] sm:$0xff]  ;;  %v7756_v63 = vmul.f32 %v14634_v38, %v14634_v38 }
 0x6ab   : > { %v7679_v27 = vadd.f32 %v7678_v46, %v14600_v39  ;;  %v7819_v51 = vadd.f32 %v7818_v6, %v7751_v20  ;;  %v7225_v45 = vpop.f32.mrf.mxu0  ;;  %v16215_v6 = vld [vmem:[#allocation15_spill] sm:$0xff] }
 0x6ac   : > { %v14640_v14 = vadd.f32 %v7513_v13, %v16212_v12  ;;  %v16216_v13 = vld [vmem:[#allocation28_spill] sm:$0xff] }
 0x6ad   : > { %v7680_v10 = vadd.f32 %v7679_v27, %v14607_v49  ;;  %v7820_v22 = vadd.f32 %v7819_v51, %v7752_v5  ;;  %v7226_v21 = vpop.f32.mrf.mxu0 }
 0x6ae   : > { %v7516_v48 = vadd.f32 %v9093_v33, %v7226_v21  ;;  %v7757_v42 = vmul.f32 %v14640_v14, %v14640_v14 }
 0x6af   : > { %v7681_v1 = vadd.f32 %v7680_v10, %v14614_v43  ;;  %v7821_v56 = vadd.f32 %v7820_v22, %v7753_v16  ;;  %v7228_v62 = vpop.f32.mrf.mxu0  ;;  %v7536_v22 = vpop.f32.mrf.mxu1 }
 0x6b0   : > { %v14646_v33 = vadd.f32 %v7516_v48, %v16213_v17 }
 0x6b1   : > { %v7682_v37 = vadd.f32 %v7681_v1, %v14620_v8  ;;  %v7822_v28 = vadd.f32 %v7821_v56, %v7754_v34  ;;  %v7231_v36 = vpop.f32.mrf.mxu0 }
 0x6b2   : > { %v7521_v52 = vadd.f32 %v7520_v11, %v7231_v36  ;;  %v7758_v47 = vmul.f32 %v14646_v33, %v14646_v33 }
 0x6b3   : > { %v7683_v50 = vadd.f32 %v7682_v37, %v14627_v55  ;;  %v7233_v54 = vpop.f32.mrf.mxu0  ;;  %v7823_v59 = vadd.f32 %v7822_v28, %v7755_v9  ;;  %v16217_v37 = vld [vmem:[#allocation79_spill] sm:$0xff]  ;;  %v9101_v9 = vpop.f32.mrf.mxu1 }
 0x6b4   : > { %v14652_v0 = vadd.f32 %v7521_v52, %v16214_v53  ;;  %v16218_v52 = vld [vmem:[#allocation13_spill] sm:$0xff] }
 0x6b5   : > { %v7684_v3 = vadd.f32 %v7683_v50, %v14634_v38  ;;  %v7234_v19 = vpop.f32.mrf.mxu0  ;;  %v7824_v35 = vadd.f32 %v7823_v59, %v7756_v63  ;;  %v7539_v59 = vpop.f32.mrf.mxu1 }
 0x6b6   : > { %v7524_v20 = vadd.f32 %v7523_v31, %v7234_v19  ;;  %v7759_v44 = vmul.f32 %v14652_v0, %v14652_v0 }
 0x6b7   : > { %v7685_v30 = vadd.f32 %v7684_v3, %v14640_v14  ;;  %v7236_v29 = vpop.f32.mrf.mxu0  ;;  %v7825_v41 = vadd.f32 %v7824_v35, %v7757_v42  ;;  %v16219_v35 = vld [vmem:[#allocation80_spill] sm:$0xff] }
 0x6b8   : > { %v14661_v5 = vadd.f32 %v7524_v20, %v16215_v6 }
 0x6b9   : > { %v7686_v46 = vadd.f32 %v7685_v30, %v14646_v33  ;;  %v7239_v25 = vpop.f32.mrf.mxu0  ;;  %v7826_v27 = vadd.f32 %v7825_v41, %v7758_v47  ;;  %v9104_v47 = vpop.f32.mrf.mxu1 }
 0x6ba   : > { %v7760_v51 = vmul.f32 %v14661_v5, %v14661_v5  ;;  %v7529_v16 = vadd.f32 %v9096_v60, %v7239_v25  ;;  %v16220_v25 = vld [vmem:[#allocation113_spill] sm:$0xff] }
 0x6bb   : > { %v7687_v4 = vadd.f32 %v7686_v46, %v14652_v0  ;;  %v7241_v45 = vpop.f32.mrf.mxu0  ;;  %v7827_v10 = vadd.f32 %v7826_v27, %v7759_v44 }
 0x6bc   : > { %v14668_v11 = vadd.f32 %v7529_v16, %v16216_v13 }
 0x6bd   : > { %v7688_v61 = vadd.f32 %v7687_v4, %v14661_v5  ;;  %v7242_v34 = vpop.f32.mrf.mxu0  ;;  %v7828_v21 = vadd.f32 %v7827_v10, %v7760_v51  ;;  %v7552_v4 = vpop.f32.mrf.mxu1 }
 0x6be   : > { %v7761_v32 = vmul.f32 %v14668_v11, %v14668_v11  ;;  %v7532_v48 = vadd.f32 %v9097_v24, %v7242_v34 }
 0x6bf   : > { %v7689_v1 = vadd.f32 %v7688_v61, %v14668_v11  ;;  %v7244_v56 = vpop.f32.mrf.mxu0 }
 0x6c0   : > { %v7829_v62 = vadd.f32 %v7828_v21, %v7761_v32  ;;  %v14674_v60 = vadd.f32 %v7532_v48, %v16217_v37  ;;  %v9105_v21 = vpop.f32.mrf.mxu1  ;;  %v16222_v37 = vld [vmem:[#allocation84_spill] sm:$0xff] }
 0x6c1   : > { %v7247_v12 = vpop.f32.mrf.mxu0 }
 0x6c2   : > { %v7690_v28 = vadd.f32 %v7689_v1, %v14674_v60  ;;  %v7762_v36 = vmul.f32 %v14674_v60, %v14674_v60  ;;  %v7537_v50 = vadd.f32 %v7536_v22, %v7247_v12  ;;  %v16221_v22 = vld [vmem:[#allocation33_spill] sm:$0xff] }
 0x6c3   : > { %v7249_v63 = vpop.f32.mrf.mxu0 }
 0x6c4   : > { %v7830_v17 = vadd.f32 %v7829_v62, %v7762_v36  ;;  %v14680_v54 = vadd.f32 %v7537_v50, %v16218_v52 }
 0x6c5   : > { %v7250_v24 = vpop.f32.mrf.mxu0 }
 0x6c6   : > { %v7691_v3 = vadd.f32 %v7690_v28, %v14680_v54  ;;  %v7763_v42 = vmul.f32 %v14680_v54, %v14680_v54  ;;  %v7540_v53 = vadd.f32 %v7539_v59, %v7250_v24  ;;  %v7555_v28 = vpop.f32.mrf.mxu1  ;;  %v16223_v59 = vld [vmem:[#allocation66_spill] sm:$0xff] }
 0x6c7   : > { %v7252_v31 = vpop.f32.mrf.mxu0 }
 0x6c8   : > { %v7831_v19 = vadd.f32 %v7830_v17, %v7763_v42  ;;  %v14686_v30 = vadd.f32 %v7540_v53, %v16219_v35 }
 0x6c9   : > { %v7255_v20 = vpop.f32.mrf.mxu0 }
 0x6ca   : > { %v7692_v29 = vadd.f32 %v7691_v3, %v14686_v30  ;;  %v7764_v41 = vmul.f32 %v14686_v30, %v14686_v30  ;;  %v7545_v46 = vadd.f32 %v9100_v15, %v7255_v20  ;;  %v16224_v20 = vld [vmem:[#allocation96_spill] sm:$0xff] }
 0x6cb   : > { %v7257_v44 = vpop.f32.mrf.mxu0 }
 0x6cc   : > { %v7832_v6 = vadd.f32 %v7831_v19, %v7764_v41  ;;  %v14692_v27 = vadd.f32 %v7545_v46, %v16220_v25 }
 0x6cd   : > { %v7258_v51 = vpop.f32.mrf.mxu0 }
 0x6ce   : > { %v7693_v16 = vadd.f32 %v7692_v29, %v14692_v27  ;;  %v7765_v45 = vmul.f32 %v14692_v27, %v14692_v27  ;;  %v7548_v10 = vadd.f32 %v9101_v9, %v7258_v51  ;;  %v16225_v51 = vld [vmem:[#allocation85_spill] sm:$0xff] }
 0x6cf   : > { %v7260_v61 = vpop.f32.mrf.mxu0 }
 0x6d0   : > { %v7833_v13 = vadd.f32 %v7832_v6, %v7765_v45  ;;  %v14698_v34 = vadd.f32 %v7548_v10, %v16221_v22 }
 0x6d1   : > { %v7263_v15 = vpop.f32.mrf.mxu0 }
 0x6d2   : > { %v7694_v1 = vadd.f32 %v7693_v16, %v14698_v34  ;;  %v7766_v32 = vmul.f32 %v14698_v34, %v14698_v34  ;;  %v7553_v48 = vadd.f32 %v7552_v4, %v7263_v15 }
 0x6d3   : > { %v7265_v56 = vpop.f32.mrf.mxu0 }
 0x6d4   : > { %v7834_v62 = vadd.f32 %v7833_v13, %v7766_v32  ;;  %v14704_v12 = vadd.f32 %v7553_v48, %v16222_v37 }
 0x6d5   : > { %v7266_v9 = vpop.f32.mrf.mxu0 }
 0x6d6   : > { %v7695_v36 = vadd.f32 %v7694_v1, %v14704_v12  ;;  %v7767_v50 = vmul.f32 %v14704_v12, %v14704_v12  ;;  %v7556_v63 = vadd.f32 %v7555_v28, %v7266_v9 }
 0x6d7   : > { %v7268_v17 = vpop.f32.mrf.mxu0 }
 0x6d8   : > { %v7835_v52 = vadd.f32 %v7834_v62, %v7767_v50  ;;  %v14710_v24 = vadd.f32 %v7556_v63, %v16223_v59 }
 0x6d9   : > { %v7271_v3 = vpop.f32.mrf.mxu0 }
 0x6da   : > { %v7696_v42 = vadd.f32 %v7695_v36, %v14710_v24  ;;  %v7768_v53 = vmul.f32 %v14710_v24, %v14710_v24  ;;  %v7561_v31 = vadd.f32 %v9104_v47, %v7271_v3 }
 0x6db   : > { %v7273_v19 = vpop.f32.mrf.mxu0 }
 0x6dc   : > { %v7836_v35 = vadd.f32 %v7835_v52, %v7768_v53  ;;  %v14716_v29 = vadd.f32 %v7561_v31, %v16224_v20 }
 0x6dd   : > { %v7274_v41 = vpop.f32.mrf.mxu0 }
 0x6de   : > { %v7697_v46 = vadd.f32 %v7696_v42, %v14716_v29  ;;  %v7769_v44 = vmul.f32 %v14716_v29, %v14716_v29  ;;  %v7564_v6 = vadd.f32 %v9105_v21, %v7274_v41 }
 0x6df   : > { %v7276_v25 = vpop.f32.mrf.mxu0 }
 0x6e0   : > { %v7837_v4 = vadd.f32 %v7836_v35, %v7769_v44  ;;  %v7630_v16 = vadd.f32 %v7564_v6, %v16225_v51 }
 0x6e2   : > { %v7698_v45 = vadd.f32 %v7697_v46, %v7630_v16  ;;  %v7770_v10 = vmul.f32 %v7630_v16, %v7630_v16 }
 0x6e4   : > { %v7699_v61 = vrot.slane %v7698_v45, 4  ;;  %v7838_v47 = vadd.f32 %v7837_v4, %v7770_v10 }
 0x6e6   : > { %v7700_v13 = vadd.f32 %v7699_v61, %v7698_v45  ;;  %v7839_v22 = vrot.slane %v7838_v47, 4 }
 0x6e8   : > { %v7701_v15 = vrot.slane %v7700_v13, 2  ;;  %v7840_v1 = vadd.f32 %v7839_v22, %v7838_v47  ;;  %v9364_v22 = vld [vmem:[%s9709_s6 + $0x1f8] sm:$0xff] }
 0x6ea   : > { %v7702_v32 = vadd.f32 %v7701_v15, %v7700_v13  ;;  %v7841_v48 = vrot.slane %v7840_v1, 2 }
 0x6ec   : > { %v7703_v56 = vrot.slane %v7702_v32, 1  ;;  %v7842_v62 = vadd.f32 %v7841_v48, %v7840_v1 }
 0x6ee   : > { %v7704_v37 = vadd.f32 %v7703_v56, %v7702_v32  ;;  %v7843_v28 = vrot.slane %v7842_v62, 1 }
 0x6f0   : > { %v14722_v9 = vmul.f32 0.00390625, %v7704_v37  ;;  %v7844_v21 = vadd.f32 %v7843_v28, %v7842_v62 }
 0x6f2   : > { %v7846_v36 = vmul.f32 0.00390625, %v7844_v21  ;;  %v7848_v50 = vmul.f32 %v14722_v9, %v14722_v9  ;;  %v7914_v63 = vsub.f32 %v7630_v16, %v14722_v9  ;;  %v7904_v59 = vsub.f32 %v14661_v5, %v14722_v9 }
 0x6f3   : > { %v7905_v3 = vsub.f32 %v14668_v11, %v14722_v9  ;;  %v7906_v42 = vsub.f32 %v14674_v60, %v14722_v9  ;;  %v7907_v53 = vsub.f32 %v14680_v54, %v14722_v9  ;;  %v7908_v31 = vsub.f32 %v14686_v30, %v14722_v9  ;;  %v16226_v54 = vld [vmem:[#allocation116_spill] sm:$0xff] }
 0x6f4   : > { %v7850_v17 = vsub.f32 %v7846_v36, %v7848_v50  ;;  %v7909_v19 = vsub.f32 %v14692_v27, %v14722_v9  ;;  %v7910_v35 = vsub.f32 %v14698_v34, %v14722_v9  ;;  %v7911_v5 = vsub.f32 %v14704_v12, %v14722_v9  ;;  %v16227_v30 = vld [vmem:[#allocation112_spill] sm:$0xff]  ;;  %v16228_v27 = vld [vmem:[#allocation90_spill] sm:$0xff] }
 0x6f5   : > { %v7912_v11 = vsub.f32 %v14710_v24, %v14722_v9  ;;  %v7913_v60 = vsub.f32 %v14716_v29, %v14722_v9  ;;  %v7883_v20 = vsub.f32 %v16226_v54, %v14722_v9  ;;  %v7884_v41 = vsub.f32 %v16227_v30, %v14722_v9  ;;  %v16229_v34 = vld [vmem:[#allocation56_spill] sm:$0xff] }
 0x6f6   : > { %v7916_v52 = vadd.f32 1e-05, %v7850_v17  ;;  %v7885_v46 = vsub.f32 %v16228_v27, %v14722_v9  ;;  %v7886_v44 = vsub.f32 %v16229_v34, %v14722_v9  ;;  %v7887_v12 = vsub.f32 %v14315_v2, %v14722_v9  ;;  %v9368_v34 = vld [vmem:[%s9709_s6 + $0x118] sm:$0xff] }
 0x6f7   : > { %v7888_v24 = vsub.f32 %v14356_v7, %v14722_v9  ;;  %v7889_v29 = vsub.f32 %v14359_v57, %v14722_v9  ;;  %v7890_v6 = vsub.f32 %v14551_v18, %v14722_v9  ;;  %v7891_v25 = vsub.f32 %v14568_v40, %v14722_v9 }
 0x6f8   : > { %9330 = vrsqrt.f32 %v7916_v52  ;;  %v7892_v4 = vsub.f32 %v14576_v58, %v14722_v9  ;;  %v7893_v51 = vsub.f32 %v14584_v26, %v14722_v9  ;;  %v7894_v2 = vsub.f32 %v14592_v23, %v14722_v9 }
 0x6f9   : > { %v7895_v7 = vsub.f32 %v14600_v39, %v14722_v9  ;;  %v7896_v57 = vsub.f32 %v14607_v49, %v14722_v9  ;;  %v7897_v18 = vsub.f32 %v14614_v43, %v14722_v9  ;;  %v7898_v40 = vsub.f32 %v14620_v8, %v14722_v9 }
 0x6fa   : > { %v7899_v58 = vsub.f32 %v14627_v55, %v14722_v9  ;;  %v7900_v23 = vsub.f32 %v14634_v38, %v14722_v9  ;;  %v7901_v39 = vsub.f32 %v14640_v14, %v14722_v9  ;;  %v7902_v49 = vsub.f32 %v14646_v33, %v14722_v9 }
 0x6fb   : > { %v7903_v43 = vsub.f32 %v14652_v0, %v14722_v9 }
 0x705   : > { %v9331_v26 = vpop.eup %9330 }
 0x706   : > { %v7982_v16 = vmul.f32 %v9331_v26, %v7914_v63  ;;  %v7951_v45 = vmul.f32 %v9331_v26, %v7883_v20  ;;  %v7952_v8 = vmul.f32 %v9331_v26, %v7884_v41  ;;  %v7953_v10 = vmul.f32 %v9331_v26, %v7885_v46  ;;  %v9367_v46 = vld [vmem:[%s9709_s6 + $0x110] sm:$0xff] }
 0x707   : > { %v7954_v61 = vmul.f32 %v9331_v26, %v7886_v44  ;;  %v7955_v55 = vmul.f32 %v9331_v26, %v7887_v12  ;;  %v7956_v47 = vmul.f32 %v9331_v26, %v7888_v24  ;;  %v7957_v13 = vmul.f32 %v9331_v26, %v7889_v29  ;;  %v9370_v44 = vld [vmem:[%s9709_s6 + $0x128] sm:$0xff]  ;;  %v9371_v12 = vld [vmem:[%s9709_s6 + $0x130] sm:$0xff]  ;;  %v9372_v29 = vld [vmem:[%s9709_s6 + $0x138] sm:$0xff] }
 0x708   : > { %v8046_v38 = vadd.f32 %v9364_v22, %v7982_v16  ;;  %v7958_v15 = vmul.f32 %v9331_v26, %v7890_v6  ;;  %v7959_v1 = vmul.f32 %v9331_v26, %v7891_v25  ;;  %v7960_v14 = vmul.f32 %v9331_v26, %v7892_v4  ;;  %v9373_v25 = vld [vmem:[%s9709_s6 + $0x140] sm:$0xff]  ;;  %v9380_v16 = vld [vmem:[%s9709_s6 + $0x178] sm:$0xff] }
 0x709   : > { %v7961_v32 = vmul.f32 %v9331_v26, %v7893_v51  ;;  %v7962_v48 = vmul.f32 %v9331_v26, %v7894_v2  ;;  %v7963_v33 = vmul.f32 %v9331_v26, %v7895_v7  ;;  %v7964_v56 = vmul.f32 %v9331_v26, %v7896_v57  ;;  %v9374_v51 = vld [vmem:[%s9709_s6 + $0x148] sm:$0xff]  ;;  %v9375_v7 = vld [vmem:[%s9709_s6 + $0x150] sm:$0xff]  ;;  %v9384_v22 = vld [vmem:[%s9709_s6 + $0x198] sm:$0xff] }
 0x70a   : > { %8110 = vst [vmem:[%s14385_s18 + $0x1f8] sm:$0xff] %v8046_v38  ;;  %v7965_v0 = vmul.f32 %v9331_v26, %v7897_v18  ;;  %v7966_v62 = vmul.f32 %v9331_v26, %v7898_v40  ;;  %v7967_v37 = vmul.f32 %v9331_v26, %v7899_v58  ;;  %v7968_v28 = vmul.f32 %v9331_v26, %v7900_v23  ;;  %v9376_v18 = vld [vmem:[%s9709_s6 + $0x158] sm:$0xff]  ;;  %v9377_v58 = vld [vmem:[%s9709_s6 + $0x160] sm:$0xff]  ;;  %v9378_v23 = vld [vmem:[%s9709_s6 + $0x168] sm:$0xff] }
 0x70b   : > { %v7969_v9 = vmul.f32 %v9331_v26, %v7901_v39  ;;  %v14791_v21 = vmul.f32 %v9331_v26, %v7902_v49  ;;  %v14793_v36 = vmul.f32 %v9331_v26, %v7903_v43  ;;  %v14795_v50 = vmul.f32 %v9331_v26, %v7904_v59  ;;  %v9379_v49 = vld [vmem:[%s9709_s6 + $0x170] sm:$0xff] }
 0x70c   : > { %v14797_v63 = vmul.f32 %v9331_v26, %v7905_v3  ;;  %v14799_v17 = vmul.f32 %v9331_v26, %v7906_v42  ;;  %v14801_v52 = vmul.f32 %v9331_v26, %v7907_v53  ;;  %v14803_v54 = vmul.f32 %v9331_v26, %v7908_v31  ;;  %v9365_v42 = vld [vmem:[%s9709_s6 + $0x100] sm:$0xff]  ;;  %v9366_v53 = vld [vmem:[%s9709_s6 + $0x108] sm:$0xff] }
 0x70d   : > { %v14805_v20 = vmul.f32 %v9331_v26, %v7909_v19  ;;  %v14807_v30 = vmul.f32 %v9331_v26, %v7910_v35  ;;  %v14809_v41 = vmul.f32 %v9331_v26, %v7911_v5  ;;  %v14811_v59 = vmul.f32 %v9331_v26, %v7912_v11  ;;  %v9369_v5 = vld [vmem:[%s9709_s6 + $0x120] sm:$0xff] }
 0x70e   : > { %v14813_v3 = vmul.f32 %v9331_v26, %v7913_v60  ;;  %v8015_v27 = vadd.f32 %v9365_v42, %v7951_v45  ;;  %v8016_v31 = vadd.f32 %v9366_v53, %v7952_v8  ;;  %v8017_v19 = vadd.f32 %v9367_v46, %v7953_v10  ;;  %v9381_v8 = vld [vmem:[%s9709_s6 + $0x180] sm:$0xff]  ;;  %v9395_v42 = vld [vmem:[%s9709_s6 + $0x1f0] sm:$0xff] }
 0x70f   : > { %v8018_v35 = vadd.f32 %v9368_v34, %v7954_v61  ;;  %v8019_v11 = vadd.f32 %v9369_v5, %v7955_v55  ;;  %v8020_v60 = vadd.f32 %v9370_v44, %v7956_v47  ;;  %v8021_v24 = vadd.f32 %v9371_v12, %v7957_v13  ;;  %v9382_v61 = vld [vmem:[%s9709_s6 + $0x188] sm:$0xff]  ;;  %v9383_v47 = vld [vmem:[%s9709_s6 + $0x190] sm:$0xff] }
 0x710   : > { %v8022_v6 = vadd.f32 %v9372_v29, %v7958_v15  ;;  %v8023_v4 = vadd.f32 %v9373_v25, %v7959_v1  ;;  %v8024_v2 = vadd.f32 %v9374_v51, %v7960_v14  ;;  %v8025_v57 = vadd.f32 %v9375_v7, %v7961_v32  ;;  %8079 = vst [vmem:[%s14385_s18 + $0x100] sm:$0xff] %v8015_v27  ;;  %v9385_v15 = vld [vmem:[%s9709_s6 + $0x1a0] sm:$0xff]  ;;  %v9386_v14 = vld [vmem:[%s9709_s6 + $0x1a8] sm:$0xff] }
 0x711   : > { %8080 = vst [vmem:[%s14385_s18 + $0x108] sm:$0xff] %v8016_v31  ;;  %8081 = vst [vmem:[%s14385_s18 + $0x110] sm:$0xff] %v8017_v19  ;;  %v8026_v40 = vadd.f32 %v9376_v18, %v7962_v48  ;;  %v8027_v26 = vadd.f32 %v9377_v58, %v7963_v33  ;;  %v8028_v39 = vadd.f32 %v9378_v23, %v7964_v56  ;;  %v9387_v48 = vld [vmem:[%s9709_s6 + $0x1b0] sm:$0xff]  ;;  %v9388_v56 = vld [vmem:[%s9709_s6 + $0x1b8] sm:$0xff] }
 0x712   : > { %v8029_v43 = vadd.f32 %v9379_v49, %v7965_v0  ;;  %8082 = vst [vmem:[%s14385_s18 + $0x118] sm:$0xff] %v8018_v35  ;;  %8083 = vst [vmem:[%s14385_s18 + $0x120] sm:$0xff] %v8019_v11  ;;  %v8030_v45 = vadd.f32 %v9380_v16, %v7966_v62  ;;  %v8031_v10 = vadd.f32 %v9381_v8, %v7967_v37  ;;  %v9389_v62 = vld [vmem:[%s9709_s6 + $0x1c0] sm:$0xff] }
 0x713   : > { %8084 = vst [vmem:[%s14385_s18 + $0x128] sm:$0xff] %v8020_v60  ;;  %8085 = vst [vmem:[%s14385_s18 + $0x130] sm:$0xff] %v8021_v24  ;;  %v8032_v55 = vadd.f32 %v9382_v61, %v7968_v28  ;;  %v8033_v13 = vadd.f32 %v9383_v47, %v7969_v9  ;;  %v8034_v38 = vadd.f32 %v9384_v22, %v14791_v21  ;;  %v9390_v28 = vld [vmem:[%s9709_s6 + $0x1c8] sm:$0xff]  ;;  %v9391_v21 = vld [vmem:[%s9709_s6 + $0x1d0] sm:$0xff] }
 0x714   : > { %8086 = vst [vmem:[%s14385_s18 + $0x138] sm:$0xff] %v8022_v6  ;;  %8087 = vst [vmem:[%s14385_s18 + $0x140] sm:$0xff] %v8023_v4  ;;  %v8035_v1 = vadd.f32 %v9385_v15, %v14793_v36  ;;  %v8036_v32 = vadd.f32 %v9386_v14, %v14795_v50  ;;  %v8037_v33 = vadd.f32 %v9387_v48, %v14797_v63  ;;  %v9392_v50 = vld [vmem:[%s9709_s6 + $0x1d8] sm:$0xff] }
 0x715   : > { %8088 = vst [vmem:[%s14385_s18 + $0x148] sm:$0xff] %v8024_v2  ;;  %8089 = vst [vmem:[%s14385_s18 + $0x150] sm:$0xff] %v8025_v57  ;;  %v8038_v0 = vadd.f32 %v9388_v56, %v14799_v17  ;;  %v8039_v37 = vadd.f32 %v9389_v62, %v14801_v52  ;;  %v8040_v9 = vadd.f32 %v9390_v28, %v14803_v54  ;;  %v9393_v17 = vld [vmem:[%s9709_s6 + $0x1e0] sm:$0xff]  ;;  %v9394_v54 = vld [vmem:[%s9709_s6 + $0x1e8] sm:$0xff] }
 0x716   : > { %8090 = vst [vmem:[%s14385_s18 + $0x158] sm:$0xff] %v8026_v40  ;;  %8091 = vst [vmem:[%s14385_s18 + $0x160] sm:$0xff] %v8027_v26  ;;  %v8041_v36 = vadd.f32 %v9391_v21, %v14805_v20  ;;  %v8042_v63 = vadd.f32 %v9392_v50, %v14807_v30  ;;  %v8043_v52 = vadd.f32 %v9393_v17, %v14809_v41 }
 0x717   : > { %8092 = vst [vmem:[%s14385_s18 + $0x168] sm:$0xff] %v8028_v39  ;;  %8093 = vst [vmem:[%s14385_s18 + $0x170] sm:$0xff] %v8029_v43  ;;  %v8044_v20 = vadd.f32 %v9394_v54, %v14811_v59  ;;  %v8045_v27 = vadd.f32 %v9395_v42, %v14813_v3 }
 0x718   : > { %8094 = vst [vmem:[%s14385_s18 + $0x178] sm:$0xff] %v8030_v45  ;;  %8095 = vst [vmem:[%s14385_s18 + $0x180] sm:$0xff] %v8031_v10 }
 0x719   : > { %8096 = vst [vmem:[%s14385_s18 + $0x188] sm:$0xff] %v8032_v55  ;;  %8097 = vst [vmem:[%s14385_s18 + $0x190] sm:$0xff] %v8033_v13 }
 0x71a   : > { %8098 = vst [vmem:[%s14385_s18 + $0x198] sm:$0xff] %v8034_v38  ;;  %8099 = vst [vmem:[%s14385_s18 + $0x1a0] sm:$0xff] %v8035_v1 }
 0x71b   : > { %8100 = vst [vmem:[%s14385_s18 + $0x1a8] sm:$0xff] %v8036_v32  ;;  %8101 = vst [vmem:[%s14385_s18 + $0x1b0] sm:$0xff] %v8037_v33 }
 0x71c   : > { %8102 = vst [vmem:[%s14385_s18 + $0x1b8] sm:$0xff] %v8038_v0  ;;  %8103 = vst [vmem:[%s14385_s18 + $0x1c0] sm:$0xff] %v8039_v37 }
 0x71d   : > { %8104 = vst [vmem:[%s14385_s18 + $0x1c8] sm:$0xff] %v8040_v9  ;;  %8105 = vst [vmem:[%s14385_s18 + $0x1d0] sm:$0xff] %v8041_v36 }
 0x71e   : > { %8106 = vst [vmem:[%s14385_s18 + $0x1d8] sm:$0xff] %v8042_v63  ;;  %8107 = vst [vmem:[%s14385_s18 + $0x1e0] sm:$0xff] %v8043_v52 }
 0x71f   : > { %8108 = vst [vmem:[%s14385_s18 + $0x1e8] sm:$0xff] %v8044_v20  ;;  %8109 = vst [vmem:[%s14385_s18 + $0x1f0] sm:$0xff] %v8045_v27 }
 0x720   : > { %9489 = shalt.err (!%p9486_p9)
}
 0x721   : > { %s9490_s22 = scalar_lea.hbm %s14876_s29, 8192  ;;  %s9494_s26 = scalar_lea.hbm %s14945_s3, 32768 }
 0x722   : > { %p9491_p12 = scmp.ne.s32.totalorder %s14876_s29, %s9490_s22  ;;  %p9495_p4 = scmp.lt.s32.totalorder %s14876_s29, %s14945_s3 }
 0x723   : > { %p9496_p8 = scmp.lt.s32.totalorder %s9494_s26, %s9490_s22 }
 0x724   : > { %p9492_p3 = pnand %p9491_p12, %p16230_p0 }
 0x725   : > { %p9497_p5 = por %p9496_p8, %p9495_p4 }
 0x726   : > { %p9493_p13 = pneg %p9492_p3 }
 0x728   : > { %p9498_p10 = pnand %p9497_p5, %p9493_p13 }
 0x72a   : > { %9501 = shalt.err (!%p9498_p10)
}
 0x72b   : > { %s9555_s6 = smov 128   ;;  %s9556_s18 = smov 8  }
 0x72c   : > { %9116 = dma.vmem_to_hbm [thread:$0]  (%p16230_p0), %s14880_s25, 8192, %s14876_s29, %s8112_s16, %s9555_s6, %s9555_s6, %s9556_s18  }
 0x72d PF: > { %p9138_p1 = scmp.ge.s32.totalorder %s9544_s15, 2  ;;  %s8141_s20 = sand.u32 1, %s9532_s12  }
 0x72e   : > { %p16231_p2 = scmp.ne.s32.totalorder %s15271_s19, 0  ;;  %s8142_s27 = scalar_lea.sflag [#allocation4], %s8141_s20 }
 0x730   : > { %p9130_p6 = pnand %p9138_p1, %p16231_p2 }
 0x732   : > { %p9131_p11 = pneg %p9130_p6 }
 0x734   : > { %9527 = dma.done.wait (%p9131_p11), %s8142_s27, 8192  }
 0x735   : > { %9529 = vsyncadd (%p9131_p11), %s8142_s27, 4294959104  ;;  %p17_p7 = scmp.ge.s32.totalorder %s9648_s7, 6   ;;  %s16232_s12 = smov %s9536_s13 }
 0x736   : > { %s16233_s13 = smov %s9540_s14  ;;  %s16234_s14 = smov %s9664_s11 }
 0x737   : > { %s16235_s15 = smov %s9648_s7  ;;  %19 = sbr.rel (!%p17_p7) target bundleno = 6 (0x6), region = 85 }
 0x73c   :  { %8147 = vsyncpa [#allocation3], 1 }
 0x73d   :  { %8149 = vsyncpa [#allocation3 + $0x1], 1 }
 0x73e   :  { %8150 = vsyncpa [#allocation6], 1 }
 0x73f   :  { %8151 = vsyncpa [#allocation4], 1 }
 0x740   :  { %8153 = vsyncpa [#allocation4 + $0x1], 1 }

</bundles_post_ra>
